<compile_context>
chip_gen: v5e
topology: v5e:2x2
jax: 0.10.0
libtpu: 0.0.40
codegen_flags: <defaults>
</compile_context>

<pallas_src>
import math

import jax
import jax.numpy as jnp
from jax.experimental import pallas as pl
from jax.experimental.pallas import tpu as pltpu

# ----------------------------- problem sizes --------------------------------
B, S, H = 2, 8, 32          # batch, seq, hidden
MEM = 128                   # memory_size
NH = 4                      # num_heads
HD = H // NH                # head_dim
C = 3                       # num_contexts
LN_EPS = 1e-5

# Column layout of the fused x-side weight matrix (H, 2*C*H + C):
_QO_OFF = 0                 # [0, C*H)            : per-context Wq
_OX_OFF = C * H             # [C*H, 2*C*H)        : per-context x-half of Wo
_GT_OFF = 2 * C * H         # [2*C*H, 2*C*H + C)  : context gate
_XW_COLS = 2 * C * H + C


# ------------------------------ Pallas kernel -------------------------------
def _fused_kernel(x_ref, mem_ref, wx_ref, wkv_ref, woc_ref, vec_ref, gb_ref,
                  out_ref, cw_ref):
    """Entire ContextManager forward (read path) in one invocation."""
    scale = 1.0 / math.sqrt(HD)

    # One wide bf16 matmul for all batch rows: [q_c0..c2 | Wo_x_c0..c2 | gate].
    # (B*S, H) @ (H, 2*C*H + C) -> (B*S, 195), accumulated in f32.
    xproj = jnp.dot(x_ref[...], wx_ref[...],
                    preferred_element_type=jnp.float32)

    # ---- context gate: softmax(context_gate(mean_seq(x))) -------------------
    glist = []
    for b in range(B):
        gcols = xproj[b * S:(b + 1) * S, _GT_OFF:_GT_OFF + C]      # (S, C)
        glist.append(jnp.mean(gcols, axis=0, keepdims=True))       # (1, C)
    logits = jnp.concatenate(glist, axis=0) + gb_ref[...]          # (B, C)
    logits = logits - jnp.max(logits, axis=-1, keepdims=True)
    eg = jnp.exp(logits)
    wgt = eg / jnp.sum(eg, axis=-1, keepdims=True)                 # (B, C) f32
    cw_ref[...] = wgt

    # ---- per-context WorkingMemory.read -------------------------------------
    reads = [[None] * B for _ in range(C)]
    for c in range(C):
        vec_c = vec_ref[c]            # (6, H) f32: bq, bk, bv, bo, gamma, beta
        bq = vec_c[0:1, :]
        bk = vec_c[1:2, :]
        bv = vec_c[2:3, :]
        bo = vec_c[3:4, :]
        gamma = vec_c[4:5, :]
        beta = vec_c[5:6, :]
        wkv_c = wkv_ref[c]            # (H, 2H) bf16  [Wk | Wv]
        woc_c = woc_ref[c]            # (H, H)  bf16  ctx-half of output_proj

        for b in range(B):
            xp_b = xproj[b * S:(b + 1) * S, :]                     # (S, 195)
            q = (xp_b[:, _QO_OFF + c * H:_QO_OFF + (c + 1) * H] + bq
                 ).astype(jnp.bfloat16)                            # (S, H)
            # output_proj(cat([x, ctx])) folded (no concatenates):
            #   ro = x@Wo_x + sum_h ctx_h @ Wo_ctx[h] + bo
            ro = xp_b[:, _OX_OFF + c * H:_OX_OFF + (c + 1) * H] + bo   # (S, H)

            # K|V in one matmul for this (context, batch): (MEM,H)@(H,2H)
            kv = jnp.dot(mem_ref[c, b], wkv_c,
                         preferred_element_type=jnp.float32)       # (MEM, 2H)
            k = (kv[:, :H] + bk).astype(jnp.bfloat16)              # (MEM, H)
            v = (kv[:, H:] + bv).astype(jnp.bfloat16)              # (MEM, H)

            for h in range(NH):
                lo = h * HD
                qh = q[:, lo:lo + HD]                              # (S, HD)
                kh = k[:, lo:lo + HD]                              # (MEM, HD)
                vh = v[:, lo:lo + HD]                              # (MEM, HD)
                sc = jax.lax.dot_general(
                    qh, kh, (((1,), (1,)), ((), ())),
                    preferred_element_type=jnp.float32) * scale    # (S, MEM)
                sc = sc - jnp.max(sc, axis=-1, keepdims=True)
                p = jnp.exp(sc)
                p = p * pl.reciprocal(jnp.sum(p, axis=-1, keepdims=True),
                                      approx=True)                 # softmax
                ctx_h = jnp.dot(p.astype(jnp.bfloat16), vh,
                                preferred_element_type=jnp.float32)    # (S, HD)
                ro = ro + jnp.dot(ctx_h.astype(jnp.bfloat16),
                                  woc_c[lo:lo + HD, :],
                                  preferred_element_type=jnp.float32)  # (S, H)

            # LayerNorm (f32)
            mu = jnp.mean(ro, axis=-1, keepdims=True)
            var = jnp.mean(jnp.square(ro - mu), axis=-1, keepdims=True)
            reads[c][b] = (ro - mu) * jax.lax.rsqrt(var + LN_EPS) * gamma + beta

    # ---- gate-weighted combination of the per-context reads -----------------
    for b in range(B):
        acc = wgt[b:b + 1, 0:1] * reads[0][b]
        for c in range(1, C):
            acc = acc + wgt[b:b + 1, c:c + 1] * reads[c][b]
        out_ref[b] = acc


def _context_manager_pallas(x, memory, wx, wkv, woc, vecs, gate_b):
    """x: (B,S,H) f32, memory: (C,B,MEM,H) f32. Returns (out (B,S,H), w (B,C))."""
    x_flat = x.reshape(B * S, H).astype(jnp.bfloat16)
    mem_bf = memory.astype(jnp.bfloat16)
    vmem = pl.BlockSpec(memory_space=pltpu.MemorySpace.VMEM)
    out, ctx_w = pl.pallas_call(
        _fused_kernel,
        out_shape=(jax.ShapeDtypeStruct((B, S, H), jnp.float32),
                   jax.ShapeDtypeStruct((B, C), jnp.float32)),
        in_specs=[vmem] * 7,
        out_specs=(vmem, vmem),
    )(x_flat, mem_bf, wx, wkv, woc, vecs, gate_b)
    return out, ctx_w


# --------------------------- parameter construction -------------------------
def _xavier(key, fan_in, fan_out):
    bound = math.sqrt(6.0 / (fan_in + fan_out))
    return jax.random.uniform(key, (fan_in, fan_out), jnp.float32, -bound, bound)


def init_params(key):
    keys = jax.random.split(key, 4 * C + 1)
    return dict(
        wq=jnp.stack([_xavier(keys[4 * c + 0], H, H) for c in range(C)]),
        wk=jnp.stack([_xavier(keys[4 * c + 1], H, H) for c in range(C)]),
        wv=jnp.stack([_xavier(keys[4 * c + 2], H, H) for c in range(C)]),
        wo=jnp.stack([_xavier(keys[4 * c + 3], 2 * H, H) for c in range(C)]),
        bq=jnp.zeros((C, H), jnp.float32),
        bk=jnp.zeros((C, H), jnp.float32),
        bv=jnp.zeros((C, H), jnp.float32),
        bo=jnp.zeros((C, H), jnp.float32),
        ln_gamma=jnp.ones((C, H), jnp.float32),
        ln_beta=jnp.zeros((C, H), jnp.float32),
        gate_w=_xavier(keys[-1], H, C),
        gate_b=jnp.zeros((C,), jnp.float32),
    )


def _pack_params(params):
    """Pack natural (per-module) params into the kernel's fused operands."""
    wq, wk, wv, wo = params["wq"], params["wk"], params["wv"], params["wo"]
    wx = jnp.concatenate(
        [wq[c] for c in range(C)]
        + [wo[c, :H, :] for c in range(C)]
        + [params["gate_w"]], axis=1).astype(jnp.bfloat16)         # (H, 195)
    assert wx.shape == (H, _XW_COLS)
    wkv = jnp.concatenate([wk, wv], axis=2).astype(jnp.bfloat16)   # (C, H, 2H)
    woc = wo[:, H:, :].astype(jnp.bfloat16)                        # (C, H, H)
    vecs = jnp.stack([params["bq"], params["bk"], params["bv"], params["bo"],
                      params["ln_gamma"], params["ln_beta"]],
                     axis=1).astype(jnp.float32)                   # (C, 6, H)
    gate_b = params["gate_b"].reshape(1, C).astype(jnp.float32)    # (1, C)
    return wx, wkv, woc, vecs, gate_b


# ------------------------------ forward wrapper ------------------------------
@jax.jit
def context_manager_forward(x, params, memory):
    """memory: (C, B, MEM, H). Zeros == state right after start_session()."""
    wx, wkv, woc, vecs, gate_b = _pack_params(params)
    out, ctx_w = _context_manager_pallas(x, memory, wx, wkv, woc, vecs, gate_b)
    metadata = {"context_weights": ctx_w, "interaction_count": 1}
    return out, metadata


# --------------------------- pure-JAX reference ------------------------------
def _reference_forward(x, params, memory):
    outs = []
    for c in range(C):
        q = x @ params["wq"][c] + params["bq"][c]
        k = memory[c] @ params["wk"][c] + params["bk"][c]
        v = memory[c] @ params["wv"][c] + params["bv"][c]
        q = q.reshape(B, S, NH, HD).transpose(0, 2, 1, 3)
        k = k.reshape(B, MEM, NH, HD).transpose(0, 2, 1, 3)
        v = v.reshape(B, MEM, NH, HD).transpose(0, 2, 1, 3)
        sc = jnp.einsum("bhsd,bhmd->bhsm", q, k) / math.sqrt(HD)
        p = jax.nn.softmax(sc, axis=-1)
        ctx = jnp.einsum("bhsm,bhmd->bhsd", p, v)
        ctx = ctx.transpose(0, 2, 1, 3).reshape(B, S, H)
        comb = jnp.concatenate([x, ctx], axis=-1)
        ro = comb @ params["wo"][c] + params["bo"][c]
        mu = ro.mean(-1, keepdims=True)
        var = ((ro - mu) ** 2).mean(-1, keepdims=True)
        outs.append((ro - mu) / jnp.sqrt(var + LN_EPS)
                    * params["ln_gamma"][c] + params["ln_beta"][c])
    w = jax.nn.softmax(x.mean(axis=1) @ params["gate_w"] + params["gate_b"], -1)
    weighted = jnp.einsum("bc,cbsh->bsh", w, jnp.stack(outs, axis=0))
    return weighted, w


# ----------------------------------- main ------------------------------------
if __name__ == "__main__":
    key = jax.random.PRNGKey(0)
    k_x, k_p, k_m = jax.random.split(key, 3)
    x = jax.random.normal(k_x, (B, S, H), jnp.float32)
    params = init_params(k_p)

    # session start: every WorkingMemory buffer is zeros (module semantics)
    mem0 = jnp.zeros((C, B, MEM, H), jnp.float32)
    out, meta = context_manager_forward(x, params, mem0)
    out = jax.block_until_ready(out)
    assert out.shape == (B, S, H)
    assert meta["context_weights"].shape == (B, C)
    assert bool(jnp.all(jnp.isfinite(out)))

    # sanity-check the general read path against a pure-JAX f32 reference
    # (non-zero memory exercises the attention math; bf16 weights -> loose tol)
    mem_r = 0.5 * jax.random.normal(k_m, (C, B, MEM, H), jnp.float32)
    out_r, meta_r = context_manager_forward(x, params, mem_r)
    out_r = jax.block_until_ready(out_r)
    ref0, _ = _reference_forward(x, params, mem0)
    ref_r, ref_w = _reference_forward(x, params, mem_r)
    assert float(jnp.max(jnp.abs(out - ref0))) < 0.1
    assert float(jnp.max(jnp.abs(out_r - ref_r))) < 0.1
    assert float(jnp.max(jnp.abs(meta_r["context_weights"] - ref_w))) < 0.02

    print("KERNEL_OK")
</pallas_src>

<mosaic_0001>
module attributes {stable_mosaic.version = 11 : i64} {
  func.func @_fused_kernel(%arg0: memref<16x32xbf16, #tpu.memory_space<vmem>>, %arg1: memref<3x2x128x32xbf16, #tpu.memory_space<vmem>>, %arg2: memref<32x195xbf16, #tpu.memory_space<vmem>>, %arg3: memref<3x32x64xbf16, #tpu.memory_space<vmem>>, %arg4: memref<3x32x32xbf16, #tpu.memory_space<vmem>>, %arg5: memref<3x6x32xf32, #tpu.memory_space<vmem>>, %arg6: memref<1x3xf32, #tpu.memory_space<vmem>>, %arg7: memref<2x8x32xf32, #tpu.memory_space<vmem>>, %arg8: memref<2x3xf32, #tpu.memory_space<vmem>>) attributes {dimension_semantics = [], scalar_prefetch = 0 : i64, scratch_operands = 0 : i64, tpu.core_type = #tpu.core_type<tc>} {
    %c0 = arith.constant 0 : index
    %c0_0 = arith.constant 0 : index
    %0 = vector.load %arg0[%c0, %c0_0] : memref<16x32xbf16, #tpu.memory_space<vmem>>, vector<16x32xbf16>
    %c0_1 = arith.constant 0 : index
    %c0_2 = arith.constant 0 : index
    %1 = vector.load %arg2[%c0_1, %c0_2] : memref<32x195xbf16, #tpu.memory_space<vmem>>, vector<32x195xbf16>
    %cst = arith.constant dense<0.000000e+00> : vector<16x195xf32>
    %2 = tpu.matmul %0, %1, %cst {dimension_numbers = #tpu.dot_dimension_numbers<[1], [0], [0], [1], [0, 0, 1, 1], [], []>} : vector<16x32xbf16>, vector<32x195xbf16>, vector<16x195xf32> -> vector<16x195xf32>
    %3 = vector.extract_strided_slice %2 {offsets = [0, 192], sizes = [8, 3], strides = [1, 1]} : vector<16x195xf32> to vector<8x3xf32>
    %cst_3 = arith.constant dense<0.000000e+00> : vector<3xf32>
    %4 = vector.multi_reduction <add>, %3, %cst_3 [0] : vector<8x3xf32> to vector<3xf32>
    %5 = vector.shape_cast %4 : vector<3xf32> to vector<1x3xf32>
    %cst_4 = arith.constant 8.000000e+00 : f32
    %6 = vector.broadcast %cst_4 : f32 to vector<1x3xf32>
    %7 = arith.divf %5, %6 : vector<1x3xf32>
    %8 = vector.extract_strided_slice %2 {offsets = [8, 192], sizes = [8, 3], strides = [1, 1]} : vector<16x195xf32> to vector<8x3xf32>
    %cst_5 = arith.constant dense<0.000000e+00> : vector<3xf32>
    %9 = vector.multi_reduction <add>, %8, %cst_5 [0] : vector<8x3xf32> to vector<3xf32>
    %10 = vector.shape_cast %9 : vector<3xf32> to vector<1x3xf32>
    %cst_6 = arith.constant 8.000000e+00 : f32
    %11 = vector.broadcast %cst_6 : f32 to vector<1x3xf32>
    %12 = arith.divf %10, %11 : vector<1x3xf32>
    %13 = tpu.concatenate %7, %12 in 0 : vector<1x3xf32>, vector<1x3xf32> -> vector<2x3xf32>
    %c0_7 = arith.constant 0 : index
    %c0_8 = arith.constant 0 : index
    %14 = vector.load %arg6[%c0_7, %c0_8] : memref<1x3xf32, #tpu.memory_space<vmem>>, vector<1x3xf32>
    %15 = vector.broadcast %14 : vector<1x3xf32> to vector<2x3xf32>
    %16 = arith.addf %13, %15 : vector<2x3xf32>
    %cst_9 = arith.constant dense<0xFF800000> : vector<2xf32>
    %17 = vector.multi_reduction <maximumf>, %16, %cst_9 [1] : vector<2x3xf32> to vector<2xf32>
    %18 = vector.shape_cast %17 : vector<2xf32> to vector<2x1xf32>
    %19 = vector.broadcast %18 : vector<2x1xf32> to vector<2x3xf32>
    %20 = arith.subf %16, %19 : vector<2x3xf32>
    %21 = math.exp %20 : vector<2x3xf32>
    %cst_10 = arith.constant dense<0.000000e+00> : vector<2xf32>
    %22 = vector.multi_reduction <add>, %21, %cst_10 [1] : vector<2x3xf32> to vector<2xf32>
    %23 = vector.shape_cast %22 : vector<2xf32> to vector<2x1xf32>
    %24 = vector.broadcast %23 : vector<2x1xf32> to vector<2x3xf32>
    %25 = arith.divf %21, %24 : vector<2x3xf32>
    %c0_11 = arith.constant 0 : index
    %c0_12 = arith.constant 0 : index
    %26 = vector.load %arg8[%c0_11, %c0_12] : memref<2x3xf32, #tpu.memory_space<vmem>>, vector<2x3xf32>
    tpu.vector_store %arg8[%c0_11, %c0_12], %25 {strides = array<i32>} : memref<2x3xf32, #tpu.memory_space<vmem>>, vector<2x3xf32>,
    %c0_13 = arith.constant 0 : index
    %c0_14 = arith.constant 0 : index
    %c0_15 = arith.constant 0 : index
    %27 = vector.load %arg5[%c0_13, %c0_14, %c0_15] : memref<3x6x32xf32, #tpu.memory_space<vmem>>, vector<1x6x32xf32>
    %28 = vector.shape_cast %27 : vector<1x6x32xf32> to vector<6x32xf32>
    %29 = vector.extract_strided_slice %28 {offsets = [0, 0], sizes = [1, 32], strides = [1, 1]} : vector<6x32xf32> to vector<1x32xf32>
    %30 = vector.extract_strided_slice %28 {offsets = [1, 0], sizes = [1, 32], strides = [1, 1]} : vector<6x32xf32> to vector<1x32xf32>
    %31 = vector.extract_strided_slice %28 {offsets = [2, 0], sizes = [1, 32], strides = [1, 1]} : vector<6x32xf32> to vector<1x32xf32>
    %32 = vector.extract_strided_slice %28 {offsets = [3, 0], sizes = [1, 32], strides = [1, 1]} : vector<6x32xf32> to vector<1x32xf32>
    %33 = vector.extract_strided_slice %28 {offsets = [4, 0], sizes = [1, 32], strides = [1, 1]} : vector<6x32xf32> to vector<1x32xf32>
    %34 = vector.extract_strided_slice %28 {offsets = [5, 0], sizes = [1, 32], strides = [1, 1]} : vector<6x32xf32> to vector<1x32xf32>
    %c0_16 = arith.constant 0 : index
    %c0_17 = arith.constant 0 : index
    %c0_18 = arith.constant 0 : index
    %35 = vector.load %arg3[%c0_16, %c0_17, %c0_18] : memref<3x32x64xbf16, #tpu.memory_space<vmem>>, vector<1x32x64xbf16>
    %36 = vector.shape_cast %35 : vector<1x32x64xbf16> to vector<32x64xbf16>
    %c0_19 = arith.constant 0 : index
    %c0_20 = arith.constant 0 : index
    %c0_21 = arith.constant 0 : index
    %37 = vector.load %arg4[%c0_19, %c0_20, %c0_21] : memref<3x32x32xbf16, #tpu.memory_space<vmem>>, vector<1x32x32xbf16>
    %38 = vector.shape_cast %37 : vector<1x32x32xbf16> to vector<32x32xbf16>
    %39 = vector.extract_strided_slice %2 {offsets = [0, 0], sizes = [8, 195], strides = [1, 1]} : vector<16x195xf32> to vector<8x195xf32>
    %40 = vector.extract_strided_slice %39 {offsets = [0, 0], sizes = [8, 32], strides = [1, 1]} : vector<8x195xf32> to vector<8x32xf32>
    %41 = vector.broadcast %29 : vector<1x32xf32> to vector<8x32xf32>
    %42 = arith.addf %40, %41 : vector<8x32xf32>
    %43 = arith.truncf %42 : vector<8x32xf32> to vector<8x32xbf16>
    %44 = vector.extract_strided_slice %39 {offsets = [0, 96], sizes = [8, 32], strides = [1, 1]} : vector<8x195xf32> to vector<8x32xf32>
    %45 = vector.broadcast %32 : vector<1x32xf32> to vector<8x32xf32>
    %46 = arith.addf %44, %45 : vector<8x32xf32>
    %c0_22 = arith.constant 0 : index
    %c0_23 = arith.constant 0 : index
    %c0_24 = arith.constant 0 : index
    %c0_25 = arith.constant 0 : index
    %47 = vector.load %arg1[%c0_22, %c0_23, %c0_24, %c0_25] : memref<3x2x128x32xbf16, #tpu.memory_space<vmem>>, vector<1x1x128x32xbf16>
    %48 = vector.shape_cast %47 : vector<1x1x128x32xbf16> to vector<128x32xbf16>
    %cst_26 = arith.constant dense<0.000000e+00> : vector<128x64xf32>
    %49 = tpu.matmul %48, %36, %cst_26 {dimension_numbers = #tpu.dot_dimension_numbers<[1], [0], [0], [1], [0, 0, 1, 1], [], []>} : vector<128x32xbf16>, vector<32x64xbf16>, vector<128x64xf32> -> vector<128x64xf32>
    %50 = vector.extract_strided_slice %49 {offsets = [0, 0], sizes = [128, 32], strides = [1, 1]} : vector<128x64xf32> to vector<128x32xf32>
    %51 = vector.broadcast %30 : vector<1x32xf32> to vector<128x32xf32>
    %52 = arith.addf %50, %51 : vector<128x32xf32>
    %53 = arith.truncf %52 : vector<128x32xf32> to vector<128x32xbf16>
    %54 = vector.extract_strided_slice %49 {offsets = [0, 32], sizes = [128, 32], strides = [1, 1]} : vector<128x64xf32> to vector<128x32xf32>
    %55 = vector.broadcast %31 : vector<1x32xf32> to vector<128x32xf32>
    %56 = arith.addf %54, %55 : vector<128x32xf32>
    %57 = arith.truncf %56 : vector<128x32xf32> to vector<128x32xbf16>
    %58 = vector.extract_strided_slice %43 {offsets = [0, 0], sizes = [8, 8], strides = [1, 1]} : vector<8x32xbf16> to vector<8x8xbf16>
    %59 = vector.extract_strided_slice %53 {offsets = [0, 0], sizes = [128, 8], strides = [1, 1]} : vector<128x32xbf16> to vector<128x8xbf16>
    %60 = vector.extract_strided_slice %57 {offsets = [0, 0], sizes = [128, 8], strides = [1, 1]} : vector<128x32xbf16> to vector<128x8xbf16>
    %cst_27 = arith.constant dense<0.000000e+00> : vector<8x128xf32>
    %61 = tpu.matmul %58, %59, %cst_27 {dimension_numbers = #tpu.dot_dimension_numbers<[1], [1], [0], [0], [0, 0, 1, 0], [], []>} : vector<8x8xbf16>, vector<128x8xbf16>, vector<8x128xf32> -> vector<8x128xf32>
    %cst_28 = arith.constant 0.353553385 : f32
    %62 = vector.broadcast %cst_28 : f32 to vector<8x128xf32>
    %63 = arith.mulf %61, %62 : vector<8x128xf32>
    %cst_29 = arith.constant dense<0xFF800000> : vector<8xf32>
    %64 = vector.multi_reduction <maximumf>, %63, %cst_29 [1] : vector<8x128xf32> to vector<8xf32>
    %65 = vector.shape_cast %64 : vector<8xf32> to vector<8x1xf32>
    %66 = vector.broadcast %65 : vector<8x1xf32> to vector<8x128xf32>
    %67 = arith.subf %63, %66 : vector<8x128xf32>
    %68 = math.exp %67 : vector<8x128xf32>
    %cst_30 = arith.constant dense<0.000000e+00> : vector<8xf32>
    %69 = vector.multi_reduction <add>, %68, %cst_30 [1] : vector<8x128xf32> to vector<8xf32>
    %70 = vector.shape_cast %69 : vector<8xf32> to vector<8x1xf32>
    %71 = tpu.reciprocal %70 {approx = true} : vector<8x1xf32> -> vector<8x1xf32>
    %72 = vector.broadcast %71 : vector<8x1xf32> to vector<8x128xf32>
    %73 = arith.mulf %68, %72 : vector<8x128xf32>
    %74 = arith.truncf %73 : vector<8x128xf32> to vector<8x128xbf16>
    %cst_31 = arith.constant dense<0.000000e+00> : vector<8x8xf32>
    %75 = tpu.matmul %74, %60, %cst_31 {dimension_numbers = #tpu.dot_dimension_numbers<[1], [0], [0], [1], [0, 0, 1, 1], [], []>} : vector<8x128xbf16>, vector<128x8xbf16>, vector<8x8xf32> -> vector<8x8xf32>
    %76 = arith.truncf %75 : vector<8x8xf32> to vector<8x8xbf16>
    %77 = vector.extract_strided_slice %38 {offsets = [0, 0], sizes = [8, 32], strides = [1, 1]} : vector<32x32xbf16> to vector<8x32xbf16>
    %cst_32 = arith.constant dense<0.000000e+00> : vector<8x32xf32>
    %78 = tpu.matmul %76, %77, %cst_32 {dimension_numbers = #tpu.dot_dimension_numbers<[1], [0], [0], [1], [0, 0, 1, 1], [], []>} : vector<8x8xbf16>, vector<8x32xbf16>, vector<8x32xf32> -> vector<8x32xf32>
    %79 = arith.addf %46, %78 : vector<8x32xf32>
    %80 = vector.extract_strided_slice %43 {offsets = [0, 8], sizes = [8, 8], strides = [1, 1]} : vector<8x32xbf16> to vector<8x8xbf16>
    %81 = vector.extract_strided_slice %53 {offsets = [0, 8], sizes = [128, 8], strides = [1, 1]} : vector<128x32xbf16> to vector<128x8xbf16>
    %82 = vector.extract_strided_slice %57 {offsets = [0, 8], sizes = [128, 8], strides = [1, 1]} : vector<128x32xbf16> to vector<128x8xbf16>
    %cst_33 = arith.constant dense<0.000000e+00> : vector<8x128xf32>
    %83 = tpu.matmul %80, %81, %cst_33 {dimension_numbers = #tpu.dot_dimension_numbers<[1], [1], [0], [0], [0, 0, 1, 0], [], []>} : vector<8x8xbf16>, vector<128x8xbf16>, vector<8x128xf32> -> vector<8x128xf32>
    %cst_34 = arith.constant 0.353553385 : f32
    %84 = vector.broadcast %cst_34 : f32 to vector<8x128xf32>
    %85 = arith.mulf %83, %84 : vector<8x128xf32>
    %cst_35 = arith.constant dense<0xFF800000> : vector<8xf32>
    %86 = vector.multi_reduction <maximumf>, %85, %cst_35 [1] : vector<8x128xf32> to vector<8xf32>
    %87 = vector.shape_cast %86 : vector<8xf32> to vector<8x1xf32>
    %88 = vector.broadcast %87 : vector<8x1xf32> to vector<8x128xf32>
    %89 = arith.subf %85, %88 : vector<8x128xf32>
    %90 = math.exp %89 : vector<8x128xf32>
    %cst_36 = arith.constant dense<0.000000e+00> : vector<8xf32>
    %91 = vector.multi_reduction <add>, %90, %cst_36 [1] : vector<8x128xf32> to vector<8xf32>
    %92 = vector.shape_cast %91 : vector<8xf32> to vector<8x1xf32>
    %93 = tpu.reciprocal %92 {approx = true} : vector<8x1xf32> -> vector<8x1xf32>
    %94 = vector.broadcast %93 : vector<8x1xf32> to vector<8x128xf32>
    %95 = arith.mulf %90, %94 : vector<8x128xf32>
    %96 = arith.truncf %95 : vector<8x128xf32> to vector<8x128xbf16>
    %cst_37 = arith.constant dense<0.000000e+00> : vector<8x8xf32>
    %97 = tpu.matmul %96, %82, %cst_37 {dimension_numbers = #tpu.dot_dimension_numbers<[1], [0], [0], [1], [0, 0, 1, 1], [], []>} : vector<8x128xbf16>, vector<128x8xbf16>, vector<8x8xf32> -> vector<8x8xf32>
    %98 = arith.truncf %97 : vector<8x8xf32> to vector<8x8xbf16>
    %99 = vector.extract_strided_slice %38 {offsets = [8, 0], sizes = [8, 32], strides = [1, 1]} : vector<32x32xbf16> to vector<8x32xbf16>
    %cst_38 = arith.constant dense<0.000000e+00> : vector<8x32xf32>
    %100 = tpu.matmul %98, %99, %cst_38 {dimension_numbers = #tpu.dot_dimension_numbers<[1], [0], [0], [1], [0, 0, 1, 1], [], []>} : vector<8x8xbf16>, vector<8x32xbf16>, vector<8x32xf32> -> vector<8x32xf32>
    %101 = arith.addf %79, %100 : vector<8x32xf32>
    %102 = vector.extract_strided_slice %43 {offsets = [0, 16], sizes = [8, 8], strides = [1, 1]} : vector<8x32xbf16> to vector<8x8xbf16>
    %103 = vector.extract_strided_slice %53 {offsets = [0, 16], sizes = [128, 8], strides = [1, 1]} : vector<128x32xbf16> to vector<128x8xbf16>
    %104 = vector.extract_strided_slice %57 {offsets = [0, 16], sizes = [128, 8], strides = [1, 1]} : vector<128x32xbf16> to vector<128x8xbf16>
    %cst_39 = arith.constant dense<0.000000e+00> : vector<8x128xf32>
    %105 = tpu.matmul %102, %103, %cst_39 {dimension_numbers = #tpu.dot_dimension_numbers<[1], [1], [0], [0], [0, 0, 1, 0], [], []>} : vector<8x8xbf16>, vector<128x8xbf16>, vector<8x128xf32> -> vector<8x128xf32>
    %cst_40 = arith.constant 0.353553385 : f32
    %106 = vector.broadcast %cst_40 : f32 to vector<8x128xf32>
    %107 = arith.mulf %105, %106 : vector<8x128xf32>
    %cst_41 = arith.constant dense<0xFF800000> : vector<8xf32>
    %108 = vector.multi_reduction <maximumf>, %107, %cst_41 [1] : vector<8x128xf32> to vector<8xf32>
    %109 = vector.shape_cast %108 : vector<8xf32> to vector<8x1xf32>
    %110 = vector.broadcast %109 : vector<8x1xf32> to vector<8x128xf32>
    %111 = arith.subf %107, %110 : vector<8x128xf32>
    %112 = math.exp %111 : vector<8x128xf32>
    %cst_42 = arith.constant dense<0.000000e+00> : vector<8xf32>
    %113 = vector.multi_reduction <add>, %112, %cst_42 [1] : vector<8x128xf32> to vector<8xf32>
    %114 = vector.shape_cast %113 : vector<8xf32> to vector<8x1xf32>
    %115 = tpu.reciprocal %114 {approx = true} : vector<8x1xf32> -> vector<8x1xf32>
    %116 = vector.broadcast %115 : vector<8x1xf32> to vector<8x128xf32>
    %117 = arith.mulf %112, %116 : vector<8x128xf32>
    %118 = arith.truncf %117 : vector<8x128xf32> to vector<8x128xbf16>
    %cst_43 = arith.constant dense<0.000000e+00> : vector<8x8xf32>
    %119 = tpu.matmul %118, %104, %cst_43 {dimension_numbers = #tpu.dot_dimension_numbers<[1], [0], [0], [1], [0, 0, 1, 1], [], []>} : vector<8x128xbf16>, vector<128x8xbf16>, vector<8x8xf32> -> vector<8x8xf32>
    %120 = arith.truncf %119 : vector<8x8xf32> to vector<8x8xbf16>
    %121 = vector.extract_strided_slice %38 {offsets = [16, 0], sizes = [8, 32], strides = [1, 1]} : vector<32x32xbf16> to vector<8x32xbf16>
    %cst_44 = arith.constant dense<0.000000e+00> : vector<8x32xf32>
    %122 = tpu.matmul %120, %121, %cst_44 {dimension_numbers = #tpu.dot_dimension_numbers<[1], [0], [0], [1], [0, 0, 1, 1], [], []>} : vector<8x8xbf16>, vector<8x32xbf16>, vector<8x32xf32> -> vector<8x32xf32>
    %123 = arith.addf %101, %122 : vector<8x32xf32>
    %124 = vector.extract_strided_slice %43 {offsets = [0, 24], sizes = [8, 8], strides = [1, 1]} : vector<8x32xbf16> to vector<8x8xbf16>
    %125 = vector.extract_strided_slice %53 {offsets = [0, 24], sizes = [128, 8], strides = [1, 1]} : vector<128x32xbf16> to vector<128x8xbf16>
    %126 = vector.extract_strided_slice %57 {offsets = [0, 24], sizes = [128, 8], strides = [1, 1]} : vector<128x32xbf16> to vector<128x8xbf16>
    %cst_45 = arith.constant dense<0.000000e+00> : vector<8x128xf32>
    %127 = tpu.matmul %124, %125, %cst_45 {dimension_numbers = #tpu.dot_dimension_numbers<[1], [1], [0], [0], [0, 0, 1, 0], [], []>} : vector<8x8xbf16>, vector<128x8xbf16>, vector<8x128xf32> -> vector<8x128xf32>
    %cst_46 = arith.constant 0.353553385 : f32
    %128 = vector.broadcast %cst_46 : f32 to vector<8x128xf32>
    %129 = arith.mulf %127, %128 : vector<8x128xf32>
    %cst_47 = arith.constant dense<0xFF800000> : vector<8xf32>
    %130 = vector.multi_reduction <maximumf>, %129, %cst_47 [1] : vector<8x128xf32> to vector<8xf32>
    %131 = vector.shape_cast %130 : vector<8xf32> to vector<8x1xf32>
    %132 = vector.broadcast %131 : vector<8x1xf32> to vector<8x128xf32>
    %133 = arith.subf %129, %132 : vector<8x128xf32>
    %134 = math.exp %133 : vector<8x128xf32>
    %cst_48 = arith.constant dense<0.000000e+00> : vector<8xf32>
    %135 = vector.multi_reduction <add>, %134, %cst_48 [1] : vector<8x128xf32> to vector<8xf32>
    %136 = vector.shape_cast %135 : vector<8xf32> to vector<8x1xf32>
    %137 = tpu.reciprocal %136 {approx = true} : vector<8x1xf32> -> vector<8x1xf32>
    %138 = vector.broadcast %137 : vector<8x1xf32> to vector<8x128xf32>
    %139 = arith.mulf %134, %138 : vector<8x128xf32>
    %140 = arith.truncf %139 : vector<8x128xf32> to vector<8x128xbf16>
    %cst_49 = arith.constant dense<0.000000e+00> : vector<8x8xf32>
    %141 = tpu.matmul %140, %126, %cst_49 {dimension_numbers = #tpu.dot_dimension_numbers<[1], [0], [0], [1], [0, 0, 1, 1], [], []>} : vector<8x128xbf16>, vector<128x8xbf16>, vector<8x8xf32> -> vector<8x8xf32>
    %142 = arith.truncf %141 : vector<8x8xf32> to vector<8x8xbf16>
    %143 = vector.extract_strided_slice %38 {offsets = [24, 0], sizes = [8, 32], strides = [1, 1]} : vector<32x32xbf16> to vector<8x32xbf16>
    %cst_50 = arith.constant dense<0.000000e+00> : vector<8x32xf32>
    %144 = tpu.matmul %142, %143, %cst_50 {dimension_numbers = #tpu.dot_dimension_numbers<[1], [0], [0], [1], [0, 0, 1, 1], [], []>} : vector<8x8xbf16>, vector<8x32xbf16>, vector<8x32xf32> -> vector<8x32xf32>
    %145 = arith.addf %123, %144 : vector<8x32xf32>
    %cst_51 = arith.constant dense<0.000000e+00> : vector<8xf32>
    %146 = vector.multi_reduction <add>, %145, %cst_51 [1] : vector<8x32xf32> to vector<8xf32>
    %147 = vector.shape_cast %146 : vector<8xf32> to vector<8x1xf32>
    %cst_52 = arith.constant 3.200000e+01 : f32
    %148 = vector.broadcast %cst_52 : f32 to vector<8x1xf32>
    %149 = arith.divf %147, %148 : vector<8x1xf32>
    %150 = vector.broadcast %149 : vector<8x1xf32> to vector<8x32xf32>
    %151 = arith.subf %145, %150 : vector<8x32xf32>
    %152 = arith.mulf %151, %151 : vector<8x32xf32>
    %cst_53 = arith.constant dense<0.000000e+00> : vector<8xf32>
    %153 = vector.multi_reduction <add>, %152, %cst_53 [1] : vector<8x32xf32> to vector<8xf32>
    %154 = vector.shape_cast %153 : vector<8xf32> to vector<8x1xf32>
    %cst_54 = arith.constant 3.200000e+01 : f32
    %155 = vector.broadcast %cst_54 : f32 to vector<8x1xf32>
    %156 = arith.divf %154, %155 : vector<8x1xf32>
    %157 = vector.broadcast %149 : vector<8x1xf32> to vector<8x32xf32>
    %158 = arith.subf %145, %157 : vector<8x32xf32>
    %cst_55 = arith.constant 9.99999974E-6 : f32
    %159 = vector.broadcast %cst_55 : f32 to vector<8x1xf32>
    %160 = arith.addf %156, %159 : vector<8x1xf32>
    %161 = math.rsqrt %160 : vector<8x1xf32>
    %162 = vector.broadcast %161 : vector<8x1xf32> to vector<8x32xf32>
    %163 = arith.mulf %158, %162 : vector<8x32xf32>
    %164 = vector.broadcast %33 : vector<1x32xf32> to vector<8x32xf32>
    %165 = arith.mulf %163, %164 : vector<8x32xf32>
    %166 = vector.broadcast %34 : vector<1x32xf32> to vector<8x32xf32>
    %167 = arith.addf %165, %166 : vector<8x32xf32>
    %168 = vector.extract_strided_slice %2 {offsets = [8, 0], sizes = [8, 195], strides = [1, 1]} : vector<16x195xf32> to vector<8x195xf32>
    %169 = vector.extract_strided_slice %168 {offsets = [0, 0], sizes = [8, 32], strides = [1, 1]} : vector<8x195xf32> to vector<8x32xf32>
    %170 = vector.broadcast %29 : vector<1x32xf32> to vector<8x32xf32>
    %171 = arith.addf %169, %170 : vector<8x32xf32>
    %172 = arith.truncf %171 : vector<8x32xf32> to vector<8x32xbf16>
    %173 = vector.extract_strided_slice %168 {offsets = [0, 96], sizes = [8, 32], strides = [1, 1]} : vector<8x195xf32> to vector<8x32xf32>
    %174 = vector.broadcast %32 : vector<1x32xf32> to vector<8x32xf32>
    %175 = arith.addf %173, %174 : vector<8x32xf32>
    %c0_56 = arith.constant 0 : index
    %c1 = arith.constant 1 : index
    %c0_57 = arith.constant 0 : index
    %c0_58 = arith.constant 0 : index
    %176 = vector.load %arg1[%c0_56, %c1, %c0_57, %c0_58] : memref<3x2x128x32xbf16, #tpu.memory_space<vmem>>, vector<1x1x128x32xbf16>
    %177 = vector.shape_cast %176 : vector<1x1x128x32xbf16> to vector<128x32xbf16>
    %cst_59 = arith.constant dense<0.000000e+00> : vector<128x64xf32>
    %178 = tpu.matmul %177, %36, %cst_59 {dimension_numbers = #tpu.dot_dimension_numbers<[1], [0], [0], [1], [0, 0, 1, 1], [], []>} : vector<128x32xbf16>, vector<32x64xbf16>, vector<128x64xf32> -> vector<128x64xf32>
    %179 = vector.extract_strided_slice %178 {offsets = [0, 0], sizes = [128, 32], strides = [1, 1]} : vector<128x64xf32> to vector<128x32xf32>
    %180 = vector.broadcast %30 : vector<1x32xf32> to vector<128x32xf32>
    %181 = arith.addf %179, %180 : vector<128x32xf32>
    %182 = arith.truncf %181 : vector<128x32xf32> to vector<128x32xbf16>
    %183 = vector.extract_strided_slice %178 {offsets = [0, 32], sizes = [128, 32], strides = [1, 1]} : vector<128x64xf32> to vector<128x32xf32>
    %184 = vector.broadcast %31 : vector<1x32xf32> to vector<128x32xf32>
    %185 = arith.addf %183, %184 : vector<128x32xf32>
    %186 = arith.truncf %185 : vector<128x32xf32> to vector<128x32xbf16>
    %187 = vector.extract_strided_slice %172 {offsets = [0, 0], sizes = [8, 8], strides = [1, 1]} : vector<8x32xbf16> to vector<8x8xbf16>
    %188 = vector.extract_strided_slice %182 {offsets = [0, 0], sizes = [128, 8], strides = [1, 1]} : vector<128x32xbf16> to vector<128x8xbf16>
    %189 = vector.extract_strided_slice %186 {offsets = [0, 0], sizes = [128, 8], strides = [1, 1]} : vector<128x32xbf16> to vector<128x8xbf16>
    %cst_60 = arith.constant dense<0.000000e+00> : vector<8x128xf32>
    %190 = tpu.matmul %187, %188, %cst_60 {dimension_numbers = #tpu.dot_dimension_numbers<[1], [1], [0], [0], [0, 0, 1, 0], [], []>} : vector<8x8xbf16>, vector<128x8xbf16>, vector<8x128xf32> -> vector<8x128xf32>
    %cst_61 = arith.constant 0.353553385 : f32
    %191 = vector.broadcast %cst_61 : f32 to vector<8x128xf32>
    %192 = arith.mulf %190, %191 : vector<8x128xf32>
    %cst_62 = arith.constant dense<0xFF800000> : vector<8xf32>
    %193 = vector.multi_reduction <maximumf>, %192, %cst_62 [1] : vector<8x128xf32> to vector<8xf32>
    %194 = vector.shape_cast %193 : vector<8xf32> to vector<8x1xf32>
    %195 = vector.broadcast %194 : vector<8x1xf32> to vector<8x128xf32>
    %196 = arith.subf %192, %195 : vector<8x128xf32>
    %197 = math.exp %196 : vector<8x128xf32>
    %cst_63 = arith.constant dense<0.000000e+00> : vector<8xf32>
    %198 = vector.multi_reduction <add>, %197, %cst_63 [1] : vector<8x128xf32> to vector<8xf32>
    %199 = vector.shape_cast %198 : vector<8xf32> to vector<8x1xf32>
    %200 = tpu.reciprocal %199 {approx = true} : vector<8x1xf32> -> vector<8x1xf32>
    %201 = vector.broadcast %200 : vector<8x1xf32> to vector<8x128xf32>
    %202 = arith.mulf %197, %201 : vector<8x128xf32>
    %203 = arith.truncf %202 : vector<8x128xf32> to vector<8x128xbf16>
    %cst_64 = arith.constant dense<0.000000e+00> : vector<8x8xf32>
    %204 = tpu.matmul %203, %189, %cst_64 {dimension_numbers = #tpu.dot_dimension_numbers<[1], [0], [0], [1], [0, 0, 1, 1], [], []>} : vector<8x128xbf16>, vector<128x8xbf16>, vector<8x8xf32> -> vector<8x8xf32>
    %205 = arith.truncf %204 : vector<8x8xf32> to vector<8x8xbf16>
    %206 = vector.extract_strided_slice %38 {offsets = [0, 0], sizes = [8, 32], strides = [1, 1]} : vector<32x32xbf16> to vector<8x32xbf16>
    %cst_65 = arith.constant dense<0.000000e+00> : vector<8x32xf32>
    %207 = tpu.matmul %205, %206, %cst_65 {dimension_numbers = #tpu.dot_dimension_numbers<[1], [0], [0], [1], [0, 0, 1, 1], [], []>} : vector<8x8xbf16>, vector<8x32xbf16>, vector<8x32xf32> -> vector<8x32xf32>
    %208 = arith.addf %175, %207 : vector<8x32xf32>
    %209 = vector.extract_strided_slice %172 {offsets = [0, 8], sizes = [8, 8], strides = [1, 1]} : vector<8x32xbf16> to vector<8x8xbf16>
    %210 = vector.extract_strided_slice %182 {offsets = [0, 8], sizes = [128, 8], strides = [1, 1]} : vector<128x32xbf16> to vector<128x8xbf16>
    %211 = vector.extract_strided_slice %186 {offsets = [0, 8], sizes = [128, 8], strides = [1, 1]} : vector<128x32xbf16> to vector<128x8xbf16>
    %cst_66 = arith.constant dense<0.000000e+00> : vector<8x128xf32>
    %212 = tpu.matmul %209, %210, %cst_66 {dimension_numbers = #tpu.dot_dimension_numbers<[1], [1], [0], [0], [0, 0, 1, 0], [], []>} : vector<8x8xbf16>, vector<128x8xbf16>, vector<8x128xf32> -> vector<8x128xf32>
    %cst_67 = arith.constant 0.353553385 : f32
    %213 = vector.broadcast %cst_67 : f32 to vector<8x128xf32>
    %214 = arith.mulf %212, %213 : vector<8x128xf32>
    %cst_68 = arith.constant dense<0xFF800000> : vector<8xf32>
    %215 = vector.multi_reduction <maximumf>, %214, %cst_68 [1] : vector<8x128xf32> to vector<8xf32>
    %216 = vector.shape_cast %215 : vector<8xf32> to vector<8x1xf32>
    %217 = vector.broadcast %216 : vector<8x1xf32> to vector<8x128xf32>
    %218 = arith.subf %214, %217 : vector<8x128xf32>
    %219 = math.exp %218 : vector<8x128xf32>
    %cst_69 = arith.constant dense<0.000000e+00> : vector<8xf32>
    %220 = vector.multi_reduction <add>, %219, %cst_69 [1] : vector<8x128xf32> to vector<8xf32>
    %221 = vector.shape_cast %220 : vector<8xf32> to vector<8x1xf32>
    %222 = tpu.reciprocal %221 {approx = true} : vector<8x1xf32> -> vector<8x1xf32>
    %223 = vector.broadcast %222 : vector<8x1xf32> to vector<8x128xf32>
    %224 = arith.mulf %219, %223 : vector<8x128xf32>
    %225 = arith.truncf %224 : vector<8x128xf32> to vector<8x128xbf16>
    %cst_70 = arith.constant dense<0.000000e+00> : vector<8x8xf32>
    %226 = tpu.matmul %225, %211, %cst_70 {dimension_numbers = #tpu.dot_dimension_numbers<[1], [0], [0], [1], [0, 0, 1, 1], [], []>} : vector<8x128xbf16>, vector<128x8xbf16>, vector<8x8xf32> -> vector<8x8xf32>
    %227 = arith.truncf %226 : vector<8x8xf32> to vector<8x8xbf16>
    %228 = vector.extract_strided_slice %38 {offsets = [8, 0], sizes = [8, 32], strides = [1, 1]} : vector<32x32xbf16> to vector<8x32xbf16>
    %cst_71 = arith.constant dense<0.000000e+00> : vector<8x32xf32>
    %229 = tpu.matmul %227, %228, %cst_71 {dimension_numbers = #tpu.dot_dimension_numbers<[1], [0], [0], [1], [0, 0, 1, 1], [], []>} : vector<8x8xbf16>, vector<8x32xbf16>, vector<8x32xf32> -> vector<8x32xf32>
    %230 = arith.addf %208, %229 : vector<8x32xf32>
    %231 = vector.extract_strided_slice %172 {offsets = [0, 16], sizes = [8, 8], strides = [1, 1]} : vector<8x32xbf16> to vector<8x8xbf16>
    %232 = vector.extract_strided_slice %182 {offsets = [0, 16], sizes = [128, 8], strides = [1, 1]} : vector<128x32xbf16> to vector<128x8xbf16>
    %233 = vector.extract_strided_slice %186 {offsets = [0, 16], sizes = [128, 8], strides = [1, 1]} : vector<128x32xbf16> to vector<128x8xbf16>
    %cst_72 = arith.constant dense<0.000000e+00> : vector<8x128xf32>
    %234 = tpu.matmul %231, %232, %cst_72 {dimension_numbers = #tpu.dot_dimension_numbers<[1], [1], [0], [0], [0, 0, 1, 0], [], []>} : vector<8x8xbf16>, vector<128x8xbf16>, vector<8x128xf32> -> vector<8x128xf32>
    %cst_73 = arith.constant 0.353553385 : f32
    %235 = vector.broadcast %cst_73 : f32 to vector<8x128xf32>
    %236 = arith.mulf %234, %235 : vector<8x128xf32>
    %cst_74 = arith.constant dense<0xFF800000> : vector<8xf32>
    %237 = vector.multi_reduction <maximumf>, %236, %cst_74 [1] : vector<8x128xf32> to vector<8xf32>
    %238 = vector.shape_cast %237 : vector<8xf32> to vector<8x1xf32>
    %239 = vector.broadcast %238 : vector<8x1xf32> to vector<8x128xf32>
    %240 = arith.subf %236, %239 : vector<8x128xf32>
    %241 = math.exp %240 : vector<8x128xf32>
    %cst_75 = arith.constant dense<0.000000e+00> : vector<8xf32>
    %242 = vector.multi_reduction <add>, %241, %cst_75 [1] : vector<8x128xf32> to vector<8xf32>
    %243 = vector.shape_cast %242 : vector<8xf32> to vector<8x1xf32>
    %244 = tpu.reciprocal %243 {approx = true} : vector<8x1xf32> -> vector<8x1xf32>
    %245 = vector.broadcast %244 : vector<8x1xf32> to vector<8x128xf32>
    %246 = arith.mulf %241, %245 : vector<8x128xf32>
    %247 = arith.truncf %246 : vector<8x128xf32> to vector<8x128xbf16>
    %cst_76 = arith.constant dense<0.000000e+00> : vector<8x8xf32>
    %248 = tpu.matmul %247, %233, %cst_76 {dimension_numbers = #tpu.dot_dimension_numbers<[1], [0], [0], [1], [0, 0, 1, 1], [], []>} : vector<8x128xbf16>, vector<128x8xbf16>, vector<8x8xf32> -> vector<8x8xf32>
    %249 = arith.truncf %248 : vector<8x8xf32> to vector<8x8xbf16>
    %250 = vector.extract_strided_slice %38 {offsets = [16, 0], sizes = [8, 32], strides = [1, 1]} : vector<32x32xbf16> to vector<8x32xbf16>
    %cst_77 = arith.constant dense<0.000000e+00> : vector<8x32xf32>
    %251 = tpu.matmul %249, %250, %cst_77 {dimension_numbers = #tpu.dot_dimension_numbers<[1], [0], [0], [1], [0, 0, 1, 1], [], []>} : vector<8x8xbf16>, vector<8x32xbf16>, vector<8x32xf32> -> vector<8x32xf32>
    %252 = arith.addf %230, %251 : vector<8x32xf32>
    %253 = vector.extract_strided_slice %172 {offsets = [0, 24], sizes = [8, 8], strides = [1, 1]} : vector<8x32xbf16> to vector<8x8xbf16>
    %254 = vector.extract_strided_slice %182 {offsets = [0, 24], sizes = [128, 8], strides = [1, 1]} : vector<128x32xbf16> to vector<128x8xbf16>
    %255 = vector.extract_strided_slice %186 {offsets = [0, 24], sizes = [128, 8], strides = [1, 1]} : vector<128x32xbf16> to vector<128x8xbf16>
    %cst_78 = arith.constant dense<0.000000e+00> : vector<8x128xf32>
    %256 = tpu.matmul %253, %254, %cst_78 {dimension_numbers = #tpu.dot_dimension_numbers<[1], [1], [0], [0], [0, 0, 1, 0], [], []>} : vector<8x8xbf16>, vector<128x8xbf16>, vector<8x128xf32> -> vector<8x128xf32>
    %cst_79 = arith.constant 0.353553385 : f32
    %257 = vector.broadcast %cst_79 : f32 to vector<8x128xf32>
    %258 = arith.mulf %256, %257 : vector<8x128xf32>
    %cst_80 = arith.constant dense<0xFF800000> : vector<8xf32>
    %259 = vector.multi_reduction <maximumf>, %258, %cst_80 [1] : vector<8x128xf32> to vector<8xf32>
    %260 = vector.shape_cast %259 : vector<8xf32> to vector<8x1xf32>
    %261 = vector.broadcast %260 : vector<8x1xf32> to vector<8x128xf32>
    %262 = arith.subf %258, %261 : vector<8x128xf32>
    %263 = math.exp %262 : vector<8x128xf32>
    %cst_81 = arith.constant dense<0.000000e+00> : vector<8xf32>
    %264 = vector.multi_reduction <add>, %263, %cst_81 [1] : vector<8x128xf32> to vector<8xf32>
    %265 = vector.shape_cast %264 : vector<8xf32> to vector<8x1xf32>
    %266 = tpu.reciprocal %265 {approx = true} : vector<8x1xf32> -> vector<8x1xf32>
    %267 = vector.broadcast %266 : vector<8x1xf32> to vector<8x128xf32>
    %268 = arith.mulf %263, %267 : vector<8x128xf32>
    %269 = arith.truncf %268 : vector<8x128xf32> to vector<8x128xbf16>
    %cst_82 = arith.constant dense<0.000000e+00> : vector<8x8xf32>
    %270 = tpu.matmul %269, %255, %cst_82 {dimension_numbers = #tpu.dot_dimension_numbers<[1], [0], [0], [1], [0, 0, 1, 1], [], []>} : vector<8x128xbf16>, vector<128x8xbf16>, vector<8x8xf32> -> vector<8x8xf32>
    %271 = arith.truncf %270 : vector<8x8xf32> to vector<8x8xbf16>
    %272 = vector.extract_strided_slice %38 {offsets = [24, 0], sizes = [8, 32], strides = [1, 1]} : vector<32x32xbf16> to vector<8x32xbf16>
    %cst_83 = arith.constant dense<0.000000e+00> : vector<8x32xf32>
    %273 = tpu.matmul %271, %272, %cst_83 {dimension_numbers = #tpu.dot_dimension_numbers<[1], [0], [0], [1], [0, 0, 1, 1], [], []>} : vector<8x8xbf16>, vector<8x32xbf16>, vector<8x32xf32> -> vector<8x32xf32>
    %274 = arith.addf %252, %273 : vector<8x32xf32>
    %cst_84 = arith.constant dense<0.000000e+00> : vector<8xf32>
    %275 = vector.multi_reduction <add>, %274, %cst_84 [1] : vector<8x32xf32> to vector<8xf32>
    %276 = vector.shape_cast %275 : vector<8xf32> to vector<8x1xf32>
    %cst_85 = arith.constant 3.200000e+01 : f32
    %277 = vector.broadcast %cst_85 : f32 to vector<8x1xf32>
    %278 = arith.divf %276, %277 : vector<8x1xf32>
    %279 = vector.broadcast %278 : vector<8x1xf32> to vector<8x32xf32>
    %280 = arith.subf %274, %279 : vector<8x32xf32>
    %281 = arith.mulf %280, %280 : vector<8x32xf32>
    %cst_86 = arith.constant dense<0.000000e+00> : vector<8xf32>
    %282 = vector.multi_reduction <add>, %281, %cst_86 [1] : vector<8x32xf32> to vector<8xf32>
    %283 = vector.shape_cast %282 : vector<8xf32> to vector<8x1xf32>
    %cst_87 = arith.constant 3.200000e+01 : f32
    %284 = vector.broadcast %cst_87 : f32 to vector<8x1xf32>
    %285 = arith.divf %283, %284 : vector<8x1xf32>
    %286 = vector.broadcast %278 : vector<8x1xf32> to vector<8x32xf32>
    %287 = arith.subf %274, %286 : vector<8x32xf32>
    %cst_88 = arith.constant 9.99999974E-6 : f32
    %288 = vector.broadcast %cst_88 : f32 to vector<8x1xf32>
    %289 = arith.addf %285, %288 : vector<8x1xf32>
    %290 = math.rsqrt %289 : vector<8x1xf32>
    %291 = vector.broadcast %290 : vector<8x1xf32> to vector<8x32xf32>
    %292 = arith.mulf %287, %291 : vector<8x32xf32>
    %293 = vector.broadcast %33 : vector<1x32xf32> to vector<8x32xf32>
    %294 = arith.mulf %292, %293 : vector<8x32xf32>
    %295 = vector.broadcast %34 : vector<1x32xf32> to vector<8x32xf32>
    %296 = arith.addf %294, %295 : vector<8x32xf32>
    %c1_89 = arith.constant 1 : index
    %c0_90 = arith.constant 0 : index
    %c0_91 = arith.constant 0 : index
    %297 = vector.load %arg5[%c1_89, %c0_90, %c0_91] : memref<3x6x32xf32, #tpu.memory_space<vmem>>, vector<1x6x32xf32>
    %298 = vector.shape_cast %297 : vector<1x6x32xf32> to vector<6x32xf32>
    %299 = vector.extract_strided_slice %298 {offsets = [0, 0], sizes = [1, 32], strides = [1, 1]} : vector<6x32xf32> to vector<1x32xf32>
    %300 = vector.extract_strided_slice %298 {offsets = [1, 0], sizes = [1, 32], strides = [1, 1]} : vector<6x32xf32> to vector<1x32xf32>
    %301 = vector.extract_strided_slice %298 {offsets = [2, 0], sizes = [1, 32], strides = [1, 1]} : vector<6x32xf32> to vector<1x32xf32>
    %302 = vector.extract_strided_slice %298 {offsets = [3, 0], sizes = [1, 32], strides = [1, 1]} : vector<6x32xf32> to vector<1x32xf32>
    %303 = vector.extract_strided_slice %298 {offsets = [4, 0], sizes = [1, 32], strides = [1, 1]} : vector<6x32xf32> to vector<1x32xf32>
    %304 = vector.extract_strided_slice %298 {offsets = [5, 0], sizes = [1, 32], strides = [1, 1]} : vector<6x32xf32> to vector<1x32xf32>
    %c1_92 = arith.constant 1 : index
    %c0_93 = arith.constant 0 : index
    %c0_94 = arith.constant 0 : index
    %305 = vector.load %arg3[%c1_92, %c0_93, %c0_94] : memref<3x32x64xbf16, #tpu.memory_space<vmem>>, vector<1x32x64xbf16>
    %306 = vector.shape_cast %305 : vector<1x32x64xbf16> to vector<32x64xbf16>
    %c1_95 = arith.constant 1 : index
    %c0_96 = arith.constant 0 : index
    %c0_97 = arith.constant 0 : index
    %307 = vector.load %arg4[%c1_95, %c0_96, %c0_97] : memref<3x32x32xbf16, #tpu.memory_space<vmem>>, vector<1x32x32xbf16>
    %308 = vector.shape_cast %307 : vector<1x32x32xbf16> to vector<32x32xbf16>
    %309 = vector.extract_strided_slice %2 {offsets = [0, 0], sizes = [8, 195], strides = [1, 1]} : vector<16x195xf32> to vector<8x195xf32>
    %310 = vector.extract_strided_slice %309 {offsets = [0, 32], sizes = [8, 32], strides = [1, 1]} : vector<8x195xf32> to vector<8x32xf32>
    %311 = vector.broadcast %299 : vector<1x32xf32> to vector<8x32xf32>
    %312 = arith.addf %310, %311 : vector<8x32xf32>
    %313 = arith.truncf %312 : vector<8x32xf32> to vector<8x32xbf16>
    %314 = vector.extract_strided_slice %309 {offsets = [0, 128], sizes = [8, 32], strides = [1, 1]} : vector<8x195xf32> to vector<8x32xf32>
    %315 = vector.broadcast %302 : vector<1x32xf32> to vector<8x32xf32>
    %316 = arith.addf %314, %315 : vector<8x32xf32>
    %c1_98 = arith.constant 1 : index
    %c0_99 = arith.constant 0 : index
    %c0_100 = arith.constant 0 : index
    %c0_101 = arith.constant 0 : index
    %317 = vector.load %arg1[%c1_98, %c0_99, %c0_100, %c0_101] : memref<3x2x128x32xbf16, #tpu.memory_space<vmem>>, vector<1x1x128x32xbf16>
    %318 = vector.shape_cast %317 : vector<1x1x128x32xbf16> to vector<128x32xbf16>
    %cst_102 = arith.constant dense<0.000000e+00> : vector<128x64xf32>
    %319 = tpu.matmul %318, %306, %cst_102 {dimension_numbers = #tpu.dot_dimension_numbers<[1], [0], [0], [1], [0, 0, 1, 1], [], []>} : vector<128x32xbf16>, vector<32x64xbf16>, vector<128x64xf32> -> vector<128x64xf32>
    %320 = vector.extract_strided_slice %319 {offsets = [0, 0], sizes = [128, 32], strides = [1, 1]} : vector<128x64xf32> to vector<128x32xf32>
    %321 = vector.broadcast %300 : vector<1x32xf32> to vector<128x32xf32>
    %322 = arith.addf %320, %321 : vector<128x32xf32>
    %323 = arith.truncf %322 : vector<128x32xf32> to vector<128x32xbf16>
    %324 = vector.extract_strided_slice %319 {offsets = [0, 32], sizes = [128, 32], strides = [1, 1]} : vector<128x64xf32> to vector<128x32xf32>
    %325 = vector.broadcast %301 : vector<1x32xf32> to vector<128x32xf32>
    %326 = arith.addf %324, %325 : vector<128x32xf32>
    %327 = arith.truncf %326 : vector<128x32xf32> to vector<128x32xbf16>
    %328 = vector.extract_strided_slice %313 {offsets = [0, 0], sizes = [8, 8], strides = [1, 1]} : vector<8x32xbf16> to vector<8x8xbf16>
    %329 = vector.extract_strided_slice %323 {offsets = [0, 0], sizes = [128, 8], strides = [1, 1]} : vector<128x32xbf16> to vector<128x8xbf16>
    %330 = vector.extract_strided_slice %327 {offsets = [0, 0], sizes = [128, 8], strides = [1, 1]} : vector<128x32xbf16> to vector<128x8xbf16>
    %cst_103 = arith.constant dense<0.000000e+00> : vector<8x128xf32>
    %331 = tpu.matmul %328, %329, %cst_103 {dimension_numbers = #tpu.dot_dimension_numbers<[1], [1], [0], [0], [0, 0, 1, 0], [], []>} : vector<8x8xbf16>, vector<128x8xbf16>, vector<8x128xf32> -> vector<8x128xf32>
    %cst_104 = arith.constant 0.353553385 : f32
    %332 = vector.broadcast %cst_104 : f32 to vector<8x128xf32>
    %333 = arith.mulf %331, %332 : vector<8x128xf32>
    %cst_105 = arith.constant dense<0xFF800000> : vector<8xf32>
    %334 = vector.multi_reduction <maximumf>, %333, %cst_105 [1] : vector<8x128xf32> to vector<8xf32>
    %335 = vector.shape_cast %334 : vector<8xf32> to vector<8x1xf32>
    %336 = vector.broadcast %335 : vector<8x1xf32> to vector<8x128xf32>
    %337 = arith.subf %333, %336 : vector<8x128xf32>
    %338 = math.exp %337 : vector<8x128xf32>
    %cst_106 = arith.constant dense<0.000000e+00> : vector<8xf32>
    %339 = vector.multi_reduction <add>, %338, %cst_106 [1] : vector<8x128xf32> to vector<8xf32>
    %340 = vector.shape_cast %339 : vector<8xf32> to vector<8x1xf32>
    %341 = tpu.reciprocal %340 {approx = true} : vector<8x1xf32> -> vector<8x1xf32>
    %342 = vector.broadcast %341 : vector<8x1xf32> to vector<8x128xf32>
    %343 = arith.mulf %338, %342 : vector<8x128xf32>
    %344 = arith.truncf %343 : vector<8x128xf32> to vector<8x128xbf16>
    %cst_107 = arith.constant dense<0.000000e+00> : vector<8x8xf32>
    %345 = tpu.matmul %344, %330, %cst_107 {dimension_numbers = #tpu.dot_dimension_numbers<[1], [0], [0], [1], [0, 0, 1, 1], [], []>} : vector<8x128xbf16>, vector<128x8xbf16>, vector<8x8xf32> -> vector<8x8xf32>
    %346 = arith.truncf %345 : vector<8x8xf32> to vector<8x8xbf16>
    %347 = vector.extract_strided_slice %308 {offsets = [0, 0], sizes = [8, 32], strides = [1, 1]} : vector<32x32xbf16> to vector<8x32xbf16>
    %cst_108 = arith.constant dense<0.000000e+00> : vector<8x32xf32>
    %348 = tpu.matmul %346, %347, %cst_108 {dimension_numbers = #tpu.dot_dimension_numbers<[1], [0], [0], [1], [0, 0, 1, 1], [], []>} : vector<8x8xbf16>, vector<8x32xbf16>, vector<8x32xf32> -> vector<8x32xf32>
    %349 = arith.addf %316, %348 : vector<8x32xf32>
    %350 = vector.extract_strided_slice %313 {offsets = [0, 8], sizes = [8, 8], strides = [1, 1]} : vector<8x32xbf16> to vector<8x8xbf16>
    %351 = vector.extract_strided_slice %323 {offsets = [0, 8], sizes = [128, 8], strides = [1, 1]} : vector<128x32xbf16> to vector<128x8xbf16>
    %352 = vector.extract_strided_slice %327 {offsets = [0, 8], sizes = [128, 8], strides = [1, 1]} : vector<128x32xbf16> to vector<128x8xbf16>
    %cst_109 = arith.constant dense<0.000000e+00> : vector<8x128xf32>
    %353 = tpu.matmul %350, %351, %cst_109 {dimension_numbers = #tpu.dot_dimension_numbers<[1], [1], [0], [0], [0, 0, 1, 0], [], []>} : vector<8x8xbf16>, vector<128x8xbf16>, vector<8x128xf32> -> vector<8x128xf32>
    %cst_110 = arith.constant 0.353553385 : f32
    %354 = vector.broadcast %cst_110 : f32 to vector<8x128xf32>
    %355 = arith.mulf %353, %354 : vector<8x128xf32>
    %cst_111 = arith.constant dense<0xFF800000> : vector<8xf32>
    %356 = vector.multi_reduction <maximumf>, %355, %cst_111 [1] : vector<8x128xf32> to vector<8xf32>
    %357 = vector.shape_cast %356 : vector<8xf32> to vector<8x1xf32>
    %358 = vector.broadcast %357 : vector<8x1xf32> to vector<8x128xf32>
    %359 = arith.subf %355, %358 : vector<8x128xf32>
    %360 = math.exp %359 : vector<8x128xf32>
    %cst_112 = arith.constant dense<0.000000e+00> : vector<8xf32>
    %361 = vector.multi_reduction <add>, %360, %cst_112 [1] : vector<8x128xf32> to vector<8xf32>
    %362 = vector.shape_cast %361 : vector<8xf32> to vector<8x1xf32>
    %363 = tpu.reciprocal %362 {approx = true} : vector<8x1xf32> -> vector<8x1xf32>
    %364 = vector.broadcast %363 : vector<8x1xf32> to vector<8x128xf32>
    %365 = arith.mulf %360, %364 : vector<8x128xf32>
    %366 = arith.truncf %365 : vector<8x128xf32> to vector<8x128xbf16>
    %cst_113 = arith.constant dense<0.000000e+00> : vector<8x8xf32>
    %367 = tpu.matmul %366, %352, %cst_113 {dimension_numbers = #tpu.dot_dimension_numbers<[1], [0], [0], [1], [0, 0, 1, 1], [], []>} : vector<8x128xbf16>, vector<128x8xbf16>, vector<8x8xf32> -> vector<8x8xf32>
    %368 = arith.truncf %367 : vector<8x8xf32> to vector<8x8xbf16>
    %369 = vector.extract_strided_slice %308 {offsets = [8, 0], sizes = [8, 32], strides = [1, 1]} : vector<32x32xbf16> to vector<8x32xbf16>
    %cst_114 = arith.constant dense<0.000000e+00> : vector<8x32xf32>
    %370 = tpu.matmul %368, %369, %cst_114 {dimension_numbers = #tpu.dot_dimension_numbers<[1], [0], [0], [1], [0, 0, 1, 1], [], []>} : vector<8x8xbf16>, vector<8x32xbf16>, vector<8x32xf32> -> vector<8x32xf32>
    %371 = arith.addf %349, %370 : vector<8x32xf32>
    %372 = vector.extract_strided_slice %313 {offsets = [0, 16], sizes = [8, 8], strides = [1, 1]} : vector<8x32xbf16> to vector<8x8xbf16>
    %373 = vector.extract_strided_slice %323 {offsets = [0, 16], sizes = [128, 8], strides = [1, 1]} : vector<128x32xbf16> to vector<128x8xbf16>
    %374 = vector.extract_strided_slice %327 {offsets = [0, 16], sizes = [128, 8], strides = [1, 1]} : vector<128x32xbf16> to vector<128x8xbf16>
    %cst_115 = arith.constant dense<0.000000e+00> : vector<8x128xf32>
    %375 = tpu.matmul %372, %373, %cst_115 {dimension_numbers = #tpu.dot_dimension_numbers<[1], [1], [0], [0], [0, 0, 1, 0], [], []>} : vector<8x8xbf16>, vector<128x8xbf16>, vector<8x128xf32> -> vector<8x128xf32>
    %cst_116 = arith.constant 0.353553385 : f32
    %376 = vector.broadcast %cst_116 : f32 to vector<8x128xf32>
    %377 = arith.mulf %375, %376 : vector<8x128xf32>
    %cst_117 = arith.constant dense<0xFF800000> : vector<8xf32>
    %378 = vector.multi_reduction <maximumf>, %377, %cst_117 [1] : vector<8x128xf32> to vector<8xf32>
    %379 = vector.shape_cast %378 : vector<8xf32> to vector<8x1xf32>
    %380 = vector.broadcast %379 : vector<8x1xf32> to vector<8x128xf32>
    %381 = arith.subf %377, %380 : vector<8x128xf32>
    %382 = math.exp %381 : vector<8x128xf32>
    %cst_118 = arith.constant dense<0.000000e+00> : vector<8xf32>
    %383 = vector.multi_reduction <add>, %382, %cst_118 [1] : vector<8x128xf32> to vector<8xf32>
    %384 = vector.shape_cast %383 : vector<8xf32> to vector<8x1xf32>
    %385 = tpu.reciprocal %384 {approx = true} : vector<8x1xf32> -> vector<8x1xf32>
    %386 = vector.broadcast %385 : vector<8x1xf32> to vector<8x128xf32>
    %387 = arith.mulf %382, %386 : vector<8x128xf32>
    %388 = arith.truncf %387 : vector<8x128xf32> to vector<8x128xbf16>
    %cst_119 = arith.constant dense<0.000000e+00> : vector<8x8xf32>
    %389 = tpu.matmul %388, %374, %cst_119 {dimension_numbers = #tpu.dot_dimension_numbers<[1], [0], [0], [1], [0, 0, 1, 1], [], []>} : vector<8x128xbf16>, vector<128x8xbf16>, vector<8x8xf32> -> vector<8x8xf32>
    %390 = arith.truncf %389 : vector<8x8xf32> to vector<8x8xbf16>
    %391 = vector.extract_strided_slice %308 {offsets = [16, 0], sizes = [8, 32], strides = [1, 1]} : vector<32x32xbf16> to vector<8x32xbf16>
    %cst_120 = arith.constant dense<0.000000e+00> : vector<8x32xf32>
    %392 = tpu.matmul %390, %391, %cst_120 {dimension_numbers = #tpu.dot_dimension_numbers<[1], [0], [0], [1], [0, 0, 1, 1], [], []>} : vector<8x8xbf16>, vector<8x32xbf16>, vector<8x32xf32> -> vector<8x32xf32>
    %393 = arith.addf %371, %392 : vector<8x32xf32>
    %394 = vector.extract_strided_slice %313 {offsets = [0, 24], sizes = [8, 8], strides = [1, 1]} : vector<8x32xbf16> to vector<8x8xbf16>
    %395 = vector.extract_strided_slice %323 {offsets = [0, 24], sizes = [128, 8], strides = [1, 1]} : vector<128x32xbf16> to vector<128x8xbf16>
    %396 = vector.extract_strided_slice %327 {offsets = [0, 24], sizes = [128, 8], strides = [1, 1]} : vector<128x32xbf16> to vector<128x8xbf16>
    %cst_121 = arith.constant dense<0.000000e+00> : vector<8x128xf32>
    %397 = tpu.matmul %394, %395, %cst_121 {dimension_numbers = #tpu.dot_dimension_numbers<[1], [1], [0], [0], [0, 0, 1, 0], [], []>} : vector<8x8xbf16>, vector<128x8xbf16>, vector<8x128xf32> -> vector<8x128xf32>
    %cst_122 = arith.constant 0.353553385 : f32
    %398 = vector.broadcast %cst_122 : f32 to vector<8x128xf32>
    %399 = arith.mulf %397, %398 : vector<8x128xf32>
    %cst_123 = arith.constant dense<0xFF800000> : vector<8xf32>
    %400 = vector.multi_reduction <maximumf>, %399, %cst_123 [1] : vector<8x128xf32> to vector<8xf32>
    %401 = vector.shape_cast %400 : vector<8xf32> to vector<8x1xf32>
    %402 = vector.broadcast %401 : vector<8x1xf32> to vector<8x128xf32>
    %403 = arith.subf %399, %402 : vector<8x128xf32>
    %404 = math.exp %403 : vector<8x128xf32>
    %cst_124 = arith.constant dense<0.000000e+00> : vector<8xf32>
    %405 = vector.multi_reduction <add>, %404, %cst_124 [1] : vector<8x128xf32> to vector<8xf32>
    %406 = vector.shape_cast %405 : vector<8xf32> to vector<8x1xf32>
    %407 = tpu.reciprocal %406 {approx = true} : vector<8x1xf32> -> vector<8x1xf32>
    %408 = vector.broadcast %407 : vector<8x1xf32> to vector<8x128xf32>
    %409 = arith.mulf %404, %408 : vector<8x128xf32>
    %410 = arith.truncf %409 : vector<8x128xf32> to vector<8x128xbf16>
    %cst_125 = arith.constant dense<0.000000e+00> : vector<8x8xf32>
    %411 = tpu.matmul %410, %396, %cst_125 {dimension_numbers = #tpu.dot_dimension_numbers<[1], [0], [0], [1], [0, 0, 1, 1], [], []>} : vector<8x128xbf16>, vector<128x8xbf16>, vector<8x8xf32> -> vector<8x8xf32>
    %412 = arith.truncf %411 : vector<8x8xf32> to vector<8x8xbf16>
    %413 = vector.extract_strided_slice %308 {offsets = [24, 0], sizes = [8, 32], strides = [1, 1]} : vector<32x32xbf16> to vector<8x32xbf16>
    %cst_126 = arith.constant dense<0.000000e+00> : vector<8x32xf32>
    %414 = tpu.matmul %412, %413, %cst_126 {dimension_numbers = #tpu.dot_dimension_numbers<[1], [0], [0], [1], [0, 0, 1, 1], [], []>} : vector<8x8xbf16>, vector<8x32xbf16>, vector<8x32xf32> -> vector<8x32xf32>
    %415 = arith.addf %393, %414 : vector<8x32xf32>
    %cst_127 = arith.constant dense<0.000000e+00> : vector<8xf32>
    %416 = vector.multi_reduction <add>, %415, %cst_127 [1] : vector<8x32xf32> to vector<8xf32>
    %417 = vector.shape_cast %416 : vector<8xf32> to vector<8x1xf32>
    %cst_128 = arith.constant 3.200000e+01 : f32
    %418 = vector.broadcast %cst_128 : f32 to vector<8x1xf32>
    %419 = arith.divf %417, %418 : vector<8x1xf32>
    %420 = vector.broadcast %419 : vector<8x1xf32> to vector<8x32xf32>
    %421 = arith.subf %415, %420 : vector<8x32xf32>
    %422 = arith.mulf %421, %421 : vector<8x32xf32>
    %cst_129 = arith.constant dense<0.000000e+00> : vector<8xf32>
    %423 = vector.multi_reduction <add>, %422, %cst_129 [1] : vector<8x32xf32> to vector<8xf32>
    %424 = vector.shape_cast %423 : vector<8xf32> to vector<8x1xf32>
    %cst_130 = arith.constant 3.200000e+01 : f32
    %425 = vector.broadcast %cst_130 : f32 to vector<8x1xf32>
    %426 = arith.divf %424, %425 : vector<8x1xf32>
    %427 = vector.broadcast %419 : vector<8x1xf32> to vector<8x32xf32>
    %428 = arith.subf %415, %427 : vector<8x32xf32>
    %cst_131 = arith.constant 9.99999974E-6 : f32
    %429 = vector.broadcast %cst_131 : f32 to vector<8x1xf32>
    %430 = arith.addf %426, %429 : vector<8x1xf32>
    %431 = math.rsqrt %430 : vector<8x1xf32>
    %432 = vector.broadcast %431 : vector<8x1xf32> to vector<8x32xf32>
    %433 = arith.mulf %428, %432 : vector<8x32xf32>
    %434 = vector.broadcast %303 : vector<1x32xf32> to vector<8x32xf32>
    %435 = arith.mulf %433, %434 : vector<8x32xf32>
    %436 = vector.broadcast %304 : vector<1x32xf32> to vector<8x32xf32>
    %437 = arith.addf %435, %436 : vector<8x32xf32>
    %438 = vector.extract_strided_slice %2 {offsets = [8, 0], sizes = [8, 195], strides = [1, 1]} : vector<16x195xf32> to vector<8x195xf32>
    %439 = vector.extract_strided_slice %438 {offsets = [0, 32], sizes = [8, 32], strides = [1, 1]} : vector<8x195xf32> to vector<8x32xf32>
    %440 = vector.broadcast %299 : vector<1x32xf32> to vector<8x32xf32>
    %441 = arith.addf %439, %440 : vector<8x32xf32>
    %442 = arith.truncf %441 : vector<8x32xf32> to vector<8x32xbf16>
    %443 = vector.extract_strided_slice %438 {offsets = [0, 128], sizes = [8, 32], strides = [1, 1]} : vector<8x195xf32> to vector<8x32xf32>
    %444 = vector.broadcast %302 : vector<1x32xf32> to vector<8x32xf32>
    %445 = arith.addf %443, %444 : vector<8x32xf32>
    %c1_132 = arith.constant 1 : index
    %c1_133 = arith.constant 1 : index
    %c0_134 = arith.constant 0 : index
    %c0_135 = arith.constant 0 : index
    %446 = vector.load %arg1[%c1_132, %c1_133, %c0_134, %c0_135] : memref<3x2x128x32xbf16, #tpu.memory_space<vmem>>, vector<1x1x128x32xbf16>
    %447 = vector.shape_cast %446 : vector<1x1x128x32xbf16> to vector<128x32xbf16>
    %cst_136 = arith.constant dense<0.000000e+00> : vector<128x64xf32>
    %448 = tpu.matmul %447, %306, %cst_136 {dimension_numbers = #tpu.dot_dimension_numbers<[1], [0], [0], [1], [0, 0, 1, 1], [], []>} : vector<128x32xbf16>, vector<32x64xbf16>, vector<128x64xf32> -> vector<128x64xf32>
    %449 = vector.extract_strided_slice %448 {offsets = [0, 0], sizes = [128, 32], strides = [1, 1]} : vector<128x64xf32> to vector<128x32xf32>
    %450 = vector.broadcast %300 : vector<1x32xf32> to vector<128x32xf32>
    %451 = arith.addf %449, %450 : vector<128x32xf32>
    %452 = arith.truncf %451 : vector<128x32xf32> to vector<128x32xbf16>
    %453 = vector.extract_strided_slice %448 {offsets = [0, 32], sizes = [128, 32], strides = [1, 1]} : vector<128x64xf32> to vector<128x32xf32>
    %454 = vector.broadcast %301 : vector<1x32xf32> to vector<128x32xf32>
    %455 = arith.addf %453, %454 : vector<128x32xf32>
    %456 = arith.truncf %455 : vector<128x32xf32> to vector<128x32xbf16>
    %457 = vector.extract_strided_slice %442 {offsets = [0, 0], sizes = [8, 8], strides = [1, 1]} : vector<8x32xbf16> to vector<8x8xbf16>
    %458 = vector.extract_strided_slice %452 {offsets = [0, 0], sizes = [128, 8], strides = [1, 1]} : vector<128x32xbf16> to vector<128x8xbf16>
    %459 = vector.extract_strided_slice %456 {offsets = [0, 0], sizes = [128, 8], strides = [1, 1]} : vector<128x32xbf16> to vector<128x8xbf16>
    %cst_137 = arith.constant dense<0.000000e+00> : vector<8x128xf32>
    %460 = tpu.matmul %457, %458, %cst_137 {dimension_numbers = #tpu.dot_dimension_numbers<[1], [1], [0], [0], [0, 0, 1, 0], [], []>} : vector<8x8xbf16>, vector<128x8xbf16>, vector<8x128xf32> -> vector<8x128xf32>
    %cst_138 = arith.constant 0.353553385 : f32
    %461 = vector.broadcast %cst_138 : f32 to vector<8x128xf32>
    %462 = arith.mulf %460, %461 : vector<8x128xf32>
    %cst_139 = arith.constant dense<0xFF800000> : vector<8xf32>
    %463 = vector.multi_reduction <maximumf>, %462, %cst_139 [1] : vector<8x128xf32> to vector<8xf32>
    %464 = vector.shape_cast %463 : vector<8xf32> to vector<8x1xf32>
    %465 = vector.broadcast %464 : vector<8x1xf32> to vector<8x128xf32>
    %466 = arith.subf %462, %465 : vector<8x128xf32>
    %467 = math.exp %466 : vector<8x128xf32>
    %cst_140 = arith.constant dense<0.000000e+00> : vector<8xf32>
    %468 = vector.multi_reduction <add>, %467, %cst_140 [1] : vector<8x128xf32> to vector<8xf32>
    %469 = vector.shape_cast %468 : vector<8xf32> to vector<8x1xf32>
    %470 = tpu.reciprocal %469 {approx = true} : vector<8x1xf32> -> vector<8x1xf32>
    %471 = vector.broadcast %470 : vector<8x1xf32> to vector<8x128xf32>
    %472 = arith.mulf %467, %471 : vector<8x128xf32>
    %473 = arith.truncf %472 : vector<8x128xf32> to vector<8x128xbf16>
    %cst_141 = arith.constant dense<0.000000e+00> : vector<8x8xf32>
    %474 = tpu.matmul %473, %459, %cst_141 {dimension_numbers = #tpu.dot_dimension_numbers<[1], [0], [0], [1], [0, 0, 1, 1], [], []>} : vector<8x128xbf16>, vector<128x8xbf16>, vector<8x8xf32> -> vector<8x8xf32>
    %475 = arith.truncf %474 : vector<8x8xf32> to vector<8x8xbf16>
    %476 = vector.extract_strided_slice %308 {offsets = [0, 0], sizes = [8, 32], strides = [1, 1]} : vector<32x32xbf16> to vector<8x32xbf16>
    %cst_142 = arith.constant dense<0.000000e+00> : vector<8x32xf32>
    %477 = tpu.matmul %475, %476, %cst_142 {dimension_numbers = #tpu.dot_dimension_numbers<[1], [0], [0], [1], [0, 0, 1, 1], [], []>} : vector<8x8xbf16>, vector<8x32xbf16>, vector<8x32xf32> -> vector<8x32xf32>
    %478 = arith.addf %445, %477 : vector<8x32xf32>
    %479 = vector.extract_strided_slice %442 {offsets = [0, 8], sizes = [8, 8], strides = [1, 1]} : vector<8x32xbf16> to vector<8x8xbf16>
    %480 = vector.extract_strided_slice %452 {offsets = [0, 8], sizes = [128, 8], strides = [1, 1]} : vector<128x32xbf16> to vector<128x8xbf16>
    %481 = vector.extract_strided_slice %456 {offsets = [0, 8], sizes = [128, 8], strides = [1, 1]} : vector<128x32xbf16> to vector<128x8xbf16>
    %cst_143 = arith.constant dense<0.000000e+00> : vector<8x128xf32>
    %482 = tpu.matmul %479, %480, %cst_143 {dimension_numbers = #tpu.dot_dimension_numbers<[1], [1], [0], [0], [0, 0, 1, 0], [], []>} : vector<8x8xbf16>, vector<128x8xbf16>, vector<8x128xf32> -> vector<8x128xf32>
    %cst_144 = arith.constant 0.353553385 : f32
    %483 = vector.broadcast %cst_144 : f32 to vector<8x128xf32>
    %484 = arith.mulf %482, %483 : vector<8x128xf32>
    %cst_145 = arith.constant dense<0xFF800000> : vector<8xf32>
    %485 = vector.multi_reduction <maximumf>, %484, %cst_145 [1] : vector<8x128xf32> to vector<8xf32>
    %486 = vector.shape_cast %485 : vector<8xf32> to vector<8x1xf32>
    %487 = vector.broadcast %486 : vector<8x1xf32> to vector<8x128xf32>
    %488 = arith.subf %484, %487 : vector<8x128xf32>
    %489 = math.exp %488 : vector<8x128xf32>
    %cst_146 = arith.constant dense<0.000000e+00> : vector<8xf32>
    %490 = vector.multi_reduction <add>, %489, %cst_146 [1] : vector<8x128xf32> to vector<8xf32>
    %491 = vector.shape_cast %490 : vector<8xf32> to vector<8x1xf32>
    %492 = tpu.reciprocal %491 {approx = true} : vector<8x1xf32> -> vector<8x1xf32>
    %493 = vector.broadcast %492 : vector<8x1xf32> to vector<8x128xf32>
    %494 = arith.mulf %489, %493 : vector<8x128xf32>
    %495 = arith.truncf %494 : vector<8x128xf32> to vector<8x128xbf16>
    %cst_147 = arith.constant dense<0.000000e+00> : vector<8x8xf32>
    %496 = tpu.matmul %495, %481, %cst_147 {dimension_numbers = #tpu.dot_dimension_numbers<[1], [0], [0], [1], [0, 0, 1, 1], [], []>} : vector<8x128xbf16>, vector<128x8xbf16>, vector<8x8xf32> -> vector<8x8xf32>
    %497 = arith.truncf %496 : vector<8x8xf32> to vector<8x8xbf16>
    %498 = vector.extract_strided_slice %308 {offsets = [8, 0], sizes = [8, 32], strides = [1, 1]} : vector<32x32xbf16> to vector<8x32xbf16>
    %cst_148 = arith.constant dense<0.000000e+00> : vector<8x32xf32>
    %499 = tpu.matmul %497, %498, %cst_148 {dimension_numbers = #tpu.dot_dimension_numbers<[1], [0], [0], [1], [0, 0, 1, 1], [], []>} : vector<8x8xbf16>, vector<8x32xbf16>, vector<8x32xf32> -> vector<8x32xf32>
    %500 = arith.addf %478, %499 : vector<8x32xf32>
    %501 = vector.extract_strided_slice %442 {offsets = [0, 16], sizes = [8, 8], strides = [1, 1]} : vector<8x32xbf16> to vector<8x8xbf16>
    %502 = vector.extract_strided_slice %452 {offsets = [0, 16], sizes = [128, 8], strides = [1, 1]} : vector<128x32xbf16> to vector<128x8xbf16>
    %503 = vector.extract_strided_slice %456 {offsets = [0, 16], sizes = [128, 8], strides = [1, 1]} : vector<128x32xbf16> to vector<128x8xbf16>
    %cst_149 = arith.constant dense<0.000000e+00> : vector<8x128xf32>
    %504 = tpu.matmul %501, %502, %cst_149 {dimension_numbers = #tpu.dot_dimension_numbers<[1], [1], [0], [0], [0, 0, 1, 0], [], []>} : vector<8x8xbf16>, vector<128x8xbf16>, vector<8x128xf32> -> vector<8x128xf32>
    %cst_150 = arith.constant 0.353553385 : f32
    %505 = vector.broadcast %cst_150 : f32 to vector<8x128xf32>
    %506 = arith.mulf %504, %505 : vector<8x128xf32>
    %cst_151 = arith.constant dense<0xFF800000> : vector<8xf32>
    %507 = vector.multi_reduction <maximumf>, %506, %cst_151 [1] : vector<8x128xf32> to vector<8xf32>
    %508 = vector.shape_cast %507 : vector<8xf32> to vector<8x1xf32>
    %509 = vector.broadcast %508 : vector<8x1xf32> to vector<8x128xf32>
    %510 = arith.subf %506, %509 : vector<8x128xf32>
    %511 = math.exp %510 : vector<8x128xf32>
    %cst_152 = arith.constant dense<0.000000e+00> : vector<8xf32>
    %512 = vector.multi_reduction <add>, %511, %cst_152 [1] : vector<8x128xf32> to vector<8xf32>
    %513 = vector.shape_cast %512 : vector<8xf32> to vector<8x1xf32>
    %514 = tpu.reciprocal %513 {approx = true} : vector<8x1xf32> -> vector<8x1xf32>
    %515 = vector.broadcast %514 : vector<8x1xf32> to vector<8x128xf32>
    %516 = arith.mulf %511, %515 : vector<8x128xf32>
    %517 = arith.truncf %516 : vector<8x128xf32> to vector<8x128xbf16>
    %cst_153 = arith.constant dense<0.000000e+00> : vector<8x8xf32>
    %518 = tpu.matmul %517, %503, %cst_153 {dimension_numbers = #tpu.dot_dimension_numbers<[1], [0], [0], [1], [0, 0, 1, 1], [], []>} : vector<8x128xbf16>, vector<128x8xbf16>, vector<8x8xf32> -> vector<8x8xf32>
    %519 = arith.truncf %518 : vector<8x8xf32> to vector<8x8xbf16>
    %520 = vector.extract_strided_slice %308 {offsets = [16, 0], sizes = [8, 32], strides = [1, 1]} : vector<32x32xbf16> to vector<8x32xbf16>
    %cst_154 = arith.constant dense<0.000000e+00> : vector<8x32xf32>
    %521 = tpu.matmul %519, %520, %cst_154 {dimension_numbers = #tpu.dot_dimension_numbers<[1], [0], [0], [1], [0, 0, 1, 1], [], []>} : vector<8x8xbf16>, vector<8x32xbf16>, vector<8x32xf32> -> vector<8x32xf32>
    %522 = arith.addf %500, %521 : vector<8x32xf32>
    %523 = vector.extract_strided_slice %442 {offsets = [0, 24], sizes = [8, 8], strides = [1, 1]} : vector<8x32xbf16> to vector<8x8xbf16>
    %524 = vector.extract_strided_slice %452 {offsets = [0, 24], sizes = [128, 8], strides = [1, 1]} : vector<128x32xbf16> to vector<128x8xbf16>
    %525 = vector.extract_strided_slice %456 {offsets = [0, 24], sizes = [128, 8], strides = [1, 1]} : vector<128x32xbf16> to vector<128x8xbf16>
    %cst_155 = arith.constant dense<0.000000e+00> : vector<8x128xf32>
    %526 = tpu.matmul %523, %524, %cst_155 {dimension_numbers = #tpu.dot_dimension_numbers<[1], [1], [0], [0], [0, 0, 1, 0], [], []>} : vector<8x8xbf16>, vector<128x8xbf16>, vector<8x128xf32> -> vector<8x128xf32>
    %cst_156 = arith.constant 0.353553385 : f32
    %527 = vector.broadcast %cst_156 : f32 to vector<8x128xf32>
    %528 = arith.mulf %526, %527 : vector<8x128xf32>
    %cst_157 = arith.constant dense<0xFF800000> : vector<8xf32>
    %529 = vector.multi_reduction <maximumf>, %528, %cst_157 [1] : vector<8x128xf32> to vector<8xf32>
    %530 = vector.shape_cast %529 : vector<8xf32> to vector<8x1xf32>
    %531 = vector.broadcast %530 : vector<8x1xf32> to vector<8x128xf32>
    %532 = arith.subf %528, %531 : vector<8x128xf32>
    %533 = math.exp %532 : vector<8x128xf32>
    %cst_158 = arith.constant dense<0.000000e+00> : vector<8xf32>
    %534 = vector.multi_reduction <add>, %533, %cst_158 [1] : vector<8x128xf32> to vector<8xf32>
    %535 = vector.shape_cast %534 : vector<8xf32> to vector<8x1xf32>
    %536 = tpu.reciprocal %535 {approx = true} : vector<8x1xf32> -> vector<8x1xf32>
    %537 = vector.broadcast %536 : vector<8x1xf32> to vector<8x128xf32>
    %538 = arith.mulf %533, %537 : vector<8x128xf32>
    %539 = arith.truncf %538 : vector<8x128xf32> to vector<8x128xbf16>
    %cst_159 = arith.constant dense<0.000000e+00> : vector<8x8xf32>
    %540 = tpu.matmul %539, %525, %cst_159 {dimension_numbers = #tpu.dot_dimension_numbers<[1], [0], [0], [1], [0, 0, 1, 1], [], []>} : vector<8x128xbf16>, vector<128x8xbf16>, vector<8x8xf32> -> vector<8x8xf32>
    %541 = arith.truncf %540 : vector<8x8xf32> to vector<8x8xbf16>
    %542 = vector.extract_strided_slice %308 {offsets = [24, 0], sizes = [8, 32], strides = [1, 1]} : vector<32x32xbf16> to vector<8x32xbf16>
    %cst_160 = arith.constant dense<0.000000e+00> : vector<8x32xf32>
    %543 = tpu.matmul %541, %542, %cst_160 {dimension_numbers = #tpu.dot_dimension_numbers<[1], [0], [0], [1], [0, 0, 1, 1], [], []>} : vector<8x8xbf16>, vector<8x32xbf16>, vector<8x32xf32> -> vector<8x32xf32>
    %544 = arith.addf %522, %543 : vector<8x32xf32>
    %cst_161 = arith.constant dense<0.000000e+00> : vector<8xf32>
    %545 = vector.multi_reduction <add>, %544, %cst_161 [1] : vector<8x32xf32> to vector<8xf32>
    %546 = vector.shape_cast %545 : vector<8xf32> to vector<8x1xf32>
    %cst_162 = arith.constant 3.200000e+01 : f32
    %547 = vector.broadcast %cst_162 : f32 to vector<8x1xf32>
    %548 = arith.divf %546, %547 : vector<8x1xf32>
    %549 = vector.broadcast %548 : vector<8x1xf32> to vector<8x32xf32>
    %550 = arith.subf %544, %549 : vector<8x32xf32>
    %551 = arith.mulf %550, %550 : vector<8x32xf32>
    %cst_163 = arith.constant dense<0.000000e+00> : vector<8xf32>
    %552 = vector.multi_reduction <add>, %551, %cst_163 [1] : vector<8x32xf32> to vector<8xf32>
    %553 = vector.shape_cast %552 : vector<8xf32> to vector<8x1xf32>
    %cst_164 = arith.constant 3.200000e+01 : f32
    %554 = vector.broadcast %cst_164 : f32 to vector<8x1xf32>
    %555 = arith.divf %553, %554 : vector<8x1xf32>
    %556 = vector.broadcast %548 : vector<8x1xf32> to vector<8x32xf32>
    %557 = arith.subf %544, %556 : vector<8x32xf32>
    %cst_165 = arith.constant 9.99999974E-6 : f32
    %558 = vector.broadcast %cst_165 : f32 to vector<8x1xf32>
    %559 = arith.addf %555, %558 : vector<8x1xf32>
    %560 = math.rsqrt %559 : vector<8x1xf32>
    %561 = vector.broadcast %560 : vector<8x1xf32> to vector<8x32xf32>
    %562 = arith.mulf %557, %561 : vector<8x32xf32>
    %563 = vector.broadcast %303 : vector<1x32xf32> to vector<8x32xf32>
    %564 = arith.mulf %562, %563 : vector<8x32xf32>
    %565 = vector.broadcast %304 : vector<1x32xf32> to vector<8x32xf32>
    %566 = arith.addf %564, %565 : vector<8x32xf32>
    %c2 = arith.constant 2 : index
    %c0_166 = arith.constant 0 : index
    %c0_167 = arith.constant 0 : index
    %567 = vector.load %arg5[%c2, %c0_166, %c0_167] : memref<3x6x32xf32, #tpu.memory_space<vmem>>, vector<1x6x32xf32>
    %568 = vector.shape_cast %567 : vector<1x6x32xf32> to vector<6x32xf32>
    %569 = vector.extract_strided_slice %568 {offsets = [0, 0], sizes = [1, 32], strides = [1, 1]} : vector<6x32xf32> to vector<1x32xf32>
    %570 = vector.extract_strided_slice %568 {offsets = [1, 0], sizes = [1, 32], strides = [1, 1]} : vector<6x32xf32> to vector<1x32xf32>
    %571 = vector.extract_strided_slice %568 {offsets = [2, 0], sizes = [1, 32], strides = [1, 1]} : vector<6x32xf32> to vector<1x32xf32>
    %572 = vector.extract_strided_slice %568 {offsets = [3, 0], sizes = [1, 32], strides = [1, 1]} : vector<6x32xf32> to vector<1x32xf32>
    %573 = vector.extract_strided_slice %568 {offsets = [4, 0], sizes = [1, 32], strides = [1, 1]} : vector<6x32xf32> to vector<1x32xf32>
    %574 = vector.extract_strided_slice %568 {offsets = [5, 0], sizes = [1, 32], strides = [1, 1]} : vector<6x32xf32> to vector<1x32xf32>
    %c2_168 = arith.constant 2 : index
    %c0_169 = arith.constant 0 : index
    %c0_170 = arith.constant 0 : index
    %575 = vector.load %arg3[%c2_168, %c0_169, %c0_170] : memref<3x32x64xbf16, #tpu.memory_space<vmem>>, vector<1x32x64xbf16>
    %576 = vector.shape_cast %575 : vector<1x32x64xbf16> to vector<32x64xbf16>
    %c2_171 = arith.constant 2 : index
    %c0_172 = arith.constant 0 : index
    %c0_173 = arith.constant 0 : index
    %577 = vector.load %arg4[%c2_171, %c0_172, %c0_173] : memref<3x32x32xbf16, #tpu.memory_space<vmem>>, vector<1x32x32xbf16>
    %578 = vector.shape_cast %577 : vector<1x32x32xbf16> to vector<32x32xbf16>
    %579 = vector.extract_strided_slice %2 {offsets = [0, 0], sizes = [8, 195], strides = [1, 1]} : vector<16x195xf32> to vector<8x195xf32>
    %580 = vector.extract_strided_slice %579 {offsets = [0, 64], sizes = [8, 32], strides = [1, 1]} : vector<8x195xf32> to vector<8x32xf32>
    %581 = vector.broadcast %569 : vector<1x32xf32> to vector<8x32xf32>
    %582 = arith.addf %580, %581 : vector<8x32xf32>
    %583 = arith.truncf %582 : vector<8x32xf32> to vector<8x32xbf16>
    %584 = vector.extract_strided_slice %579 {offsets = [0, 160], sizes = [8, 32], strides = [1, 1]} : vector<8x195xf32> to vector<8x32xf32>
    %585 = vector.broadcast %572 : vector<1x32xf32> to vector<8x32xf32>
    %586 = arith.addf %584, %585 : vector<8x32xf32>
    %c2_174 = arith.constant 2 : index
    %c0_175 = arith.constant 0 : index
    %c0_176 = arith.constant 0 : index
    %c0_177 = arith.constant 0 : index
    %587 = vector.load %arg1[%c2_174, %c0_175, %c0_176, %c0_177] : memref<3x2x128x32xbf16, #tpu.memory_space<vmem>>, vector<1x1x128x32xbf16>
    %588 = vector.shape_cast %587 : vector<1x1x128x32xbf16> to vector<128x32xbf16>
    %cst_178 = arith.constant dense<0.000000e+00> : vector<128x64xf32>
    %589 = tpu.matmul %588, %576, %cst_178 {dimension_numbers = #tpu.dot_dimension_numbers<[1], [0], [0], [1], [0, 0, 1, 1], [], []>} : vector<128x32xbf16>, vector<32x64xbf16>, vector<128x64xf32> -> vector<128x64xf32>
    %590 = vector.extract_strided_slice %589 {offsets = [0, 0], sizes = [128, 32], strides = [1, 1]} : vector<128x64xf32> to vector<128x32xf32>
    %591 = vector.broadcast %570 : vector<1x32xf32> to vector<128x32xf32>
    %592 = arith.addf %590, %591 : vector<128x32xf32>
    %593 = arith.truncf %592 : vector<128x32xf32> to vector<128x32xbf16>
    %594 = vector.extract_strided_slice %589 {offsets = [0, 32], sizes = [128, 32], strides = [1, 1]} : vector<128x64xf32> to vector<128x32xf32>
    %595 = vector.broadcast %571 : vector<1x32xf32> to vector<128x32xf32>
    %596 = arith.addf %594, %595 : vector<128x32xf32>
    %597 = arith.truncf %596 : vector<128x32xf32> to vector<128x32xbf16>
    %598 = vector.extract_strided_slice %583 {offsets = [0, 0], sizes = [8, 8], strides = [1, 1]} : vector<8x32xbf16> to vector<8x8xbf16>
    %599 = vector.extract_strided_slice %593 {offsets = [0, 0], sizes = [128, 8], strides = [1, 1]} : vector<128x32xbf16> to vector<128x8xbf16>
    %600 = vector.extract_strided_slice %597 {offsets = [0, 0], sizes = [128, 8], strides = [1, 1]} : vector<128x32xbf16> to vector<128x8xbf16>
    %cst_179 = arith.constant dense<0.000000e+00> : vector<8x128xf32>
    %601 = tpu.matmul %598, %599, %cst_179 {dimension_numbers = #tpu.dot_dimension_numbers<[1], [1], [0], [0], [0, 0, 1, 0], [], []>} : vector<8x8xbf16>, vector<128x8xbf16>, vector<8x128xf32> -> vector<8x128xf32>
    %cst_180 = arith.constant 0.353553385 : f32
    %602 = vector.broadcast %cst_180 : f32 to vector<8x128xf32>
    %603 = arith.mulf %601, %602 : vector<8x128xf32>
    %cst_181 = arith.constant dense<0xFF800000> : vector<8xf32>
    %604 = vector.multi_reduction <maximumf>, %603, %cst_181 [1] : vector<8x128xf32> to vector<8xf32>
    %605 = vector.shape_cast %604 : vector<8xf32> to vector<8x1xf32>
    %606 = vector.broadcast %605 : vector<8x1xf32> to vector<8x128xf32>
    %607 = arith.subf %603, %606 : vector<8x128xf32>
    %608 = math.exp %607 : vector<8x128xf32>
    %cst_182 = arith.constant dense<0.000000e+00> : vector<8xf32>
    %609 = vector.multi_reduction <add>, %608, %cst_182 [1] : vector<8x128xf32> to vector<8xf32>
    %610 = vector.shape_cast %609 : vector<8xf32> to vector<8x1xf32>
    %611 = tpu.reciprocal %610 {approx = true} : vector<8x1xf32> -> vector<8x1xf32>
    %612 = vector.broadcast %611 : vector<8x1xf32> to vector<8x128xf32>
    %613 = arith.mulf %608, %612 : vector<8x128xf32>
    %614 = arith.truncf %613 : vector<8x128xf32> to vector<8x128xbf16>
    %cst_183 = arith.constant dense<0.000000e+00> : vector<8x8xf32>
    %615 = tpu.matmul %614, %600, %cst_183 {dimension_numbers = #tpu.dot_dimension_numbers<[1], [0], [0], [1], [0, 0, 1, 1], [], []>} : vector<8x128xbf16>, vector<128x8xbf16>, vector<8x8xf32> -> vector<8x8xf32>
    %616 = arith.truncf %615 : vector<8x8xf32> to vector<8x8xbf16>
    %617 = vector.extract_strided_slice %578 {offsets = [0, 0], sizes = [8, 32], strides = [1, 1]} : vector<32x32xbf16> to vector<8x32xbf16>
    %cst_184 = arith.constant dense<0.000000e+00> : vector<8x32xf32>
    %618 = tpu.matmul %616, %617, %cst_184 {dimension_numbers = #tpu.dot_dimension_numbers<[1], [0], [0], [1], [0, 0, 1, 1], [], []>} : vector<8x8xbf16>, vector<8x32xbf16>, vector<8x32xf32> -> vector<8x32xf32>
    %619 = arith.addf %586, %618 : vector<8x32xf32>
    %620 = vector.extract_strided_slice %583 {offsets = [0, 8], sizes = [8, 8], strides = [1, 1]} : vector<8x32xbf16> to vector<8x8xbf16>
    %621 = vector.extract_strided_slice %593 {offsets = [0, 8], sizes = [128, 8], strides = [1, 1]} : vector<128x32xbf16> to vector<128x8xbf16>
    %622 = vector.extract_strided_slice %597 {offsets = [0, 8], sizes = [128, 8], strides = [1, 1]} : vector<128x32xbf16> to vector<128x8xbf16>
    %cst_185 = arith.constant dense<0.000000e+00> : vector<8x128xf32>
    %623 = tpu.matmul %620, %621, %cst_185 {dimension_numbers = #tpu.dot_dimension_numbers<[1], [1], [0], [0], [0, 0, 1, 0], [], []>} : vector<8x8xbf16>, vector<128x8xbf16>, vector<8x128xf32> -> vector<8x128xf32>
    %cst_186 = arith.constant 0.353553385 : f32
    %624 = vector.broadcast %cst_186 : f32 to vector<8x128xf32>
    %625 = arith.mulf %623, %624 : vector<8x128xf32>
    %cst_187 = arith.constant dense<0xFF800000> : vector<8xf32>
    %626 = vector.multi_reduction <maximumf>, %625, %cst_187 [1] : vector<8x128xf32> to vector<8xf32>
    %627 = vector.shape_cast %626 : vector<8xf32> to vector<8x1xf32>
    %628 = vector.broadcast %627 : vector<8x1xf32> to vector<8x128xf32>
    %629 = arith.subf %625, %628 : vector<8x128xf32>
    %630 = math.exp %629 : vector<8x128xf32>
    %cst_188 = arith.constant dense<0.000000e+00> : vector<8xf32>
    %631 = vector.multi_reduction <add>, %630, %cst_188 [1] : vector<8x128xf32> to vector<8xf32>
    %632 = vector.shape_cast %631 : vector<8xf32> to vector<8x1xf32>
    %633 = tpu.reciprocal %632 {approx = true} : vector<8x1xf32> -> vector<8x1xf32>
    %634 = vector.broadcast %633 : vector<8x1xf32> to vector<8x128xf32>
    %635 = arith.mulf %630, %634 : vector<8x128xf32>
    %636 = arith.truncf %635 : vector<8x128xf32> to vector<8x128xbf16>
    %cst_189 = arith.constant dense<0.000000e+00> : vector<8x8xf32>
    %637 = tpu.matmul %636, %622, %cst_189 {dimension_numbers = #tpu.dot_dimension_numbers<[1], [0], [0], [1], [0, 0, 1, 1], [], []>} : vector<8x128xbf16>, vector<128x8xbf16>, vector<8x8xf32> -> vector<8x8xf32>
    %638 = arith.truncf %637 : vector<8x8xf32> to vector<8x8xbf16>
    %639 = vector.extract_strided_slice %578 {offsets = [8, 0], sizes = [8, 32], strides = [1, 1]} : vector<32x32xbf16> to vector<8x32xbf16>
    %cst_190 = arith.constant dense<0.000000e+00> : vector<8x32xf32>
    %640 = tpu.matmul %638, %639, %cst_190 {dimension_numbers = #tpu.dot_dimension_numbers<[1], [0], [0], [1], [0, 0, 1, 1], [], []>} : vector<8x8xbf16>, vector<8x32xbf16>, vector<8x32xf32> -> vector<8x32xf32>
    %641 = arith.addf %619, %640 : vector<8x32xf32>
    %642 = vector.extract_strided_slice %583 {offsets = [0, 16], sizes = [8, 8], strides = [1, 1]} : vector<8x32xbf16> to vector<8x8xbf16>
    %643 = vector.extract_strided_slice %593 {offsets = [0, 16], sizes = [128, 8], strides = [1, 1]} : vector<128x32xbf16> to vector<128x8xbf16>
    %644 = vector.extract_strided_slice %597 {offsets = [0, 16], sizes = [128, 8], strides = [1, 1]} : vector<128x32xbf16> to vector<128x8xbf16>
    %cst_191 = arith.constant dense<0.000000e+00> : vector<8x128xf32>
    %645 = tpu.matmul %642, %643, %cst_191 {dimension_numbers = #tpu.dot_dimension_numbers<[1], [1], [0], [0], [0, 0, 1, 0], [], []>} : vector<8x8xbf16>, vector<128x8xbf16>, vector<8x128xf32> -> vector<8x128xf32>
    %cst_192 = arith.constant 0.353553385 : f32
    %646 = vector.broadcast %cst_192 : f32 to vector<8x128xf32>
    %647 = arith.mulf %645, %646 : vector<8x128xf32>
    %cst_193 = arith.constant dense<0xFF800000> : vector<8xf32>
    %648 = vector.multi_reduction <maximumf>, %647, %cst_193 [1] : vector<8x128xf32> to vector<8xf32>
    %649 = vector.shape_cast %648 : vector<8xf32> to vector<8x1xf32>
    %650 = vector.broadcast %649 : vector<8x1xf32> to vector<8x128xf32>
    %651 = arith.subf %647, %650 : vector<8x128xf32>
    %652 = math.exp %651 : vector<8x128xf32>
    %cst_194 = arith.constant dense<0.000000e+00> : vector<8xf32>
    %653 = vector.multi_reduction <add>, %652, %cst_194 [1] : vector<8x128xf32> to vector<8xf32>
    %654 = vector.shape_cast %653 : vector<8xf32> to vector<8x1xf32>
    %655 = tpu.reciprocal %654 {approx = true} : vector<8x1xf32> -> vector<8x1xf32>
    %656 = vector.broadcast %655 : vector<8x1xf32> to vector<8x128xf32>
    %657 = arith.mulf %652, %656 : vector<8x128xf32>
    %658 = arith.truncf %657 : vector<8x128xf32> to vector<8x128xbf16>
    %cst_195 = arith.constant dense<0.000000e+00> : vector<8x8xf32>
    %659 = tpu.matmul %658, %644, %cst_195 {dimension_numbers = #tpu.dot_dimension_numbers<[1], [0], [0], [1], [0, 0, 1, 1], [], []>} : vector<8x128xbf16>, vector<128x8xbf16>, vector<8x8xf32> -> vector<8x8xf32>
    %660 = arith.truncf %659 : vector<8x8xf32> to vector<8x8xbf16>
    %661 = vector.extract_strided_slice %578 {offsets = [16, 0], sizes = [8, 32], strides = [1, 1]} : vector<32x32xbf16> to vector<8x32xbf16>
    %cst_196 = arith.constant dense<0.000000e+00> : vector<8x32xf32>
    %662 = tpu.matmul %660, %661, %cst_196 {dimension_numbers = #tpu.dot_dimension_numbers<[1], [0], [0], [1], [0, 0, 1, 1], [], []>} : vector<8x8xbf16>, vector<8x32xbf16>, vector<8x32xf32> -> vector<8x32xf32>
    %663 = arith.addf %641, %662 : vector<8x32xf32>
    %664 = vector.extract_strided_slice %583 {offsets = [0, 24], sizes = [8, 8], strides = [1, 1]} : vector<8x32xbf16> to vector<8x8xbf16>
    %665 = vector.extract_strided_slice %593 {offsets = [0, 24], sizes = [128, 8], strides = [1, 1]} : vector<128x32xbf16> to vector<128x8xbf16>
    %666 = vector.extract_strided_slice %597 {offsets = [0, 24], sizes = [128, 8], strides = [1, 1]} : vector<128x32xbf16> to vector<128x8xbf16>
    %cst_197 = arith.constant dense<0.000000e+00> : vector<8x128xf32>
    %667 = tpu.matmul %664, %665, %cst_197 {dimension_numbers = #tpu.dot_dimension_numbers<[1], [1], [0], [0], [0, 0, 1, 0], [], []>} : vector<8x8xbf16>, vector<128x8xbf16>, vector<8x128xf32> -> vector<8x128xf32>
    %cst_198 = arith.constant 0.353553385 : f32
    %668 = vector.broadcast %cst_198 : f32 to vector<8x128xf32>
    %669 = arith.mulf %667, %668 : vector<8x128xf32>
    %cst_199 = arith.constant dense<0xFF800000> : vector<8xf32>
    %670 = vector.multi_reduction <maximumf>, %669, %cst_199 [1] : vector<8x128xf32> to vector<8xf32>
    %671 = vector.shape_cast %670 : vector<8xf32> to vector<8x1xf32>
    %672 = vector.broadcast %671 : vector<8x1xf32> to vector<8x128xf32>
    %673 = arith.subf %669, %672 : vector<8x128xf32>
    %674 = math.exp %673 : vector<8x128xf32>
    %cst_200 = arith.constant dense<0.000000e+00> : vector<8xf32>
    %675 = vector.multi_reduction <add>, %674, %cst_200 [1] : vector<8x128xf32> to vector<8xf32>
    %676 = vector.shape_cast %675 : vector<8xf32> to vector<8x1xf32>
    %677 = tpu.reciprocal %676 {approx = true} : vector<8x1xf32> -> vector<8x1xf32>
    %678 = vector.broadcast %677 : vector<8x1xf32> to vector<8x128xf32>
    %679 = arith.mulf %674, %678 : vector<8x128xf32>
    %680 = arith.truncf %679 : vector<8x128xf32> to vector<8x128xbf16>
    %cst_201 = arith.constant dense<0.000000e+00> : vector<8x8xf32>
    %681 = tpu.matmul %680, %666, %cst_201 {dimension_numbers = #tpu.dot_dimension_numbers<[1], [0], [0], [1], [0, 0, 1, 1], [], []>} : vector<8x128xbf16>, vector<128x8xbf16>, vector<8x8xf32> -> vector<8x8xf32>
    %682 = arith.truncf %681 : vector<8x8xf32> to vector<8x8xbf16>
    %683 = vector.extract_strided_slice %578 {offsets = [24, 0], sizes = [8, 32], strides = [1, 1]} : vector<32x32xbf16> to vector<8x32xbf16>
    %cst_202 = arith.constant dense<0.000000e+00> : vector<8x32xf32>
    %684 = tpu.matmul %682, %683, %cst_202 {dimension_numbers = #tpu.dot_dimension_numbers<[1], [0], [0], [1], [0, 0, 1, 1], [], []>} : vector<8x8xbf16>, vector<8x32xbf16>, vector<8x32xf32> -> vector<8x32xf32>
    %685 = arith.addf %663, %684 : vector<8x32xf32>
    %cst_203 = arith.constant dense<0.000000e+00> : vector<8xf32>
    %686 = vector.multi_reduction <add>, %685, %cst_203 [1] : vector<8x32xf32> to vector<8xf32>
    %687 = vector.shape_cast %686 : vector<8xf32> to vector<8x1xf32>
    %cst_204 = arith.constant 3.200000e+01 : f32
    %688 = vector.broadcast %cst_204 : f32 to vector<8x1xf32>
    %689 = arith.divf %687, %688 : vector<8x1xf32>
    %690 = vector.broadcast %689 : vector<8x1xf32> to vector<8x32xf32>
    %691 = arith.subf %685, %690 : vector<8x32xf32>
    %692 = arith.mulf %691, %691 : vector<8x32xf32>
    %cst_205 = arith.constant dense<0.000000e+00> : vector<8xf32>
    %693 = vector.multi_reduction <add>, %692, %cst_205 [1] : vector<8x32xf32> to vector<8xf32>
    %694 = vector.shape_cast %693 : vector<8xf32> to vector<8x1xf32>
    %cst_206 = arith.constant 3.200000e+01 : f32
    %695 = vector.broadcast %cst_206 : f32 to vector<8x1xf32>
    %696 = arith.divf %694, %695 : vector<8x1xf32>
    %697 = vector.broadcast %689 : vector<8x1xf32> to vector<8x32xf32>
    %698 = arith.subf %685, %697 : vector<8x32xf32>
    %cst_207 = arith.constant 9.99999974E-6 : f32
    %699 = vector.broadcast %cst_207 : f32 to vector<8x1xf32>
    %700 = arith.addf %696, %699 : vector<8x1xf32>
    %701 = math.rsqrt %700 : vector<8x1xf32>
    %702 = vector.broadcast %701 : vector<8x1xf32> to vector<8x32xf32>
    %703 = arith.mulf %698, %702 : vector<8x32xf32>
    %704 = vector.broadcast %573 : vector<1x32xf32> to vector<8x32xf32>
    %705 = arith.mulf %703, %704 : vector<8x32xf32>
    %706 = vector.broadcast %574 : vector<1x32xf32> to vector<8x32xf32>
    %707 = arith.addf %705, %706 : vector<8x32xf32>
    %708 = vector.extract_strided_slice %2 {offsets = [8, 0], sizes = [8, 195], strides = [1, 1]} : vector<16x195xf32> to vector<8x195xf32>
    %709 = vector.extract_strided_slice %708 {offsets = [0, 64], sizes = [8, 32], strides = [1, 1]} : vector<8x195xf32> to vector<8x32xf32>
    %710 = vector.broadcast %569 : vector<1x32xf32> to vector<8x32xf32>
    %711 = arith.addf %709, %710 : vector<8x32xf32>
    %712 = arith.truncf %711 : vector<8x32xf32> to vector<8x32xbf16>
    %713 = vector.extract_strided_slice %708 {offsets = [0, 160], sizes = [8, 32], strides = [1, 1]} : vector<8x195xf32> to vector<8x32xf32>
    %714 = vector.broadcast %572 : vector<1x32xf32> to vector<8x32xf32>
    %715 = arith.addf %713, %714 : vector<8x32xf32>
    %c2_208 = arith.constant 2 : index
    %c1_209 = arith.constant 1 : index
    %c0_210 = arith.constant 0 : index
    %c0_211 = arith.constant 0 : index
    %716 = vector.load %arg1[%c2_208, %c1_209, %c0_210, %c0_211] : memref<3x2x128x32xbf16, #tpu.memory_space<vmem>>, vector<1x1x128x32xbf16>
    %717 = vector.shape_cast %716 : vector<1x1x128x32xbf16> to vector<128x32xbf16>
    %cst_212 = arith.constant dense<0.000000e+00> : vector<128x64xf32>
    %718 = tpu.matmul %717, %576, %cst_212 {dimension_numbers = #tpu.dot_dimension_numbers<[1], [0], [0], [1], [0, 0, 1, 1], [], []>} : vector<128x32xbf16>, vector<32x64xbf16>, vector<128x64xf32> -> vector<128x64xf32>
    %719 = vector.extract_strided_slice %718 {offsets = [0, 0], sizes = [128, 32], strides = [1, 1]} : vector<128x64xf32> to vector<128x32xf32>
    %720 = vector.broadcast %570 : vector<1x32xf32> to vector<128x32xf32>
    %721 = arith.addf %719, %720 : vector<128x32xf32>
    %722 = arith.truncf %721 : vector<128x32xf32> to vector<128x32xbf16>
    %723 = vector.extract_strided_slice %718 {offsets = [0, 32], sizes = [128, 32], strides = [1, 1]} : vector<128x64xf32> to vector<128x32xf32>
    %724 = vector.broadcast %571 : vector<1x32xf32> to vector<128x32xf32>
    %725 = arith.addf %723, %724 : vector<128x32xf32>
    %726 = arith.truncf %725 : vector<128x32xf32> to vector<128x32xbf16>
    %727 = vector.extract_strided_slice %712 {offsets = [0, 0], sizes = [8, 8], strides = [1, 1]} : vector<8x32xbf16> to vector<8x8xbf16>
    %728 = vector.extract_strided_slice %722 {offsets = [0, 0], sizes = [128, 8], strides = [1, 1]} : vector<128x32xbf16> to vector<128x8xbf16>
    %729 = vector.extract_strided_slice %726 {offsets = [0, 0], sizes = [128, 8], strides = [1, 1]} : vector<128x32xbf16> to vector<128x8xbf16>
    %cst_213 = arith.constant dense<0.000000e+00> : vector<8x128xf32>
    %730 = tpu.matmul %727, %728, %cst_213 {dimension_numbers = #tpu.dot_dimension_numbers<[1], [1], [0], [0], [0, 0, 1, 0], [], []>} : vector<8x8xbf16>, vector<128x8xbf16>, vector<8x128xf32> -> vector<8x128xf32>
    %cst_214 = arith.constant 0.353553385 : f32
    %731 = vector.broadcast %cst_214 : f32 to vector<8x128xf32>
    %732 = arith.mulf %730, %731 : vector<8x128xf32>
    %cst_215 = arith.constant dense<0xFF800000> : vector<8xf32>
    %733 = vector.multi_reduction <maximumf>, %732, %cst_215 [1] : vector<8x128xf32> to vector<8xf32>
    %734 = vector.shape_cast %733 : vector<8xf32> to vector<8x1xf32>
    %735 = vector.broadcast %734 : vector<8x1xf32> to vector<8x128xf32>
    %736 = arith.subf %732, %735 : vector<8x128xf32>
    %737 = math.exp %736 : vector<8x128xf32>
    %cst_216 = arith.constant dense<0.000000e+00> : vector<8xf32>
    %738 = vector.multi_reduction <add>, %737, %cst_216 [1] : vector<8x128xf32> to vector<8xf32>
    %739 = vector.shape_cast %738 : vector<8xf32> to vector<8x1xf32>
    %740 = tpu.reciprocal %739 {approx = true} : vector<8x1xf32> -> vector<8x1xf32>
    %741 = vector.broadcast %740 : vector<8x1xf32> to vector<8x128xf32>
    %742 = arith.mulf %737, %741 : vector<8x128xf32>
    %743 = arith.truncf %742 : vector<8x128xf32> to vector<8x128xbf16>
    %cst_217 = arith.constant dense<0.000000e+00> : vector<8x8xf32>
    %744 = tpu.matmul %743, %729, %cst_217 {dimension_numbers = #tpu.dot_dimension_numbers<[1], [0], [0], [1], [0, 0, 1, 1], [], []>} : vector<8x128xbf16>, vector<128x8xbf16>, vector<8x8xf32> -> vector<8x8xf32>
    %745 = arith.truncf %744 : vector<8x8xf32> to vector<8x8xbf16>
    %746 = vector.extract_strided_slice %578 {offsets = [0, 0], sizes = [8, 32], strides = [1, 1]} : vector<32x32xbf16> to vector<8x32xbf16>
    %cst_218 = arith.constant dense<0.000000e+00> : vector<8x32xf32>
    %747 = tpu.matmul %745, %746, %cst_218 {dimension_numbers = #tpu.dot_dimension_numbers<[1], [0], [0], [1], [0, 0, 1, 1], [], []>} : vector<8x8xbf16>, vector<8x32xbf16>, vector<8x32xf32> -> vector<8x32xf32>
    %748 = arith.addf %715, %747 : vector<8x32xf32>
    %749 = vector.extract_strided_slice %712 {offsets = [0, 8], sizes = [8, 8], strides = [1, 1]} : vector<8x32xbf16> to vector<8x8xbf16>
    %750 = vector.extract_strided_slice %722 {offsets = [0, 8], sizes = [128, 8], strides = [1, 1]} : vector<128x32xbf16> to vector<128x8xbf16>
    %751 = vector.extract_strided_slice %726 {offsets = [0, 8], sizes = [128, 8], strides = [1, 1]} : vector<128x32xbf16> to vector<128x8xbf16>
    %cst_219 = arith.constant dense<0.000000e+00> : vector<8x128xf32>
    %752 = tpu.matmul %749, %750, %cst_219 {dimension_numbers = #tpu.dot_dimension_numbers<[1], [1], [0], [0], [0, 0, 1, 0], [], []>} : vector<8x8xbf16>, vector<128x8xbf16>, vector<8x128xf32> -> vector<8x128xf32>
    %cst_220 = arith.constant 0.353553385 : f32
    %753 = vector.broadcast %cst_220 : f32 to vector<8x128xf32>
    %754 = arith.mulf %752, %753 : vector<8x128xf32>
    %cst_221 = arith.constant dense<0xFF800000> : vector<8xf32>
    %755 = vector.multi_reduction <maximumf>, %754, %cst_221 [1] : vector<8x128xf32> to vector<8xf32>
    %756 = vector.shape_cast %755 : vector<8xf32> to vector<8x1xf32>
    %757 = vector.broadcast %756 : vector<8x1xf32> to vector<8x128xf32>
    %758 = arith.subf %754, %757 : vector<8x128xf32>
    %759 = math.exp %758 : vector<8x128xf32>
    %cst_222 = arith.constant dense<0.000000e+00> : vector<8xf32>
    %760 = vector.multi_reduction <add>, %759, %cst_222 [1] : vector<8x128xf32> to vector<8xf32>
    %761 = vector.shape_cast %760 : vector<8xf32> to vector<8x1xf32>
    %762 = tpu.reciprocal %761 {approx = true} : vector<8x1xf32> -> vector<8x1xf32>
    %763 = vector.broadcast %762 : vector<8x1xf32> to vector<8x128xf32>
    %764 = arith.mulf %759, %763 : vector<8x128xf32>
    %765 = arith.truncf %764 : vector<8x128xf32> to vector<8x128xbf16>
    %cst_223 = arith.constant dense<0.000000e+00> : vector<8x8xf32>
    %766 = tpu.matmul %765, %751, %cst_223 {dimension_numbers = #tpu.dot_dimension_numbers<[1], [0], [0], [1], [0, 0, 1, 1], [], []>} : vector<8x128xbf16>, vector<128x8xbf16>, vector<8x8xf32> -> vector<8x8xf32>
    %767 = arith.truncf %766 : vector<8x8xf32> to vector<8x8xbf16>
    %768 = vector.extract_strided_slice %578 {offsets = [8, 0], sizes = [8, 32], strides = [1, 1]} : vector<32x32xbf16> to vector<8x32xbf16>
    %cst_224 = arith.constant dense<0.000000e+00> : vector<8x32xf32>
    %769 = tpu.matmul %767, %768, %cst_224 {dimension_numbers = #tpu.dot_dimension_numbers<[1], [0], [0], [1], [0, 0, 1, 1], [], []>} : vector<8x8xbf16>, vector<8x32xbf16>, vector<8x32xf32> -> vector<8x32xf32>
    %770 = arith.addf %748, %769 : vector<8x32xf32>
    %771 = vector.extract_strided_slice %712 {offsets = [0, 16], sizes = [8, 8], strides = [1, 1]} : vector<8x32xbf16> to vector<8x8xbf16>
    %772 = vector.extract_strided_slice %722 {offsets = [0, 16], sizes = [128, 8], strides = [1, 1]} : vector<128x32xbf16> to vector<128x8xbf16>
    %773 = vector.extract_strided_slice %726 {offsets = [0, 16], sizes = [128, 8], strides = [1, 1]} : vector<128x32xbf16> to vector<128x8xbf16>
    %cst_225 = arith.constant dense<0.000000e+00> : vector<8x128xf32>
    %774 = tpu.matmul %771, %772, %cst_225 {dimension_numbers = #tpu.dot_dimension_numbers<[1], [1], [0], [0], [0, 0, 1, 0], [], []>} : vector<8x8xbf16>, vector<128x8xbf16>, vector<8x128xf32> -> vector<8x128xf32>
    %cst_226 = arith.constant 0.353553385 : f32
    %775 = vector.broadcast %cst_226 : f32 to vector<8x128xf32>
    %776 = arith.mulf %774, %775 : vector<8x128xf32>
    %cst_227 = arith.constant dense<0xFF800000> : vector<8xf32>
    %777 = vector.multi_reduction <maximumf>, %776, %cst_227 [1] : vector<8x128xf32> to vector<8xf32>
    %778 = vector.shape_cast %777 : vector<8xf32> to vector<8x1xf32>
    %779 = vector.broadcast %778 : vector<8x1xf32> to vector<8x128xf32>
    %780 = arith.subf %776, %779 : vector<8x128xf32>
    %781 = math.exp %780 : vector<8x128xf32>
    %cst_228 = arith.constant dense<0.000000e+00> : vector<8xf32>
    %782 = vector.multi_reduction <add>, %781, %cst_228 [1] : vector<8x128xf32> to vector<8xf32>
    %783 = vector.shape_cast %782 : vector<8xf32> to vector<8x1xf32>
    %784 = tpu.reciprocal %783 {approx = true} : vector<8x1xf32> -> vector<8x1xf32>
    %785 = vector.broadcast %784 : vector<8x1xf32> to vector<8x128xf32>
    %786 = arith.mulf %781, %785 : vector<8x128xf32>
    %787 = arith.truncf %786 : vector<8x128xf32> to vector<8x128xbf16>
    %cst_229 = arith.constant dense<0.000000e+00> : vector<8x8xf32>
    %788 = tpu.matmul %787, %773, %cst_229 {dimension_numbers = #tpu.dot_dimension_numbers<[1], [0], [0], [1], [0, 0, 1, 1], [], []>} : vector<8x128xbf16>, vector<128x8xbf16>, vector<8x8xf32> -> vector<8x8xf32>
    %789 = arith.truncf %788 : vector<8x8xf32> to vector<8x8xbf16>
    %790 = vector.extract_strided_slice %578 {offsets = [16, 0], sizes = [8, 32], strides = [1, 1]} : vector<32x32xbf16> to vector<8x32xbf16>
    %cst_230 = arith.constant dense<0.000000e+00> : vector<8x32xf32>
    %791 = tpu.matmul %789, %790, %cst_230 {dimension_numbers = #tpu.dot_dimension_numbers<[1], [0], [0], [1], [0, 0, 1, 1], [], []>} : vector<8x8xbf16>, vector<8x32xbf16>, vector<8x32xf32> -> vector<8x32xf32>
    %792 = arith.addf %770, %791 : vector<8x32xf32>
    %793 = vector.extract_strided_slice %712 {offsets = [0, 24], sizes = [8, 8], strides = [1, 1]} : vector<8x32xbf16> to vector<8x8xbf16>
    %794 = vector.extract_strided_slice %722 {offsets = [0, 24], sizes = [128, 8], strides = [1, 1]} : vector<128x32xbf16> to vector<128x8xbf16>
    %795 = vector.extract_strided_slice %726 {offsets = [0, 24], sizes = [128, 8], strides = [1, 1]} : vector<128x32xbf16> to vector<128x8xbf16>
    %cst_231 = arith.constant dense<0.000000e+00> : vector<8x128xf32>
    %796 = tpu.matmul %793, %794, %cst_231 {dimension_numbers = #tpu.dot_dimension_numbers<[1], [1], [0], [0], [0, 0, 1, 0], [], []>} : vector<8x8xbf16>, vector<128x8xbf16>, vector<8x128xf32> -> vector<8x128xf32>
    %cst_232 = arith.constant 0.353553385 : f32
    %797 = vector.broadcast %cst_232 : f32 to vector<8x128xf32>
    %798 = arith.mulf %796, %797 : vector<8x128xf32>
    %cst_233 = arith.constant dense<0xFF800000> : vector<8xf32>
    %799 = vector.multi_reduction <maximumf>, %798, %cst_233 [1] : vector<8x128xf32> to vector<8xf32>
    %800 = vector.shape_cast %799 : vector<8xf32> to vector<8x1xf32>
    %801 = vector.broadcast %800 : vector<8x1xf32> to vector<8x128xf32>
    %802 = arith.subf %798, %801 : vector<8x128xf32>
    %803 = math.exp %802 : vector<8x128xf32>
    %cst_234 = arith.constant dense<0.000000e+00> : vector<8xf32>
    %804 = vector.multi_reduction <add>, %803, %cst_234 [1] : vector<8x128xf32> to vector<8xf32>
    %805 = vector.shape_cast %804 : vector<8xf32> to vector<8x1xf32>
    %806 = tpu.reciprocal %805 {approx = true} : vector<8x1xf32> -> vector<8x1xf32>
    %807 = vector.broadcast %806 : vector<8x1xf32> to vector<8x128xf32>
    %808 = arith.mulf %803, %807 : vector<8x128xf32>
    %809 = arith.truncf %808 : vector<8x128xf32> to vector<8x128xbf16>
    %cst_235 = arith.constant dense<0.000000e+00> : vector<8x8xf32>
    %810 = tpu.matmul %809, %795, %cst_235 {dimension_numbers = #tpu.dot_dimension_numbers<[1], [0], [0], [1], [0, 0, 1, 1], [], []>} : vector<8x128xbf16>, vector<128x8xbf16>, vector<8x8xf32> -> vector<8x8xf32>
    %811 = arith.truncf %810 : vector<8x8xf32> to vector<8x8xbf16>
    %812 = vector.extract_strided_slice %578 {offsets = [24, 0], sizes = [8, 32], strides = [1, 1]} : vector<32x32xbf16> to vector<8x32xbf16>
    %cst_236 = arith.constant dense<0.000000e+00> : vector<8x32xf32>
    %813 = tpu.matmul %811, %812, %cst_236 {dimension_numbers = #tpu.dot_dimension_numbers<[1], [0], [0], [1], [0, 0, 1, 1], [], []>} : vector<8x8xbf16>, vector<8x32xbf16>, vector<8x32xf32> -> vector<8x32xf32>
    %814 = arith.addf %792, %813 : vector<8x32xf32>
    %cst_237 = arith.constant dense<0.000000e+00> : vector<8xf32>
    %815 = vector.multi_reduction <add>, %814, %cst_237 [1] : vector<8x32xf32> to vector<8xf32>
    %816 = vector.shape_cast %815 : vector<8xf32> to vector<8x1xf32>
    %cst_238 = arith.constant 3.200000e+01 : f32
    %817 = vector.broadcast %cst_238 : f32 to vector<8x1xf32>
    %818 = arith.divf %816, %817 : vector<8x1xf32>
    %819 = vector.broadcast %818 : vector<8x1xf32> to vector<8x32xf32>
    %820 = arith.subf %814, %819 : vector<8x32xf32>
    %821 = arith.mulf %820, %820 : vector<8x32xf32>
    %cst_239 = arith.constant dense<0.000000e+00> : vector<8xf32>
    %822 = vector.multi_reduction <add>, %821, %cst_239 [1] : vector<8x32xf32> to vector<8xf32>
    %823 = vector.shape_cast %822 : vector<8xf32> to vector<8x1xf32>
    %cst_240 = arith.constant 3.200000e+01 : f32
    %824 = vector.broadcast %cst_240 : f32 to vector<8x1xf32>
    %825 = arith.divf %823, %824 : vector<8x1xf32>
    %826 = vector.broadcast %818 : vector<8x1xf32> to vector<8x32xf32>
    %827 = arith.subf %814, %826 : vector<8x32xf32>
    %cst_241 = arith.constant 9.99999974E-6 : f32
    %828 = vector.broadcast %cst_241 : f32 to vector<8x1xf32>
    %829 = arith.addf %825, %828 : vector<8x1xf32>
    %830 = math.rsqrt %829 : vector<8x1xf32>
    %831 = vector.broadcast %830 : vector<8x1xf32> to vector<8x32xf32>
    %832 = arith.mulf %827, %831 : vector<8x32xf32>
    %833 = vector.broadcast %573 : vector<1x32xf32> to vector<8x32xf32>
    %834 = arith.mulf %832, %833 : vector<8x32xf32>
    %835 = vector.broadcast %574 : vector<1x32xf32> to vector<8x32xf32>
    %836 = arith.addf %834, %835 : vector<8x32xf32>
    %837 = vector.extract_strided_slice %25 {offsets = [0, 0], sizes = [1, 1], strides = [1, 1]} : vector<2x3xf32> to vector<1x1xf32>
    %838 = vector.broadcast %837 : vector<1x1xf32> to vector<8x32xf32>
    %839 = arith.mulf %838, %167 : vector<8x32xf32>
    %840 = vector.extract_strided_slice %25 {offsets = [0, 1], sizes = [1, 1], strides = [1, 1]} : vector<2x3xf32> to vector<1x1xf32>
    %841 = vector.broadcast %840 : vector<1x1xf32> to vector<8x32xf32>
    %842 = arith.mulf %841, %437 : vector<8x32xf32>
    %843 = arith.addf %839, %842 : vector<8x32xf32>
    %844 = vector.extract_strided_slice %25 {offsets = [0, 2], sizes = [1, 1], strides = [1, 1]} : vector<2x3xf32> to vector<1x1xf32>
    %845 = vector.broadcast %844 : vector<1x1xf32> to vector<8x32xf32>
    %846 = arith.mulf %845, %707 : vector<8x32xf32>
    %847 = arith.addf %843, %846 : vector<8x32xf32>
    %c0_242 = arith.constant 0 : index
    %c0_243 = arith.constant 0 : index
    %c0_244 = arith.constant 0 : index
    %848 = vector.load %arg7[%c0_242, %c0_243, %c0_244] : memref<2x8x32xf32, #tpu.memory_space<vmem>>, vector<1x8x32xf32>
    %849 = vector.shape_cast %848 : vector<1x8x32xf32> to vector<8x32xf32>
    %850 = vector.shape_cast %847 : vector<8x32xf32> to vector<1x8x32xf32>
    tpu.vector_store %arg7[%c0_242, %c0_243, %c0_244], %850 {strides = array<i32>} : memref<2x8x32xf32, #tpu.memory_space<vmem>>, vector<1x8x32xf32>,
    %851 = vector.extract_strided_slice %25 {offsets = [1, 0], sizes = [1, 1], strides = [1, 1]} : vector<2x3xf32> to vector<1x1xf32>
    %852 = vector.broadcast %851 : vector<1x1xf32> to vector<8x32xf32>
    %853 = arith.mulf %852, %296 : vector<8x32xf32>
    %854 = vector.extract_strided_slice %25 {offsets = [1, 1], sizes = [1, 1], strides = [1, 1]} : vector<2x3xf32> to vector<1x1xf32>
    %855 = vector.broadcast %854 : vector<1x1xf32> to vector<8x32xf32>
    %856 = arith.mulf %855, %566 : vector<8x32xf32>
    %857 = arith.addf %853, %856 : vector<8x32xf32>
    %858 = vector.extract_strided_slice %25 {offsets = [1, 2], sizes = [1, 1], strides = [1, 1]} : vector<2x3xf32> to vector<1x1xf32>
    %859 = vector.broadcast %858 : vector<1x1xf32> to vector<8x32xf32>
    %860 = arith.mulf %859, %836 : vector<8x32xf32>
    %861 = arith.addf %857, %860 : vector<8x32xf32>
    %c1_245 = arith.constant 1 : index
    %c0_246 = arith.constant 0 : index
    %c0_247 = arith.constant 0 : index
    %862 = vector.load %arg7[%c1_245, %c0_246, %c0_247] : memref<2x8x32xf32, #tpu.memory_space<vmem>>, vector<1x8x32xf32>
    %863 = vector.shape_cast %862 : vector<1x8x32xf32> to vector<8x32xf32>
    %864 = vector.shape_cast %861 : vector<8x32xf32> to vector<1x8x32xf32>
    tpu.vector_store %arg7[%c1_245, %c0_246, %c0_247], %864 {strides = array<i32>} : memref<2x8x32xf32, #tpu.memory_space<vmem>>, vector<1x8x32xf32>,
    return
  }
}

</mosaic_0001>

<bundles_post_ra>
// kernel: context_manager_forward.1
= control target key start
LH: loop header
LB: loop body
LE: loop exit
PB: predicated region body
PF: predicated region fallthrough
CT: control target
= control target key end

     0   :  { %14 = vsyncpa [#allocation3], 0  ;;  %s8401_s0 = inlined_call_operand.vmem [shape: bf16[16,32], index: 0, kind: input, shape index: {}]   ;;  %s8402_s1 = inlined_call_operand.vmem [shape: bf16[3,2,128,32], index: 1, kind: input, shape index: {}]   ;;  %s8403_s2 = inlined_call_operand.vmem [shape: bf16[32,195], index: 2, kind: input, shape index: {}]   ;;  %s8404_s3 = inlined_call_operand.vmem [shape: bf16[3,32,64], index: 3, kind: input, shape index: {}]   ;;  %s8405_s4 = inlined_call_operand.vmem [shape: bf16[3,32,32], index: 4, kind: input, shape index: {}]   ;;  %s8406_s5 = inlined_call_operand.vmem [shape: f32[3,6,32], index: 5, kind: input, shape index: {}]   ;;  %s8407_s6 = inlined_call_operand.vmem [shape: f32[1,3], index: 6, kind: input, shape index: {}]   ;;  %s8408_s7 = inlined_call_operand.hbm [shape: f32[2,8,32], index: 7, kind: output, shape index: {0}]   ;;  %s8409_s8 = inlined_call_operand.hbm [shape: f32[2,3], index: 8, kind: output, shape index: {1}]  }
   0x1   :  { %v5996_v0 = vld [vmem:[%s8404_s3 + $0x8] sm:$0xff]  ;;  %v6001_v1 = vld [vmem:[%s8406_s5] sm:$0x3f] }
   0x2   :  { %278 = vmatpush.bf16.msra.mxu2 %v5996_v0  ;;  %v6007_v2 = vld [vmem:[%s8404_s3] sm:$0xff]  ;;  %v354_v3 = vperm.slane %v6001_v1, 2 }
   0x3   :  { %15 = vsyncpa [#allocation5], 0  ;;  %s5928_s11 = smov 32   ;;  %v5672_v4 = vld [vmem:[%s8402_s1] sm:$0xff]  ;;  %vm62_vm0 = vcmask 261120   ;;  %v5673_v5 = vld [vmem:[%s8402_s1 + $0x8] sm:$0xff] }
   0x4   :  { %356 = vrot.lane.b32.xlu0 %v354_v3, %s5928_s11  ;;  %v5674_v6 = vld [vmem:[%s8402_s1 + $0x10] sm:$0xff]  ;;  %v5675_v7 = vld [vmem:[%s8402_s1 + $0x18] sm:$0xff]  ;;  %v5676_v8 = vld [vmem:[%s8402_s1 + $0x20] sm:$0xff]  ;;  %v6100_v49 = vperm.slane %v6001_v1, 1  ;;  %vm431_vm1 = vcmask 64512   ;;  %s5930_s17 = smov 120  }
   0x5   :  { %v5677_v9 = vld [vmem:[%s8402_s1 + $0x28] sm:$0xff]  ;;  %v5678_v10 = vld [vmem:[%s8402_s1 + $0x30] sm:$0xff]  ;;  %v5679_v11 = vld [vmem:[%s8402_s1 + $0x38] sm:$0xff]  ;;  %s5931_s18 = smov 112   ;;  %s5932_s19 = smov 88   ;;  %vm564_vm2 = vcmask 1043456  }
   0x6   :  { %279 = vmatpush.bf16.msra.mxu2 %v6007_v2  ;;  %v5247_v14 = vld [vmem:[%s8403_s2 + $0x10] sm:$0xf]  ;;  %v5669_v15 = vld [vmem:[%s8403_s2 + $0x14] sm:$0xf0]  ;;  %v5239_v18 = vld [vmem:[%s8403_s2] sm:$0xf] }
   0x7   :  { %v5248_v16 = vor.u32 %v5669_v15, %v5247_v14  ;;  %v5667_v19 = vld [vmem:[%s8403_s2 + $0x4] sm:$0xf0]  ;;  %v6065_v21 = vld [vmem:[%s8401_s0] sm:$0xff]  ;;  %s5929_s0 = smov 96   ;;  %s5934_s30 = smov 80   ;;  %vm94_vm3 = vcmask 548352  }
   0x8   :  { %v5240_v20 = vor.u32 %v5667_v19, %v5239_v18  ;;  %s5935_s12 = smov 72   ;;  %s5936_s20 = smov 64   ;;  %vm118_vm5 = vcmask 1040384   ;;  %vm127_vm6 = vcmask 542208   ;;  %vm138_vm7 = vcmask 17408  }
   0x9   :  { %5295 = vmatmul.msk.bf16.vlgmr.msra.gmra.mxu2 %vm62_vm0, %v5672_v4  ;;  %72 = vmatpush.bf16.msra.mxu0 %v5248_v16  ;;  %s5937_s25 = smov 56   ;;  %s5938_s27 = smov 48  }
   0xa   :  { %s5939_s9 = smov 40   ;;  %s5219_s28 = sshll.u32 %s8409_s8, 4  ;;  %s5220_s28 = int_to_ptr.hbm [resolvable:$true] %s5219_s28 }
   0xb   :  { %s5945_s29 = smov [#allocation2]   ;;  %s5205_s15 = sshll.u32 %s8408_s7, 4  ;;  %s5206_s15 = int_to_ptr.hbm [resolvable:$true] %s5205_s15 }
   0xc   :  { %s5203_s10 = sshll.u32 %s5945_s29, 4  ;;  %s5946_s8 = smov 128   ;;  %s5204_s10 = int_to_ptr.vmem [resolvable:$true] %s5203_s10 }
   0xd   :  { %73 = vmatpush.bf16.msra.mxu0 %v5240_v20  ;;  %s5947_s16 = smov 8  }
  0x10   :  { %5253 = vmatmul.msk.bf16.vlgmr.msra.gmra.mxu0 %vm62_vm0, %v6065_v21 }
  0x19   :  { %5296 = vmatmul.msk.bf16.gmra.mxu2 %vm62_vm0, %v5673_v5 }
  0x29   :  { %5297 = vmatmul.msk.bf16.gmra.mxu2 %vm62_vm0, %v5674_v6 }
  0x39   :  { %5298 = vmatmul.msk.bf16.gmra.mxu2 %vm62_vm0, %v5675_v7 }
  0x49   :  { %5299 = vmatmul.msk.bf16.gmra.mxu2 %vm62_vm0, %v5676_v8 }
  0x59   :  { %5300 = vmatmul.msk.bf16.gmra.mxu2 %vm62_vm0, %v5677_v9 }
  0x69   :  { %5301 = vmatmul.msk.bf16.gmra.mxu2 %vm62_vm0, %v5678_v10 }
  0x76   :  { %v6083_v30 = vpop.permute.xlu0 %356 }
  0x79   :  { %5302 = vmatmul.msk.bf16.gmra.mxu2 %vm62_vm0, %v5679_v11 }
  0x8c   :  { %v6044_v12 = vpop.f32.mrf.mxu2 }
  0x94   :  { %v6046_v13 = vpop.f32.mrf.mxu2 }
  0x9c   :  { %v6054_v17 = vpop.f32.mrf.mxu2 }
  0xa4   :  { %v6069_v22 = vpop.f32.mrf.mxu2 }
  0xac   :  { %v6071_v23 = vpop.f32.mrf.mxu2 }
  0xb4   :  { %v6073_v24 = vpop.f32.mrf.mxu2 }
  0xbc   :  { %v6075_v25 = vpop.f32.mrf.mxu2 }
  0xc4   :  { %v6077_v26 = vpop.f32.mrf.mxu2 }
  0xc5   :  { %v366_v18 = vadd.f32 %v6083_v30, %v6077_v26 }
  0xcc   :  { %v6079_v27 = vpop.f32.mrf.mxu2 }
  0xcd   :  { %v367_v37 = vadd.f32 %v6083_v30, %v6079_v27 }
  0xcf   :  { %v383_v43 = vpack.c.bf16 %v367_v37, %v367_v37 }
  0xd1   :  { %v507_v45 = vunpack.c.l.b16 %v383_v43  ;;  %v364_v43 = vadd.f32 %v6083_v30, %v6073_v24 }
  0xd4   :  { %v6081_v28 = vpop.f32.mrf.mxu2 }
  0xd5   :  { %v368_v35 = vadd.f32 %v6083_v30, %v6081_v28 }
  0xd7   :  { %v384_v40 = vpack.c.bf16 %v368_v35, %v368_v35 }
  0xd9   :  { %v508_v44 = vunpack.c.l.b16 %v384_v40  ;;  %v331_v40 = vadd.f32 %v6100_v49, %v6081_v28 }
  0xdb   :  { %v6095_v46 = vpack.c.b16 %v508_v44, %v507_v45  ;;  %v330_v45 = vadd.f32 %v6100_v49, %v6079_v27 }
  0xdc   :  { %v306_v29 = vpop.f32.mrf.mxu2 }
  0xdd   :  { %v369_v31 = vadd.f32 %v6083_v30, %v306_v29  ;;  %v332_v19 = vadd.f32 %v6100_v49, %v306_v29 }
  0xdf   :  { %v385_v33 = vpack.c.bf16 %v369_v31, %v369_v31  ;;  %v348_v37 = vpack.c.bf16 %v332_v19, %v332_v19  ;;  %v359_v19 = vadd.f32 %v6083_v30, %v6044_v12 }
  0xe1   :  { %v509_v38 = vunpack.c.l.b16 %v385_v33  ;;  %v365_v33 = vadd.f32 %v6083_v30, %v6075_v25 }
  0xe4   :  { %v308_v32 = vpop.f32.mrf.mxu2 }
  0xe5   :  { %v370_v34 = vadd.f32 %v6083_v30, %v308_v32  ;;  %v333_v11 = vadd.f32 %v6100_v49, %v308_v32 }
  0xe7   :  { %v386_v36 = vpack.c.bf16 %v370_v34, %v370_v34  ;;  %v349_v32 = vpack.c.bf16 %v333_v11, %v333_v11 }
  0xe9   :  { %v510_v39 = vunpack.c.l.b16 %v386_v36  ;;  %v382_v36 = vpack.c.bf16 %v366_v18, %v366_v18 }
  0xeb   :  { %v6091_v41 = vpack.c.b16 %v510_v39, %v509_v38  ;;  %v381_v39 = vpack.c.bf16 %v365_v33, %v365_v33  ;;  %v506_v44 = vunpack.c.l.b16 %v382_v36  ;;  %v375_v36 = vpack.c.bf16 %v359_v19, %v359_v19 }
  0xec   :  { %v311_v42 = vpop.f32.mrf.mxu2 }
  0xed   :  { %533 = vrot.lane.b32.xlu2 %v6091_v41, %s5929_s0  ;;  %v334_v58 = vadd.f32 %v6100_v49, %v311_v42  ;;  %v371_v62 = vadd.f32 %v6083_v30, %v311_v42  ;;  %v418_v42 = vunpack.c.l.b16 %v349_v32  ;;  %v505_v28 = vunpack.c.l.b16 %v381_v39 }
  0xef   :  { %v350_v7 = vpack.c.bf16 %v334_v58, %v334_v58  ;;  %v387_v14 = vpack.c.bf16 %v371_v62, %v371_v62  ;;  %v362_v58 = vadd.f32 %v6083_v30, %v6069_v22  ;;  %v361_v62 = vadd.f32 %v6083_v30, %v6054_v17 }
  0xf1   :  { %v419_v20 = vunpack.c.l.b16 %v350_v7  ;;  %v511_v34 = vunpack.c.l.b16 %v387_v14  ;;  %v377_v7 = vpack.c.bf16 %v361_v62, %v361_v62  ;;  %v360_v14 = vadd.f32 %v6083_v30, %v6046_v13 }
  0xf3   :  { %v376_v33 = vpack.c.bf16 %v360_v14, %v360_v14  ;;  %v5666_v14 = vld [vmem:[%s8403_s2 + $0x4] sm:$0xf] }
  0xf4   :  { %v313_v47 = vpop.f32.mrf.mxu2 }
  0xf5   :  { %531 = vrot.lane.b32.xlu2 %v6095_v46, %s5929_s0  ;;  %v335_v52 = vadd.f32 %v6100_v49, %v313_v47  ;;  %v372_v59 = vadd.f32 %v6083_v30, %v313_v47  ;;  %v417_v47 = vunpack.c.l.b16 %v348_v37  ;;  %v325_v37 = vadd.f32 %v6100_v49, %v6069_v22 }
  0xf7   :  { %v351_v63 = vpack.c.bf16 %v335_v52, %v335_v52  ;;  %v388_v8 = vpack.c.bf16 %v372_v59, %v372_v59  ;;  %v380_v52 = vpack.c.bf16 %v364_v43, %v364_v43  ;;  %v499_v43 = vunpack.c.l.b16 %v375_v36 }
  0xf9   :  { %v420_v15 = vunpack.c.l.b16 %v351_v63  ;;  %v512_v31 = vunpack.c.l.b16 %v388_v8  ;;  %v504_v59 = vunpack.c.l.b16 %v380_v52  ;;  %v327_v8 = vadd.f32 %v6100_v49, %v6073_v24 }
  0xfa   :  { %v501_v24 = vunpack.c.l.b16 %v377_v7  ;;  %v5668_v7 = vld [vmem:[%s8403_s2 + $0x14] sm:$0xf] }
  0xfb   :  { %v6124_v35 = vpack.c.b16 %v420_v15, %v419_v20  ;;  %v6126_v38 = vpack.c.b16 %v512_v31, %v511_v34  ;;  %v343_v20 = vpack.c.bf16 %v327_v8, %v327_v8  ;;  %v5249_v8 = vld [vmem:[%s8403_s2 + $0x18] sm:$0xf0] }
  0xfc   :  { %v316_v48 = vpop.f32.mrf.mxu2 }
  0xfd   :  { %v336_v50 = vadd.f32 %v6100_v49, %v316_v48  ;;  %v373_v51 = vadd.f32 %v6083_v30, %v316_v48  ;;  %v454_v29 = vsel %vm431_vm1, %v6124_v35, 0  ;;  %v363_v48 = vadd.f32 %v6083_v30, %v6071_v23 }
  0xfe   :  { %v412_v39 = vunpack.c.l.b16 %v343_v20 }
  0xff   :  { %v352_v54 = vpack.c.bf16 %v336_v50, %v336_v50  ;;  %v389_v55 = vpack.c.bf16 %v373_v51, %v373_v51  ;;  %v347_v50 = vpack.c.bf16 %v331_v40, %v331_v40  ;;  %v6140_v51 = vpack.c.b16 %v418_v42, %v417_v47 }
 0x100   :  { %v500_v40 = vunpack.c.l.b16 %v376_v33  ;;  %v324_v42 = vadd.f32 %v6100_v49, %v6054_v17  ;;  %v322_v17 = vadd.f32 %v6100_v49, %v6044_v12  ;;  %v6205_v12 = vpop.f32.mrf.mxu0 }
 0x101   :  { %v421_v3 = vunpack.c.l.b16 %v352_v54  ;;  %v513_v4 = vunpack.c.l.b16 %v389_v55  ;;  %v346_v54 = vpack.c.bf16 %v330_v45, %v330_v45  ;;  %v379_v55 = vpack.c.bf16 %v363_v48, %v363_v48 }
 0x102   :  { %v451_v27 = vsel %vm431_vm1, %v6140_v51, 0  ;;  %v6186_v47 = vpack.c.b16 %v500_v40, %v499_v43  ;;  %v340_v22 = vpack.c.bf16 %v324_v42, %v324_v42  ;;  %v323_v48 = vadd.f32 %v6100_v49, %v6046_v13 }
 0x104   :  { %v318_v53 = vpop.f32.mrf.mxu2  ;;  %v409_v52 = vunpack.c.l.b16 %v340_v22 }
 0x105   :  { %v337_v56 = vadd.f32 %v6100_v49, %v318_v53  ;;  %v374_v57 = vadd.f32 %v6083_v30, %v318_v53  ;;  %v6142_v53 = vpack.c.b16 %v506_v44, %v505_v28  ;;  %v341_v44 = vpack.c.bf16 %v325_v37, %v325_v37 }
 0x107   :  { %v353_v60 = vpack.c.bf16 %v337_v56, %v337_v56  ;;  %v390_v61 = vpack.c.bf16 %v374_v57, %v374_v57  ;;  %v329_v56 = vadd.f32 %v6100_v49, %v6077_v26  ;;  %v416_v57 = vunpack.c.l.b16 %v347_v50 }
 0x108   :  { %v503_v26 = vunpack.c.l.b16 %v379_v55  ;;  %v410_v28 = vunpack.c.l.b16 %v341_v44 }
 0x109   :  { %v422_v5 = vunpack.c.l.b16 %v353_v60  ;;  %v514_v6 = vunpack.c.l.b16 %v390_v61  ;;  %v328_v60 = vadd.f32 %v6100_v49, %v6075_v25  ;;  %v415_v61 = vunpack.c.l.b16 %v346_v54 }
 0x10a   :  { %v345_v63 = vpack.c.bf16 %v329_v56, %v329_v56  ;;  %v339_v54 = vpack.c.bf16 %v323_v48, %v323_v48  ;;  %v6196_v55 = vpack.c.b16 %v410_v28, %v409_v52  ;;  %v338_v56 = vpack.c.bf16 %v322_v17, %v322_v17 }
 0x10b   :  { %v6110_v9 = vpack.c.b16 %v422_v5, %v421_v3  ;;  %v6112_v10 = vpack.c.b16 %v514_v6, %v513_v4  ;;  %v6156_v3 = vpack.c.b16 %v416_v57, %v415_v61  ;;  %v378_v4 = vpack.c.bf16 %v362_v58, %v362_v58 }
 0x10c   :  { %v6158_v5 = vpack.c.b16 %v504_v59, %v503_v26  ;;  %v344_v6 = vpack.c.bf16 %v328_v60, %v328_v60  ;;  %v414_v11 = vunpack.c.l.b16 %v345_v63  ;;  %v408_v57 = vunpack.c.l.b16 %v339_v54 }
 0x10d   :  { %537 = vrot.lane.b32.xlu1 %v6112_v10, %s5929_s0  ;;  %v457_v16 = vsel %vm431_vm1, %v6110_v9, 0  ;;  %v448_v25 = vsel %vm431_vm1, %v6156_v3, 0  ;;  %v502_v15 = vunpack.c.l.b16 %v378_v4  ;;  %v439_v13 = vsel %vm431_vm1, %v6196_v55, 0 }
 0x10e   :  { %459 = vmatpush.bf16.xpose.msra.mxu3 %v457_v16  ;;  %v326_v16 = vadd.f32 %v6100_v49, %v6071_v23  ;;  %v413_v18 = vunpack.c.l.b16 %v344_v6  ;;  %v171_v59 = vperm.slane %v6001_v1, 0 }
 0x10f   :  { %v6174_v32 = vpack.c.b16 %v502_v15, %v501_v24  ;;  %v5241_v15 = vld [vmem:[%s8403_s2 + $0x8] sm:$0xf0]  ;;  %s5933_s2 = smov 104  }
 0x110   :  { %v6172_v31 = vpack.c.b16 %v414_v11, %v413_v18  ;;  %v342_v34 = vpack.c.bf16 %v326_v16, %v326_v16  ;;  %v172_v61 = vadd.f32 %v171_v59, %v6205_v12  ;;  %v5244_v16 = vor.u32 %v5666_v14, %v5241_v15  ;;  %v167_v18 = vld [vmem:[%s8405_s4] sm:$0xf] }
 0x111   :  { %v6251_v20 = vsel %vm564_vm2, %v167_v18, 0 }
 0x112   :  { %v445_v23 = vsel %vm431_vm1, %v6172_v31, 0  ;;  %v173_v62 = vpack.c.bf16 %v172_v61, %v172_v61 }
 0x114   :  { %v587_v26 = vunpack.c.l.b16 %v173_v62 }
 0x115   :  { %535 = vrot.lane.b32.xlu1 %v6126_v38, %s5929_s0 }
 0x116   :  { %460 = vmatpush.bf16.xpose.msra.mxu3 %v454_v29  ;;  %v411_v29 = vunpack.c.l.b16 %v342_v34  ;;  %v6219_v63 = vpack.c.b16 %v587_v26, %v587_v26 }
 0x118   :  { %v6184_v45 = vpack.c.b16 %v412_v39, %v411_v29 }
 0x11a   :  { %v442_v50 = vsel %vm431_vm1, %v6184_v45, 0 }
 0x11d   :  { %529 = vrot.lane.b32.xlu1 %v6142_v53, %s5929_s0 }
 0x11e   :  { %461 = vmatpush.bf16.xpose.msra.mxu3 %v451_v27  ;;  %v407_v27 = vunpack.c.l.b16 %v338_v56 }
 0x120   :  { %v6202_v58 = vpack.c.b16 %v408_v57, %v407_v27 }
 0x122   :  { %v436_v60 = vsel %vm431_vm1, %v6202_v58, 0 }
 0x125   :  { %527 = vrot.lane.b32.xlu1 %v6158_v5, %s5929_s0 }
 0x126   :  { %462 = vmatpush.bf16.xpose.msra.mxu3 %v448_v25  ;;  %v5252_v25 = vor.u32 %v5668_v7, %v5249_v8 }
 0x128   :  { %86 = vmatpush.bf16.msra.mxu1 %v5252_v25 }
 0x12c   :  { %87 = vmatpush.bf16.msra.mxu1 %v5244_v16 }
 0x12d   :  { %525 = vrot.lane.b32.xlu1 %v6174_v32, %s5929_s0 }
 0x12e   :  { %463 = vmatpush.bf16.xpose.msra.mxu3 %v445_v23 }
 0x12f   :  { %5254 = vmatmul.msk.bf16.vlgmr.msra.gmra.mxu1 %vm62_vm0, %v6065_v21 }
 0x130   :  { %575 = vmatpush.bf16.msrb.mxu1 %v6251_v20 }
 0x135   :  { %523 = vrot.lane.b32.xlu1 %v6186_v47, %s5929_s0 }
 0x136   :  { %464 = vmatpush.bf16.xpose.msra.mxu3 %v442_v50 }
 0x13d   :  { %605 = vrot.lane.b32.xlu1 %v6110_v9, %s5930_s17 }
 0x13e   :  { %465 = vmatpush.bf16.xpose.msra.mxu3 %v439_v13 }
 0x145   :  { %601 = vrot.lane.b32.xlu1 %v6140_v51, %s5930_s17 }
 0x146   :  { %466 = vmatpush.bf16.xpose.msra.mxu3 %v436_v60 }
 0x147   :  { %v534_v6 = vpop.permute.xlu2 %533 }
 0x14d   :  { %597 = vrot.lane.b32.xlu1 %v6172_v31, %s5930_s17  ;;  %5303 = vmatmul.msk.bf16.vlgmr.msra.gmra.mxu3 %vm431_vm1, %v173_v62 }
 0x14f   :  { %v532_v19 = vpop.permute.xlu2 %531 }
 0x155   :  { %593 = vrot.lane.b32.xlu1 %v6196_v55, %s5930_s17 }
 0x15d   :  { %589 = vrot.lane.b32.xlu1 %v6219_v63, %s5930_s17 }
 0x165   :  { %734 = vrot.lane.b32.xlu1 %v6124_v35, %s5931_s18 }
 0x16d   :  { %672 = vrot.lane.b32.xlu1 %v6112_v10, %s5932_s19 }
 0x175   :  { %730 = vrot.lane.b32.xlu1 %v6156_v3, %s5931_s18 }
 0x17d   :  { %666 = vrot.lane.b32.xlu1 %v6095_v46, %s5932_s19 }
 0x17f   :  { %v538_v4 = vpop.permute.xlu1 %537 }
 0x180   :  { %547 = vmatpush.bf16.msrb.mxu0 %v538_v4 }
 0x185   :  { %664 = vrot.lane.b32.xlu1 %v6142_v53, %s5932_s19 }
 0x187   :  { %v536_v11 = vpop.permute.xlu1 %535 }
 0x188   :  { %548 = vmatpush.bf16.msrb.mxu0 %v536_v11 }
 0x18c   :  { %549 = vmatpush.bf16.msrb.mxu0 %v534_v6 }
 0x18d   :  { %726 = vrot.lane.b32.xlu1 %v6184_v45, %s5931_s18 }
 0x18f   :  { %v530_v24 = vpop.permute.xlu1 %529 }
 0x190   :  { %550 = vmatpush.bf16.msrb.mxu0 %v532_v19 }
 0x194   :  { %551 = vmatpush.bf16.msrb.mxu0 %v530_v24 }
 0x195   :  { %724 = vrot.lane.b32.xlu1 %v6196_v55, %s5931_s18 }
 0x197   :  { %v528_v33 = vpop.permute.xlu1 %527 }
 0x198   :  { %552 = vmatpush.bf16.msrb.mxu0 %v528_v33 }
 0x19d   :  { %720 = vrot.lane.b32.xlu1 %v6219_v63, %s5931_s18 }
 0x19f   :  { %v526_v34 = vpop.permute.xlu1 %525 }
 0x1a0   :  { %553 = vmatpush.bf16.msrb.mxu0 %v526_v34 }
 0x1a5   :  { %865 = vrot.lane.b32.xlu1 %v6124_v35, %s5933_s2 }
 0x1a7   :  { %v524_v36 = vpop.permute.xlu1 %523 }
 0x1a8   :  { %554 = vmatpush.bf16.msrb.mxu0 %v524_v36 }
 0x1ad   :  { %859 = vrot.lane.b32.xlu1 %v6172_v31, %s5933_s2 }
 0x1af   :  { %v606_v21 = vpop.permute.xlu1 %605 }
 0x1b0   :  { %v632_v37 = vsel %vm431_vm1, %v606_v21, 0 }
 0x1b1   :  { %634 = vmatpush.bf16.xpose.msra.mxu1 %v632_v37 }
 0x1b5   :  { %853 = vrot.lane.b32.xlu1 %v6202_v58, %s5933_s2 }
 0x1b7   :  { %v602_v39 = vpop.permute.xlu1 %601 }
 0x1b8   :  { %v626_v8 = vsel %vm431_vm1, %v602_v39, 0 }
 0x1bd   :  { %803 = vrot.lane.b32.xlu1 %v6112_v10, %s5934_s30 }
 0x1bf   :  { %v6269_v23 = vpop.permute.xlu1 %597 }
 0x1c5   :  { %799 = vrot.lane.b32.xlu1 %v6091_v41, %s5934_s30 }
 0x1c7   :  { %v6273_v40 = vpop.permute.xlu1 %593 }
 0x1cd   :  { %795 = vrot.lane.b32.xlu1 %v6142_v53, %s5934_s30 }
 0x1cf   :  { %v6277_v42 = vpop.permute.xlu1 %589 }
 0x1d0   :  { %v468_v29 = vpop.f32.mrf.mxu3 }
 0x1d1   :  { %v472_v43 = vmul.f32 0.35355338, %v468_v29 }
 0x1d3   :  { %473 = vmax.xlane.f32.xlu0 %v472_v43 }
 0x1d5   :  { %793 = vrot.lane.b32.xlu1 %v6158_v5, %s5934_s30 }
 0x1d7   :  { %v6281_v44 = vpop.permute.xlu1 %734 }
 0x1d8   :  { %v470_v22 = vpop.f32.mrf.mxu3 }
 0x1dd   :  { %791 = vrot.lane.b32.xlu1 %v6174_v32, %s5934_s30 }
 0x1df   :  { %v673_v48 = vpop.permute.xlu1 %672 }
 0x1e0   :  { %682 = vmatpush.bf16.msra.mxu0 %v673_v48  ;;  %v614_v48 = vsel %vm431_vm1, %v6273_v40, 0 }
 0x1e7   :  { %v6285_v28 = vpop.permute.xlu1 %730  ;;  %603 = vrot.lane.b32.xlu0 %v6124_v35, %s5930_s17  ;;  %v168_v35 = vld [vmem:[%s8405_s4 + $0x4] sm:$0xf] }
 0x1e8   :  { %v6305_v56 = vsel %vm564_vm2, %v168_v35, 0 }
 0x1e9   :  { %709 = vmatpush.bf16.msrb.mxu3 %v6305_v56 }
 0x1ef   :  { %v667_v50 = vpop.permute.xlu1 %666  ;;  %595 = vrot.lane.b32.xlu0 %v6184_v45, %s5930_s17 }
 0x1f7   :  { %v665_v17 = vpop.permute.xlu1 %664  ;;  %591 = vrot.lane.b32.xlu0 %v6202_v58, %s5930_s17 }
 0x1ff   :  { %v6293_v52 = vpop.permute.xlu1 %726  ;;  %736 = vrot.lane.b32.xlu0 %v6110_v9, %s5931_s18 }
 0x207   :  { %v6297_v54 = vpop.permute.xlu1 %724  ;;  %732 = vrot.lane.b32.xlu0 %v6140_v51, %s5931_s18 }
 0x20f   :  { %v6308_v57 = vpop.permute.xlu1 %720  ;;  %670 = vrot.lane.b32.xlu0 %v6126_v38, %s5932_s19 }
 0x217   :  { %v866_v13 = vpop.permute.xlu1 %865  ;;  %668 = vrot.lane.b32.xlu0 %v6091_v41, %s5932_s19 }
 0x218   :  { %v891_v33 = vsel %vm431_vm1, %v866_v13, 0 }
 0x21f   :  { %v6314_v27 = vpop.permute.xlu1 %859  ;;  %728 = vrot.lane.b32.xlu0 %v6172_v31, %s5931_s18 }
 0x227   :  { %v6318_v60 = vpop.permute.xlu1 %853  ;;  %662 = vrot.lane.b32.xlu0 %v6158_v5, %s5932_s19 }
 0x22f   :  { %v804_v61 = vpop.permute.xlu1 %803  ;;  %658 = vrot.lane.b32.xlu0 %v6186_v47, %s5932_s19 }
 0x230   :  { %813 = vmatpush.bf16.msra.mxu3 %v804_v61 }
 0x237   :  { %722 = vrot.lane.b32.xlu0 %v6202_v58, %s5931_s18 }
 0x23f   :  { %867 = vrot.lane.b32.xlu0 %v6110_v9, %s5933_s2 }
 0x246   :  { %v474_v62 = vpop.xlane.xlu0 %473 }
 0x247   :  { %v475_v26 = vsub.f32 %v472_v43, %v474_v62  ;;  %861 = vrot.lane.b32.xlu0 %v6156_v3, %s5933_s2  ;;  %v620_v43 = vsel %vm431_vm1, %v6269_v23, 0  ;;  %v6358_v23 = vpop.f32.mrf.mxu1 }
 0x249   :  { %v476_v31 = vmul.f32 1.442695, %v475_v26 }
 0x24b   :  { %5757 = vpow2.f32 %v476_v31 }
 0x24f   :  { %855 = vrot.lane.b32.xlu0 %v6196_v55, %s5933_s2  ;;  %v6360_v62 = vpop.f32.mrf.mxu1 }
 0x251   :  { %v5758_v4 = vpop.eup %5757 }
 0x252   :  { %478 = vadd.xlane.f32.xlu2 %v5758_v4 }
 0x259   :  { %v604_v6 = vpop.permute.xlu0 %603 }
 0x25a   :  { %v629_v7 = vsel %vm431_vm1, %v604_v6, 0 }
 0x25b   :  { %635 = vmatpush.bf16.xpose.msra.mxu1 %v629_v7 }
 0x261   :  { %v596_v58 = vpop.permute.xlu0 %595 }
 0x262   :  { %v617_v22 = vsel %vm431_vm1, %v596_v58, 0 }
 0x263   :  { %636 = vmatpush.bf16.xpose.msra.mxu1 %v626_v8 }
 0x269   :  { %v592_v9 = vpop.permute.xlu0 %591 }
 0x26a   :  { %599 = vrot.lane.b32.xlu2 %v6156_v3, %s5930_s17 }
 0x271   :  { %v6336_v11 = vpop.permute.xlu0 %736 }
 0x279   :  { %v6338_v25 = vpop.permute.xlu0 %732 }
 0x281   :  { %v671_v14 = vpop.permute.xlu0 %670 }
 0x282   :  { %683 = vmatpush.bf16.msra.mxu0 %v671_v14 }
 0x289   :  { %v669_v55 = vpop.permute.xlu0 %668 }
 0x28a   :  { %684 = vmatpush.bf16.msra.mxu0 %v669_v55 }
 0x28e   :  { %685 = vmatpush.bf16.msra.mxu0 %v667_v50  ;;  %v611_v50 = vsel %vm431_vm1, %v592_v9, 0 }
 0x291   :  { %v6340_v15 = vpop.permute.xlu0 %728 }
 0x292   :  { %686 = vmatpush.bf16.msra.mxu0 %v665_v17  ;;  %v6353_v17 = vpop.f32.mrf.mxu0 }
 0x299   :  { %v663_v16 = vpop.permute.xlu0 %662 }
 0x29a   :  { %687 = vmatpush.bf16.msra.mxu0 %v663_v16 }
 0x2a1   :  { %v659_v18 = vpop.permute.xlu0 %658 }
 0x2a9   :  { %v6342_v19 = vpop.permute.xlu0 %722 }
 0x2b1   :  { %v868_v24 = vpop.permute.xlu0 %867 }
 0x2b2   :  { %v894_v3 = vsel %vm431_vm1, %v868_v24, 0 }
 0x2b3   :  { %896 = vmatpush.bf16.xpose.msrb.mxu2 %v894_v3  ;;  %v760_v3 = vsel %vm431_vm1, %v6281_v44, 0 }
 0x2bb   :  { %897 = vmatpush.bf16.xpose.msrb.mxu2 %v891_v33  ;;  %v862_v33 = vpop.permute.xlu0 %861 }
 0x2c5   :  { %v479_v34 = vpop.xlane.xlu2 %478 }
 0x2c6   :  { %5759 = vrcp.f32 %v479_v34 }
 0x2cc   :  { %v5760_v36 = vpop.eup %5759 }
 0x2cd   :  { %v600_v21 = vpop.permute.xlu2 %599  ;;  %v481_v37 = vmul.f32 %v5760_v36, %v5758_v4  ;;  %v885_v36 = vsel %vm431_vm1, %v862_v33, 0 }
 0x2ce   :  { %v623_v39 = vsel %vm431_vm1, %v600_v21, 0 }
 0x2cf   :  { %637 = vmatpush.bf16.xpose.msra.mxu1 %v623_v39  ;;  %v482_v29 = vpack.c.bf16 %v481_v37, %v481_v37  ;;  %v882_v37 = vsel %vm431_vm1, %v6314_v27, 0  ;;  %v754_v39 = vsel %vm431_vm1, %v6285_v28, 0  ;;  %v748_v28 = vsel %vm431_vm1, %v6293_v52, 0 }
 0x2d1   :  { %555 = vmatmul.bf16.vlgmr.msrb.gmra.mxu0 %v482_v29 }
 0x2d7   :  { %638 = vmatpush.bf16.xpose.msra.mxu1 %v620_v43 }
 0x2df   :  { %639 = vmatpush.bf16.xpose.msra.mxu1 %v617_v22  ;;  %v856_v22 = vpop.permute.xlu0 %855 }
 0x2e0   :  { %v876_v27 = vsel %vm431_vm1, %v856_v22, 0 }
 0x2e7   :  { %640 = vmatpush.bf16.xpose.msra.mxu1 %v614_v48 }
 0x2ef   :  { %641 = vmatpush.bf16.xpose.msra.mxu1 %v611_v50 }
 0x34e   :  { %v556_v35 = vpop.f32.mrf.mxu0 }
 0x34f   :  { %v560_v13 = vpack.c.bf16 %v556_v35, %v556_v35  ;;  %v873_v35 = vsel %vm431_vm1, %v6318_v60, 0 }
 0x351   :  { %5304 = vmatmul.msk.bf16.vlgmr.msrb.gmra.mxu1 %vm431_vm1, %v560_v13  ;;  %v745_v13 = vsel %vm431_vm1, %v6297_v54, 0 }
 0x356   :  { %v558_v61 = vpop.f32.mrf.mxu0 }
 0x357   :  { %v742_v61 = vsel %vm431_vm1, %v6342_v19, 0 }
 0x361   :  { %5305 = vmatmul.msk.bf16.vlgmr.msra.gmra.mxu1 %vm431_vm1, %v6277_v42 }
 0x3ce   :  { %v6362_v26 = vpop.f32.mrf.mxu1 }
 0x3d6   :  { %v579_v40 = vpop.f32.mrf.mxu1 }
 0x3de   :  { %v643_v31 = vpop.f32.mrf.mxu1 }
 0x3df   :  { %v647_v4 = vmul.f32 0.35355338, %v643_v31 }
 0x3e1   :  { %648 = vmax.xlane.f32.xlu2 %v647_v4 }
 0x3e6   :  { %v645_v6 = vpop.f32.mrf.mxu1 }
 0x454   :  { %v649_v7 = vpop.xlane.xlu2 %648 }
 0x455   :  { %v650_v58 = vsub.f32 %v647_v4, %v649_v7 }
 0x457   :  { %v651_v8 = vmul.f32 1.442695, %v650_v58 }
 0x459   :  { %5761 = vpow2.f32 %v651_v8 }
 0x45f   :  { %v5762_v9 = vpop.eup %5761 }
 0x460   :  { %653 = vadd.xlane.f32.xlu2 %v5762_v9 }
 0x478   :  { %660 = vrot.lane.b32.xlu2 %v6174_v32, %s5932_s19 }
 0x480   :  { %863 = vrot.lane.b32.xlu2 %v6140_v51, %s5933_s2  ;;  %v763_v51 = vsel %vm431_vm1, %v6336_v11, 0  ;;  %v757_v11 = vsel %vm431_vm1, %v6338_v25, 0  ;;  %v751_v25 = vsel %vm431_vm1, %v6340_v15, 0 }
 0x488   :  { %857 = vrot.lane.b32.xlu2 %v6184_v45, %s5933_s2 }
 0x490   :  { %851 = vrot.lane.b32.xlu2 %v6219_v63, %s5933_s2 }
 0x498   :  { %801 = vrot.lane.b32.xlu2 %v6126_v38, %s5934_s30 }
 0x4a0   :  { %797 = vrot.lane.b32.xlu2 %v6095_v46, %s5934_s30 }
 0x4d3   :  { %v654_v42 = vpop.xlane.xlu2 %653 }
 0x4d4   :  { %5763 = vrcp.f32 %v654_v42 }
 0x4da   :  { %v5764_v14 = vpop.eup %5763 }
 0x4db   :  { %v661_v55 = vpop.permute.xlu2 %660  ;;  %v656_v16 = vmul.f32 %v5764_v14, %v5762_v9 }
 0x4dc   :  { %688 = vmatpush.bf16.msra.mxu0 %v661_v55 }
 0x4dd   :  { %v657_v45 = vpack.c.bf16 %v656_v16, %v656_v16 }
 0x4e0   :  { %689 = vmatpush.bf16.msra.mxu0 %v659_v18  ;;  %v800_v18 = vpop.permute.xlu1 %799 }
 0x4e3   :  { %690 = vmatmul.bf16.vlgmr.msra.gmra.mxu0 %v657_v45  ;;  %v864_v63 = vpop.permute.xlu2 %863 }
 0x4e4   :  { %765 = vmatpush.bf16.xpose.msrb.mxu0 %v763_v51  ;;  %v888_v24 = vsel %vm431_vm1, %v864_v63, 0 }
 0x4e5   :  { %898 = vmatpush.bf16.xpose.msrb.mxu2 %v888_v24 }
 0x4e8   :  { %v796_v44 = vpop.permute.xlu1 %795 }
 0x4eb   :  { %v858_v34 = vpop.permute.xlu2 %857 }
 0x4ec   :  { %766 = vmatpush.bf16.xpose.msrb.mxu0 %v760_v3  ;;  %v879_v43 = vsel %vm431_vm1, %v858_v34, 0 }
 0x4ed   :  { %899 = vmatpush.bf16.xpose.msrb.mxu2 %v885_v36 }
 0x4f0   :  { %v794_v50 = vpop.permute.xlu1 %793 }
 0x4f3   :  { %v852_v21 = vpop.permute.xlu2 %851 }
 0x4f4   :  { %767 = vmatpush.bf16.xpose.msrb.mxu0 %v757_v11 }
 0x4f5   :  { %900 = vmatpush.bf16.xpose.msrb.mxu2 %v882_v37 }
 0x4f8   :  { %v792_v15 = vpop.permute.xlu1 %791 }
 0x4fb   :  { %v802_v29 = vpop.permute.xlu2 %801 }
 0x4fc   :  { %768 = vmatpush.bf16.xpose.msrb.mxu0 %v754_v39  ;;  %814 = vmatpush.bf16.msra.mxu3 %v802_v29 }
 0x4fd   :  { %901 = vmatpush.bf16.xpose.msrb.mxu2 %v879_v43  ;;  %v170_v43 = vld [vmem:[%s8405_s4 + $0xc] sm:$0xf] }
 0x500   :  { %815 = vmatpush.bf16.msra.mxu3 %v800_v18 }
 0x503   :  { %v798_v48 = vpop.permute.xlu2 %797 }
 0x504   :  { %769 = vmatpush.bf16.xpose.msrb.mxu0 %v751_v25  ;;  %816 = vmatpush.bf16.msra.mxu3 %v798_v48  ;;  %v6437_v25 = vsel %vm564_vm2, %v170_v43, 0 }
 0x505   :  { %902 = vmatpush.bf16.xpose.msrb.mxu2 %v876_v27 }
 0x508   :  { %817 = vmatpush.bf16.msra.mxu3 %v796_v44 }
 0x50c   :  { %770 = vmatpush.bf16.xpose.msrb.mxu0 %v748_v28  ;;  %818 = vmatpush.bf16.msra.mxu3 %v794_v50 }
 0x50d   :  { %903 = vmatpush.bf16.xpose.msrb.mxu2 %v873_v35  ;;  %v5680_v35 = vld [vmem:[%s8402_s1 + $0x40] sm:$0xff] }
 0x510   :  { %819 = vmatpush.bf16.msra.mxu3 %v792_v15  ;;  %v5683_v15 = vld [vmem:[%s8402_s1 + $0x58] sm:$0xff] }
 0x514   :  { %771 = vmatpush.bf16.xpose.msrb.mxu0 %v745_v13  ;;  %5309 = vmatmul.msk.bf16.vlgmr.msrb.gmra.mxu2 %vm431_vm1, %v852_v21  ;;  %v5684_v13 = vld [vmem:[%s8402_s1 + $0x60] sm:$0xff] }
 0x515   :  { %1407 = vmatpush.bf16.msra.mxu2 %v6251_v20 }
 0x51c   :  { %772 = vmatpush.bf16.xpose.msrb.mxu0 %v742_v61  ;;  %v5685_v61 = vld [vmem:[%s8402_s1 + $0x68] sm:$0xff] }
 0x523   :  { %5307 = vmatmul.msk.bf16.vlgmr.msrb.gmra.mxu0 %vm431_vm1, %v6308_v57 }
 0x560   :  { %v691_v52 = vpop.f32.mrf.mxu0 }
 0x561   :  { %v695_v60 = vpack.c.bf16 %v691_v52, %v691_v52  ;;  %v5686_v52 = vld [vmem:[%s8402_s1 + $0x70] sm:$0xff] }
 0x563   :  { %5306 = vmatmul.msk.bf16.vlgmr.msrb.gmra.mxu3 %vm431_vm1, %v695_v60  ;;  %v5687_v60 = vld [vmem:[%s8402_s1 + $0x78] sm:$0xff] }
 0x568   :  { %v693_v20 = vpop.f32.mrf.mxu0 }
 0x597   :  { %v905_v40 = vpop.f32.mrf.mxu2 }
 0x598   :  { %v909_v31 = vmul.f32 0.35355338, %v905_v40 }
 0x59a   :  { %910 = vmax.xlane.f32.xlu1 %v909_v31 }
 0x59f   :  { %v907_v6 = vpop.f32.mrf.mxu2 }
 0x5a0   :  { %v774_v4 = vpop.f32.mrf.mxu0 }
 0x5a1   :  { %v778_v54 = vmul.f32 0.35355338, %v774_v4 }
 0x5a3   :  { %779 = vmax.xlane.f32.xlu0 %v778_v54 }
 0x5a8   :  { %v776_v7 = vpop.f32.mrf.mxu0 }
 0x5b3   :  { %926 = vrot.lane.b32.xlu1 %v6142_v53, %s5935_s12 }
 0x5b7   :  { %789 = vrot.lane.b32.xlu0 %v6186_v47, %s5934_s30 }
 0x5bf   :  { %932 = vrot.lane.b32.xlu0 %v6126_v38, %s5935_s12 }
 0x5c7   :  { %930 = vrot.lane.b32.xlu0 %v6091_v41, %s5935_s12 }
 0x5cf   :  { %928 = vrot.lane.b32.xlu0 %v6095_v46, %s5935_s12 }
 0x5d7   :  { %924 = vrot.lane.b32.xlu0 %v6158_v5, %s5935_s12 }
 0x5df   :  { %922 = vrot.lane.b32.xlu0 %v6174_v32, %s5935_s12 }
 0x5e6   :  { %v6421_v53 = vpop.f32.mrf.mxu3 }
 0x5e7   :  { %920 = vrot.lane.b32.xlu0 %v6186_v47, %s5935_s12  ;;  %v169_v47 = vld [vmem:[%s8405_s4 + $0x8] sm:$0xf] }
 0x5e8   :  { %v6429_v42 = vsel %vm564_vm2, %v169_v47, 0 }
 0x5e9   :  { %840 = vmatpush.bf16.msrb.mxu1 %v6429_v42 }
 0x5ee   :  { %v713_v57 = vpop.f32.mrf.mxu3 }
 0x60d   :  { %v911_v46 = vpop.xlane.xlu1 %910 }
 0x60e   :  { %v912_v5 = vsub.f32 %v909_v31, %v911_v46 }
 0x610   :  { %v913_v32 = vmul.f32 1.442695, %v912_v5 }
 0x616   :  { %v780_v19 = vpop.xlane.xlu0 %779 }
 0x617   :  { %v781_v38 = vsub.f32 %v778_v54, %v780_v19 }
 0x619   :  { %v782_v58 = vmul.f32 1.442695, %v781_v38 }
 0x61b   :  { %5765 = vpow2.f32 %v782_v58 }
 0x61c   :  { %5767 = vpow2.f32 %v913_v32 }
 0x621   :  { %v5766_v41 = vpop.eup %5765 }
 0x622   :  { %784 = vadd.xlane.f32.xlu2 %v5766_v41  ;;  %v5768_v9 = vpop.eup %5767 }
 0x625   :  { %v927_v33 = vpop.permute.xlu1 %926 }
 0x629   :  { %v790_v8 = vpop.permute.xlu0 %789 }
 0x62a   :  { %820 = vmatpush.bf16.msra.mxu3 %v790_v8 }
 0x62e   :  { %971 = vmatpush.bf16.msrb.mxu3 %v6437_v25 }
 0x631   :  { %v933_v14 = vpop.permute.xlu0 %932 }
 0x639   :  { %v931_v55 = vpop.permute.xlu0 %930 }
 0x63a   :  { %934 = vrot.lane.b32.xlu2 %v6112_v10, %s5935_s12 }
 0x641   :  { %v929_v10 = vpop.permute.xlu0 %928 }
 0x649   :  { %v925_v3 = vpop.permute.xlu0 %924 }
 0x651   :  { %v923_v34 = vpop.permute.xlu0 %922 }
 0x659   :  { %v921_v36 = vpop.permute.xlu0 %920 }
 0x663   :  { %915 = vadd.xlane.f32.xlu2 %v5768_v9 }
 0x695   :  { %v785_v16 = vpop.xlane.xlu2 %784 }
 0x696   :  { %5769 = vrcp.f32 %v785_v16 }
 0x69c   :  { %v5770_v51 = vpop.eup %5769 }
 0x69d   :  { %v935_v45 = vpop.permute.xlu2 %934  ;;  %v787_v63 = vmul.f32 %v5770_v51, %v5766_v41 }
 0x69e   :  { %944 = vmatpush.bf16.msra.mxu1 %v935_v45 }
 0x69f   :  { %v788_v24 = vpack.c.bf16 %v787_v63, %v787_v63 }
 0x6a1   :  { %821 = vmatmul.bf16.vlgmr.msra.gmra.mxu3 %v788_v24 }
 0x6a2   :  { %945 = vmatpush.bf16.msra.mxu1 %v933_v14  ;;  %1121 = vmatpush.bf16.msra.mxu3 %v5996_v0  ;;  %v5681_v0 = vld [vmem:[%s8402_s1 + $0x48] sm:$0xff] }
 0x6a6   :  { %946 = vmatpush.bf16.msra.mxu1 %v931_v55  ;;  %1122 = vmatpush.bf16.msra.mxu3 %v6007_v2  ;;  %v5682_v2 = vld [vmem:[%s8402_s1 + $0x50] sm:$0xff] }
 0x6aa   :  { %947 = vmatpush.bf16.msra.mxu1 %v929_v10 }
 0x6ae   :  { %948 = vmatpush.bf16.msra.mxu1 %v927_v33 }
 0x6b2   :  { %949 = vmatpush.bf16.msra.mxu1 %v925_v3 }
 0x6b6   :  { %950 = vmatpush.bf16.msra.mxu1 %v923_v34 }
 0x6ba   :  { %951 = vmatpush.bf16.msra.mxu1 %v921_v36 }
 0x6d6   :  { %v916_v18 = vpop.xlane.xlu2 %915 }
 0x6d7   :  { %5771 = vrcp.f32 %v916_v18 }
 0x6dd   :  { %v5772_v39 = vpop.eup %5771 }
 0x6de   :  { %v918_v44 = vmul.f32 %v5772_v39, %v5768_v9 }
 0x6e0   :  { %v919_v29 = vpack.c.bf16 %v918_v44, %v918_v44 }
 0x724   :  { %v822_v11 = vpop.f32.mrf.mxu3 }
 0x725   :  { %v826_v21 = vpack.c.bf16 %v822_v11, %v822_v11 }
 0x727   :  { %5308 = vmatmul.msk.bf16.vlgmr.msrb.gmra.mxu1 %vm431_vm1, %v826_v21 }
 0x72c   :  { %v824_v37 = vpop.f32.mrf.mxu3 }
 0x737   :  { %952 = vmatmul.bf16.vlgmr.msra.gmra.mxu1 %v919_v29 }
 0x7a4   :  { %v6442_v22 = vpop.f32.mrf.mxu1 }
 0x7ac   :  { %v844_v48 = vpop.f32.mrf.mxu1 }
 0x7b4   :  { %v953_v27 = vpop.f32.mrf.mxu1 }
 0x7b5   :  { %v957_v50 = vpack.c.bf16 %v953_v27, %v953_v27 }
 0x7b7   :  { %5310 = vmatmul.msk.bf16.vlgmr.msrb.gmra.mxu3 %vm431_vm1, %v957_v50 }
 0x7bc   :  { %v955_v28 = vpop.f32.mrf.mxu1 }
 0x7c7   :  { %5359 = vmatmul.msk.bf16.vlgmr.msra.gmra.mxu3 %vm62_vm0, %v5680_v35 }
 0x7d7   :  { %5360 = vmatmul.msk.bf16.gmra.mxu3 %vm62_vm0, %v5681_v0 }
 0x7e7   :  { %5361 = vmatmul.msk.bf16.gmra.mxu3 %vm62_vm0, %v5682_v2 }
 0x7f7   :  { %5362 = vmatmul.msk.bf16.gmra.mxu3 %vm62_vm0, %v5683_v15 }
 0x807   :  { %5363 = vmatmul.msk.bf16.gmra.mxu3 %vm62_vm0, %v5684_v13 }
 0x817   :  { %5364 = vmatmul.msk.bf16.gmra.mxu3 %vm62_vm0, %v5685_v61 }
 0x827   :  { %5365 = vmatmul.msk.bf16.gmra.mxu3 %vm62_vm0, %v5686_v52 }
 0x837   :  { %5366 = vmatmul.msk.bf16.gmra.mxu3 %vm62_vm0, %v5687_v60 }
 0x83a   :  { %v6477_v20 = vpop.f32.mrf.mxu3 }
 0x842   :  { %v975_v40 = vpop.f32.mrf.mxu3 }
 0x84a   :  { %v6479_v31 = vpop.f32.mrf.mxu3 }
 0x84b   :  { %v1196_v3 = vadd.f32 %v6479_v31, %v6083_v30 }
 0x84d   :  { %v1212_v18 = vpack.c.bf16 %v1196_v3, %v1196_v3 }
 0x84f   :  { %v1335_v37 = vunpack.c.l.b16 %v1212_v18 }
 0x852   :  { %v6481_v4 = vpop.f32.mrf.mxu3 }
 0x853   :  { %v1197_v63 = vadd.f32 %v6481_v4, %v6083_v30 }
 0x855   :  { %v1213_v34 = vpack.c.bf16 %v1197_v63, %v1197_v63 }
 0x857   :  { %v1336_v21 = vunpack.c.l.b16 %v1213_v34 }
 0x859   :  { %v6516_v39 = vpack.c.b16 %v1336_v21, %v1335_v37 }
 0x85a   :  { %v6483_v54 = vpop.f32.mrf.mxu3 }
 0x862   :  { %v6485_v6 = vpop.f32.mrf.mxu3 }
 0x86a   :  { %v6487_v7 = vpop.f32.mrf.mxu3 }
 0x86b   :  { %v1200_v47 = vadd.f32 %v6487_v7, %v6083_v30 }
 0x86d   :  { %v1216_v45 = vpack.c.bf16 %v1200_v47, %v1200_v47 }
 0x86f   :  { %v1339_v33 = vunpack.c.l.b16 %v1216_v45 }
 0x872   :  { %v6489_v57 = vpop.f32.mrf.mxu3 }
 0x873   :  { %v1201_v32 = vadd.f32 %v6489_v57, %v6083_v30 }
 0x875   :  { %v1217_v16 = vpack.c.bf16 %v1201_v32, %v1201_v32 }
 0x877   :  { %v1340_v24 = vunpack.c.l.b16 %v1217_v16 }
 0x879   :  { %v6512_v36 = vpack.c.b16 %v1340_v24, %v1339_v33 }
 0x87a   :  { %v6491_v19 = vpop.f32.mrf.mxu3 }
 0x882   :  { %v6493_v38 = vpop.f32.mrf.mxu3 }
 0x88a   :  { %v6495_v58 = vpop.f32.mrf.mxu3 }
 0x88b   :  { %v1204_v41 = vadd.f32 %v6495_v58, %v6083_v30 }
 0x88d   :  { %v1220_v46 = vpack.c.bf16 %v1204_v41, %v1204_v41 }
 0x88f   :  { %v1343_v14 = vunpack.c.l.b16 %v1220_v46 }
 0x892   :  { %v1146_v8 = vpop.f32.mrf.mxu3 }
 0x893   :  { %v1205_v5 = vadd.f32 %v1146_v8, %v6083_v30  ;;  %v1173_v33 = vadd.f32 %v1146_v8, %v6100_v49 }
 0x895   :  { %v1221_v9 = vpack.c.bf16 %v1205_v5, %v1205_v5 }
 0x897   :  { %v1344_v55 = vunpack.c.l.b16 %v1221_v9 }
 0x899   :  { %v6504_v10 = vpack.c.b16 %v1344_v55, %v1343_v14 }
 0x89a   :  { %v1149_v51 = vpop.f32.mrf.mxu3 }
 0x89b   :  { %1367 = vrot.lane.b32.xlu2 %v6504_v10, %s5929_s0  ;;  %v1174_v34 = vadd.f32 %v1149_v51, %v6100_v49 }
 0x8a2   :  { %v1151_v11 = vpop.f32.mrf.mxu3 }
 0x8a3   :  { %1363 = vrot.lane.b32.xlu2 %v6512_v36, %s5929_s0  ;;  %v1175_v45 = vadd.f32 %v1151_v11, %v6100_v49  ;;  %v1207_v18 = vadd.f32 %v1151_v11, %v6083_v30  ;;  %v1203_v11 = vadd.f32 %v6493_v38, %v6083_v30 }
 0x8aa   :  { %v1154_v44 = vpop.f32.mrf.mxu3 }
 0x8ab   :  { %1359 = vrot.lane.b32.xlu2 %v6516_v39, %s5929_s0  ;;  %v1176_v13 = vadd.f32 %v1154_v44, %v6100_v49  ;;  %v1208_v40 = vadd.f32 %v1154_v44, %v6083_v30  ;;  %v1172_v44 = vadd.f32 %v6495_v58, %v6100_v49 }
 0x8ad   :  { %v1192_v47 = vpack.c.bf16 %v1176_v13, %v1176_v13  ;;  %v1224_v63 = vpack.c.bf16 %v1208_v40, %v1208_v40  ;;  %v1202_v40 = vadd.f32 %v6491_v19, %v6083_v30 }
 0x8af   :  { %v1256_v21 = vunpack.c.l.b16 %v1192_v47 }
 0x8b2   :  { %v1156_v29 = vpop.f32.mrf.mxu3 }
 0x8b3   :  { %v1177_v50 = vadd.f32 %v1156_v29, %v6100_v49  ;;  %v1209_v61 = vadd.f32 %v1156_v29, %v6083_v30  ;;  %v1206_v29 = vadd.f32 %v1149_v51, %v6083_v30  ;;  %v1167_v51 = vadd.f32 %v6485_v6, %v6100_v49 }
 0x8b5   :  { %v1193_v41 = vpack.c.bf16 %v1177_v50, %v1177_v50  ;;  %v1225_v14 = vpack.c.bf16 %v1209_v61, %v1209_v61  ;;  %v1189_v50 = vpack.c.bf16 %v1173_v33, %v1173_v33 }
 0x8b7   :  { %v1257_v24 = vunpack.c.l.b16 %v1193_v41  ;;  %v1348_v37 = vunpack.c.l.b16 %v1225_v14  ;;  %v1253_v13 = vunpack.c.l.b16 %v1189_v50 }
 0x8ba   :  { %v1159_v43 = vpop.f32.mrf.mxu3 }
 0x8bb   :  { %v1178_v48 = vadd.f32 %v1159_v43, %v6100_v49  ;;  %v1210_v27 = vadd.f32 %v1159_v43, %v6083_v30  ;;  %v1191_v43 = vpack.c.bf16 %v1175_v45, %v1175_v45 }
 0x8bd   :  { %v1194_v35 = vpack.c.bf16 %v1178_v48, %v1178_v48  ;;  %v1226_v0 = vpack.c.bf16 %v1210_v27, %v1210_v27  ;;  %v1347_v48 = vunpack.c.l.b16 %v1224_v63  ;;  %v6545_v27 = vpack.c.b16 %v1257_v24, %v1256_v21 }
 0x8be   :  { %v1218_v63 = vpack.c.bf16 %v1202_v40, %v1202_v40  ;;  %v1171_v24 = vadd.f32 %v6493_v38, %v6100_v49  ;;  %v1031_v21 = vadd.f32 %v171_v59, %v6353_v17  ;;  %v1168_v59 = vadd.f32 %v6487_v7, %v6100_v49 }
 0x8bf   :  { %v1258_v46 = vunpack.c.l.b16 %v1194_v35  ;;  %v1349_v5 = vunpack.c.l.b16 %v1226_v0  ;;  %v1223_v35 = vpack.c.bf16 %v1207_v18, %v1207_v18  ;;  %v6547_v8 = vpack.c.b16 %v1348_v37, %v1347_v48 }
 0x8c0   :  { %v1188_v0 = vpack.c.bf16 %v1172_v44, %v1172_v44  ;;  %v1290_v58 = vsel %vm431_vm1, %v6545_v27, 0  ;;  %v1341_v37 = vunpack.c.l.b16 %v1218_v63  ;;  %v1187_v44 = vpack.c.bf16 %v1171_v24, %v1171_v24 }
 0x8c1   :  { %v1032_v50 = vpack.c.bf16 %v1031_v21, %v1031_v21  ;;  %v1165_v7 = vadd.f32 %v6481_v4, %v6100_v49 }
 0x8c2   :  { %v1161_v28 = vpop.f32.mrf.mxu3  ;;  %v1252_v41 = vunpack.c.l.b16 %v1188_v0 }
 0x8c3   :  { %v1179_v2 = vadd.f32 %v1161_v28, %v6100_v49  ;;  %v1211_v15 = vadd.f32 %v1161_v28, %v6083_v30  ;;  %v1190_v28 = vpack.c.bf16 %v1174_v34, %v1174_v34  ;;  %v1170_v34 = vadd.f32 %v6491_v19, %v6100_v49 }
 0x8c4   :  { %v6565_v47 = vpack.c.b16 %v1253_v13, %v1252_v41  ;;  %v1419_v0 = vunpack.c.l.b16 %v1032_v50  ;;  %v1181_v40 = vpack.c.bf16 %v1165_v7, %v1165_v7 }
 0x8c5   :  { %v1195_v52 = vpack.c.bf16 %v1179_v2, %v1179_v2  ;;  %v1227_v60 = vpack.c.bf16 %v1211_v15, %v1211_v15  ;;  %v1222_v2 = vpack.c.bf16 %v1206_v29, %v1206_v29  ;;  %v1255_v15 = vunpack.c.l.b16 %v1191_v43 }
 0x8c6   :  { %v1254_v61 = vunpack.c.l.b16 %v1190_v28  ;;  %v1186_v43 = vpack.c.bf16 %v1170_v34, %v1170_v34  ;;  %v1169_v28 = vadd.f32 %v6489_v57, %v6100_v49  ;;  %v1284_v1 = vsel %vm431_vm1, %v6565_v47, 0 }
 0x8c7   :  { %v1259_v32 = vunpack.c.l.b16 %v1195_v52  ;;  %v1350_v9 = vunpack.c.l.b16 %v1227_v60  ;;  %v1346_v52 = vunpack.c.l.b16 %v1223_v35  ;;  %v1166_v60 = vadd.f32 %v6483_v54, %v6100_v49 }
 0x8c8   :  { %v1251_v35 = vunpack.c.l.b16 %v1187_v44  ;;  %v1250_v19 = vunpack.c.l.b16 %v1186_v43  ;;  %v1184_v57 = vpack.c.bf16 %v1168_v59, %v1168_v59 }
 0x8c9   :  { %v6528_v55 = vpack.c.b16 %v1259_v32, %v1258_v46  ;;  %v6530_v16 = vpack.c.b16 %v1350_v9, %v1349_v5  ;;  %v1345_v46 = vunpack.c.l.b16 %v1222_v2  ;;  %v6563_v5 = vpack.c.b16 %v1255_v15, %v1254_v61 }
 0x8ca   :  { %v1183_v32 = vpack.c.bf16 %v1167_v51, %v1167_v51  ;;  %v1219_v9 = vpack.c.bf16 %v1203_v11, %v1203_v11  ;;  %v1182_v45 = vpack.c.bf16 %v1166_v60, %v1166_v60  ;;  %v1185_v2 = vpack.c.bf16 %v1169_v28, %v1169_v28 }
 0x8cb   :  { %1373 = vrot.lane.b32.xlu0 %v6530_v16, %s5929_s0  ;;  %1437 = vrot.lane.b32.xlu2 %v6528_v55, %s5930_s17  ;;  %v1293_v3 = vsel %vm431_vm1, %v6528_v55, 0  ;;  %v6567_v14 = vpack.c.b16 %v1346_v52, %v1345_v46  ;;  %v6596_v15 = vpack.c.b16 %v1251_v35, %v1250_v19  ;;  %v1248_v13 = vunpack.c.l.b16 %v1184_v57 }
 0x8cc   :  { %1295 = vmatpush.bf16.xpose.msra.mxu0 %v1293_v3  ;;  %v1287_v3 = vsel %vm431_vm1, %v6563_v5, 0  ;;  %v1247_v33 = vunpack.c.l.b16 %v1183_v32  ;;  %v1342_v18 = vunpack.c.l.b16 %v1219_v9  ;;  %v1246_v38 = vunpack.c.l.b16 %v1182_v45 }
 0x8cd   :  { %v1249_v51 = vunpack.c.l.b16 %v1185_v2  ;;  %v1281_v11 = vsel %vm431_vm1, %v6596_v15, 0  ;;  %v1164_v60 = vadd.f32 %v6479_v31, %v6100_v49  ;;  %v1245_v46 = vunpack.c.l.b16 %v1181_v40 }
 0x8ce   :  { %v6582_v29 = vpack.c.b16 %v1247_v33, %v1246_v38  ;;  %v6584_v48 = vpack.c.b16 %v1342_v18, %v1341_v37  ;;  %v1199_v28 = vadd.f32 %v6485_v6, %v6083_v30 }
 0x8cf   :  { %v6604_v61 = vpack.c.b16 %v1249_v51, %v1248_v13  ;;  %v1180_v41 = vpack.c.bf16 %v1164_v60, %v1164_v60 }
 0x8d0   :  { %v1275_v32 = vsel %vm431_vm1, %v6582_v29, 0  ;;  %v1215_v59 = vpack.c.bf16 %v1199_v28, %v1199_v28 }
 0x8d1   :  { %v1278_v52 = vsel %vm431_vm1, %v6604_v61, 0  ;;  %v1244_v4 = vunpack.c.l.b16 %v1180_v41 }
 0x8d3   :  { %1371 = vrot.lane.b32.xlu0 %v6547_v8, %s5929_s0  ;;  %1435 = vrot.lane.b32.xlu2 %v6545_v27, %s5930_s17  ;;  %v6618_v9 = vpack.c.b16 %v1245_v46, %v1244_v4 }
 0x8d4   :  { %1296 = vmatpush.bf16.xpose.msra.mxu0 %v1290_v58  ;;  %v6598_v58 = vpack.c.b16 %v1419_v0, %v1419_v0  ;;  %v1338_v0 = vunpack.c.l.b16 %v1215_v59 }
 0x8d5   :  { %v1272_v45 = vsel %vm431_vm1, %v6618_v9, 0 }
 0x8db   :  { %1369 = vrot.lane.b32.xlu0 %v6567_v14, %s5929_s0  ;;  %1431 = vrot.lane.b32.xlu2 %v6565_v47, %s5930_s17 }
 0x8dc   :  { %1297 = vmatpush.bf16.xpose.msra.mxu0 %v1287_v3 }
 0x8e3   :  { %1365 = vrot.lane.b32.xlu0 %v6584_v48, %s5929_s0  ;;  %1425 = vrot.lane.b32.xlu2 %v6582_v29, %s5930_s17 }
 0x8e4   :  { %1298 = vmatpush.bf16.xpose.msra.mxu0 %v1284_v1  ;;  %v1198_v1 = vadd.f32 %v6483_v54, %v6083_v30 }
 0x8e6   :  { %v1214_v19 = vpack.c.bf16 %v1198_v1, %v1198_v1 }
 0x8e8   :  { %v1337_v57 = vunpack.c.l.b16 %v1214_v19 }
 0x8ea   :  { %v6670_v51 = vpack.c.b16 %v1338_v0, %v1337_v57 }
 0x8eb   :  { %1421 = vrot.lane.b32.xlu2 %v6598_v58, %s5930_s17 }
 0x8ec   :  { %1299 = vmatpush.bf16.xpose.msra.mxu0 %v1281_v11 }
 0x8f3   :  { %1563 = vrot.lane.b32.xlu2 %v6545_v27, %s5931_s18 }
 0x8f4   :  { %1300 = vmatpush.bf16.xpose.msra.mxu0 %v1278_v52 }
 0x8f5   :  { %v1368_v49 = vpop.permute.xlu2 %1367 }
 0x8fb   :  { %1504 = vrot.lane.b32.xlu2 %v6530_v16, %s5932_s19 }
 0x8fc   :  { %1301 = vmatpush.bf16.xpose.msra.mxu0 %v1275_v32 }
 0x8fd   :  { %v1364_v31 = vpop.permute.xlu2 %1363 }
 0x903   :  { %1559 = vrot.lane.b32.xlu2 %v6565_v47, %s5931_s18 }
 0x904   :  { %1302 = vmatpush.bf16.xpose.msra.mxu0 %v1272_v45 }
 0x905   :  { %v6632_v63 = vpop.permute.xlu2 %1359 }
 0x90b   :  { %1498 = vrot.lane.b32.xlu2 %v6504_v10, %s5932_s19  ;;  %5367 = vmatmul.msk.bf16.vlgmr.msra.gmra.mxu0 %vm431_vm1, %v1032_v50 }
 0x90c   :  { %1538 = vmatpush.bf16.msrb.mxu0 %v6305_v56 }
 0x913   :  { %1496 = vrot.lane.b32.xlu2 %v6584_v48, %s5932_s19 }
 0x91b   :  { %1555 = vrot.lane.b32.xlu2 %v6604_v61, %s5931_s18 }
 0x923   :  { %1553 = vrot.lane.b32.xlu2 %v6582_v29, %s5931_s18 }
 0x925   :  { %v1438_v24 = vpop.permute.xlu2 %1437 }
 0x926   :  { %v1464_v56 = vsel %vm431_vm1, %v1438_v24, 0 }
 0x927   :  { %1466 = vmatpush.bf16.xpose.msrb.mxu2 %v1464_v56 }
 0x92b   :  { %1549 = vrot.lane.b32.xlu2 %v6598_v58, %s5931_s18 }
 0x92d   :  { %v1436_v3 = vpop.permute.xlu2 %1435 }
 0x92e   :  { %v1461_v33 = vsel %vm431_vm1, %v1436_v3, 0 }
 0x92f   :  { %1467 = vmatpush.bf16.xpose.msrb.mxu2 %v1461_v33 }
 0x933   :  { %1691 = vrot.lane.b32.xlu2 %v6545_v27, %s5933_s2 }
 0x935   :  { %v6642_v34 = vpop.permute.xlu2 %1431 }
 0x936   :  { %v1455_v3 = vsel %vm431_vm1, %v6642_v34, 0 }
 0x93b   :  { %1685 = vrot.lane.b32.xlu2 %v6596_v15, %s5933_s2 }
 0x93d   :  { %v1374_v18 = vpop.permute.xlu0 %1373  ;;  %v6646_v21 = vpop.permute.xlu2 %1425 }
 0x93e   :  { %1383 = vmatpush.bf16.msrb.mxu1 %v1374_v18 }
 0x943   :  { %1679 = vrot.lane.b32.xlu2 %v6618_v9, %s5933_s2 }
 0x945   :  { %v1372_v38 = vpop.permute.xlu0 %1371  ;;  %v6650_v37 = vpop.permute.xlu2 %1421 }
 0x946   :  { %1384 = vmatpush.bf16.msrb.mxu1 %v1372_v38 }
 0x94b   :  { %1632 = vrot.lane.b32.xlu2 %v6530_v16, %s5934_s30 }
 0x94d   :  { %v1370_v27 = vpop.permute.xlu0 %1369  ;;  %v6654_v44 = vpop.permute.xlu2 %1563 }
 0x94e   :  { %1385 = vmatpush.bf16.msrb.mxu1 %v1370_v27 }
 0x952   :  { %1386 = vmatpush.bf16.msrb.mxu1 %v1368_v49 }
 0x953   :  { %1628 = vrot.lane.b32.xlu2 %v6567_v14, %s5934_s30 }
 0x955   :  { %v1366_v43 = vpop.permute.xlu0 %1365  ;;  %v1505_v50 = vpop.permute.xlu2 %1504 }
 0x956   :  { %1387 = vmatpush.bf16.msrb.mxu1 %v1366_v43 }
 0x95a   :  { %1388 = vmatpush.bf16.msrb.mxu1 %v1364_v31 }
 0x95b   :  { %1624 = vrot.lane.b32.xlu2 %v6584_v48, %s5934_s30 }
 0x95d   :  { %v6662_v35 = vpop.permute.xlu2 %1559 }
 0x963   :  { %1622 = vrot.lane.b32.xlu2 %v6512_v36, %s5934_s30 }
 0x965   :  { %v6668_v2 = vpop.permute.xlu2 %1498 }
 0x96b   :  { %1620 = vrot.lane.b32.xlu2 %v6670_v51, %s5934_s30 }
 0x96d   :  { %v6674_v6 = vpop.permute.xlu2 %1496 }
 0x975   :  { %v6676_v11 = vpop.permute.xlu2 %1555 }
 0x97d   :  { %v6678_v13 = vpop.permute.xlu2 %1553 }
 0x985   :  { %v6680_v30 = vpop.permute.xlu2 %1549 }
 0x988   :  { %v1304_v54 = vpop.f32.mrf.mxu0 }
 0x989   :  { %v1308_v7 = vmul.f32 0.35355338, %v1304_v54 }
 0x98b   :  { %1309 = vmax.xlane.f32.xlu1 %v1308_v7 }
 0x98d   :  { %v6682_v52 = vpop.permute.xlu2 %1691 }
 0x990   :  { %v1306_v60 = vpop.f32.mrf.mxu0 }
 0x995   :  { %v6684_v40 = vpop.permute.xlu2 %1685 }
 0x99d   :  { %v6686_v41 = vpop.permute.xlu2 %1679 }
 0x9a4   :  { %1361 = vrot.lane.b32.xlu1 %v6670_v51, %s5929_s0 }
 0x9a5   :  { %v1633_v46 = vpop.permute.xlu2 %1632 }
 0x9a6   :  { %1642 = vmatpush.bf16.msra.mxu0 %v1633_v46 }
 0x9ac   :  { %1433 = vrot.lane.b32.xlu1 %v6563_v5, %s5930_s17 }
 0x9b4   :  { %1427 = vrot.lane.b32.xlu1 %v6604_v61, %s5930_s17 }
 0x9bc   :  { %1423 = vrot.lane.b32.xlu1 %v6618_v9, %s5930_s17 }
 0x9fe   :  { %v1310_v32 = vpop.xlane.xlu1 %1309 }
 0x9ff   :  { %v1311_v4 = vsub.f32 %v1308_v7, %v1310_v32  ;;  %v1717_v7 = vsel %vm431_vm1, %v6682_v52, 0 }
 0xa01   :  { %v1312_v45 = vmul.f32 1.442695, %v1311_v4 }
 0xa03   :  { %5773 = vpow2.f32 %v1312_v45 }
 0xa09   :  { %v5774_v49 = vpop.eup %5773 }
 0xa0a   :  { %1314 = vadd.xlane.f32.xlu0 %v5774_v49 }
 0xa16   :  { %v1362_v31 = vpop.permute.xlu1 %1361 }
 0xa17   :  { %1389 = vmatpush.bf16.msrb.mxu1 %v1362_v31 }
 0xa1b   :  { %1390 = vmatpush.bf16.msrb.mxu1 %v6632_v63 }
 0xa1e   :  { %1429 = vrot.lane.b32.xlu0 %v6596_v15, %s5930_s17  ;;  %v1434_v24 = vpop.permute.xlu1 %1433 }
 0xa1f   :  { %1514 = vmatpush.bf16.msra.mxu1 %v1505_v50  ;;  %v1458_v56 = vsel %vm431_vm1, %v1434_v24, 0 }
 0xa20   :  { %1468 = vmatpush.bf16.xpose.msrb.mxu2 %v1458_v56 }
 0xa26   :  { %1565 = vrot.lane.b32.xlu0 %v6528_v55, %s5931_s18 }
 0xa28   :  { %1469 = vmatpush.bf16.xpose.msrb.mxu2 %v1455_v3 }
 0xa2e   :  { %1561 = vrot.lane.b32.xlu0 %v6563_v5, %s5931_s18 }
 0xa36   :  { %1502 = vrot.lane.b32.xlu0 %v6547_v8, %s5932_s19 }
 0xa3e   :  { %1500 = vrot.lane.b32.xlu0 %v6567_v14, %s5932_s19 }
 0xa46   :  { %1557 = vrot.lane.b32.xlu0 %v6596_v15, %s5931_s18 }
 0xa4e   :  { %1494 = vrot.lane.b32.xlu0 %v6512_v36, %s5932_s19 }
 0xa56   :  { %1490 = vrot.lane.b32.xlu0 %v6516_v39, %s5932_s19 }
 0xa5e   :  { %1551 = vrot.lane.b32.xlu0 %v6618_v9, %s5931_s18  ;;  %v1428_v9 = vpop.permute.xlu1 %1427 }
 0xa66   :  { %1693 = vrot.lane.b32.xlu0 %v6528_v55, %s5933_s2  ;;  %v1449_v55 = vsel %vm431_vm1, %v1428_v9, 0 }
 0xa6e   :  { %1687 = vrot.lane.b32.xlu0 %v6565_v47, %s5933_s2  ;;  %v1446_v47 = vsel %vm431_vm1, %v6646_v21, 0 }
 0xa76   :  { %1681 = vrot.lane.b32.xlu0 %v6582_v29, %s5933_s2  ;;  %v1424_v29 = vpop.permute.xlu1 %1423 }
 0xa77   :  { %v1443_v28 = vsel %vm431_vm1, %v1424_v29, 0  ;;  %v1583_v29 = vsel %vm431_vm1, %v6662_v35, 0  ;;  %v1577_v35 = vsel %vm431_vm1, %v6676_v11, 0 }
 0xa7d   :  { %v1315_v63 = vpop.xlane.xlu0 %1314 }
 0xa7e   :  { %5775 = vrcp.f32 %v1315_v63 }
 0xa84   :  { %v5776_v15 = vpop.eup %5775 }
 0xa85   :  { %v1317_v33 = vmul.f32 %v5776_v15, %v5774_v49 }
 0xa87   :  { %v1318_v34 = vpack.c.bf16 %v1317_v33, %v1317_v33  ;;  %v1589_v33 = vsel %vm431_vm1, %v6654_v44, 0 }
 0xa89   :  { %1391 = vmatmul.bf16.vlgmr.msrb.gmra.mxu1 %v1318_v34 }
 0xa90   :  { %v1430_v18 = vpop.permute.xlu0 %1429 }
 0xa91   :  { %v1452_v38 = vsel %vm431_vm1, %v1430_v18, 0 }
 0xa92   :  { %1470 = vmatpush.bf16.xpose.msrb.mxu2 %v1452_v38 }
 0xa98   :  { %v1566_v27 = vpop.permute.xlu0 %1565 }
 0xa9a   :  { %1471 = vmatpush.bf16.xpose.msrb.mxu2 %v1449_v55 }
 0xaa0   :  { %v6726_v43 = vpop.permute.xlu0 %1561 }
 0xaa1   :  { %v1586_v9 = vsel %vm431_vm1, %v6726_v43, 0 }
 0xaa2   :  { %1472 = vmatpush.bf16.xpose.msrb.mxu2 %v1446_v47  ;;  %v1708_v47 = vsel %vm431_vm1, %v6684_v40, 0 }
 0xaa8   :  { %v1503_v50 = vpop.permute.xlu0 %1502 }
 0xaa9   :  { %1515 = vmatpush.bf16.msra.mxu1 %v1503_v50 }
 0xaaa   :  { %1473 = vmatpush.bf16.xpose.msrb.mxu2 %v1443_v28 }
 0xab0   :  { %v1501_v1 = vpop.permute.xlu0 %1500 }
 0xab1   :  { %1516 = vmatpush.bf16.msra.mxu1 %v1501_v1 }
 0xab5   :  { %1517 = vmatpush.bf16.msra.mxu1 %v6668_v2 }
 0xab8   :  { %v6732_v59 = vpop.permute.xlu0 %1557 }
 0xab9   :  { %1518 = vmatpush.bf16.msra.mxu1 %v6674_v6  ;;  %v1580_v43 = vsel %vm431_vm1, %v6732_v59, 0  ;;  %v1574_v59 = vsel %vm431_vm1, %v6678_v13, 0 }
 0xac0   :  { %v1495_v19 = vpop.permute.xlu0 %1494 }
 0xac1   :  { %1519 = vmatpush.bf16.msra.mxu1 %v1495_v19 }
 0xac8   :  { %v1491_v0 = vpop.permute.xlu0 %1490 }
 0xad0   :  { %v6735_v57 = vpop.permute.xlu0 %1551 }
 0xad8   :  { %v1694_v21 = vpop.permute.xlu0 %1693 }
 0xad9   :  { %v1720_v54 = vsel %vm431_vm1, %v1694_v21, 0  ;;  %v1699_v21 = vsel %vm431_vm1, %v6686_v41, 0 }
 0xada   :  { %1722 = vmatpush.bf16.xpose.msrb.mxu3 %v1720_v54 }
 0xae0   :  { %v1688_v34 = vpop.permute.xlu0 %1687 }
 0xae1   :  { %v1711_v38 = vsel %vm431_vm1, %v1688_v34, 0 }
 0xae2   :  { %1723 = vmatpush.bf16.xpose.msrb.mxu3 %v1717_v7  ;;  %v1571_v7 = vsel %vm431_vm1, %v6735_v57, 0 }
 0xae8   :  { %v1682_v1 = vpop.permute.xlu0 %1681 }
 0xae9   :  { %v1702_v40 = vsel %vm431_vm1, %v1682_v1, 0  ;;  %v6825_v1 = vld [vmem:[%s8404_s3 + $0x18] sm:$0xff] }
 0xb06   :  { %v1392_v60 = vpop.f32.mrf.mxu1 }
 0xb07   :  { %v1396_v46 = vpack.c.bf16 %v1392_v60, %v1392_v60 }
 0xb09   :  { %5368 = vmatmul.msk.bf16.vlgmr.msra.gmra.mxu2 %vm431_vm1, %v1396_v46 }
 0xb0a   :  { %1666 = vmatpush.bf16.msra.mxu2 %v6429_v42 }
 0xb0e   :  { %v1394_v2 = vpop.f32.mrf.mxu1 }
 0xb19   :  { %5369 = vmatmul.msk.bf16.vlgmr.msrb.gmra.mxu2 %vm431_vm1, %v6650_v37 }
 0xb8c   :  { %v6744_v6 = vpop.f32.mrf.mxu2 }
 0xb94   :  { %v1411_v32 = vpop.f32.mrf.mxu2 }
 0xb9c   :  { %v1475_v4 = vpop.f32.mrf.mxu2 }
 0xb9d   :  { %v1479_v45 = vmul.f32 0.35355338, %v1475_v4 }
 0xb9f   :  { %1480 = vmax.xlane.f32.xlu1 %v1479_v45 }
 0xba4   :  { %v1477_v49 = vpop.f32.mrf.mxu2 }
 0xc12   :  { %v1481_v31 = vpop.xlane.xlu1 %1480 }
 0xc13   :  { %v1482_v52 = vsub.f32 %v1479_v45, %v1481_v31 }
 0xc15   :  { %v1483_v24 = vmul.f32 1.442695, %v1482_v52 }
 0xc17   :  { %5777 = vpow2.f32 %v1483_v24 }
 0xc1d   :  { %v5778_v56 = vpop.eup %5777 }
 0xc1e   :  { %1485 = vadd.xlane.f32.xlu1 %v5778_v56 }
 0xc37   :  { %1492 = vrot.lane.b32.xlu1 %v6670_v51, %s5932_s19 }
 0xc3f   :  { %1689 = vrot.lane.b32.xlu1 %v6563_v5, %s5933_s2  ;;  %v1592_v5 = vsel %vm431_vm1, %v1566_v27, 0  ;;  %v1629_v27 = vpop.permute.xlu2 %1628 }
 0xc47   :  { %1683 = vrot.lane.b32.xlu1 %v6604_v61, %s5933_s2  ;;  %v1625_v44 = vpop.permute.xlu2 %1624 }
 0xc4f   :  { %1677 = vrot.lane.b32.xlu1 %v6598_v58, %s5933_s2 }
 0xc57   :  { %1630 = vrot.lane.b32.xlu1 %v6547_v8, %s5934_s30 }
 0xc5f   :  { %1626 = vrot.lane.b32.xlu1 %v6504_v10, %s5934_s30 }
 0xc91   :  { %v1486_v42 = vpop.xlane.xlu1 %1485 }
 0xc92   :  { %5779 = vrcp.f32 %v1486_v42 }
 0xc98   :  { %v5780_v37 = vpop.eup %5779 }
 0xc99   :  { %v1488_v63 = vmul.f32 %v5780_v37, %v5778_v56 }
 0xc9b   :  { %v1489_v61 = vpack.c.bf16 %v1488_v63, %v1488_v63 }
 0xca9   :  { %v1493_v3 = vpop.permute.xlu1 %1492 }
 0xcaa   :  { %1520 = vmatpush.bf16.msra.mxu1 %v1493_v3 }
 0xcae   :  { %1521 = vmatpush.bf16.msra.mxu1 %v1491_v0  ;;  %v1623_v0 = vpop.permute.xlu2 %1622 }
 0xcb1   :  { %1522 = vmatmul.bf16.vlgmr.msra.gmra.mxu1 %v1489_v61  ;;  %v1690_v15 = vpop.permute.xlu1 %1689 }
 0xcb2   :  { %1594 = vmatpush.bf16.xpose.msrb.mxu1 %v1592_v5  ;;  %v1714_v58 = vsel %vm431_vm1, %v1690_v15, 0 }
 0xcb3   :  { %1724 = vmatpush.bf16.xpose.msrb.mxu3 %v1714_v58 }
 0xcb6   :  { %v1621_v54 = vpop.permute.xlu2 %1620 }
 0xcb9   :  { %v1684_v18 = vpop.permute.xlu1 %1683 }
 0xcba   :  { %1595 = vmatpush.bf16.xpose.msrb.mxu1 %v1589_v33  ;;  %v1705_v28 = vsel %vm431_vm1, %v1684_v18, 0 }
 0xcbb   :  { %1725 = vmatpush.bf16.xpose.msrb.mxu3 %v1711_v38 }
 0xcc1   :  { %v1678_v55 = vpop.permute.xlu1 %1677 }
 0xcc2   :  { %1596 = vmatpush.bf16.xpose.msrb.mxu1 %v1586_v9 }
 0xcc3   :  { %1726 = vmatpush.bf16.xpose.msrb.mxu3 %v1708_v47 }
 0xcc9   :  { %v1631_v50 = vpop.permute.xlu1 %1630 }
 0xcca   :  { %1597 = vmatpush.bf16.xpose.msrb.mxu1 %v1583_v29  ;;  %1643 = vmatpush.bf16.msra.mxu0 %v1631_v50 }
 0xccb   :  { %1727 = vmatpush.bf16.xpose.msrb.mxu3 %v1705_v28 }
 0xcce   :  { %1644 = vmatpush.bf16.msra.mxu0 %v1629_v27 }
 0xcd1   :  { %v1627_v19 = vpop.permute.xlu1 %1626 }
 0xcd2   :  { %1598 = vmatpush.bf16.xpose.msrb.mxu1 %v1580_v43  ;;  %1645 = vmatpush.bf16.msra.mxu0 %v1627_v19  ;;  %v6831_v19 = vld [vmem:[%s8404_s3 + $0x10] sm:$0xff] }
 0xcd3   :  { %1728 = vmatpush.bf16.xpose.msrb.mxu3 %v1702_v40 }
 0xcd6   :  { %1646 = vmatpush.bf16.msra.mxu0 %v1625_v44 }
 0xcda   :  { %1599 = vmatpush.bf16.xpose.msrb.mxu1 %v1577_v35  ;;  %1647 = vmatpush.bf16.msra.mxu0 %v1623_v0 }
 0xcdb   :  { %1729 = vmatpush.bf16.xpose.msrb.mxu3 %v1699_v21 }
 0xcde   :  { %1648 = vmatpush.bf16.msra.mxu0 %v1621_v54 }
 0xce2   :  { %1600 = vmatpush.bf16.xpose.msrb.mxu1 %v1574_v59  ;;  %5373 = vmatmul.msk.bf16.vlgmr.msrb.gmra.mxu3 %vm431_vm1, %v1678_v55  ;;  %v5690_v59 = vld [vmem:[%s8402_s1 + $0x80] sm:$0xff] }
 0xcea   :  { %1601 = vmatpush.bf16.xpose.msrb.mxu1 %v1571_v7 }
 0xcf1   :  { %5371 = vmatmul.msk.bf16.vlgmr.msrb.gmra.mxu1 %vm431_vm1, %v6680_v30  ;;  %v6792_v30 = vld [vmem:[%s8406_s5 + $0x8] sm:$0x3f] }
 0xcf2   :  { %v1849_v57 = vperm.slane %v6792_v30, 0  ;;  %v2033_v7 = vperm.slane %v6792_v30, 2 }
 0xd2e   :  { %v1523_v11 = vpop.f32.mrf.mxu1 }
 0xd2f   :  { %v1527_v60 = vpack.c.bf16 %v1523_v11, %v1523_v11  ;;  %v5691_v11 = vld [vmem:[%s8402_s1 + $0x88] sm:$0xff] }
 0xd31   :  { %5370 = vmatmul.msk.bf16.vlgmr.msrb.gmra.mxu0 %vm431_vm1, %v1527_v60  ;;  %v5692_v60 = vld [vmem:[%s8402_s1 + $0x90] sm:$0xff] }
 0xd36   :  { %v1525_v41 = vpop.f32.mrf.mxu1 }
 0xd37   :  { %v5693_v41 = vld [vmem:[%s8402_s1 + $0x98] sm:$0xff] }
 0xd65   :  { %v1731_v46 = vpop.f32.mrf.mxu3 }
 0xd66   :  { %v1735_v2 = vmul.f32 0.35355338, %v1731_v46  ;;  %v5694_v46 = vld [vmem:[%s8402_s1 + $0xa0] sm:$0xff] }
 0xd68   :  { %1736 = vmax.xlane.f32.xlu2 %v1735_v2 }
 0xd6d   :  { %v1733_v4 = vpop.f32.mrf.mxu3 }
 0xd6e   :  { %v1603_v32 = vpop.f32.mrf.mxu1 }
 0xd6f   :  { %v1607_v13 = vmul.f32 0.35355338, %v1603_v32  ;;  %v5696_v32 = vld [vmem:[%s8402_s1 + $0xb0] sm:$0xff] }
 0xd71   :  { %1608 = vmax.xlane.f32.xlu0 %v1607_v13 }
 0xd76   :  { %v1605_v45 = vpop.f32.mrf.mxu1 }
 0xd80   :  { %1752 = vrot.lane.b32.xlu2 %v6584_v48, %s5935_s12 }
 0xd85   :  { %1618 = vrot.lane.b32.xlu0 %v6516_v39, %s5934_s30 }
 0xd88   :  { %1851 = vrot.lane.b32.xlu2 %v1849_v57, %s5928_s11 }
 0xd8d   :  { %1760 = vrot.lane.b32.xlu0 %v6530_v16, %s5935_s12 }
 0xd90   :  { %2035 = vrot.lane.b32.xlu2 %v2033_v7, %s5928_s11 }
 0xd95   :  { %1756 = vrot.lane.b32.xlu0 %v6567_v14, %s5935_s12 }
 0xd9d   :  { %1754 = vrot.lane.b32.xlu0 %v6504_v10, %s5935_s12 }
 0xdae   :  { %v6802_v48 = vpop.f32.mrf.mxu0 }
 0xdb6   :  { %v1542_v49 = vpop.f32.mrf.mxu0 }
 0xddb   :  { %v1737_v31 = vpop.xlane.xlu2 %1736 }
 0xddc   :  { %v1738_v52 = vsub.f32 %v1735_v2, %v1737_v31  ;;  %v5695_v2 = vld [vmem:[%s8402_s1 + $0xa8] sm:$0xff] }
 0xdde   :  { %v1739_v24 = vmul.f32 1.442695, %v1738_v52 }
 0xde0   :  { %5781 = vpow2.f32 %v1739_v24 }
 0xde3   :  { %v1753_v14 = vpop.permute.xlu2 %1752 }
 0xde4   :  { %v1609_v56 = vpop.xlane.xlu0 %1608 }
 0xde5   :  { %v1610_v42 = vsub.f32 %v1607_v13, %v1609_v56  ;;  %v5697_v13 = vld [vmem:[%s8402_s1 + $0xb8] sm:$0xff] }
 0xde6   :  { %v5782_v3 = vpop.eup %5781 }
 0xde7   :  { %v1611_v37 = vmul.f32 1.442695, %v1610_v42  ;;  %1741 = vadd.xlane.f32.xlu0 %v5782_v3 }
 0xde9   :  { %5783 = vpow2.f32 %v1611_v37 }
 0xdeb   :  { %v6809_v5 = vpop.permute.xlu2 %1851 }
 0xdec   :  { %v1854_v61 = vadd.f32 %v6809_v5, %v6205_v12 }
 0xdee   :  { %v1855_v15 = vpack.c.bf16 %v1854_v61, %v1854_v61 }
 0xdef   :  { %v5784_v16 = vpop.eup %5783 }
 0xdf0   :  { %1613 = vadd.xlane.f32.xlu1 %v5784_v16 }
 0xdf3   :  { %v6891_v61 = vpop.permute.xlu2 %2035 }
 0xdf7   :  { %v1619_v63 = vpop.permute.xlu0 %1618 }
 0xdf8   :  { %1649 = vmatpush.bf16.msra.mxu0 %v1619_v63 }
 0xdfc   :  { %1794 = vmatpush.bf16.msrb.mxu0 %v6437_v25  ;;  %v2071_v25 = vunpack.c.l.b16 %v1855_v15 }
 0xdfe   :  { %v6817_v58 = vpack.c.b16 %v2071_v25, %v2071_v25 }
 0xdff   :  { %v1761_v10 = vpop.permute.xlu0 %1760 }
 0xe00   :  { %1770 = vmatpush.bf16.msrb.mxu2 %v1761_v10 }
 0xe09   :  { %1758 = vrot.lane.b32.xlu1 %v6547_v8, %s5935_s12 }
 0xe11   :  { %1750 = vrot.lane.b32.xlu1 %v6512_v36, %s5935_s12 }
 0xe19   :  { %1748 = vrot.lane.b32.xlu1 %v6670_v51, %s5935_s12  ;;  %v1757_v51 = vpop.permute.xlu0 %1756 }
 0xe21   :  { %1746 = vrot.lane.b32.xlu1 %v6516_v39, %s5935_s12  ;;  %v1755_v38 = vpop.permute.xlu0 %1754 }
 0xe29   :  { %2073 = vrot.lane.b32.xlu1 %v6817_v58, %s5929_s0 }
 0xe5a   :  { %v1742_v47 = vpop.xlane.xlu0 %1741 }
 0xe63   :  { %v1614_v8 = vpop.xlane.xlu1 %1613 }
 0xe64   :  { %5785 = vrcp.f32 %v1614_v8 }
 0xe65   :  { %5787 = vrcp.f32 %v1742_v47 }
 0xe6a   :  { %v5786_v36 = vpop.eup %5785 }
 0xe6b   :  { %v1616_v33 = vmul.f32 %v5786_v36, %v5784_v16  ;;  %v5788_v50 = vpop.eup %5787 }
 0xe6c   :  { %v1744_v28 = vmul.f32 %v5788_v50, %v5782_v3 }
 0xe6d   :  { %v1617_v34 = vpack.c.bf16 %v1616_v33, %v1616_v33 }
 0xe6e   :  { %v1745_v43 = vpack.c.bf16 %v1744_v28, %v1744_v28 }
 0xe6f   :  { %1650 = vmatmul.bf16.vlgmr.msra.gmra.mxu0 %v1617_v34 }
 0xe70   :  { %1957 = vmatpush.bf16.msra.mxu0 %v6825_v1 }
 0xe74   :  { %1958 = vmatpush.bf16.msra.mxu0 %v6831_v19 }
 0xe7b   :  { %v1759_v18 = vpop.permute.xlu1 %1758 }
 0xe7c   :  { %1771 = vmatpush.bf16.msrb.mxu2 %v1759_v18 }
 0xe80   :  { %1772 = vmatpush.bf16.msrb.mxu2 %v1757_v51 }
 0xe83   :  { %v1751_v9 = vpop.permute.xlu1 %1750 }
 0xe84   :  { %1773 = vmatpush.bf16.msrb.mxu2 %v1755_v38 }
 0xe88   :  { %1774 = vmatpush.bf16.msrb.mxu2 %v1753_v14 }
 0xe8b   :  { %v1749_v39 = vpop.permute.xlu1 %1748 }
 0xe8c   :  { %1775 = vmatpush.bf16.msrb.mxu2 %v1751_v9  ;;  %v6900_v9 = vperm.slane %v6792_v30, 1 }
 0xe90   :  { %1776 = vmatpush.bf16.msrb.mxu2 %v1749_v39 }
 0xe93   :  { %v1747_v27 = vpop.permute.xlu1 %1746 }
 0xe94   :  { %1777 = vmatpush.bf16.msrb.mxu2 %v1747_v27 }
 0xeec   :  { %v1651_v55 = vpop.f32.mrf.mxu0 }
 0xeed   :  { %v1655_v29 = vpack.c.bf16 %v1651_v55, %v1651_v55 }
 0xeef   :  { %5372 = vmatmul.msk.bf16.vlgmr.msra.gmra.mxu2 %vm431_vm1, %v1655_v29 }
 0xef4   :  { %v1653_v44 = vpop.f32.mrf.mxu0 }
 0xeff   :  { %1778 = vmatmul.bf16.vlgmr.msrb.gmra.mxu2 %v1745_v43 }
 0xf72   :  { %v6834_v40 = vpop.f32.mrf.mxu2 }
 0xf7a   :  { %v1670_v0 = vpop.f32.mrf.mxu2 }
 0xf82   :  { %v1779_v35 = vpop.f32.mrf.mxu2 }
 0xf83   :  { %v1783_v21 = vpack.c.bf16 %v1779_v35, %v1779_v35 }
 0xf85   :  { %5374 = vmatmul.msk.bf16.vlgmr.msrb.gmra.mxu0 %vm431_vm1, %v1783_v21 }
 0xf8a   :  { %v1781_v54 = vpop.f32.mrf.mxu2 }
 0xf95   :  { %5440 = vmatmul.msk.bf16.vlgmr.msra.gmra.mxu0 %vm62_vm0, %v5690_v59 }
 0xfa5   :  { %5441 = vmatmul.msk.bf16.gmra.mxu0 %vm62_vm0, %v5691_v11 }
 0xfb5   :  { %5442 = vmatmul.msk.bf16.gmra.mxu0 %vm62_vm0, %v5692_v60 }
 0xfc5   :  { %5443 = vmatmul.msk.bf16.gmra.mxu0 %vm62_vm0, %v5693_v41 }
 0xfd5   :  { %5444 = vmatmul.msk.bf16.gmra.mxu0 %vm62_vm0, %v5694_v46 }
 0xfe5   :  { %5445 = vmatmul.msk.bf16.gmra.mxu0 %vm62_vm0, %v5695_v2 }
 0xff5   :  { %5446 = vmatmul.msk.bf16.gmra.mxu0 %vm62_vm0, %v5696_v32 }
0x1002   :  { %v6870_v4 = vpop.f32.mrf.mxu0 }
0x1005   :  { %5447 = vmatmul.msk.bf16.gmra.mxu0 %vm62_vm0, %v5697_v13 }
0x100a   :  { %v1798_v45 = vpop.f32.mrf.mxu0 }
0x1012   :  { %v6873_v57 = vpop.f32.mrf.mxu0 }
0x101a   :  { %v6875_v49 = vpop.f32.mrf.mxu0 }
0x1022   :  { %v6877_v31 = vpop.f32.mrf.mxu0 }
0x102a   :  { %v6879_v52 = vpop.f32.mrf.mxu0 }
0x1032   :  { %v6881_v24 = vpop.f32.mrf.mxu0 }
0x103a   :  { %v6883_v56 = vpop.f32.mrf.mxu0 }
0x1042   :  { %v6885_v42 = vpop.f32.mrf.mxu0 }
0x104a   :  { %v6887_v37 = vpop.f32.mrf.mxu0 }
0x1052   :  { %v6889_v3 = vpop.f32.mrf.mxu0 }
0x105a   :  { %v1982_v16 = vpop.f32.mrf.mxu0 }
0x1062   :  { %v1985_v63 = vpop.f32.mrf.mxu0 }
0x1063   :  { %v2048_v54 = vadd.f32 %v6891_v61, %v1985_v63 }
0x1065   :  { %v2064_v45 = vpack.c.bf16 %v2048_v54, %v2048_v54 }
0x106a   :  { %v1987_v10 = vpop.f32.mrf.mxu0 }
0x106b   :  { %v2049_v43 = vadd.f32 %v6891_v61, %v1987_v10 }
0x106d   :  { %v2065_v46 = vpack.c.bf16 %v2049_v43, %v2049_v43  ;;  %v2009_v43 = vadd.f32 %v6900_v9, %v6889_v3 }
0x1072   :  { %v1990_v14 = vpop.f32.mrf.mxu0 }
0x1073   :  { %v2050_v15 = vadd.f32 %v6891_v61, %v1990_v14  ;;  %v2013_v0 = vadd.f32 %v6900_v9, %v1990_v14 }
0x1075   :  { %v2066_v8 = vpack.c.bf16 %v2050_v15, %v2050_v15  ;;  %v2029_v2 = vpack.c.bf16 %v2013_v0, %v2013_v0  ;;  %v2012_v15 = vadd.f32 %v6900_v9, %v1987_v10 }
0x1077   :  { %v2194_v34 = vunpack.c.l.b16 %v2066_v8  ;;  %v2047_v8 = vadd.f32 %v6891_v61, %v1982_v16 }
0x107a   :  { %v1992_v25 = vpop.f32.mrf.mxu0 }
0x107b   :  { %v2051_v36 = vadd.f32 %v6891_v61, %v1992_v25  ;;  %v2014_v55 = vadd.f32 %v6900_v9, %v1992_v25 }
0x107d   :  { %v2067_v33 = vpack.c.bf16 %v2051_v36, %v2051_v36  ;;  %v2030_v59 = vpack.c.bf16 %v2014_v55, %v2014_v55  ;;  %v2011_v36 = vadd.f32 %v6900_v9, %v1985_v63 }
0x107f   :  { %v2195_v51 = vunpack.c.l.b16 %v2067_v33  ;;  %v2104_v25 = vunpack.c.l.b16 %v2030_v59  ;;  %v2193_v33 = vunpack.c.l.b16 %v2065_v46  ;;  %v2027_v55 = vpack.c.bf16 %v2011_v36, %v2011_v36 }
0x1080   :  { %v2008_v46 = vadd.f32 %v6900_v9, %v6887_v37 }
0x1081   :  { %v6895_v18 = vpack.c.b16 %v2195_v51, %v2194_v34  ;;  %v2103_v34 = vunpack.c.l.b16 %v2029_v2  ;;  %v2046_v51 = vadd.f32 %v6891_v61, %v6889_v3 }
0x1082   :  { %v1995_v38 = vpop.f32.mrf.mxu0  ;;  %v2024_v36 = vpack.c.bf16 %v2008_v46, %v2008_v46 }
0x1083   :  { %2218 = vrot.lane.b32.xlu0 %v6895_v18, %s5929_s0  ;;  %v2015_v39 = vadd.f32 %v6900_v9, %v1995_v38  ;;  %v2052_v27 = vadd.f32 %v6891_v61, %v1995_v38  ;;  %v2192_v38 = vunpack.c.l.b16 %v2064_v45  ;;  %v6923_v10 = vpack.c.b16 %v2104_v25, %v2103_v34 }
0x1084   :  { %v2043_v45 = vadd.f32 %v6891_v61, %v6883_v56 }
0x1085   :  { %v2031_v29 = vpack.c.bf16 %v2015_v39, %v2015_v39  ;;  %v2068_v44 = vpack.c.bf16 %v2052_v27, %v2052_v27  ;;  %v2028_v39 = vpack.c.bf16 %v2012_v15, %v2012_v15  ;;  %v2063_v27 = vpack.c.bf16 %v2047_v8, %v2047_v8 }
0x1086   :  { %v2137_v63 = vsel %vm431_vm1, %v6923_v10, 0  ;;  %v2007_v15 = vadd.f32 %v6900_v9, %v6885_v42  ;;  %v2042_v8 = vadd.f32 %v6891_v61, %v6881_v24  ;;  %v2059_v34 = vpack.c.bf16 %v2043_v45, %v2043_v45 }
0x1087   :  { %v2105_v7 = vunpack.c.l.b16 %v2031_v29  ;;  %v2196_v11 = vunpack.c.l.b16 %v2068_v44  ;;  %v2062_v29 = vpack.c.bf16 %v2046_v51, %v2046_v51  ;;  %v2010_v44 = vadd.f32 %v6900_v9, %v1982_v16 }
0x1088   :  { %v2191_v0 = vunpack.c.l.b16 %v2063_v27  ;;  %v2023_v51 = vpack.c.bf16 %v2007_v15, %v2007_v15  ;;  %v2006_v27 = vadd.f32 %v6900_v9, %v6883_v56 }
0x1089   :  { %v2190_v16 = vunpack.c.l.b16 %v2062_v29  ;;  %v2026_v54 = vpack.c.bf16 %v2010_v44, %v2010_v44  ;;  %v2041_v29 = vadd.f32 %v6891_v61, %v6879_v52  ;;  %v2005_v44 = vadd.f32 %v6900_v9, %v6881_v24 }
0x108a   :  { %v1997_v47 = vpop.f32.mrf.mxu0 }
0x108b   :  { %v2016_v50 = vadd.f32 %v6900_v9, %v1997_v47  ;;  %v2053_v28 = vadd.f32 %v6891_v61, %v1997_v47  ;;  %v6925_v47 = vpack.c.b16 %v2193_v33, %v2192_v38  ;;  %v2100_v2 = vunpack.c.l.b16 %v2026_v54 }
0x108d   :  { %v2032_v35 = vpack.c.bf16 %v2016_v50, %v2016_v50  ;;  %v2069_v21 = vpack.c.bf16 %v2053_v28, %v2053_v28  ;;  %v2102_v50 = vunpack.c.l.b16 %v2028_v39  ;;  %v2045_v28 = vadd.f32 %v6891_v61, %v6887_v37 }
0x108e   :  { %v2058_v39 = vpack.c.bf16 %v2042_v8, %v2042_v8 }
0x108f   :  { %v2106_v60 = vunpack.c.l.b16 %v2032_v35  ;;  %v2197_v41 = vunpack.c.l.b16 %v2069_v21  ;;  %v2101_v35 = vunpack.c.l.b16 %v2027_v55  ;;  %v2044_v21 = vadd.f32 %v6891_v61, %v6885_v42 }
0x1090   :  { %v2098_v55 = vunpack.c.l.b16 %v2024_v36  ;;  %v2186_v56 = vunpack.c.l.b16 %v2058_v39 }
0x1091   :  { %v6910_v32 = vpack.c.b16 %v2106_v60, %v2105_v7  ;;  %v6912_v13 = vpack.c.b16 %v2197_v41, %v2196_v11  ;;  %v6938_v59 = vpack.c.b16 %v2102_v50, %v2101_v35  ;;  %v2061_v7 = vpack.c.bf16 %v2045_v28, %v2045_v28 }
0x1092   :  { %v2025_v11 = vpack.c.bf16 %v2009_v43, %v2009_v43  ;;  %v6940_v60 = vpack.c.b16 %v2191_v0, %v2190_v16  ;;  %v2060_v41 = vpack.c.bf16 %v2044_v21, %v2044_v21  ;;  %v2187_v50 = vunpack.c.l.b16 %v2059_v34 }
0x1093   :  { %2220 = vrot.lane.b32.xlu2 %v6912_v13, %s5929_s0  ;;  %v2140_v14 = vsel %vm431_vm1, %v6910_v32, 0  ;;  %v2134_v3 = vsel %vm431_vm1, %v6938_v59, 0  ;;  %v2189_v25 = vunpack.c.l.b16 %v2061_v7  ;;  %v2040_v28 = vadd.f32 %v6891_v61, %v6877_v31 }
0x1094   :  { %2142 = vmatpush.bf16.xpose.msra.mxu1 %v2140_v14  ;;  %v2099_v14 = vunpack.c.l.b16 %v2025_v11  ;;  %v2188_v37 = vunpack.c.l.b16 %v2060_v41  ;;  %v2022_v43 = vpack.c.bf16 %v2006_v27, %v2006_v27  ;;  %v2057_v35 = vpack.c.bf16 %v2041_v29, %v2041_v29 }
0x1095   :  { %v2021_v21 = vpack.c.bf16 %v2005_v44, %v2005_v44  ;;  %v6972_v16 = vpack.c.b16 %v2187_v50, %v2186_v56  ;;  %v2056_v54 = vpack.c.bf16 %v2040_v28, %v2040_v28  ;;  %v2004_v7 = vadd.f32 %v6900_v9, %v6879_v52  ;;  %v2074_v50 = vpop.permute.xlu1 %2073 }
0x1096   :  { %v6954_v33 = vpack.c.b16 %v2100_v2, %v2099_v14  ;;  %v6956_v38 = vpack.c.b16 %v2189_v25, %v2188_v37  ;;  %v2096_v11 = vunpack.c.l.b16 %v2022_v43  ;;  %v2003_v41 = vadd.f32 %v6900_v9, %v6877_v31  ;;  %v5380_v43 = vld [vmem:[%s8405_s4 + $0x10] sm:$0xf] }
0x1097   :  { %v2185_v46 = vunpack.c.l.b16 %v2057_v35  ;;  %v2095_v2 = vunpack.c.l.b16 %v2021_v21  ;;  %v2020_v45 = vpack.c.bf16 %v2004_v7, %v2004_v7  ;;  %v2002_v52 = vadd.f32 %v6900_v9, %v6875_v49 }
0x1098   :  { %v2131_v42 = vsel %vm431_vm1, %v6954_v33, 0  ;;  %v2019_v25 = vpack.c.bf16 %v2003_v41, %v2003_v41  ;;  %v2001_v31 = vadd.f32 %v6900_v9, %v6873_v57  ;;  %v7023_v21 = vsel %vm564_vm2, %v5380_v43, 0 }
0x1099   :  { %v6982_v15 = vpack.c.b16 %v2096_v11, %v2095_v2  ;;  %v2094_v8 = vunpack.c.l.b16 %v2020_v45  ;;  %v2018_v34 = vpack.c.bf16 %v2002_v52, %v2002_v52  ;;  %2257 = vmatpush.bf16.msra.mxu3 %v7023_v21 }
0x109a   :  { %v2093_v36 = vunpack.c.l.b16 %v2019_v25  ;;  %v2017_v39 = vpack.c.bf16 %v2001_v31, %v2001_v31  ;;  %v2038_v31 = vadd.f32 %v6891_v61, %v6873_v57 }
0x109b   :  { %2216 = vrot.lane.b32.xlu2 %v6925_v47, %s5929_s0  ;;  %v2125_v37 = vsel %vm431_vm1, %v6982_v15, 0  ;;  %v2092_v27 = vunpack.c.l.b16 %v2018_v34 }
0x109c   :  { %2143 = vmatpush.bf16.xpose.msra.mxu1 %v2137_v63  ;;  %v2097_v63 = vunpack.c.l.b16 %v2023_v51  ;;  %v6994_v51 = vpack.c.b16 %v2094_v8, %v2093_v36  ;;  %v2054_v34 = vpack.c.bf16 %v2038_v31, %v2038_v31 }
0x109e   :  { %v6970_v0 = vpack.c.b16 %v2098_v55, %v2097_v63  ;;  %v2122_v55 = vsel %vm431_vm1, %v6994_v51, 0 }
0x10a0   :  { %v2128_v24 = vsel %vm431_vm1, %v6970_v0, 0 }
0x10a3   :  { %2214 = vrot.lane.b32.xlu2 %v6940_v60, %s5929_s0 }
0x10a4   :  { %2144 = vmatpush.bf16.xpose.msra.mxu1 %v2134_v3  ;;  %v2184_v3 = vunpack.c.l.b16 %v2056_v54 }
0x10a6   :  { %v6984_v14 = vpack.c.b16 %v2185_v46, %v2184_v3 }
0x10ab   :  { %2212 = vrot.lane.b32.xlu2 %v6956_v38, %s5929_s0 }
0x10ac   :  { %2145 = vmatpush.bf16.xpose.msra.mxu1 %v2131_v42  ;;  %v2091_v42 = vunpack.c.l.b16 %v2017_v39 }
0x10ae   :  { %v7000_v29 = vpack.c.b16 %v2092_v27, %v2091_v42  ;;  %v2182_v27 = vunpack.c.l.b16 %v2054_v34 }
0x10b0   :  { %v2119_v44 = vsel %vm431_vm1, %v7000_v29, 0 }
0x10b3   :  { %2210 = vrot.lane.b32.xlu2 %v6972_v16, %s5929_s0 }
0x10b4   :  { %2146 = vmatpush.bf16.xpose.msra.mxu1 %v2128_v24 }
0x10bb   :  { %2208 = vrot.lane.b32.xlu2 %v6984_v14, %s5929_s0 }
0x10bc   :  { %2147 = vmatpush.bf16.xpose.msra.mxu1 %v2125_v37  ;;  %v2039_v37 = vadd.f32 %v6891_v61, %v6875_v49 }
0x10be   :  { %v2055_v36 = vpack.c.bf16 %v2039_v37, %v2039_v37 }
0x10c0   :  { %v2183_v39 = vunpack.c.l.b16 %v2055_v36 }
0x10c3   :  { %2280 = vrot.lane.b32.xlu2 %v6910_v32, %s5930_s17 }
0x10c4   :  { %2148 = vmatpush.bf16.xpose.msra.mxu1 %v2122_v55  ;;  %v7037_v55 = vpack.c.b16 %v2183_v39, %v2182_v27 }
0x10cb   :  { %2278 = vrot.lane.b32.xlu2 %v6923_v10, %s5930_s17 }
0x10cc   :  { %2149 = vmatpush.bf16.xpose.msra.mxu1 %v2119_v44 }
0x10d3   :  { %2276 = vrot.lane.b32.xlu2 %v6938_v59, %s5930_s17  ;;  %5448 = vmatmul.msk.bf16.vlgmr.msra.gmra.mxu1 %vm431_vm1, %v2074_v50 }
0x10db   :  { %2270 = vrot.lane.b32.xlu2 %v6982_v15, %s5930_s17 }
0x10e3   :  { %2266 = vrot.lane.b32.xlu2 %v7000_v29, %s5930_s17 }
0x10eb   :  { %2407 = vrot.lane.b32.xlu2 %v6910_v32, %s5931_s18 }
0x10ed   :  { %v2221_v63 = vpop.permute.xlu2 %2220 }
0x10ee   :  { %2230 = vmatpush.bf16.msra.mxu2 %v2221_v63 }
0x10f3   :  { %2403 = vrot.lane.b32.xlu2 %v6938_v59, %s5931_s18 }
0x10f5   :  { %v2219_v28 = vpop.permute.xlu0 %2218  ;;  %v2217_v56 = vpop.permute.xlu2 %2216 }
0x10f6   :  { %2231 = vmatpush.bf16.msra.mxu2 %v2219_v28 }
0x10fa   :  { %2232 = vmatpush.bf16.msra.mxu2 %v2217_v56 }
0x10fb   :  { %2345 = vrot.lane.b32.xlu2 %v6895_v18, %s5932_s19 }
0x10fd   :  { %v2215_v35 = vpop.permute.xlu2 %2214 }
0x10fe   :  { %2233 = vmatpush.bf16.msra.mxu2 %v2215_v35 }
0x1103   :  { %2343 = vrot.lane.b32.xlu2 %v6925_v47, %s5932_s19 }
0x1105   :  { %v2213_v54 = vpop.permute.xlu2 %2212 }
0x1106   :  { %2234 = vmatpush.bf16.msra.mxu2 %v2213_v54 }
0x110b   :  { %2399 = vrot.lane.b32.xlu2 %v6970_v0, %s5931_s18 }
0x110d   :  { %v2211_v7 = vpop.permute.xlu2 %2210 }
0x110e   :  { %2235 = vmatpush.bf16.msra.mxu2 %v2211_v7 }
0x1115   :  { %v2209_v11 = vpop.permute.xlu2 %2208 }
0x1116   :  { %2236 = vmatpush.bf16.msra.mxu2 %v2209_v11 }
0x111d   :  { %v2281_v24 = vpop.permute.xlu2 %2280 }
0x111e   :  { %v2307_v41 = vsel %vm431_vm1, %v2281_v24, 0 }
0x111f   :  { %2309 = vmatpush.bf16.xpose.msrb.mxu3 %v2307_v41 }
0x1125   :  { %v2279_v46 = vpop.permute.xlu2 %2278 }
0x1126   :  { %v2304_v2 = vsel %vm431_vm1, %v2279_v46, 0 }
0x1127   :  { %2310 = vmatpush.bf16.xpose.msrb.mxu3 %v2304_v2 }
0x112d   :  { %v2277_v3 = vpop.permute.xlu2 %2276 }
0x112e   :  { %v2301_v45 = vsel %vm431_vm1, %v2277_v3, 0 }
0x112f   :  { %2311 = vmatpush.bf16.xpose.msrb.mxu3 %v2301_v45 }
0x1135   :  { %v2271_v50 = vpop.permute.xlu2 %2270 }
0x113d   :  { %v2267_v28 = vpop.permute.xlu2 %2266 }
0x1145   :  { %v7076_v35 = vpop.permute.xlu2 %2407 }
0x1150   :  { %v2151_v25 = vpop.f32.mrf.mxu1 }
0x1151   :  { %v2155_v52 = vmul.f32 0.35355338, %v2151_v25 }
0x1153   :  { %2156 = vmax.xlane.f32.xlu1 %v2155_v52 }
0x1158   :  { %v2153_v8 = vpop.f32.mrf.mxu1 }
0x116c   :  { %2206 = vrot.lane.b32.xlu1 %v7037_v55, %s5929_s0 }
0x1174   :  { %2274 = vrot.lane.b32.xlu1 %v6954_v33, %s5930_s17 }
0x117c   :  { %2268 = vrot.lane.b32.xlu1 %v6994_v51, %s5930_s17 }
0x1184   :  { %2264 = vrot.lane.b32.xlu1 %v6817_v58, %s5932_s19 }
0x118c   :  { %2405 = vrot.lane.b32.xlu1 %v6923_v10, %s5931_s18 }
0x1194   :  { %2347 = vrot.lane.b32.xlu1 %v6912_v13, %s5932_s19 }
0x119c   :  { %2401 = vrot.lane.b32.xlu1 %v6954_v33, %s5931_s18 }
0x11a4   :  { %2341 = vrot.lane.b32.xlu1 %v6940_v60, %s5932_s19 }
0x11ac   :  { %2339 = vrot.lane.b32.xlu1 %v6956_v38, %s5932_s19 }
0x11b4   :  { %2397 = vrot.lane.b32.xlu1 %v6982_v15, %s5931_s18 }
0x11bc   :  { %2335 = vrot.lane.b32.xlu1 %v6984_v14, %s5932_s19 }
0x11c4   :  { %2333 = vrot.lane.b32.xlu1 %v7037_v55, %s5932_s19 }
0x11c6   :  { %v2157_v57 = vpop.xlane.xlu1 %2156 }
0x11c7   :  { %v2158_v49 = vsub.f32 %v2155_v52, %v2157_v57  ;;  %v5381_v52 = vld [vmem:[%s8405_s4 + $0x14] sm:$0xf] }
0x11c9   :  { %v2159_v42 = vmul.f32 1.442695, %v2158_v49 }
0x11cb   :  { %5789 = vpow2.f32 %v2159_v42  ;;  %v2292_v42 = vsel %vm431_vm1, %v2271_v50, 0 }
0x11cc   :  { %2393 = vrot.lane.b32.xlu1 %v7000_v29, %s5931_s18 }
0x11d1   :  { %v5790_v44 = vpop.eup %5789 }
0x11d2   :  { %2161 = vadd.xlane.f32.xlu0 %v5790_v44 }
0x11d4   :  { %2534 = vrot.lane.b32.xlu1 %v6910_v32, %s5933_s2 }
0x11dc   :  { %2528 = vrot.lane.b32.xlu1 %v6954_v33, %s5933_s2 }
0x11de   :  { %v2207_v63 = vpop.permute.xlu1 %2206 }
0x11df   :  { %2237 = vmatpush.bf16.msra.mxu2 %v2207_v63 }
0x11e4   :  { %2524 = vrot.lane.b32.xlu1 %v6982_v15, %s5933_s2  ;;  %v7082_v15 = vpop.permute.xlu2 %2403 }
0x11e6   :  { %2272 = vrot.lane.b32.xlu0 %v6970_v0, %s5930_s17  ;;  %v2275_v56 = vpop.permute.xlu1 %2274 }
0x11e7   :  { %v2298_v43 = vsel %vm431_vm1, %v2275_v56, 0 }
0x11e8   :  { %2312 = vmatpush.bf16.xpose.msrb.mxu3 %v2298_v43 }
0x11ec   :  { %2520 = vrot.lane.b32.xlu1 %v7000_v29, %s5933_s2  ;;  %v2346_v7 = vpop.permute.xlu2 %2345 }
0x11ee   :  { %v2269_v32 = vpop.permute.xlu1 %2268 }
0x11ef   :  { %v2289_v56 = vsel %vm431_vm1, %v2269_v32, 0 }
0x11f4   :  { %2474 = vrot.lane.b32.xlu1 %v6912_v13, %s5934_s30  ;;  %v2344_v11 = vpop.permute.xlu2 %2343 }
0x11f6   :  { %v7080_v33 = vpop.permute.xlu1 %2264 }
0x11fc   :  { %2470 = vrot.lane.b32.xlu1 %v6925_v47, %s5934_s30 }
0x11fe   :  { %v7086_v54 = vpop.permute.xlu1 %2405 }
0x1204   :  { %2466 = vrot.lane.b32.xlu1 %v6956_v38, %s5934_s30 }
0x1206   :  { %v2348_v29 = vpop.permute.xlu1 %2347 }
0x1207   :  { %2357 = vmatpush.bf16.msrb.mxu2 %v2348_v29 }
0x120b   :  { %2358 = vmatpush.bf16.msrb.mxu2 %v2346_v7 }
0x120c   :  { %2464 = vrot.lane.b32.xlu1 %v6972_v16, %s5934_s30 }
0x120e   :  { %v7092_v24 = vpop.permute.xlu1 %2401 }
0x120f   :  { %2359 = vmatpush.bf16.msrb.mxu2 %v2344_v11  ;;  %v5382_v11 = vld [vmem:[%s8405_s4 + $0x18] sm:$0xf] }
0x1210   :  { %v7142_v32 = vsel %vm564_vm2, %v5382_v11, 0  ;;  %v2400_v11 = vpop.permute.xlu2 %2399 }
0x1214   :  { %2462 = vrot.lane.b32.xlu1 %v6984_v14, %s5934_s30 }
0x1216   :  { %v2342_v41 = vpop.permute.xlu1 %2341 }
0x1217   :  { %2360 = vmatpush.bf16.msrb.mxu2 %v2342_v41 }
0x121c   :  { %2460 = vrot.lane.b32.xlu1 %v7037_v55, %s5934_s30 }
0x121e   :  { %v2340_v46 = vpop.permute.xlu1 %2339 }
0x121f   :  { %2361 = vmatpush.bf16.msrb.mxu2 %v2340_v46 }
0x1224   :  { %2601 = vrot.lane.b32.xlu1 %v6912_v13, %s5935_s12  ;;  %v7116_v13 = vsel %vm564_vm2, %v5381_v52, 0 }
0x1225   :  { %2384 = vmatpush.bf16.msrb.mxu1 %v7116_v13 }
0x1226   :  { %v7100_v2 = vpop.permute.xlu1 %2397 }
0x122c   :  { %2597 = vrot.lane.b32.xlu1 %v6925_v47, %s5935_s12 }
0x122e   :  { %v7104_v3 = vpop.permute.xlu1 %2335 }
0x1234   :  { %2593 = vrot.lane.b32.xlu1 %v6956_v38, %s5935_s12 }
0x1236   :  { %v7108_v45 = vpop.permute.xlu1 %2333 }
0x123e   :  { %v7110_v25 = vpop.permute.xlu1 %2393 }
0x1245   :  { %v2162_v8 = vpop.xlane.xlu0 %2161 }
0x1246   :  { %5791 = vrcp.f32 %v2162_v8  ;;  %v2535_v47 = vpop.permute.xlu1 %2534 }
0x1247   :  { %v2561_v37 = vsel %vm431_vm1, %v2535_v47, 0 }
0x1248   :  { %2563 = vmatpush.bf16.xpose.msrb.mxu0 %v2561_v37 }
0x124c   :  { %v5792_v38 = vpop.eup %5791 }
0x124d   :  { %v2164_v31 = vmul.f32 %v5792_v38, %v5790_v44  ;;  %v2286_v44 = vsel %vm431_vm1, %v2267_v28, 0 }
0x124e   :  { %v7120_v36 = vpop.permute.xlu1 %2528 }
0x124f   :  { %v2165_v34 = vpack.c.bf16 %v2164_v31, %v2164_v31 }
0x1251   :  { %2238 = vmatmul.bf16.vlgmr.msra.gmra.mxu2 %v2165_v34 }
0x1256   :  { %v7122_v39 = vpop.permute.xlu1 %2524 }
0x1258   :  { %v2273_v27 = vpop.permute.xlu0 %2272 }
0x1259   :  { %v2295_v57 = vsel %vm431_vm1, %v2273_v27, 0 }
0x125a   :  { %2313 = vmatpush.bf16.xpose.msrb.mxu3 %v2295_v57 }
0x125e   :  { %v7125_v49 = vpop.permute.xlu1 %2520 }
0x1262   :  { %2314 = vmatpush.bf16.xpose.msrb.mxu3 %v2292_v42 }
0x1266   :  { %v2475_v63 = vpop.permute.xlu1 %2474 }
0x1267   :  { %2484 = vmatpush.bf16.msra.mxu1 %v2475_v63  ;;  %v2431_v63 = vsel %vm431_vm1, %v7086_v54, 0 }
0x126a   :  { %2315 = vmatpush.bf16.xpose.msrb.mxu3 %v2289_v56 }
0x126e   :  { %v7130_v43 = vpop.permute.xlu1 %2470 }
0x1272   :  { %2316 = vmatpush.bf16.xpose.msrb.mxu3 %v2286_v44  ;;  %v2428_v44 = vsel %vm431_vm1, %v7082_v15, 0 }
0x1276   :  { %v7132_v7 = vpop.permute.xlu1 %2466 }
0x127e   :  { %v7134_v29 = vpop.permute.xlu1 %2464 }
0x1286   :  { %v7139_v50 = vpop.permute.xlu1 %2462 }
0x128e   :  { %v2461_v52 = vpop.permute.xlu1 %2460 }
0x1296   :  { %v2602_v8 = vpop.permute.xlu1 %2601 }
0x12d4   :  { %v2239_v41 = vpop.f32.mrf.mxu2 }
0x12d5   :  { %v2243_v46 = vpack.c.bf16 %v2239_v41, %v2239_v41 }
0x12d7   :  { %5449 = vmatmul.msk.bf16.vlgmr.msra.gmra.mxu3 %vm431_vm1, %v2243_v46  ;;  %v2419_v46 = vsel %vm431_vm1, %v7100_v2, 0 }
0x12d8   :  { %2511 = vmatpush.bf16.msra.mxu3 %v7142_v32 }
0x12dc   :  { %v2241_v28 = vpop.f32.mrf.mxu2 }
0x12e7   :  { %5450 = vmatmul.msk.bf16.vlgmr.msrb.gmra.mxu3 %vm431_vm1, %v7080_v33 }
0x12e8   :  { %2611 = vmatpush.bf16.msrb.mxu3 %v2602_v8 }
0x135a   :  { %v7148_v47 = vpop.f32.mrf.mxu3 }
0x1362   :  { %v2261_v37 = vpop.f32.mrf.mxu3 }
0x136a   :  { %v2318_v38 = vpop.f32.mrf.mxu3 }
0x136b   :  { %v2322_v31 = vmul.f32 0.35355338, %v2318_v38 }
0x136d   :  { %2323 = vmax.xlane.f32.xlu0 %v2322_v31 }
0x1372   :  { %v2320_v34 = vpop.f32.mrf.mxu3 }
0x1381   :  { %2337 = vrot.lane.b32.xlu0 %v6972_v16, %s5932_s19 }
0x1389   :  { %2395 = vrot.lane.b32.xlu0 %v6994_v51, %s5931_s18 }
0x1391   :  { %2391 = vrot.lane.b32.xlu0 %v6817_v58, %s5934_s30 }
0x1399   :  { %2532 = vrot.lane.b32.xlu0 %v6923_v10, %s5933_s2 }
0x13a1   :  { %2526 = vrot.lane.b32.xlu0 %v6970_v0, %s5933_s2 }
0x13a9   :  { %2522 = vrot.lane.b32.xlu0 %v6994_v51, %s5933_s2 }
0x13b1   :  { %2518 = vrot.lane.b32.xlu0 %v6817_v58, %s5935_s12  ;;  %v2434_v58 = vsel %vm431_vm1, %v7076_v35, 0 }
0x13b9   :  { %2472 = vrot.lane.b32.xlu0 %v6895_v18, %s5934_s30 }
0x13c1   :  { %2468 = vrot.lane.b32.xlu0 %v6940_v60, %s5934_s30 }
0x13e0   :  { %v2324_v33 = vpop.xlane.xlu0 %2323 }
0x13e1   :  { %v2325_v27 = vsub.f32 %v2322_v31, %v2324_v33 }
0x13e3   :  { %v2326_v57 = vmul.f32 1.442695, %v2325_v27 }
0x13e5   :  { %5793 = vpow2.f32 %v2326_v57 }
0x13eb   :  { %v5794_v10 = vpop.eup %5793 }
0x13ec   :  { %2328 = vadd.xlane.f32.xlu2 %v5794_v10 }
0x13f3   :  { %v2338_v42 = vpop.permute.xlu0 %2337 }
0x13f4   :  { %2362 = vmatpush.bf16.msrb.mxu2 %v2338_v42 }
0x13f8   :  { %2363 = vmatpush.bf16.msrb.mxu2 %v7104_v3 }
0x13fb   :  { %v2396_v0 = vpop.permute.xlu0 %2395 }
0x13fc   :  { %2364 = vmatpush.bf16.msrb.mxu2 %v7108_v45  ;;  %v2425_v45 = vsel %vm431_vm1, %v7092_v24, 0  ;;  %v2416_v28 = vsel %vm431_vm1, %v2396_v0, 0  ;;  %v2413_v24 = vsel %vm431_vm1, %v7110_v25, 0  ;;  %v2552_v25 = vsel %vm431_vm1, %v7120_v36, 0 }
0x1400   :  { %2436 = vmatpush.bf16.xpose.msra.mxu2 %v2434_v58 }
0x1403   :  { %v2392_v51 = vpop.permute.xlu0 %2391 }
0x1404   :  { %2530 = vrot.lane.b32.xlu2 %v6938_v59, %s5933_s2  ;;  %v2422_v59 = vsel %vm431_vm1, %v2400_v11, 0 }
0x1408   :  { %2437 = vmatpush.bf16.xpose.msra.mxu2 %v2431_v63 }
0x140b   :  { %v2533_v56 = vpop.permute.xlu0 %2532 }
0x140c   :  { %v2558_v3 = vsel %vm431_vm1, %v2533_v56, 0  ;;  %v1856_v56 = vperm.slane %v6792_v30, 3 }
0x140d   :  { %2564 = vmatpush.bf16.xpose.msrb.mxu0 %v2558_v3 }
0x1410   :  { %2438 = vmatpush.bf16.xpose.msra.mxu2 %v2428_v44 }
0x1413   :  { %v2527_v35 = vpop.permute.xlu0 %2526 }
0x1418   :  { %2439 = vmatpush.bf16.xpose.msra.mxu2 %v2425_v45 }
0x141b   :  { %v2523_v41 = vpop.permute.xlu0 %2522 }
0x1420   :  { %2440 = vmatpush.bf16.xpose.msra.mxu2 %v2422_v59 }
0x1423   :  { %v2519_v54 = vpop.permute.xlu0 %2518 }
0x1428   :  { %2441 = vmatpush.bf16.xpose.msra.mxu2 %v2419_v46 }
0x142b   :  { %v2473_v15 = vpop.permute.xlu0 %2472 }
0x142c   :  { %2485 = vmatpush.bf16.msra.mxu1 %v2473_v15 }
0x1430   :  { %2442 = vmatpush.bf16.xpose.msra.mxu2 %v2416_v28  ;;  %2486 = vmatpush.bf16.msra.mxu1 %v7130_v43 }
0x1433   :  { %v2469_v8 = vpop.permute.xlu0 %2468 }
0x1434   :  { %2487 = vmatpush.bf16.msra.mxu1 %v2469_v8 }
0x1438   :  { %2443 = vmatpush.bf16.xpose.msra.mxu2 %v2413_v24  ;;  %2488 = vmatpush.bf16.msra.mxu1 %v7132_v7  ;;  %v2549_v7 = vsel %vm431_vm1, %v2527_v35, 0 }
0x143c   :  { %2489 = vmatpush.bf16.msra.mxu1 %v7134_v29  ;;  %v2546_v29 = vsel %vm431_vm1, %v7122_v39, 0 }
0x1440   :  { %2490 = vmatpush.bf16.msra.mxu1 %v7139_v50  ;;  %v2543_v50 = vsel %vm431_vm1, %v2523_v41, 0 }
0x1444   :  { %2491 = vmatpush.bf16.msra.mxu1 %v2461_v52  ;;  %v2540_v52 = vsel %vm431_vm1, %v7125_v49, 0 }
0x145f   :  { %v2329_v2 = vpop.xlane.xlu2 %2328 }
0x1460   :  { %5795 = vrcp.f32 %v2329_v2 }
0x1466   :  { %v5796_v37 = vpop.eup %5795 }
0x1467   :  { %v2331_v38 = vmul.f32 %v5796_v37, %v5794_v10  ;;  %v2531_v31 = vpop.permute.xlu2 %2530 }
0x1468   :  { %v2555_v43 = vsel %vm431_vm1, %v2531_v31, 0 }
0x1469   :  { %v2332_v34 = vpack.c.bf16 %v2331_v38, %v2331_v38  ;;  %2565 = vmatpush.bf16.xpose.msrb.mxu0 %v2555_v43 }
0x146b   :  { %2365 = vmatmul.bf16.vlgmr.msrb.gmra.mxu2 %v2332_v34 }
0x1471   :  { %2566 = vmatpush.bf16.xpose.msrb.mxu0 %v2552_v25 }
0x1479   :  { %2567 = vmatpush.bf16.xpose.msrb.mxu0 %v2549_v7 }
0x147b   :  { %5452 = vmatmul.msk.bf16.vlgmr.msra.gmra.mxu2 %vm431_vm1, %v2392_v51 }
0x1481   :  { %2568 = vmatpush.bf16.xpose.msrb.mxu0 %v2546_v29 }
0x1489   :  { %2569 = vmatpush.bf16.xpose.msrb.mxu0 %v2543_v50 }
0x1491   :  { %2570 = vmatpush.bf16.xpose.msrb.mxu0 %v2540_v52 }
0x1498   :  { %5454 = vmatmul.msk.bf16.vlgmr.msrb.gmra.mxu0 %vm431_vm1, %v2519_v54 }
0x1499   :  { %3052 = vmatpush.bf16.msra.mxu0 %v7023_v21  ;;  %v2671_v21 = vadd.f32 %v6809_v5, %v6353_v17 }
0x149b   :  { %v2672_v49 = vpack.c.bf16 %v2671_v21, %v2671_v21  ;;  %v5701_v21 = vld [vmem:[%s8402_s1 + $0xd8] sm:$0xff] }
0x149d   :  { %v2869_v51 = vunpack.c.l.b16 %v2672_v49  ;;  %v5702_v49 = vld [vmem:[%s8402_s1 + $0xe0] sm:$0xff] }
0x149f   :  { %v7212_v63 = vpack.c.b16 %v2869_v51, %v2869_v51  ;;  %v5703_v51 = vld [vmem:[%s8402_s1 + $0xe8] sm:$0xff] }
0x14ee   :  { %v2366_v36 = vpop.f32.mrf.mxu2 }
0x14ef   :  { %v2370_v33 = vpack.c.bf16 %v2366_v36, %v2366_v36  ;;  %v5383_v36 = vld [vmem:[%s8405_s4 + $0x1c] sm:$0xf] }
0x14f1   :  { %5451 = vmatmul.msk.bf16.vlgmr.msrb.gmra.mxu1 %vm431_vm1, %v2370_v33  ;;  %v7230_v33 = vsel %vm564_vm2, %v5383_v36, 0 }
0x14f2   :  { %2638 = vmatpush.bf16.msrb.mxu1 %v7230_v33 }
0x14f6   :  { %v2368_v27 = vpop.f32.mrf.mxu2 }
0x14fe   :  { %v2445_v57 = vpop.f32.mrf.mxu2 }
0x14ff   :  { %v2449_v10 = vmul.f32 0.35355338, %v2445_v57 }
0x1501   :  { %2450 = vmax.xlane.f32.xlu2 %v2449_v10 }
0x1506   :  { %v2447_v39 = vpop.f32.mrf.mxu2 }
0x1515   :  { %v2572_v42 = vpop.f32.mrf.mxu0 }
0x1516   :  { %v2576_v0 = vmul.f32 0.35355338, %v2572_v42 }
0x1518   :  { %2577 = vmax.xlane.f32.xlu2 %v2576_v0 }
0x151d   :  { %v2574_v58 = vpop.f32.mrf.mxu0 }
0x151e   :  { %v5698_v58 = vld [vmem:[%s8402_s1 + $0xc0] sm:$0xff] }
0x1530   :  { %2599 = vrot.lane.b32.xlu2 %v6895_v18, %s5935_s12  ;;  %v1857_v18 = vadd.f32 %v1856_v56, %v6358_v23 }
0x1538   :  { %2591 = vrot.lane.b32.xlu2 %v6972_v16, %s5935_s12  ;;  %v2263_v16 = vadd.f32 %v7148_v47, %v1857_v18  ;;  %v2598_v47 = vpop.permute.xlu1 %2597  ;;  %v5704_v18 = vld [vmem:[%s8402_s1 + $0xf0] sm:$0xff] }
0x1540   :  { %2589 = vrot.lane.b32.xlu2 %v6984_v14, %s5935_s12  ;;  %v2594_v31 = vpop.permute.xlu1 %2593 }
0x1548   :  { %2871 = vrot.lane.b32.xlu2 %v7212_v63, %s5929_s0 }
0x156e   :  { %v2386_v44 = vpop.f32.mrf.mxu1 }
0x156f   :  { %v2390_v5 = vadd.f32 %v2386_v44, %v2263_v16  ;;  %v5705_v16 = vld [vmem:[%s8402_s1 + $0xf8] sm:$0xff] }
0x1574   :  { %v2451_v3 = vpop.xlane.xlu2 %2450 }
0x1575   :  { %v2452_v35 = vsub.f32 %v2449_v10, %v2451_v3 }
0x1576   :  { %v2388_v45 = vpop.f32.mrf.mxu1 }
0x1577   :  { %v2453_v14 = vmul.f32 1.442695, %v2452_v35 }
0x1579   :  { %5797 = vpow2.f32 %v2453_v14 }
0x157f   :  { %v5798_v11 = vpop.eup %5797 }
0x1580   :  { %2455 = vadd.xlane.f32.xlu0 %v5798_v11 }
0x158b   :  { %v2578_v41 = vpop.xlane.xlu2 %2577 }
0x158c   :  { %v2579_v59 = vsub.f32 %v2576_v0, %v2578_v41 }
0x158e   :  { %v2580_v54 = vmul.f32 1.442695, %v2579_v59 }
0x1590   :  { %5799 = vpow2.f32 %v2580_v54 }
0x1593   :  { %v2600_v46 = vpop.permute.xlu2 %2599 }
0x1594   :  { %2595 = vrot.lane.b32.xlu0 %v6940_v60, %s5935_s12  ;;  %2612 = vmatpush.bf16.msrb.mxu3 %v2600_v46 }
0x1596   :  { %v5800_v15 = vpop.eup %5799 }
0x1597   :  { %2582 = vadd.xlane.f32.xlu1 %v5800_v15 }
0x1598   :  { %2613 = vmatpush.bf16.msrb.mxu3 %v2598_v47 }
0x159b   :  { %v2592_v38 = vpop.permute.xlu2 %2591 }
0x159c   :  { %2587 = vrot.lane.b32.xlu0 %v7037_v55, %s5935_s12 }
0x15a3   :  { %v2590_v60 = vpop.permute.xlu2 %2589 }
0x15f3   :  { %v2456_v28 = vpop.xlane.xlu0 %2455 }
0x15f4   :  { %5801 = vrcp.f32 %v2456_v28 }
0x15fa   :  { %v5802_v8 = vpop.eup %5801 }
0x15fb   :  { %v2458_v24 = vmul.f32 %v5802_v8, %v5798_v11 }
0x15fd   :  { %v2459_v2 = vpack.c.bf16 %v2458_v24, %v2458_v24 }
0x15ff   :  { %2492 = vmatmul.bf16.vlgmr.msra.gmra.mxu1 %v2459_v2 }
0x1600   :  { %2761 = vmatpush.bf16.msra.mxu1 %v6825_v1  ;;  %v5699_v1 = vld [vmem:[%s8402_s1 + $0xc8] sm:$0xff] }
0x1604   :  { %2762 = vmatpush.bf16.msra.mxu1 %v6831_v19  ;;  %v5700_v19 = vld [vmem:[%s8402_s1 + $0xd0] sm:$0xff] }
0x1606   :  { %v2596_v37 = vpop.permute.xlu0 %2595 }
0x1607   :  { %2614 = vmatpush.bf16.msrb.mxu3 %v2596_v37 }
0x160a   :  { %v2583_v25 = vpop.xlane.xlu1 %2582 }
0x160b   :  { %2615 = vmatpush.bf16.msrb.mxu3 %v2594_v31  ;;  %5803 = vrcp.f32 %v2583_v25 }
0x160e   :  { %v2588_v43 = vpop.permute.xlu0 %2587 }
0x160f   :  { %2616 = vmatpush.bf16.msrb.mxu3 %v2592_v38 }
0x1611   :  { %v5804_v29 = vpop.eup %5803 }
0x1612   :  { %v2585_v50 = vmul.f32 %v5804_v29, %v5800_v15 }
0x1613   :  { %2617 = vmatpush.bf16.msrb.mxu3 %v2590_v60 }
0x1614   :  { %v2586_v52 = vpack.c.bf16 %v2585_v50, %v2585_v50 }
0x1617   :  { %2618 = vmatpush.bf16.msrb.mxu3 %v2588_v43 }
0x167c   :  { %v2493_v34 = vpop.f32.mrf.mxu1 }
0x167d   :  { %v2497_v7 = vpack.c.bf16 %v2493_v34, %v2493_v34 }
0x167f   :  { %5453 = vmatmul.msk.bf16.vlgmr.msra.gmra.mxu3 %vm431_vm1, %v2497_v7 }
0x1684   :  { %v2495_v55 = vpop.f32.mrf.mxu1 }
0x168f   :  { %2619 = vmatmul.bf16.vlgmr.msrb.gmra.mxu3 %v2586_v52 }
0x1702   :  { %v2513_v27 = vpop.f32.mrf.mxu3 }
0x1703   :  { %v2517_v57 = vadd.f32 %v2513_v27, %v2390_v5 }
0x170a   :  { %v2515_v10 = vpop.f32.mrf.mxu3 }
0x1712   :  { %v2620_v39 = vpop.f32.mrf.mxu3 }
0x1713   :  { %v2624_v42 = vpack.c.bf16 %v2620_v39, %v2620_v39 }
0x1715   :  { %5455 = vmatmul.msk.bf16.vlgmr.msrb.gmra.mxu1 %vm431_vm1, %v2624_v42 }
0x171a   :  { %v2622_v0 = vpop.f32.mrf.mxu3 }
0x1725   :  { %5504 = vmatmul.msk.bf16.vlgmr.msra.gmra.mxu1 %vm62_vm0, %v5698_v58 }
0x1735   :  { %5505 = vmatmul.msk.bf16.gmra.mxu1 %vm62_vm0, %v5699_v1 }
0x1745   :  { %5506 = vmatmul.msk.bf16.gmra.mxu1 %vm62_vm0, %v5700_v19 }
0x1755   :  { %5507 = vmatmul.msk.bf16.gmra.mxu1 %vm62_vm0, %v5701_v21 }
0x1765   :  { %5508 = vmatmul.msk.bf16.gmra.mxu1 %vm62_vm0, %v5702_v49 }
0x1775   :  { %5509 = vmatmul.msk.bf16.gmra.mxu1 %vm62_vm0, %v5703_v51 }
0x1785   :  { %5510 = vmatmul.msk.bf16.gmra.mxu1 %vm62_vm0, %v5704_v18 }
0x1792   :  { %v2640_v44 = vpop.f32.mrf.mxu1 }
0x1793   :  { %v7267_v5 = vadd.f32 %v2640_v44, %v2517_v57 }
0x1795   :  { %5511 = vmatmul.msk.bf16.gmra.mxu1 %vm62_vm0, %v5705_v16 }
0x179a   :  { %v2642_v3 = vpop.f32.mrf.mxu1 }
0x17a2   :  { %v7270_v35 = vpop.f32.mrf.mxu1 }
0x17a3   :  { %v2836_v50 = vadd.f32 %v7270_v35, %v6891_v61 }
0x17a5   :  { %v2852_v10 = vpack.c.bf16 %v2836_v50, %v2836_v50 }
0x17a7   :  { %v2980_v42 = vunpack.c.l.b16 %v2852_v10 }
0x17aa   :  { %v7272_v45 = vpop.f32.mrf.mxu1 }
0x17ab   :  { %v2837_v55 = vadd.f32 %v7272_v45, %v6891_v61 }
0x17ad   :  { %v2853_v36 = vpack.c.bf16 %v2837_v55, %v2837_v55 }
0x17af   :  { %v2981_v39 = vunpack.c.l.b16 %v2853_v36 }
0x17b1   :  { %v7300_v0 = vpack.c.b16 %v2981_v39, %v2980_v42 }
0x17b2   :  { %v2769_v14 = vpop.f32.mrf.mxu1 }
0x17b3   :  { %v2838_v38 = vadd.f32 %v2769_v14, %v6891_v61 }
0x17b5   :  { %v2854_v7 = vpack.c.bf16 %v2838_v38, %v2838_v38 }
0x17b7   :  { %v2982_v52 = vunpack.c.l.b16 %v2854_v7 }
0x17ba   :  { %v2771_v11 = vpop.f32.mrf.mxu1 }
0x17bb   :  { %v2839_v2 = vadd.f32 %v2771_v11, %v6891_v61 }
0x17bd   :  { %v2855_v43 = vpack.c.bf16 %v2839_v2, %v2839_v2 }
0x17bf   :  { %v2983_v29 = vunpack.c.l.b16 %v2855_v43 }
0x17c1   :  { %v7296_v27 = vpack.c.b16 %v2983_v29, %v2982_v52 }
0x17c2   :  { %v7274_v41 = vpop.f32.mrf.mxu1 }
0x17ca   :  { %v7276_v59 = vpop.f32.mrf.mxu1 }
0x17d2   :  { %v7278_v54 = vpop.f32.mrf.mxu1 }
0x17da   :  { %v7280_v46 = vpop.f32.mrf.mxu1 }
0x17e2   :  { %v2784_v15 = vpop.f32.mrf.mxu1 }
0x17e3   :  { %v2844_v47 = vadd.f32 %v2784_v15, %v6891_v61  ;;  %v2812_v16 = vadd.f32 %v2784_v15, %v6900_v9 }
0x17e5   :  { %v2860_v8 = vpack.c.bf16 %v2844_v47, %v2844_v47  ;;  %v2828_v2 = vpack.c.bf16 %v2812_v16, %v2812_v16 }
0x17e7   :  { %v2988_v31 = vunpack.c.l.b16 %v2860_v8 }
0x17ea   :  { %v2786_v28 = vpop.f32.mrf.mxu1 }
0x17eb   :  { %v2845_v24 = vadd.f32 %v2786_v28, %v6891_v61  ;;  %v2813_v51 = vadd.f32 %v2786_v28, %v6900_v9 }
0x17ed   :  { %v2861_v37 = vpack.c.bf16 %v2845_v24, %v2845_v24  ;;  %v2829_v47 = vpack.c.bf16 %v2813_v51, %v2813_v51 }
0x17ef   :  { %v2989_v60 = vunpack.c.l.b16 %v2861_v37  ;;  %v2807_v37 = vadd.f32 %v2771_v11, %v6900_v9  ;;  %v2898_v38 = vunpack.c.l.b16 %v2829_v47 }
0x17f1   :  { %v7286_v34 = vpack.c.b16 %v2989_v60, %v2988_v31  ;;  %v2806_v31 = vadd.f32 %v2769_v14, %v6900_v9  ;;  %v2897_v60 = vunpack.c.l.b16 %v2828_v2  ;;  %v2823_v43 = vpack.c.bf16 %v2807_v37, %v2807_v37 }
0x17f2   :  { %v7288_v25 = vpop.f32.mrf.mxu1 }
0x17f3   :  { %3012 = vrot.lane.b32.xlu1 %v7286_v34, %s5929_s0  ;;  %v7316_v7 = vpack.c.b16 %v2898_v38, %v2897_v60  ;;  %v2822_v55 = vpack.c.bf16 %v2806_v31, %v2806_v31  ;;  %v2892_v14 = vunpack.c.l.b16 %v2823_v43  ;;  %v2846_v60 = vadd.f32 %v7288_v25, %v6891_v61 }
0x17fa   :  { %v2791_v57 = vpop.f32.mrf.mxu1 }
0x17fb   :  { %3006 = vrot.lane.b32.xlu1 %v7296_v27, %s5929_s0  ;;  %v2815_v2 = vadd.f32 %v2791_v57, %v6900_v9  ;;  %v2847_v38 = vadd.f32 %v2791_v57, %v6891_v61 }
0x1802   :  { %v2794_v58 = vpop.f32.mrf.mxu1 }
0x1803   :  { %3004 = vrot.lane.b32.xlu1 %v7300_v0, %s5929_s0  ;;  %v2816_v1 = vadd.f32 %v2794_v58, %v6900_v9 }
0x1805   :  { %v2832_v21 = vpack.c.bf16 %v2816_v1, %v2816_v1  ;;  %v2891_v1 = vunpack.c.l.b16 %v2822_v55  ;;  %v2863_v55 = vpack.c.bf16 %v2847_v38, %v2847_v38  ;;  %v2929_v38 = vsel %vm431_vm1, %v7316_v7, 0 }
0x1807   :  { %v2901_v44 = vunpack.c.l.b16 %v2832_v21  ;;  %v2848_v21 = vadd.f32 %v2794_v58, %v6891_v61 }
0x1809   :  { %v2864_v37 = vpack.c.bf16 %v2848_v21, %v2848_v21 }
0x180a   :  { %v2796_v19 = vpop.f32.mrf.mxu1 }
0x180b   :  { %v2817_v49 = vadd.f32 %v2796_v19, %v6900_v9  ;;  %v2849_v11 = vadd.f32 %v2796_v19, %v6891_v61  ;;  %v2814_v19 = vadd.f32 %v7288_v25, %v6900_v9  ;;  %v2843_v25 = vadd.f32 %v7280_v46, %v6891_v61 }
0x180d   :  { %v2833_v18 = vpack.c.bf16 %v2817_v49, %v2817_v49  ;;  %v2830_v43 = vpack.c.bf16 %v2814_v19, %v2814_v19 }
0x180f   :  { %v2902_v3 = vunpack.c.l.b16 %v2833_v18 }
0x1811   :  { %v7308_v8 = vpack.c.b16 %v2902_v3, %v2901_v44  ;;  %v7324_v44 = vpack.c.b16 %v2892_v14, %v2891_v1  ;;  %v2865_v3 = vpack.c.bf16 %v2849_v11, %v2849_v11  ;;  %v2842_v14 = vadd.f32 %v7278_v54, %v6891_v61 }
0x1812   :  { %v2799_v24 = vpop.f32.mrf.mxu1 }
0x1813   :  { %3073 = vrot.lane.b32.xlu1 %v7308_v8, %s5930_s17  ;;  %v2818_v28 = vadd.f32 %v2799_v24, %v6900_v9  ;;  %v2850_v15 = vadd.f32 %v2799_v24, %v6891_v61  ;;  %v2993_v31 = vunpack.c.l.b16 %v2865_v3  ;;  %v2935_v57 = vsel %vm431_vm1, %v7308_v8, 0 }
0x1814   :  { %v2858_v21 = vpack.c.bf16 %v2842_v14, %v2842_v14 }
0x1815   :  { %v2834_v50 = vpack.c.bf16 %v2818_v28, %v2818_v28  ;;  %v2866_v52 = vpack.c.bf16 %v2850_v15, %v2850_v15  ;;  %v2831_v28 = vpack.c.bf16 %v2815_v2, %v2815_v2  ;;  %v2992_v15 = vunpack.c.l.b16 %v2864_v37 }
0x1816   :  { %v2986_v3 = vunpack.c.l.b16 %v2858_v21 }
0x1817   :  { %v2903_v49 = vunpack.c.l.b16 %v2834_v50  ;;  %v2994_v51 = vunpack.c.l.b16 %v2866_v52  ;;  %v2862_v50 = vpack.c.bf16 %v2846_v60, %v2846_v60  ;;  %v2900_v52 = vunpack.c.l.b16 %v2831_v28 }
0x1819   :  { %v2990_v11 = vunpack.c.l.b16 %v2862_v50 }
0x181a   :  { %v2801_v29 = vpop.f32.mrf.mxu1 }
0x181b   :  { %v2819_v36 = vadd.f32 %v2801_v29, %v6900_v9  ;;  %v2851_v10 = vadd.f32 %v2801_v29, %v6891_v61  ;;  %3069 = vrot.lane.b32.xlu1 %v7316_v7, %s5930_s17  ;;  %v7342_v29 = vpack.c.b16 %v2993_v31, %v2992_v15 }
0x181d   :  { %v2835_v39 = vpack.c.bf16 %v2819_v36, %v2819_v36  ;;  %v2867_v42 = vpack.c.bf16 %v2851_v10, %v2851_v10  ;;  %v2899_v36 = vunpack.c.l.b16 %v2830_v43  ;;  %v2991_v10 = vunpack.c.l.b16 %v2863_v55 }
0x181f   :  { %v2904_v18 = vunpack.c.l.b16 %v2835_v39  ;;  %v2995_v16 = vunpack.c.l.b16 %v2867_v42  ;;  %v7354_v39 = vpack.c.b16 %v2900_v52, %v2899_v36  ;;  %v2859_v42 = vpack.c.bf16 %v2843_v25, %v2843_v25 }
0x1820   :  { %v7356_v1 = vpack.c.b16 %v2991_v10, %v2990_v11  ;;  %v2804_v36 = vadd.f32 %v7270_v35, %v6900_v9  ;;  %v2841_v10 = vadd.f32 %v7276_v59, %v6891_v61  ;;  %v2840_v11 = vadd.f32 %v7274_v41, %v6891_v61 }
0x1821   :  { %v7326_v47 = vpack.c.b16 %v2904_v18, %v2903_v49  ;;  %v7328_v24 = vpack.c.b16 %v2995_v16, %v2994_v51  ;;  %v2811_v49 = vadd.f32 %v7280_v46, %v6900_v9  ;;  %v2932_v51 = vsel %vm431_vm1, %v7354_v39, 0 }
0x1822   :  { %v2810_v18 = vadd.f32 %v7278_v54, %v6900_v9  ;;  %v2987_v16 = vunpack.c.l.b16 %v2859_v42  ;;  %v2809_v46 = vadd.f32 %v7276_v59, %v6900_v9  ;;  %v2808_v54 = vadd.f32 %v7274_v41, %v6900_v9  ;;  %v2872_v41 = vpop.permute.xlu2 %2871 }
0x1823   :  { %3063 = vrot.lane.b32.xlu1 %v7324_v44, %s5930_s17  ;;  %3018 = vrot.lane.b32.xlu2 %v7328_v24, %s5929_s0  ;;  %v2938_v58 = vsel %vm431_vm1, %v7326_v47, 0  ;;  %v2827_v2 = vpack.c.bf16 %v2811_v49, %v2811_v49  ;;  %v2820_v42 = vpack.c.bf16 %v2804_v36, %v2804_v36  ;;  %v2857_v21 = vpack.c.bf16 %v2841_v10, %v2841_v10 }
0x1824   :  { %2940 = vmatpush.bf16.xpose.msrb.mxu2 %v2938_v58  ;;  %v2826_v37 = vpack.c.bf16 %v2810_v18, %v2810_v18  ;;  %v7368_v58 = vpack.c.b16 %v2987_v16, %v2986_v3  ;;  %v2825_v60 = vpack.c.bf16 %v2809_v46, %v2809_v46  ;;  %v2824_v15 = vpack.c.bf16 %v2808_v54, %v2808_v54 }
0x1825   :  { %v2896_v19 = vunpack.c.l.b16 %v2827_v2  ;;  %v2856_v49 = vpack.c.bf16 %v2840_v11, %v2840_v11  ;;  %v2889_v18 = vunpack.c.l.b16 %v2820_v42  ;;  %v2985_v16 = vunpack.c.l.b16 %v2857_v21 }
0x1826   :  { %v2895_v31 = vunpack.c.l.b16 %v2826_v37  ;;  %v2894_v43 = vunpack.c.l.b16 %v2825_v60  ;;  %v2893_v50 = vunpack.c.l.b16 %v2824_v15 }
0x1827   :  { %v2984_v35 = vunpack.c.l.b16 %v2856_v49 }
0x1828   :  { %v2908_v28 = vpack.c.b16 %v2896_v19, %v2895_v31  ;;  %v7383_v52 = vpack.c.b16 %v2894_v43, %v2893_v50 }
0x1829   :  { %v7402_v59 = vpack.c.b16 %v2985_v16, %v2984_v35 }
0x182a   :  { %v2926_v55 = vsel %vm431_vm1, %v2908_v28, 0  ;;  %v2923_v25 = vsel %vm431_vm1, %v7383_v52, 0 }
0x182b   :  { %3059 = vrot.lane.b32.xlu1 %v7212_v63, %s5932_s19  ;;  %3016 = vrot.lane.b32.xlu2 %v7342_v29, %s5929_s0 }
0x182c   :  { %2941 = vmatpush.bf16.xpose.msrb.mxu2 %v2935_v57  ;;  %v2805_v57 = vadd.f32 %v7272_v45, %v6900_v9 }
0x182e   :  { %v2821_v14 = vpack.c.bf16 %v2805_v57, %v2805_v57 }
0x1830   :  { %v2890_v45 = vunpack.c.l.b16 %v2821_v14 }
0x1832   :  { %v7400_v9 = vpack.c.b16 %v2890_v45, %v2889_v18 }
0x1833   :  { %3014 = vrot.lane.b32.xlu2 %v7356_v1, %s5929_s0  ;;  %3199 = vrot.lane.b32.xlu1 %v7326_v47, %s5931_s18 }
0x1834   :  { %2942 = vmatpush.bf16.xpose.msrb.mxu2 %v2932_v51  ;;  %v2920_v51 = vsel %vm431_vm1, %v7324_v44, 0  ;;  %v2917_v61 = vsel %vm431_vm1, %v7400_v9, 0 }
0x183b   :  { %3010 = vrot.lane.b32.xlu2 %v7368_v58, %s5929_s0  ;;  %3195 = vrot.lane.b32.xlu1 %v7354_v39, %s5931_s18 }
0x183c   :  { %2943 = vmatpush.bf16.xpose.msrb.mxu2 %v2929_v38 }
0x1843   :  { %3140 = vrot.lane.b32.xlu1 %v7342_v29, %s5932_s19 }
0x1844   :  { %2944 = vmatpush.bf16.xpose.msrb.mxu2 %v2926_v55 }
0x184b   :  { %3138 = vrot.lane.b32.xlu1 %v7356_v1, %s5932_s19 }
0x184c   :  { %2945 = vmatpush.bf16.xpose.msrb.mxu2 %v2923_v25 }
0x1853   :  { %3191 = vrot.lane.b32.xlu1 %v2908_v28, %s5931_s18 }
0x1854   :  { %2946 = vmatpush.bf16.xpose.msrb.mxu2 %v2920_v51 }
0x185b   :  { %3132 = vrot.lane.b32.xlu1 %v7402_v59, %s5932_s19 }
0x185c   :  { %2947 = vmatpush.bf16.xpose.msrb.mxu2 %v2917_v61 }
0x1863   :  { %3189 = vrot.lane.b32.xlu1 %v7383_v52, %s5931_s18  ;;  %5512 = vmatmul.msk.bf16.vlgmr.msrb.gmra.mxu2 %vm431_vm1, %v2872_v41 }
0x1864   :  { %3176 = vmatpush.bf16.msra.mxu2 %v7116_v13 }
0x1865   :  { %v3013_v37 = vpop.permute.xlu1 %3012 }
0x186b   :  { %3130 = vrot.lane.b32.xlu1 %v7296_v27, %s5932_s19 }
0x186d   :  { %v3007_v43 = vpop.permute.xlu1 %3006 }
0x1873   :  { %3187 = vrot.lane.b32.xlu1 %v7324_v44, %s5931_s18 }
0x1875   :  { %v3005_v50 = vpop.permute.xlu1 %3004 }
0x187b   :  { %3183 = vrot.lane.b32.xlu1 %v7212_v63, %s5934_s30 }
0x187d   :  { %v3019_v3 = vpop.permute.xlu2 %3018 }
0x187e   :  { %3028 = vmatpush.bf16.msra.mxu3 %v3019_v3 }
0x1883   :  { %3319 = vrot.lane.b32.xlu1 %v7354_v39, %s5933_s2 }
0x1885   :  { %v3017_v13 = vpop.permute.xlu2 %3016 }
0x1886   :  { %3029 = vmatpush.bf16.msra.mxu3 %v3017_v13 }
0x188b   :  { %3315 = vrot.lane.b32.xlu1 %v2908_v28, %s5933_s2 }
0x188d   :  { %v3015_v2 = vpop.permute.xlu2 %3014 }
0x188e   :  { %3030 = vmatpush.bf16.msra.mxu3 %v3015_v2 }
0x1892   :  { %3031 = vmatpush.bf16.msra.mxu3 %v3013_v37 }
0x1893   :  { %3311 = vrot.lane.b32.xlu1 %v7324_v44, %s5933_s2 }
0x1895   :  { %v3011_v46 = vpop.permute.xlu2 %3010 }
0x1896   :  { %3032 = vmatpush.bf16.msra.mxu3 %v3011_v46 }
0x18e6   :  { %v2949_v19 = vpop.f32.mrf.mxu2 }
0x18e7   :  { %v2953_v38 = vmul.f32 0.35355338, %v2949_v19 }
0x18e9   :  { %2954 = vmax.xlane.f32.xlu0 %v2953_v38 }
0x18ee   :  { %v2951_v54 = vpop.f32.mrf.mxu2 }
0x18fd   :  { %3008 = vrot.lane.b32.xlu0 %v7402_v59, %s5929_s0 }
0x1905   :  { %3075 = vrot.lane.b32.xlu0 %v7326_v47, %s5930_s17 }
0x190d   :  { %3071 = vrot.lane.b32.xlu0 %v7354_v39, %s5930_s17  ;;  %v3074_v39 = vpop.permute.xlu1 %3073 }
0x1915   :  { %3067 = vrot.lane.b32.xlu0 %v2908_v28, %s5930_s17  ;;  %v3099_v28 = vsel %vm431_vm1, %v3074_v39, 0  ;;  %v3070_v14 = vpop.permute.xlu1 %3069 }
0x1916   :  { %v3093_v11 = vsel %vm431_vm1, %v3070_v14, 0 }
0x191d   :  { %3061 = vrot.lane.b32.xlu0 %v7400_v9, %s5930_s17  ;;  %v3064_v45 = vpop.permute.xlu1 %3063 }
0x191e   :  { %v3084_v37 = vsel %vm431_vm1, %v3064_v45, 0 }
0x1925   :  { %v3060_v49 = vpop.permute.xlu1 %3059 }
0x192d   :  { %v7447_v18 = vpop.permute.xlu1 %3199 }
0x1935   :  { %v7450_v13 = vpop.permute.xlu1 %3195 }
0x193d   :  { %v3141_v46 = vpop.permute.xlu1 %3140 }
0x195c   :  { %v2955_v44 = vpop.xlane.xlu0 %2954 }
0x195d   :  { %v2956_v31 = vsub.f32 %v2953_v38, %v2955_v44  ;;  %v3139_v44 = vpop.permute.xlu1 %3138 }
0x195f   :  { %v2957_v60 = vmul.f32 1.442695, %v2956_v31 }
0x1961   :  { %5805 = vpow2.f32 %v2957_v60 }
0x1967   :  { %v5806_v15 = vpop.eup %5805 }
0x1968   :  { %2959 = vadd.xlane.f32.xlu2 %v5806_v15 }
0x196f   :  { %v3009_v55 = vpop.permute.xlu0 %3008 }
0x1970   :  { %3033 = vmatpush.bf16.msra.mxu3 %v3009_v55 }
0x1974   :  { %3034 = vmatpush.bf16.msra.mxu3 %v3007_v43 }
0x1977   :  { %v3076_v57 = vpop.permute.xlu0 %3075 }
0x1978   :  { %v3102_v25 = vsel %vm431_vm1, %v3076_v57, 0  ;;  %3035 = vmatpush.bf16.msra.mxu3 %v3005_v50 }
0x1979   :  { %3104 = vmatpush.bf16.xpose.msrb.mxu0 %v3102_v25 }
0x197f   :  { %v3072_v36 = vpop.permute.xlu0 %3071 }
0x1980   :  { %3065 = vrot.lane.b32.xlu2 %v7383_v52, %s5930_s17  ;;  %v3096_v10 = vsel %vm431_vm1, %v3072_v36, 0 }
0x1981   :  { %3105 = vmatpush.bf16.xpose.msrb.mxu0 %v3099_v28 }
0x1987   :  { %v3068_v42 = vpop.permute.xlu0 %3067 }
0x1988   :  { %3197 = vrot.lane.b32.xlu2 %v7308_v8, %s5931_s18  ;;  %v3090_v21 = vsel %vm431_vm1, %v3068_v42, 0 }
0x1989   :  { %3106 = vmatpush.bf16.xpose.msrb.mxu0 %v3096_v10 }
0x198f   :  { %v3062_v19 = vpop.permute.xlu0 %3061 }
0x1990   :  { %3142 = vrot.lane.b32.xlu2 %v7328_v24, %s5932_s19  ;;  %v3081_v54 = vsel %vm431_vm1, %v3062_v19, 0 }
0x1991   :  { %3107 = vmatpush.bf16.xpose.msrb.mxu0 %v3093_v11 }
0x1998   :  { %3193 = vrot.lane.b32.xlu2 %v7316_v7, %s5931_s18 }
0x1999   :  { %3108 = vmatpush.bf16.xpose.msrb.mxu0 %v3090_v21  ;;  %v3226_v21 = vsel %vm431_vm1, %v7447_v18, 0 }
0x19a0   :  { %3136 = vrot.lane.b32.xlu2 %v7286_v34, %s5932_s19 }
0x19db   :  { %v2960_v51 = vpop.xlane.xlu2 %2959 }
0x19dc   :  { %5807 = vrcp.f32 %v2960_v51 }
0x19e2   :  { %v5808_v16 = vpop.eup %5807 }
0x19e3   :  { %v2962_v35 = vmul.f32 %v5808_v16, %v5806_v15  ;;  %v3066_v61 = vpop.permute.xlu2 %3065 }
0x19e4   :  { %v3087_v41 = vsel %vm431_vm1, %v3066_v61, 0 }
0x19e5   :  { %v2963_v3 = vpack.c.bf16 %v2962_v35, %v2962_v35  ;;  %3109 = vmatpush.bf16.xpose.msrb.mxu0 %v3087_v41 }
0x19e7   :  { %3036 = vmatmul.bf16.vlgmr.msra.gmra.mxu3 %v2963_v3 }
0x19eb   :  { %v7452_v2 = vpop.permute.xlu2 %3197 }
0x19ed   :  { %3110 = vmatpush.bf16.xpose.msrb.mxu0 %v3084_v37 }
0x19f3   :  { %v3143_v38 = vpop.permute.xlu2 %3142 }
0x19f4   :  { %3152 = vmatpush.bf16.msrb.mxu3 %v3143_v38 }
0x19f5   :  { %3111 = vmatpush.bf16.xpose.msrb.mxu0 %v3081_v54 }
0x19f8   :  { %3153 = vmatpush.bf16.msrb.mxu3 %v3141_v46 }
0x19fb   :  { %v3194_v31 = vpop.permute.xlu2 %3193 }
0x19fc   :  { %3154 = vmatpush.bf16.msrb.mxu3 %v3139_v44 }
0x1a03   :  { %v3137_v60 = vpop.permute.xlu2 %3136 }
0x1a04   :  { %3155 = vmatpush.bf16.msrb.mxu3 %v3137_v60 }
0x1a6a   :  { %v3037_v15 = vpop.f32.mrf.mxu3 }
0x1a6b   :  { %v3041_v43 = vpack.c.bf16 %v3037_v15, %v3037_v15 }
0x1a6d   :  { %5513 = vmatmul.msk.bf16.vlgmr.msra.gmra.mxu0 %vm431_vm1, %v3041_v43 }
0x1a6e   :  { %3300 = vmatpush.bf16.msra.mxu0 %v7142_v32  ;;  %v3192_v32 = vpop.permute.xlu1 %3191 }
0x1a6f   :  { %v3214_v16 = vsel %vm431_vm1, %v3192_v32, 0 }
0x1a72   :  { %v3039_v55 = vpop.f32.mrf.mxu3 }
0x1a7d   :  { %5514 = vmatmul.msk.bf16.vlgmr.msrb.gmra.mxu0 %vm431_vm1, %v3060_v49 }
0x1aea   :  { %v7459_v50 = vpop.f32.mrf.mxu0 }
0x1af2   :  { %v3056_v57 = vpop.f32.mrf.mxu0 }
0x1afa   :  { %v3113_v25 = vpop.f32.mrf.mxu0 }
0x1afb   :  { %v3117_v39 = vmul.f32 0.35355338, %v3113_v25 }
0x1afd   :  { %3118 = vmax.xlane.f32.xlu0 %v3117_v39 }
0x1b02   :  { %v3115_v28 = vpop.f32.mrf.mxu0 }
0x1b11   :  { %3134 = vrot.lane.b32.xlu0 %v7368_v58, %s5932_s19 }
0x1b19   :  { %3128 = vrot.lane.b32.xlu0 %v7300_v0, %s5932_s19 }
0x1b21   :  { %3185 = vrot.lane.b32.xlu0 %v7400_v9, %s5931_s18 }
0x1b29   :  { %3323 = vrot.lane.b32.xlu0 %v7326_v47, %s5933_s2 }
0x1b31   :  { %3317 = vrot.lane.b32.xlu0 %v7316_v7, %s5933_s2 }
0x1b39   :  { %3313 = vrot.lane.b32.xlu0 %v7383_v52, %s5933_s2 }
0x1b41   :  { %3309 = vrot.lane.b32.xlu0 %v7400_v9, %s5933_s2  ;;  %v3133_v9 = vpop.permute.xlu1 %3132 }
0x1b49   :  { %3266 = vrot.lane.b32.xlu0 %v7328_v24, %s5934_s30  ;;  %v3190_v10 = vpop.permute.xlu1 %3189 }
0x1b4a   :  { %v3211_v35 = vsel %vm431_vm1, %v3190_v10, 0 }
0x1b51   :  { %3262 = vrot.lane.b32.xlu0 %v7356_v1, %s5934_s30  ;;  %v3131_v11 = vpop.permute.xlu1 %3130 }
0x1b59   :  { %3258 = vrot.lane.b32.xlu0 %v7368_v58, %s5934_s30  ;;  %v3188_v41 = vpop.permute.xlu1 %3187 }
0x1b5a   :  { %v3208_v3 = vsel %vm431_vm1, %v3188_v41, 0 }
0x1b61   :  { %3256 = vrot.lane.b32.xlu0 %v7402_v59, %s5934_s30 }
0x1b69   :  { %3254 = vrot.lane.b32.xlu0 %v7296_v27, %s5934_s30 }
0x1b70   :  { %v3119_v7 = vpop.xlane.xlu0 %3118 }
0x1b71   :  { %v3120_v47 = vsub.f32 %v3117_v39, %v3119_v7  ;;  %3252 = vrot.lane.b32.xlu0 %v7300_v0, %s5934_s30 }
0x1b73   :  { %v3121_v52 = vmul.f32 1.442695, %v3120_v47 }
0x1b75   :  { %5809 = vpow2.f32 %v3121_v52 }
0x1b79   :  { %3390 = vrot.lane.b32.xlu0 %v7328_v24, %s5935_s12 }
0x1b7b   :  { %v5810_v36 = vpop.eup %5809 }
0x1b7c   :  { %3123 = vadd.xlane.f32.xlu2 %v5810_v36 }
0x1b81   :  { %3386 = vrot.lane.b32.xlu0 %v7356_v1, %s5935_s12  ;;  %v3223_v1 = vsel %vm431_vm1, %v7452_v2, 0 }
0x1b83   :  { %v3135_v14 = vpop.permute.xlu0 %3134 }
0x1b84   :  { %3156 = vmatpush.bf16.msrb.mxu3 %v3135_v14 }
0x1b88   :  { %3157 = vmatpush.bf16.msrb.mxu3 %v3133_v9 }
0x1b89   :  { %3382 = vrot.lane.b32.xlu0 %v7368_v58, %s5935_s12  ;;  %v3220_v58 = vsel %vm431_vm1, %v7450_v13, 0 }
0x1b8b   :  { %v3129_v42 = vpop.permute.xlu0 %3128 }
0x1b8c   :  { %3158 = vmatpush.bf16.msrb.mxu3 %v3131_v11 }
0x1b90   :  { %3159 = vmatpush.bf16.msrb.mxu3 %v3129_v42 }
0x1b93   :  { %v3186_v24 = vpop.permute.xlu0 %3185 }
0x1b94   :  { %3228 = vmatpush.bf16.xpose.msra.mxu3 %v3226_v21  ;;  %3321 = vrot.lane.b32.xlu2 %v7308_v8, %s5933_s2  ;;  %v3217_v8 = vsel %vm431_vm1, %v3194_v31, 0  ;;  %v3205_v2 = vsel %vm431_vm1, %v3186_v24, 0  ;;  %v3184_v31 = vpop.permute.xlu1 %3183 }
0x1b9b   :  { %v3324_v45 = vpop.permute.xlu0 %3323 }
0x1b9c   :  { %3229 = vmatpush.bf16.xpose.msra.mxu3 %v3223_v1  ;;  %v3350_v49 = vsel %vm431_vm1, %v3324_v45, 0  ;;  %3307 = vrot.lane.b32.xlu2 %v7212_v63, %s5935_s12  ;;  %v3320_v25 = vpop.permute.xlu1 %3319 }
0x1b9d   :  { %3352 = vmatpush.bf16.xpose.msrb.mxu1 %v3350_v49  ;;  %v3344_v28 = vsel %vm431_vm1, %v3320_v25, 0 }
0x1ba3   :  { %v3318_v51 = vpop.permute.xlu0 %3317 }
0x1ba4   :  { %3230 = vmatpush.bf16.xpose.msra.mxu3 %v3220_v58  ;;  %3264 = vrot.lane.b32.xlu2 %v7342_v29, %s5934_s30  ;;  %v3341_v7 = vsel %vm431_vm1, %v3318_v51, 0  ;;  %v3316_v47 = vpop.permute.xlu1 %3315 }
0x1ba5   :  { %v3338_v9 = vsel %vm431_vm1, %v3316_v47, 0 }
0x1bab   :  { %v3314_v18 = vpop.permute.xlu0 %3313 }
0x1bac   :  { %3231 = vmatpush.bf16.xpose.msra.mxu3 %v3217_v8  ;;  %3260 = vrot.lane.b32.xlu2 %v7286_v34, %s5934_s30  ;;  %v3312_v10 = vpop.permute.xlu1 %3311 }
0x1bad   :  { %v3332_v14 = vsel %vm431_vm1, %v3312_v10, 0  ;;  %v7563_v10 = vld [vmem:[%s8404_s3 + $0x20] sm:$0xff] }
0x1bb3   :  { %v3310_v63 = vpop.permute.xlu0 %3309 }
0x1bb4   :  { %3232 = vmatpush.bf16.xpose.msra.mxu3 %v3214_v16  ;;  %v3329_v11 = vsel %vm431_vm1, %v3310_v63, 0 }
0x1bbb   :  { %v3267_v61 = vpop.permute.xlu0 %3266 }
0x1bbc   :  { %3233 = vmatpush.bf16.xpose.msra.mxu3 %v3211_v35  ;;  %3276 = vmatpush.bf16.msrb.mxu2 %v3267_v61 }
0x1bc3   :  { %v3263_v13 = vpop.permute.xlu0 %3262 }
0x1bc4   :  { %3234 = vmatpush.bf16.xpose.msra.mxu3 %v3208_v3 }
0x1bcb   :  { %v3259_v37 = vpop.permute.xlu0 %3258 }
0x1bcc   :  { %3235 = vmatpush.bf16.xpose.msra.mxu3 %v3205_v2 }
0x1bd3   :  { %v3257_v46 = vpop.permute.xlu0 %3256 }
0x1bdb   :  { %v3255_v19 = vpop.permute.xlu0 %3254 }
0x1be3   :  { %v3253_v38 = vpop.permute.xlu0 %3252 }
0x1beb   :  { %v3391_v54 = vpop.permute.xlu0 %3390 }
0x1bec   :  { %3400 = vmatpush.bf16.msrb.mxu0 %v3391_v54 }
0x1bef   :  { %v3124_v44 = vpop.xlane.xlu2 %3123 }
0x1bf0   :  { %5811 = vrcp.f32 %v3124_v44 }
0x1bf6   :  { %v5812_v60 = vpop.eup %5811 }
0x1bf7   :  { %v3126_v15 = vmul.f32 %v5812_v60, %v5810_v36  ;;  %v3322_v43 = vpop.permute.xlu2 %3321  ;;  %v3335_v36 = vsel %vm431_vm1, %v3314_v18, 0 }
0x1bf8   :  { %v3347_v55 = vsel %vm431_vm1, %v3322_v43, 0 }
0x1bf9   :  { %v3127_v57 = vpack.c.bf16 %v3126_v15, %v3126_v15  ;;  %3353 = vmatpush.bf16.xpose.msrb.mxu1 %v3347_v55 }
0x1bfb   :  { %3160 = vmatmul.bf16.vlgmr.msrb.gmra.mxu3 %v3127_v57 }
0x1bff   :  { %v3308_v39 = vpop.permute.xlu2 %3307 }
0x1c01   :  { %3354 = vmatpush.bf16.xpose.msrb.mxu1 %v3344_v28 }
0x1c07   :  { %v3265_v32 = vpop.permute.xlu2 %3264 }
0x1c08   :  { %3277 = vmatpush.bf16.msrb.mxu2 %v3265_v32 }
0x1c09   :  { %3355 = vmatpush.bf16.xpose.msrb.mxu1 %v3341_v7 }
0x1c0b   :  { %5516 = vmatmul.msk.bf16.vlgmr.msra.gmra.mxu3 %vm431_vm1, %v3184_v31 }
0x1c0c   :  { %3278 = vmatpush.bf16.msrb.mxu2 %v3263_v13 }
0x1c0f   :  { %v3261_v52 = vpop.permute.xlu2 %3260 }
0x1c10   :  { %3279 = vmatpush.bf16.msrb.mxu2 %v3261_v52 }
0x1c11   :  { %3356 = vmatpush.bf16.xpose.msrb.mxu1 %v3338_v9 }
0x1c14   :  { %3280 = vmatpush.bf16.msrb.mxu2 %v3259_v37 }
0x1c18   :  { %3281 = vmatpush.bf16.msrb.mxu2 %v3257_v46 }
0x1c19   :  { %3357 = vmatpush.bf16.xpose.msrb.mxu1 %v3335_v36  ;;  %v7557_v36 = vld [vmem:[%s8404_s3 + $0x28] sm:$0xff] }
0x1c1c   :  { %3282 = vmatpush.bf16.msrb.mxu2 %v3255_v19 }
0x1c20   :  { %3283 = vmatpush.bf16.msrb.mxu2 %v3253_v38 }
0x1c21   :  { %3358 = vmatpush.bf16.xpose.msrb.mxu1 %v3332_v14 }
0x1c29   :  { %3359 = vmatpush.bf16.xpose.msrb.mxu1 %v3329_v11 }
0x1c30   :  { %5518 = vmatmul.msk.bf16.vlgmr.msrb.gmra.mxu1 %vm431_vm1, %v3308_v39 }
0x1c7e   :  { %v3161_v42 = vpop.f32.mrf.mxu3 }
0x1c7f   :  { %v3165_v21 = vpack.c.bf16 %v3161_v42, %v3161_v42 }
0x1c81   :  { %5515 = vmatmul.msk.bf16.vlgmr.msra.gmra.mxu2 %vm431_vm1, %v3165_v21 }
0x1c82   :  { %3424 = vmatpush.bf16.msra.mxu2 %v7230_v33  ;;  %v7533_v33 = vld [vmem:[%s8406_s5 + $0x10] sm:$0x3f] }
0x1c83   :  { %v3467_v18 = vperm.slane %v7533_v33, 0 }
0x1c86   :  { %v3163_v24 = vpop.f32.mrf.mxu3 }
0x1c8e   :  { %v3237_v1 = vpop.f32.mrf.mxu3 }
0x1c8f   :  { %v3241_v45 = vmul.f32 0.35355338, %v3237_v1  ;;  %v3655_v1 = vperm.slane %v7533_v33, 2 }
0x1c91   :  { %3242 = vmax.xlane.f32.xlu1 %v3241_v45 }
0x1c96   :  { %v3239_v49 = vpop.f32.mrf.mxu3 }
0x1c97   :  { %v5708_v49 = vld [vmem:[%s8402_s1 + $0x100] sm:$0xff] }
0x1cad   :  { %v3361_v58 = vpop.f32.mrf.mxu1 }
0x1cae   :  { %v3365_v51 = vmul.f32 0.35355338, %v3361_v58  ;;  %v5709_v58 = vld [vmem:[%s8402_s1 + $0x108] sm:$0xff] }
0x1cb0   :  { %3366 = vmax.xlane.f32.xlu1 %v3365_v51 }
0x1cb5   :  { %v3363_v8 = vpop.f32.mrf.mxu1 }
0x1cb6   :  { %v5711_v8 = vld [vmem:[%s8402_s1 + $0x118] sm:$0xff] }
0x1cc9   :  { %3388 = vrot.lane.b32.xlu1 %v7342_v29, %s5935_s12  ;;  %v2673_v29 = vadd.f32 %v1856_v56, %v6360_v62 }
0x1ccb   :  { %v3058_v16 = vadd.f32 %v7459_v50, %v2673_v29  ;;  %v3387_v50 = vpop.permute.xlu0 %3386  ;;  %v5713_v29 = vld [vmem:[%s8402_s1 + $0x128] sm:$0xff] }
0x1cd1   :  { %3380 = vrot.lane.b32.xlu1 %v7402_v59, %s5935_s12 }
0x1cd3   :  { %v3383_v57 = vpop.permute.xlu0 %3382 }
0x1cd9   :  { %3378 = vrot.lane.b32.xlu1 %v7296_v27, %s5935_s12 }
0x1ce1   :  { %3469 = vrot.lane.b32.xlu1 %v3467_v18, %s5936_s20  ;;  %v5712_v18 = vld [vmem:[%s8402_s1 + $0x120] sm:$0xff] }
0x1ce9   :  { %3657 = vrot.lane.b32.xlu1 %v3655_v1, %s5928_s11 }
0x1d04   :  { %v3243_v59 = vpop.xlane.xlu1 %3242  ;;  %v3178_v63 = vpop.f32.mrf.mxu2 }
0x1d05   :  { %v3244_v35 = vsub.f32 %v3241_v45, %v3243_v59  ;;  %v3182_v27 = vadd.f32 %v3178_v63, %v3058_v16  ;;  %v5714_v16 = vld [vmem:[%s8402_s1 + $0x130] sm:$0xff]  ;;  %v5715_v59 = vld [vmem:[%s8402_s1 + $0x138] sm:$0xff] }
0x1d07   :  { %v3245_v61 = vmul.f32 1.442695, %v3244_v35 }
0x1d09   :  { %5813 = vpow2.f32 %v3245_v61 }
0x1d0c   :  { %v3180_v41 = vpop.f32.mrf.mxu2 }
0x1d0f   :  { %v5814_v3 = vpop.eup %5813 }
0x1d10   :  { %3247 = vadd.xlane.f32.xlu2 %v5814_v3 }
0x1d23   :  { %v3367_v13 = vpop.xlane.xlu1 %3366 }
0x1d24   :  { %v3368_v2 = vsub.f32 %v3365_v51, %v3367_v13  ;;  %v5710_v51 = vld [vmem:[%s8402_s1 + $0x110] sm:$0xff]  ;;  %v7608_v13 = vperm.slane %v7533_v33, 1 }
0x1d26   :  { %v3369_v37 = vmul.f32 1.442695, %v3368_v2 }
0x1d28   :  { %5815 = vpow2.f32 %v3369_v37  ;;  %3384 = vrot.lane.b32.xlu2 %v7286_v34, %s5935_s12 }
0x1d2e   :  { %v5816_v30 = vpop.eup %5815 }
0x1d2f   :  { %3371 = vadd.xlane.f32.xlu0 %v5816_v30 }
0x1d30   :  { %3376 = vrot.lane.b32.xlu2 %v7300_v0, %s5935_s12 }
0x1d3b   :  { %v3389_v56 = vpop.permute.xlu1 %3388 }
0x1d3c   :  { %3401 = vmatpush.bf16.msrb.mxu0 %v3389_v56 }
0x1d40   :  { %3402 = vmatpush.bf16.msrb.mxu0 %v3387_v50 }
0x1d43   :  { %v3381_v46 = vpop.permute.xlu1 %3380 }
0x1d4b   :  { %v3379_v19 = vpop.permute.xlu1 %3378 }
0x1d53   :  { %v7545_v38 = vpop.permute.xlu1 %3469 }
0x1d54   :  { %v3472_v54 = vadd.f32 %v7545_v38, %v6205_v12 }
0x1d56   :  { %v3473_v44 = vpack.c.bf16 %v3472_v54, %v3472_v54 }
0x1d58   :  { %v3693_v31 = vunpack.c.l.b16 %v3473_v44 }
0x1d5a   :  { %v7549_v60 = vpack.c.b16 %v3693_v31, %v3693_v31 }
0x1d5b   :  { %v7610_v2 = vpop.permute.xlu1 %3657 }
0x1d5c   :  { %3695 = vrot.lane.b32.xlu2 %v7549_v60, %s5936_s20 }
0x1d83   :  { %v3248_v34 = vpop.xlane.xlu2 %3247 }
0x1d84   :  { %5817 = vrcp.f32 %v3248_v34 }
0x1d8a   :  { %v5818_v0 = vpop.eup %5817 }
0x1d8b   :  { %v3250_v15 = vmul.f32 %v5818_v0, %v5814_v3  ;;  %v3385_v43 = vpop.permute.xlu2 %3384 }
0x1d8c   :  { %3403 = vmatpush.bf16.msrb.mxu0 %v3385_v43 }
0x1d8d   :  { %v3251_v55 = vpack.c.bf16 %v3250_v15, %v3250_v15 }
0x1d8f   :  { %3284 = vmatmul.bf16.vlgmr.msrb.gmra.mxu2 %v3251_v55 }
0x1d90   :  { %3404 = vmatpush.bf16.msrb.mxu0 %v3383_v57  ;;  %3579 = vmatpush.bf16.msrb.mxu2 %v7557_v36 }
0x1d93   :  { %v3377_v25 = vpop.permute.xlu2 %3376 }
0x1d94   :  { %3405 = vmatpush.bf16.msrb.mxu0 %v3381_v46  ;;  %3580 = vmatpush.bf16.msrb.mxu2 %v7563_v10 }
0x1d98   :  { %3406 = vmatpush.bf16.msrb.mxu0 %v3379_v19 }
0x1d9c   :  { %3407 = vmatpush.bf16.msrb.mxu0 %v3377_v25 }
0x1da2   :  { %v3372_v28 = vpop.xlane.xlu0 %3371 }
0x1da3   :  { %5819 = vrcp.f32 %v3372_v28 }
0x1da9   :  { %v5820_v47 = vpop.eup %5819 }
0x1daa   :  { %v3374_v52 = vmul.f32 %v5820_v47, %v5816_v30 }
0x1dac   :  { %v3375_v9 = vpack.c.bf16 %v3374_v52, %v3374_v52 }
0x1e12   :  { %v3285_v39 = vpop.f32.mrf.mxu2 }
0x1e13   :  { %v3289_v32 = vpack.c.bf16 %v3285_v39, %v3285_v39 }
0x1e15   :  { %5517 = vmatmul.msk.bf16.vlgmr.msra.gmra.mxu0 %vm431_vm1, %v3289_v32 }
0x1e1a   :  { %v3287_v7 = vpop.f32.mrf.mxu2 }
0x1e25   :  { %3408 = vmatmul.bf16.vlgmr.msrb.gmra.mxu0 %v3375_v9 }
0x1e92   :  { %v3302_v14 = vpop.f32.mrf.mxu0 }
0x1e93   :  { %v3306_v11 = vadd.f32 %v3302_v14, %v3182_v27 }
0x1e9a   :  { %v3304_v42 = vpop.f32.mrf.mxu0 }
0x1ea2   :  { %v3409_v21 = vpop.f32.mrf.mxu0 }
0x1ea3   :  { %v3413_v24 = vpack.c.bf16 %v3409_v21, %v3409_v21 }
0x1ea5   :  { %5519 = vmatmul.msk.bf16.vlgmr.msra.gmra.mxu2 %vm431_vm1, %v3413_v24 }
0x1eaa   :  { %v3411_v45 = vpop.f32.mrf.mxu0 }
0x1eb5   :  { %5585 = vmatmul.msk.bf16.vlgmr.msrb.gmra.mxu2 %vm62_vm0, %v5708_v49 }
0x1ec5   :  { %5586 = vmatmul.msk.bf16.gmra.mxu2 %vm62_vm0, %v5709_v58 }
0x1ed5   :  { %5587 = vmatmul.msk.bf16.gmra.mxu2 %vm62_vm0, %v5710_v51 }
0x1ee5   :  { %5588 = vmatmul.msk.bf16.gmra.mxu2 %vm62_vm0, %v5711_v8 }
0x1ef5   :  { %5589 = vmatmul.msk.bf16.gmra.mxu2 %vm62_vm0, %v5712_v18 }
0x1f05   :  { %5590 = vmatmul.msk.bf16.gmra.mxu2 %vm62_vm0, %v5713_v29 }
0x1f15   :  { %5591 = vmatmul.msk.bf16.gmra.mxu2 %vm62_vm0, %v5714_v16 }
0x1f25   :  { %5592 = vmatmul.msk.bf16.gmra.mxu2 %vm62_vm0, %v5715_v59 }
0x1f28   :  { %v3426_v63 = vpop.f32.mrf.mxu2 }
0x1f29   :  { %v7601_v35 = vadd.f32 %v3426_v63, %v3306_v11 }
0x1f30   :  { %v3428_v27 = vpop.f32.mrf.mxu2 }
0x1f38   :  { %v7603_v61 = vpop.f32.mrf.mxu2 }
0x1f40   :  { %v7605_v41 = vpop.f32.mrf.mxu2 }
0x1f48   :  { %v3587_v3 = vpop.f32.mrf.mxu2 }
0x1f49   :  { %v3625_v37 = vadd.f32 %v7608_v13, %v3587_v3  ;;  %v3662_v30 = vadd.f32 %v7610_v2, %v3587_v3 }
0x1f4b   :  { %v3641_v50 = vpack.c.bf16 %v3625_v37, %v3625_v37  ;;  %v3678_v46 = vpack.c.bf16 %v3662_v30, %v3662_v30 }
0x1f4d   :  { %v3715_v34 = vunpack.c.l.b16 %v3641_v50  ;;  %v3806_v0 = vunpack.c.l.b16 %v3678_v46 }
0x1f50   :  { %v3589_v56 = vpop.f32.mrf.mxu2 }
0x1f51   :  { %v3626_v19 = vadd.f32 %v7608_v13, %v3589_v56  ;;  %v3663_v54 = vadd.f32 %v7610_v2, %v3589_v56 }
0x1f53   :  { %v3642_v44 = vpack.c.bf16 %v3626_v19, %v3626_v19  ;;  %v3679_v31 = vpack.c.bf16 %v3663_v54, %v3663_v54 }
0x1f55   :  { %v3716_v15 = vunpack.c.l.b16 %v3642_v44  ;;  %v3807_v33 = vunpack.c.l.b16 %v3679_v31 }
0x1f57   :  { %v7616_v43 = vpack.c.b16 %v3716_v15, %v3715_v34  ;;  %v7618_v55 = vpack.c.b16 %v3807_v33, %v3806_v0 }
0x1f58   :  { %v3592_v57 = vpop.f32.mrf.mxu2 }
0x1f59   :  { %v3627_v25 = vadd.f32 %v7608_v13, %v3592_v57  ;;  %v3664_v39 = vadd.f32 %v7610_v2, %v3592_v57 }
0x1f5b   :  { %v3643_v32 = vpack.c.bf16 %v3627_v25, %v3627_v25  ;;  %v3680_v7 = vpack.c.bf16 %v3664_v39, %v3664_v39 }
0x1f5d   :  { %v3717_v11 = vunpack.c.l.b16 %v3643_v32  ;;  %v3808_v42 = vunpack.c.l.b16 %v3680_v7 }
0x1f60   :  { %v3594_v28 = vpop.f32.mrf.mxu2 }
0x1f61   :  { %v3628_v47 = vadd.f32 %v7608_v13, %v3594_v28  ;;  %v3665_v52 = vadd.f32 %v7610_v2, %v3594_v28 }
0x1f63   :  { %v3644_v9 = vpack.c.bf16 %v3628_v47, %v3628_v47  ;;  %v3681_v14 = vpack.c.bf16 %v3665_v52, %v3665_v52 }
0x1f65   :  { %v3718_v21 = vunpack.c.l.b16 %v3644_v9  ;;  %v3809_v24 = vunpack.c.l.b16 %v3681_v14 }
0x1f67   :  { %v7624_v1 = vpack.c.b16 %v3718_v21, %v3717_v11  ;;  %v7626_v45 = vpack.c.b16 %v3809_v24, %v3808_v42 }
0x1f68   :  { %v3597_v49 = vpop.f32.mrf.mxu2 }
0x1f69   :  { %v3629_v58 = vadd.f32 %v7608_v13, %v3597_v49  ;;  %v3666_v51 = vadd.f32 %v7610_v2, %v3597_v49 }
0x1f6b   :  { %v3645_v18 = vpack.c.bf16 %v3629_v58, %v3629_v58  ;;  %v3682_v29 = vpack.c.bf16 %v3666_v51, %v3666_v51 }
0x1f6d   :  { %v3719_v3 = vunpack.c.l.b16 %v3645_v18  ;;  %v3810_v37 = vunpack.c.l.b16 %v3682_v29 }
0x1f70   :  { %v3599_v8 = vpop.f32.mrf.mxu2 }
0x1f71   :  { %v3630_v16 = vadd.f32 %v7608_v13, %v3599_v8  ;;  %v3667_v59 = vadd.f32 %v7610_v2, %v3599_v8 }
0x1f73   :  { %v3646_v63 = vpack.c.bf16 %v3630_v16, %v3630_v16  ;;  %v3683_v27 = vpack.c.bf16 %v3667_v59, %v3667_v59 }
0x1f75   :  { %v3720_v30 = vunpack.c.l.b16 %v3646_v63  ;;  %v3811_v56 = vunpack.c.l.b16 %v3683_v27 }
0x1f77   :  { %v7632_v50 = vpack.c.b16 %v3720_v30, %v3719_v3  ;;  %v7634_v46 = vpack.c.b16 %v3811_v56, %v3810_v37 }
0x1f78   :  { %v3602_v19 = vpop.f32.mrf.mxu2 }
0x1f79   :  { %v3631_v54 = vadd.f32 %v7608_v13, %v3602_v19  ;;  %v3668_v44 = vadd.f32 %v7610_v2, %v3602_v19 }
0x1f7b   :  { %v3647_v34 = vpack.c.bf16 %v3631_v54, %v3631_v54  ;;  %v3684_v0 = vpack.c.bf16 %v3668_v44, %v3668_v44 }
0x1f7d   :  { %v3721_v39 = vunpack.c.l.b16 %v3647_v34  ;;  %v3812_v28 = vunpack.c.l.b16 %v3684_v0 }
0x1f80   :  { %v3604_v31 = vpop.f32.mrf.mxu2 }
0x1f81   :  { %v3632_v15 = vadd.f32 %v7608_v13, %v3604_v31  ;;  %v3669_v33 = vadd.f32 %v7610_v2, %v3604_v31 }
0x1f83   :  { %v3648_v57 = vpack.c.bf16 %v3632_v15, %v3632_v15  ;;  %v3685_v25 = vpack.c.bf16 %v3669_v33, %v3669_v33 }
0x1f85   :  { %v3722_v32 = vunpack.c.l.b16 %v3648_v57  ;;  %v3813_v7 = vunpack.c.l.b16 %v3685_v25 }
0x1f87   :  { %v7640_v47 = vpack.c.b16 %v3722_v32, %v3721_v39  ;;  %v7642_v52 = vpack.c.b16 %v3813_v7, %v3812_v28 }
0x1f88   :  { %v3607_v9 = vpop.f32.mrf.mxu2 }
0x1f89   :  { %v3670_v14 = vadd.f32 %v7610_v2, %v3607_v9 }
0x1f8b   :  { %v3686_v42 = vpack.c.bf16 %v3670_v14, %v3670_v14 }
0x1f8d   :  { %v3814_v49 = vunpack.c.l.b16 %v3686_v42 }
0x1f90   :  { %v3609_v11 = vpop.f32.mrf.mxu2 }
0x1f91   :  { %v3671_v21 = vadd.f32 %v7610_v2, %v3609_v11  ;;  %v3634_v14 = vadd.f32 %v7608_v13, %v3609_v11 }
0x1f93   :  { %v3687_v24 = vpack.c.bf16 %v3671_v21, %v3671_v21 }
0x1f95   :  { %v3815_v58 = vunpack.c.l.b16 %v3687_v24 }
0x1f97   :  { %v7646_v51 = vpack.c.b16 %v3815_v58, %v3814_v49  ;;  %v3633_v49 = vadd.f32 %v7608_v13, %v3607_v9 }
0x1f98   :  { %v3612_v8 = vpop.f32.mrf.mxu2 }
0x1f99   :  { %3838 = vrot.lane.b32.xlu0 %v7646_v51, %s5929_s0  ;;  %v3635_v19 = vadd.f32 %v7608_v13, %v3612_v8  ;;  %v3672_v34 = vadd.f32 %v7610_v2, %v3612_v8 }
0x1f9b   :  { %v3651_v39 = vpack.c.bf16 %v3635_v19, %v3635_v19  ;;  %v3688_v42 = vpack.c.bf16 %v3672_v34, %v3672_v34  ;;  %v3660_v19 = vadd.f32 %v7610_v2, %v7603_v61 }
0x1f9d   :  { %v3725_v58 = vunpack.c.l.b16 %v3651_v39 }
0x1fa0   :  { %v3614_v18 = vpop.f32.mrf.mxu2 }
0x1fa1   :  { %v3636_v63 = vadd.f32 %v7608_v13, %v3614_v18  ;;  %v3673_v54 = vadd.f32 %v7610_v2, %v3614_v18  ;;  %v3650_v18 = vpack.c.bf16 %v3634_v14, %v3634_v14 }
0x1fa3   :  { %v3652_v0 = vpack.c.bf16 %v3636_v63, %v3636_v63  ;;  %v3689_v28 = vpack.c.bf16 %v3673_v54, %v3673_v54  ;;  %v3724_v11 = vunpack.c.l.b16 %v3650_v18 }
0x1fa5   :  { %v3726_v21 = vunpack.c.l.b16 %v3652_v0  ;;  %v3817_v8 = vunpack.c.l.b16 %v3689_v28 }
0x1fa8   :  { %v3617_v29 = vpop.f32.mrf.mxu2 }
0x1fa9   :  { %v3637_v16 = vadd.f32 %v7608_v13, %v3617_v29  ;;  %v3674_v59 = vadd.f32 %v7610_v2, %v3617_v29  ;;  %v3816_v29 = vunpack.c.l.b16 %v3688_v42  ;;  %v3744_v42 = vsel %vm431_vm1, %v7616_v43, 0 }
0x1fab   :  { %v3653_v3 = vpack.c.bf16 %v3637_v16, %v3637_v16  ;;  %v3690_v37 = vpack.c.bf16 %v3674_v59, %v3674_v59  ;;  %v7668_v16 = vpack.c.b16 %v3726_v21, %v3725_v58  ;;  %v3649_v59 = vpack.c.bf16 %v3633_v49, %v3633_v49 }
0x1fac   :  { %v7670_v63 = vpack.c.b16 %v3817_v8, %v3816_v29  ;;  %v5525_v29 = vld [vmem:[%s8405_s4 + $0x20] sm:$0xf] }
0x1fad   :  { %v3727_v15 = vunpack.c.l.b16 %v3653_v3  ;;  %v3818_v33 = vunpack.c.l.b16 %v3690_v37  ;;  %v3723_v3 = vunpack.c.l.b16 %v3649_v59  ;;  %v7737_v59 = vsel %vm564_vm2, %v5525_v29, 0 }
0x1fae   :  { %3879 = vmatpush.bf16.msra.mxu1 %v7737_v59 }
0x1faf   :  { %v7676_v37 = vpack.c.b16 %v3724_v11, %v3723_v3 }
0x1fb0   :  { %v3619_v27 = vpop.f32.mrf.mxu2 }
0x1fb1   :  { %v3638_v30 = vadd.f32 %v7608_v13, %v3619_v27  ;;  %v3675_v56 = vadd.f32 %v7610_v2, %v3619_v27  ;;  %v3759_v27 = vsel %vm431_vm1, %v7668_v16, 0  ;;  %v3756_v9 = vsel %vm431_vm1, %v7676_v37, 0 }
0x1fb3   :  { %v3654_v44 = vpack.c.bf16 %v3638_v30, %v3638_v30  ;;  %v3691_v31 = vpack.c.bf16 %v3675_v56, %v3675_v56  ;;  %v3753_v30 = vsel %vm431_vm1, %v7640_v47, 0  ;;  %v3661_v56 = vadd.f32 %v7610_v2, %v7605_v41 }
0x1fb5   :  { %v3728_v57 = vunpack.c.l.b16 %v3654_v44  ;;  %v3819_v25 = vunpack.c.l.b16 %v3691_v31  ;;  %v3677_v54 = vpack.c.bf16 %v3661_v56, %v3661_v56  ;;  %v3676_v44 = vpack.c.bf16 %v3660_v19, %v3660_v19 }
0x1fb6   :  { %v3750_v31 = vsel %vm431_vm1, %v7632_v50, 0 }
0x1fb7   :  { %v7658_v32 = vpack.c.b16 %v3728_v57, %v3727_v15  ;;  %v7660_v7 = vpack.c.b16 %v3819_v25, %v3818_v33  ;;  %v3805_v34 = vunpack.c.l.b16 %v3677_v54  ;;  %v3804_v0 = vunpack.c.l.b16 %v3676_v44 }
0x1fb8   :  { %v3624_v33 = vadd.f32 %v7608_v13, %v7605_v41  ;;  %v3747_v57 = vsel %vm431_vm1, %v7624_v1, 0  ;;  %v3623_v25 = vadd.f32 %v7608_v13, %v7603_v61  ;;  %v3696_v61 = vpop.permute.xlu2 %3695 }
0x1fb9   :  { %3842 = vrot.lane.b32.xlu1 %v7660_v7, %s5929_s0  ;;  %v3762_v24 = vsel %vm431_vm1, %v7658_v32, 0  ;;  %v7694_v15 = vpack.c.b16 %v3805_v34, %v3804_v0 }
0x1fba   :  { %3764 = vmatpush.bf16.xpose.msrb.mxu3 %v3762_v24  ;;  %v3640_v39 = vpack.c.bf16 %v3624_v33, %v3624_v33  ;;  %v3639_v28 = vpack.c.bf16 %v3623_v25, %v3623_v25 }
0x1fbc   :  { %v3714_v14 = vunpack.c.l.b16 %v3640_v39  ;;  %v3713_v41 = vunpack.c.l.b16 %v3639_v28 }
0x1fbe   :  { %v7708_v21 = vpack.c.b16 %v3714_v14, %v3713_v41 }
0x1fc0   :  { %v3741_v24 = vsel %vm431_vm1, %v7708_v21, 0 }
0x1fc1   :  { %3840 = vrot.lane.b32.xlu1 %v7670_v63, %s5929_s0 }
0x1fc2   :  { %3765 = vmatpush.bf16.xpose.msrb.mxu3 %v3759_v27 }
0x1fc9   :  { %3836 = vrot.lane.b32.xlu1 %v7642_v52, %s5929_s0 }
0x1fca   :  { %3766 = vmatpush.bf16.xpose.msrb.mxu3 %v3756_v9 }
0x1fd1   :  { %3834 = vrot.lane.b32.xlu1 %v7634_v46, %s5929_s0 }
0x1fd2   :  { %3767 = vmatpush.bf16.xpose.msrb.mxu3 %v3753_v30 }
0x1fd9   :  { %3832 = vrot.lane.b32.xlu1 %v7626_v45, %s5929_s0 }
0x1fda   :  { %3768 = vmatpush.bf16.xpose.msrb.mxu3 %v3750_v31 }
0x1fe1   :  { %3828 = vrot.lane.b32.xlu1 %v7694_v15, %s5929_s0 }
0x1fe2   :  { %3769 = vmatpush.bf16.xpose.msrb.mxu3 %v3747_v57 }
0x1fe9   :  { %3906 = vrot.lane.b32.xlu1 %v7658_v32, %s5930_s17 }
0x1fea   :  { %3770 = vmatpush.bf16.xpose.msrb.mxu3 %v3744_v42 }
0x1ff1   :  { %3904 = vrot.lane.b32.xlu1 %v7668_v16, %s5930_s17 }
0x1ff2   :  { %3771 = vmatpush.bf16.xpose.msrb.mxu3 %v3741_v24 }
0x1ff9   :  { %3900 = vrot.lane.b32.xlu1 %v7640_v47, %s5930_s17  ;;  %5593 = vmatmul.msk.bf16.vlgmr.msrb.gmra.mxu3 %vm431_vm1, %v3696_v61 }
0x2001   :  { %3894 = vrot.lane.b32.xlu1 %v7616_v43, %s5930_s17 }
0x2009   :  { %3890 = vrot.lane.b32.xlu1 %v7549_v60, %s5937_s25 }
0x200b   :  { %v3839_v8 = vpop.permute.xlu0 %3838 }
0x2011   :  { %4037 = vrot.lane.b32.xlu1 %v7658_v32, %s5931_s18 }
0x2019   :  { %4033 = vrot.lane.b32.xlu1 %v7676_v37, %s5931_s18 }
0x2021   :  { %3971 = vrot.lane.b32.xlu1 %v7670_v63, %s5932_s19 }
0x2029   :  { %3969 = vrot.lane.b32.xlu1 %v7646_v51, %s5932_s19 }
0x202b   :  { %v3843_v49 = vpop.permute.xlu1 %3842 }
0x202c   :  { %3852 = vmatpush.bf16.msra.mxu0 %v3843_v49 }
0x2031   :  { %4029 = vrot.lane.b32.xlu1 %v7632_v50, %s5931_s18 }
0x2033   :  { %v3841_v58 = vpop.permute.xlu1 %3840 }
0x2034   :  { %3853 = vmatpush.bf16.msra.mxu0 %v3841_v58 }
0x2038   :  { %3854 = vmatpush.bf16.msra.mxu0 %v3839_v8 }
0x2039   :  { %3963 = vrot.lane.b32.xlu1 %v7626_v45, %s5932_s19 }
0x203b   :  { %v3837_v18 = vpop.permute.xlu1 %3836 }
0x203c   :  { %3855 = vmatpush.bf16.msra.mxu0 %v3837_v18 }
0x2041   :  { %3959 = vrot.lane.b32.xlu1 %v7694_v15, %s5932_s19 }
0x2043   :  { %v3835_v11 = vpop.permute.xlu1 %3834 }
0x2044   :  { %3856 = vmatpush.bf16.msra.mxu0 %v3835_v11 }
0x2049   :  { %4023 = vrot.lane.b32.xlu1 %v7708_v21, %s5931_s18 }
0x204b   :  { %v3833_v27 = vpop.permute.xlu1 %3832 }
0x204c   :  { %3857 = vmatpush.bf16.msra.mxu0 %v3833_v27 }
0x2051   :  { %4168 = vrot.lane.b32.xlu1 %v7658_v32, %s5933_s2 }
0x2053   :  { %v3829_v3 = vpop.permute.xlu1 %3828 }
0x2059   :  { %4162 = vrot.lane.b32.xlu1 %v7640_v47, %s5933_s2 }
0x205b   :  { %v3907_v9 = vpop.permute.xlu1 %3906 }
0x205c   :  { %v3933_v30 = vsel %vm431_vm1, %v3907_v9, 0 }
0x205d   :  { %3935 = vmatpush.bf16.xpose.msrb.mxu1 %v3933_v30 }
0x2061   :  { %4156 = vrot.lane.b32.xlu1 %v7616_v43, %s5933_s2 }
0x2063   :  { %v3905_v56 = vpop.permute.xlu1 %3904 }
0x2064   :  { %v3930_v19 = vsel %vm431_vm1, %v3905_v56, 0 }
0x2065   :  { %3936 = vmatpush.bf16.xpose.msrb.mxu1 %v3930_v19 }
0x206b   :  { %v3901_v54 = vpop.permute.xlu1 %3900 }
0x206c   :  { %v3924_v9 = vsel %vm431_vm1, %v3901_v54, 0 }
0x2073   :  { %v7752_v44 = vpop.permute.xlu1 %3894 }
0x2074   :  { %v3915_v54 = vsel %vm431_vm1, %v7752_v44, 0 }
0x207b   :  { %v7754_v31 = vpop.permute.xlu1 %3890 }
0x207c   :  { %v3773_v32 = vpop.f32.mrf.mxu3 }
0x207d   :  { %v3777_v34 = vmul.f32 0.35355338, %v3773_v32 }
0x207f   :  { %3778 = vmax.xlane.f32.xlu2 %v3777_v34 }
0x2083   :  { %v7756_v0 = vpop.permute.xlu1 %4037 }
0x2084   :  { %v3775_v33 = vpop.f32.mrf.mxu3 }
0x208b   :  { %v7758_v57 = vpop.permute.xlu1 %4033 }
0x2093   :  { %v7760_v25 = vpop.permute.xlu1 %3971 }
0x2097   :  { %3830 = vrot.lane.b32.xlu2 %v7618_v55, %s5929_s0 }
0x209b   :  { %v7764_v39 = vpop.permute.xlu1 %3969 }
0x209f   :  { %3902 = vrot.lane.b32.xlu2 %v7676_v37, %s5930_s17 }
0x20a3   :  { %v7768_v28 = vpop.permute.xlu1 %4029 }
0x20a7   :  { %3898 = vrot.lane.b32.xlu2 %v7632_v50, %s5930_s17 }
0x20ab   :  { %v7772_v14 = vpop.permute.xlu1 %3963 }
0x20af   :  { %3892 = vrot.lane.b32.xlu2 %v7708_v21, %s5930_s17 }
0x20b3   :  { %v7776_v42 = vpop.permute.xlu1 %3959 }
0x20bb   :  { %v7778_v41 = vpop.permute.xlu1 %4023 }
0x20c3   :  { %v4169_v24 = vpop.permute.xlu1 %4168 }
0x20c4   :  { %v4195_v61 = vsel %vm431_vm1, %v4169_v24, 0 }
0x20c5   :  { %4197 = vmatpush.bf16.xpose.msra.mxu2 %v4195_v61 }
0x20f2   :  { %v3779_v49 = vpop.xlane.xlu2 %3778 }
0x20f3   :  { %v3780_v58 = vsub.f32 %v3777_v34, %v3779_v49 }
0x20f5   :  { %v3781_v8 = vmul.f32 1.442695, %v3780_v58 }
0x20f7   :  { %5821 = vpow2.f32 %v3781_v8  ;;  %v5526_v8 = vld [vmem:[%s8405_s4 + $0x24] sm:$0xf] }
0x20fa   :  { %v3831_v18 = vpop.permute.xlu2 %3830 }
0x20fb   :  { %3858 = vmatpush.bf16.msra.mxu0 %v3831_v18 }
0x20fd   :  { %v5822_v29 = vpop.eup %5821 }
0x20fe   :  { %3783 = vadd.xlane.f32.xlu0 %v5822_v29 }
0x20ff   :  { %3859 = vmatpush.bf16.msra.mxu0 %v3829_v3 }
0x2102   :  { %v3903_v11 = vpop.permute.xlu2 %3902 }
0x2103   :  { %v3927_v27 = vsel %vm431_vm1, %v3903_v11, 0 }
0x2104   :  { %3937 = vmatpush.bf16.xpose.msrb.mxu1 %v3927_v27 }
0x210a   :  { %v3899_v30 = vpop.permute.xlu2 %3898 }
0x210b   :  { %v3921_v56 = vsel %vm431_vm1, %v3899_v30, 0 }
0x210c   :  { %3938 = vmatpush.bf16.xpose.msrb.mxu1 %v3924_v9 }
0x2112   :  { %3896 = vrot.lane.b32.xlu0 %v7624_v1, %s5930_s17  ;;  %v3893_v32 = vpop.permute.xlu2 %3892 }
0x2113   :  { %v3912_v33 = vsel %vm431_vm1, %v3893_v32, 0 }
0x2114   :  { %3939 = vmatpush.bf16.xpose.msrb.mxu1 %v3921_v56 }
0x211a   :  { %4035 = vrot.lane.b32.xlu0 %v7668_v16, %s5931_s18 }
0x2122   :  { %3973 = vrot.lane.b32.xlu0 %v7660_v7, %s5932_s19 }
0x212a   :  { %4031 = vrot.lane.b32.xlu0 %v7640_v47, %s5931_s18 }
0x2132   :  { %3967 = vrot.lane.b32.xlu0 %v7642_v52, %s5932_s19 }
0x213a   :  { %3965 = vrot.lane.b32.xlu0 %v7634_v46, %s5932_s19 }
0x2142   :  { %4027 = vrot.lane.b32.xlu0 %v7624_v1, %s5931_s18 }
0x214a   :  { %4025 = vrot.lane.b32.xlu0 %v7616_v43, %s5931_s18 }
0x2152   :  { %4021 = vrot.lane.b32.xlu0 %v7549_v60, %s5938_s27 }
0x215a   :  { %4166 = vrot.lane.b32.xlu0 %v7668_v16, %s5933_s2 }
0x2162   :  { %4160 = vrot.lane.b32.xlu0 %v7632_v50, %s5933_s2 }
0x216a   :  { %4154 = vrot.lane.b32.xlu0 %v7708_v21, %s5933_s2 }
0x2171   :  { %v3784_v47 = vpop.xlane.xlu0 %3783 }
0x2172   :  { %5823 = vrcp.f32 %v3784_v47  ;;  %4104 = vrot.lane.b32.xlu0 %v7660_v7, %s5934_s30 }
0x2178   :  { %v5824_v3 = vpop.eup %5823 }
0x2179   :  { %v3786_v43 = vmul.f32 %v5824_v3, %v5822_v29 }
0x217a   :  { %4100 = vrot.lane.b32.xlu0 %v7646_v51, %s5934_s30 }
0x217b   :  { %v3787_v19 = vpack.c.bf16 %v3786_v43, %v3786_v43 }
0x217d   :  { %3860 = vmatmul.bf16.vlgmr.msra.gmra.mxu0 %v3787_v19 }
0x2182   :  { %4096 = vrot.lane.b32.xlu0 %v7634_v46, %s5934_s30 }
0x2184   :  { %v3897_v16 = vpop.permute.xlu0 %3896 }
0x2185   :  { %v3918_v50 = vsel %vm431_vm1, %v3897_v16, 0 }
0x2186   :  { %3940 = vmatpush.bf16.xpose.msrb.mxu1 %v3918_v50 }
0x218a   :  { %4094 = vrot.lane.b32.xlu0 %v7626_v45, %s5934_s30 }
0x218c   :  { %v7817_v21 = vpop.permute.xlu0 %4035 }
0x218e   :  { %3941 = vmatpush.bf16.xpose.msrb.mxu1 %v3915_v54 }
0x2192   :  { %4092 = vrot.lane.b32.xlu0 %v7618_v55, %s5934_s30 }
0x2194   :  { %v3974_v34 = vpop.permute.xlu0 %3973 }
0x2195   :  { %3983 = vmatpush.bf16.msrb.mxu0 %v3974_v34 }
0x2196   :  { %3942 = vmatpush.bf16.xpose.msrb.mxu1 %v3912_v33 }
0x2199   :  { %3984 = vmatpush.bf16.msrb.mxu0 %v7760_v25  ;;  %v7837_v25 = vsel %vm564_vm2, %v5526_v8, 0 }
0x219a   :  { %4010 = vmatpush.bf16.msra.mxu3 %v7837_v25 }
0x219c   :  { %v7825_v24 = vpop.permute.xlu0 %4031 }
0x219d   :  { %3985 = vmatpush.bf16.msrb.mxu0 %v7764_v39 }
0x21a4   :  { %v3968_v61 = vpop.permute.xlu0 %3967 }
0x21a5   :  { %3986 = vmatpush.bf16.msrb.mxu0 %v3968_v61 }
0x21ac   :  { %v3966_v49 = vpop.permute.xlu0 %3965 }
0x21ad   :  { %3987 = vmatpush.bf16.msrb.mxu0 %v3966_v49 }
0x21b1   :  { %3988 = vmatpush.bf16.msrb.mxu0 %v7772_v14 }
0x21b4   :  { %v7829_v44 = vpop.permute.xlu0 %4027 }
0x21bc   :  { %v7831_v58 = vpop.permute.xlu0 %4025 }
0x21c4   :  { %v7840_v39 = vpop.permute.xlu0 %4021 }
0x21cc   :  { %v4167_v18 = vpop.permute.xlu0 %4166 }
0x21cd   :  { %v4192_v29 = vsel %vm431_vm1, %v4167_v18, 0  ;;  %v4061_v18 = vsel %vm431_vm1, %v7817_v21, 0 }
0x21ce   :  { %4198 = vmatpush.bf16.xpose.msra.mxu2 %v4192_v29  ;;  %v4163_v29 = vpop.permute.xlu1 %4162 }
0x21d4   :  { %v4161_v14 = vpop.permute.xlu0 %4160 }
0x21dc   :  { %v7843_v11 = vpop.permute.xlu0 %4154 }
0x21e4   :  { %v4105_v27 = vpop.permute.xlu0 %4104 }
0x21e5   :  { %4114 = vmatpush.bf16.msrb.mxu3 %v4105_v27 }
0x21fa   :  { %v3861_v9 = vpop.f32.mrf.mxu0 }
0x21fb   :  { %v3865_v30 = vpack.c.bf16 %v3861_v9, %v3861_v9  ;;  %v4186_v9 = vsel %vm431_vm1, %v4163_v29, 0 }
0x21fd   :  { %5594 = vmatmul.msk.bf16.vlgmr.msra.gmra.mxu1 %vm431_vm1, %v3865_v30 }
0x2202   :  { %v3863_v56 = vpop.f32.mrf.mxu0 }
0x2203   :  { %v4183_v56 = vsel %vm431_vm1, %v4161_v14, 0 }
0x220d   :  { %5595 = vmatmul.msk.bf16.vlgmr.msrb.gmra.mxu1 %vm431_vm1, %v7754_v31 }
0x227a   :  { %v7848_v47 = vpop.f32.mrf.mxu1 }
0x2282   :  { %v3883_v3 = vpop.f32.mrf.mxu1 }
0x2283   :  { %v4055_v3 = vsel %vm431_vm1, %v7825_v24, 0  ;;  %v4049_v24 = vsel %vm431_vm1, %v7829_v44, 0 }
0x228a   :  { %v3944_v43 = vpop.f32.mrf.mxu1 }
0x228b   :  { %v3948_v19 = vmul.f32 0.35355338, %v3944_v43 }
0x228d   :  { %3949 = vmax.xlane.f32.xlu2 %v3948_v19 }
0x2292   :  { %v3946_v16 = vpop.f32.mrf.mxu1 }
0x2293   :  { %v4157_v16 = vpop.permute.xlu1 %4156 }
0x2294   :  { %v4177_v14 = vsel %vm431_vm1, %v4157_v16, 0 }
0x2300   :  { %v3950_v50 = vpop.xlane.xlu2 %3949 }
0x2301   :  { %v3951_v54 = vsub.f32 %v3948_v19, %v3950_v50 }
0x2303   :  { %v3952_v32 = vmul.f32 1.442695, %v3951_v54 }
0x2305   :  { %5825 = vpow2.f32 %v3952_v32  ;;  %v4174_v32 = vsel %vm431_vm1, %v7843_v11, 0 }
0x230b   :  { %v5826_v34 = vpop.eup %5825 }
0x230c   :  { %3954 = vadd.xlane.f32.xlu2 %v5826_v34 }
0x2324   :  { %3961 = vrot.lane.b32.xlu2 %v7618_v55, %s5932_s19 }
0x232c   :  { %4164 = vrot.lane.b32.xlu2 %v7676_v37, %s5933_s2  ;;  %v4064_v37 = vsel %vm431_vm1, %v7756_v0, 0  ;;  %v4058_v0 = vsel %vm431_vm1, %v7758_v57, 0  ;;  %v4052_v57 = vsel %vm431_vm1, %v7768_v28, 0 }
0x2334   :  { %4158 = vrot.lane.b32.xlu2 %v7624_v1, %s5933_s2 }
0x233c   :  { %4152 = vrot.lane.b32.xlu2 %v7549_v60, %s5939_s9 }
0x2344   :  { %4102 = vrot.lane.b32.xlu2 %v7670_v63, %s5934_s30 }
0x234c   :  { %4098 = vrot.lane.b32.xlu2 %v7642_v52, %s5934_s30 }
0x237f   :  { %v3955_v31 = vpop.xlane.xlu2 %3954 }
0x2380   :  { %5827 = vrcp.f32 %v3955_v31  ;;  %v4043_v31 = vsel %vm431_vm1, %v7778_v41, 0 }
0x2386   :  { %v5828_v33 = vpop.eup %5827 }
0x2387   :  { %v3962_v61 = vpop.permute.xlu2 %3961  ;;  %v3957_v49 = vmul.f32 %v5828_v33, %v5826_v34  ;;  %v4046_v34 = vsel %vm431_vm1, %v7831_v58, 0 }
0x2388   :  { %3989 = vmatpush.bf16.msrb.mxu0 %v3962_v61 }
0x2389   :  { %v3958_v1 = vpack.c.bf16 %v3957_v49, %v3957_v49 }
0x238c   :  { %3990 = vmatpush.bf16.msrb.mxu0 %v7776_v42  ;;  %v4101_v42 = vpop.permute.xlu0 %4100 }
0x238f   :  { %3991 = vmatmul.bf16.vlgmr.msrb.gmra.mxu0 %v3958_v1  ;;  %v4165_v60 = vpop.permute.xlu2 %4164 }
0x2390   :  { %4066 = vmatpush.bf16.xpose.msra.mxu0 %v4064_v37  ;;  %v4189_v8 = vsel %vm431_vm1, %v4165_v60, 0 }
0x2391   :  { %4199 = vmatpush.bf16.xpose.msra.mxu2 %v4189_v8 }
0x2394   :  { %v4097_v21 = vpop.permute.xlu0 %4096 }
0x2397   :  { %v4159_v27 = vpop.permute.xlu2 %4158 }
0x2398   :  { %4067 = vmatpush.bf16.xpose.msra.mxu0 %v4061_v18  ;;  %v4180_v19 = vsel %vm431_vm1, %v4159_v27, 0 }
0x2399   :  { %4200 = vmatpush.bf16.xpose.msra.mxu2 %v4186_v9  ;;  %v5527_v9 = vld [vmem:[%s8405_s4 + $0x28] sm:$0xf] }
0x239c   :  { %v4095_v54 = vpop.permute.xlu0 %4094 }
0x239f   :  { %v4153_v30 = vpop.permute.xlu2 %4152 }
0x23a0   :  { %4068 = vmatpush.bf16.xpose.msra.mxu0 %v4058_v0  ;;  %v7921_v0 = vsel %vm564_vm2, %v5527_v9, 0 }
0x23a1   :  { %4201 = vmatpush.bf16.xpose.msra.mxu2 %v4183_v56  ;;  %4141 = vmatpush.bf16.msra.mxu1 %v7921_v0 }
0x23a4   :  { %v4093_v28 = vpop.permute.xlu0 %4092 }
0x23a7   :  { %v4103_v43 = vpop.permute.xlu2 %4102 }
0x23a8   :  { %4069 = vmatpush.bf16.xpose.msra.mxu0 %v4055_v3  ;;  %4115 = vmatpush.bf16.msrb.mxu3 %v4103_v43 }
0x23a9   :  { %4202 = vmatpush.bf16.xpose.msra.mxu2 %v4180_v19 }
0x23ac   :  { %4116 = vmatpush.bf16.msrb.mxu3 %v4101_v42 }
0x23af   :  { %v4099_v50 = vpop.permute.xlu2 %4098 }
0x23b0   :  { %4070 = vmatpush.bf16.xpose.msra.mxu0 %v4052_v57  ;;  %4117 = vmatpush.bf16.msrb.mxu3 %v4099_v50 }
0x23b1   :  { %4203 = vmatpush.bf16.xpose.msra.mxu2 %v4177_v14 }
0x23b4   :  { %4118 = vmatpush.bf16.msrb.mxu3 %v4097_v21 }
0x23b8   :  { %4071 = vmatpush.bf16.xpose.msra.mxu0 %v4049_v24  ;;  %4119 = vmatpush.bf16.msrb.mxu3 %v4095_v54 }
0x23b9   :  { %4204 = vmatpush.bf16.xpose.msra.mxu2 %v4174_v32 }
0x23bc   :  { %4120 = vmatpush.bf16.msrb.mxu3 %v4093_v28 }
0x23c0   :  { %4072 = vmatpush.bf16.xpose.msra.mxu0 %v4046_v34  ;;  %5599 = vmatmul.msk.bf16.vlgmr.msra.gmra.mxu2 %vm431_vm1, %v4153_v30 }
0x23c1   :  { %4706 = vmatpush.bf16.msrb.mxu2 %v7737_v59 }
0x23c8   :  { %4073 = vmatpush.bf16.xpose.msra.mxu0 %v4043_v31 }
0x23cf   :  { %5597 = vmatmul.msk.bf16.vlgmr.msra.gmra.mxu0 %vm431_vm1, %v7840_v39 }
0x240c   :  { %v3992_v44 = vpop.f32.mrf.mxu0 }
0x240d   :  { %v3996_v11 = vpack.c.bf16 %v3992_v44, %v3992_v44 }
0x240f   :  { %5596 = vmatmul.msk.bf16.vlgmr.msra.gmra.mxu3 %vm431_vm1, %v3996_v11  ;;  %v5528_v11 = vld [vmem:[%s8405_s4 + $0x2c] sm:$0xf] }
0x2414   :  { %v3994_v59 = vpop.f32.mrf.mxu0 }
0x2415   :  { %v7929_v59 = vsel %vm564_vm2, %v5528_v11, 0 }
0x2443   :  { %v4206_v33 = vpop.f32.mrf.mxu2 }
0x2444   :  { %v4210_v61 = vmul.f32 0.35355338, %v4206_v33 }
0x2446   :  { %4211 = vmax.xlane.f32.xlu0 %v4210_v61 }
0x244b   :  { %v4208_v37 = vpop.f32.mrf.mxu2 }
0x244c   :  { %v4075_v49 = vpop.f32.mrf.mxu0 }
0x244d   :  { %v4079_v58 = vmul.f32 0.35355338, %v4075_v49 }
0x244f   :  { %4080 = vmax.xlane.f32.xlu1 %v4079_v58 }
0x2454   :  { %v4077_v1 = vpop.f32.mrf.mxu0 }
0x2455   :  { %v5716_v1 = vld [vmem:[%s8402_s1 + $0x140] sm:$0xff] }
0x245a   :  { %4227 = vrot.lane.b32.xlu0 %v7634_v46, %s5935_s12  ;;  %v4325_v46 = vadd.f32 %v7545_v38, %v6353_v17 }
0x245c   :  { %v4326_v41 = vpack.c.bf16 %v4325_v46, %v4325_v46  ;;  %v5719_v46 = vld [vmem:[%s8402_s1 + $0x158] sm:$0xff] }
0x2462   :  { %4221 = vrot.lane.b32.xlu0 %v7694_v15, %s5935_s12 }
0x2468   :  { %4090 = vrot.lane.b32.xlu1 %v7694_v15, %s5934_s30  ;;  %v4523_v15 = vunpack.c.l.b16 %v4326_v41  ;;  %v5720_v41 = vld [vmem:[%s8402_s1 + $0x160] sm:$0xff] }
0x2470   :  { %4233 = vrot.lane.b32.xlu1 %v7670_v63, %s5935_s12  ;;  %v7911_v63 = vpack.c.b16 %v4523_v15, %v4523_v15  ;;  %v5721_v15 = vld [vmem:[%s8402_s1 + $0x168] sm:$0xff] }
0x2478   :  { %4231 = vrot.lane.b32.xlu1 %v7646_v51, %s5935_s12 }
0x2480   :  { %4229 = vrot.lane.b32.xlu1 %v7642_v52, %s5935_s12 }
0x2488   :  { %4225 = vrot.lane.b32.xlu1 %v7626_v45, %s5935_s12 }
0x2490   :  { %4223 = vrot.lane.b32.xlu1 %v7618_v55, %s5935_s12 }
0x2492   :  { %v7909_v39 = vpop.f32.mrf.mxu3 }
0x2498   :  { %4525 = vrot.lane.b32.xlu1 %v7911_v63, %s5936_s20 }
0x249a   :  { %v4014_v51 = vpop.f32.mrf.mxu3 }
0x249b   :  { %v5722_v51 = vld [vmem:[%s8402_s1 + $0x170] sm:$0xff] }
0x24b9   :  { %v4212_v55 = vpop.xlane.xlu0 %4211 }
0x24ba   :  { %v4213_v18 = vsub.f32 %v4210_v61, %v4212_v55 }
0x24bc   :  { %v4214_v29 = vmul.f32 1.442695, %v4213_v18 }
0x24c2   :  { %v4081_v52 = vpop.xlane.xlu1 %4080 }
0x24c3   :  { %v4082_v60 = vsub.f32 %v4079_v58, %v4081_v52  ;;  %v5723_v52 = vld [vmem:[%s8402_s1 + $0x178] sm:$0xff] }
0x24c5   :  { %v4083_v8 = vmul.f32 1.442695, %v4082_v60 }
0x24c7   :  { %5829 = vpow2.f32 %v4083_v8 }
0x24c8   :  { %5831 = vpow2.f32 %v4214_v29 }
0x24cc   :  { %v4228_v16 = vpop.permute.xlu0 %4227 }
0x24cd   :  { %v5830_v45 = vpop.eup %5829 }
0x24ce   :  { %4085 = vadd.xlane.f32.xlu2 %v5830_v45  ;;  %v5832_v27 = vpop.eup %5831 }
0x24d4   :  { %v4222_v14 = vpop.permute.xlu0 %4221 }
0x24da   :  { %v4091_v38 = vpop.permute.xlu1 %4090 }
0x24db   :  { %4121 = vmatpush.bf16.msrb.mxu3 %v4091_v38 }
0x24df   :  { %4272 = vmatpush.bf16.msra.mxu3 %v7929_v59 }
0x24e2   :  { %v4234_v42 = vpop.permute.xlu1 %4233 }
0x24e6   :  { %4235 = vrot.lane.b32.xlu2 %v7660_v7, %s5935_s12 }
0x24ea   :  { %v4232_v56 = vpop.permute.xlu1 %4231 }
0x24f2   :  { %v4230_v19 = vpop.permute.xlu1 %4229 }
0x24fa   :  { %v4226_v57 = vpop.permute.xlu1 %4225 }
0x2502   :  { %v4224_v50 = vpop.permute.xlu1 %4223 }
0x250f   :  { %4216 = vadd.xlane.f32.xlu2 %v5832_v27 }
0x2541   :  { %v4086_v30 = vpop.xlane.xlu2 %4085 }
0x2542   :  { %5833 = vrcp.f32 %v4086_v30 }
0x2548   :  { %v5834_v7 = vpop.eup %5833 }
0x2549   :  { %v4088_v3 = vmul.f32 %v5834_v7, %v5830_v45  ;;  %v4236_v21 = vpop.permute.xlu2 %4235 }
0x254a   :  { %4245 = vmatpush.bf16.msrb.mxu1 %v4236_v21 }
0x254b   :  { %v4089_v43 = vpack.c.bf16 %v4088_v3, %v4088_v3 }
0x254d   :  { %4122 = vmatmul.bf16.vlgmr.msrb.gmra.mxu3 %v4089_v43 }
0x254e   :  { %4246 = vmatpush.bf16.msrb.mxu1 %v4234_v42  ;;  %4415 = vmatpush.bf16.msrb.mxu3 %v7557_v36  ;;  %v5717_v36 = vld [vmem:[%s8402_s1 + $0x148] sm:$0xff] }
0x2552   :  { %4247 = vmatpush.bf16.msrb.mxu1 %v4232_v56  ;;  %4416 = vmatpush.bf16.msrb.mxu3 %v7563_v10  ;;  %v5718_v10 = vld [vmem:[%s8402_s1 + $0x150] sm:$0xff] }
0x2556   :  { %4248 = vmatpush.bf16.msrb.mxu1 %v4230_v19 }
0x255a   :  { %4249 = vmatpush.bf16.msrb.mxu1 %v4228_v16 }
0x255e   :  { %4250 = vmatpush.bf16.msrb.mxu1 %v4226_v57 }
0x2562   :  { %4251 = vmatpush.bf16.msrb.mxu1 %v4224_v50 }
0x2566   :  { %4252 = vmatpush.bf16.msrb.mxu1 %v4222_v14 }
0x2582   :  { %v4217_v24 = vpop.xlane.xlu2 %4216 }
0x2583   :  { %5835 = vrcp.f32 %v4217_v24 }
0x2589   :  { %v5836_v34 = vpop.eup %5835 }
0x258a   :  { %v4219_v31 = vmul.f32 %v5836_v34, %v5832_v27 }
0x258c   :  { %v4220_v44 = vpack.c.bf16 %v4219_v31, %v4219_v31 }
0x25d0   :  { %v4123_v54 = vpop.f32.mrf.mxu3 }
0x25d1   :  { %v4127_v32 = vpack.c.bf16 %v4123_v54, %v4123_v54 }
0x25d3   :  { %5598 = vmatmul.msk.bf16.vlgmr.msra.gmra.mxu1 %vm431_vm1, %v4127_v32 }
0x25d8   :  { %v4125_v28 = vpop.f32.mrf.mxu3 }
0x25e3   :  { %4253 = vmatmul.bf16.vlgmr.msrb.gmra.mxu1 %v4220_v44 }
0x2650   :  { %v7934_v33 = vpop.f32.mrf.mxu1 }
0x2658   :  { %v4145_v61 = vpop.f32.mrf.mxu1 }
0x2660   :  { %v4254_v49 = vpop.f32.mrf.mxu1 }
0x2661   :  { %v4258_v58 = vpack.c.bf16 %v4254_v49, %v4254_v49 }
0x2663   :  { %5600 = vmatmul.msk.bf16.vlgmr.msra.gmra.mxu3 %vm431_vm1, %v4258_v58 }
0x2668   :  { %v4256_v37 = vpop.f32.mrf.mxu1 }
0x2673   :  { %5649 = vmatmul.msk.bf16.vlgmr.msrb.gmra.mxu3 %vm62_vm0, %v5716_v1 }
0x2683   :  { %5650 = vmatmul.msk.bf16.gmra.mxu3 %vm62_vm0, %v5717_v36 }
0x2693   :  { %5651 = vmatmul.msk.bf16.gmra.mxu3 %vm62_vm0, %v5718_v10 }
0x26a3   :  { %5652 = vmatmul.msk.bf16.gmra.mxu3 %vm62_vm0, %v5719_v46 }
0x26b3   :  { %5653 = vmatmul.msk.bf16.gmra.mxu3 %vm62_vm0, %v5720_v41 }
0x26c3   :  { %5654 = vmatmul.msk.bf16.gmra.mxu3 %vm62_vm0, %v5721_v15 }
0x26d3   :  { %5655 = vmatmul.msk.bf16.gmra.mxu3 %vm62_vm0, %v5722_v51 }
0x26e3   :  { %5656 = vmatmul.msk.bf16.gmra.mxu3 %vm62_vm0, %v5723_v52 }
0x26e6   :  { %v7969_v60 = vpop.f32.mrf.mxu3 }
0x26ee   :  { %v4276_v8 = vpop.f32.mrf.mxu3 }
0x26f6   :  { %v4418_v45 = vpop.f32.mrf.mxu3 }
0x26f7   :  { %v4458_v38 = vadd.f32 %v4418_v45, %v7608_v13  ;;  %v4490_v55 = vadd.f32 %v4418_v45, %v7610_v2 }
0x26f9   :  { %v4474_v29 = vpack.c.bf16 %v4458_v38, %v4458_v38  ;;  %v4506_v27 = vpack.c.bf16 %v4490_v55, %v4490_v55 }
0x26fb   :  { %v4543_v7 = vunpack.c.l.b16 %v4474_v29  ;;  %v4634_v3 = vunpack.c.l.b16 %v4506_v27 }
0x26fe   :  { %v4420_v18 = vpop.f32.mrf.mxu3 }
0x26ff   :  { %v4459_v9 = vadd.f32 %v4420_v18, %v7608_v13  ;;  %v4491_v42 = vadd.f32 %v4420_v18, %v7610_v2 }
0x2701   :  { %v4475_v30 = vpack.c.bf16 %v4459_v9, %v4459_v9  ;;  %v4507_v56 = vpack.c.bf16 %v4491_v42, %v4491_v42 }
0x2703   :  { %v4544_v21 = vunpack.c.l.b16 %v4475_v30  ;;  %v4635_v43 = vunpack.c.l.b16 %v4507_v56 }
0x2705   :  { %v7975_v19 = vpack.c.b16 %v4544_v21, %v4543_v7  ;;  %v7977_v57 = vpack.c.b16 %v4635_v43, %v4634_v3 }
0x2706   :  { %v4423_v16 = vpop.f32.mrf.mxu3 }
0x2707   :  { %v4460_v50 = vadd.f32 %v4423_v16, %v7608_v13  ;;  %v4492_v14 = vadd.f32 %v4423_v16, %v7610_v2 }
0x2709   :  { %v4476_v24 = vpack.c.bf16 %v4460_v50, %v4460_v50  ;;  %v4508_v32 = vpack.c.bf16 %v4492_v14, %v4492_v14 }
0x270b   :  { %v4545_v11 = vunpack.c.l.b16 %v4476_v24  ;;  %v4636_v61 = vunpack.c.l.b16 %v4508_v32 }
0x270e   :  { %v4425_v54 = vpop.f32.mrf.mxu3 }
0x270f   :  { %v4461_v28 = vadd.f32 %v4425_v54, %v7608_v13  ;;  %v4493_v34 = vadd.f32 %v4425_v54, %v7610_v2 }
0x2711   :  { %v4477_v31 = vpack.c.bf16 %v4461_v28, %v4461_v28  ;;  %v4509_v44 = vpack.c.bf16 %v4493_v34, %v4493_v34 }
0x2713   :  { %v4546_v49 = vunpack.c.l.b16 %v4477_v31  ;;  %v4637_v58 = vunpack.c.l.b16 %v4509_v44 }
0x2715   :  { %v7983_v37 = vpack.c.b16 %v4546_v49, %v4545_v11  ;;  %v7985_v1 = vpack.c.b16 %v4637_v58, %v4636_v61 }
0x2716   :  { %v4428_v36 = vpop.f32.mrf.mxu3 }
0x2717   :  { %v4462_v10 = vadd.f32 %v4428_v36, %v7608_v13 }
0x2719   :  { %v4478_v41 = vpack.c.bf16 %v4462_v10, %v4462_v10 }
0x271b   :  { %v4547_v52 = vunpack.c.l.b16 %v4478_v41 }
0x271e   :  { %v4430_v46 = vpop.f32.mrf.mxu3 }
0x271f   :  { %v4463_v15 = vadd.f32 %v4430_v46, %v7608_v13 }
0x2721   :  { %v4479_v51 = vpack.c.bf16 %v4463_v15, %v4463_v15 }
0x2723   :  { %v4548_v8 = vunpack.c.l.b16 %v4479_v51 }
0x2725   :  { %v7989_v45 = vpack.c.b16 %v4548_v8, %v4547_v52 }
0x2726   :  { %v4433_v38 = vpop.f32.mrf.mxu3 }
0x2727   :  { %v4464_v55 = vadd.f32 %v4433_v38, %v7608_v13  ;;  %v4496_v18 = vadd.f32 %v4433_v38, %v7610_v2 }
0x2729   :  { %v4480_v27 = vpack.c.bf16 %v4464_v55, %v4464_v55  ;;  %v4512_v9 = vpack.c.bf16 %v4496_v18, %v4496_v18 }
0x272b   :  { %v4549_v3 = vunpack.c.l.b16 %v4480_v27  ;;  %v4640_v21 = vunpack.c.l.b16 %v4512_v9  ;;  %v4495_v27 = vadd.f32 %v4430_v46, %v7610_v2 }
0x272e   :  { %v4435_v29 = vpop.f32.mrf.mxu3 }
0x272f   :  { %v4465_v42 = vadd.f32 %v4435_v29, %v7608_v13  ;;  %v4497_v30 = vadd.f32 %v4435_v29, %v7610_v2 }
0x2731   :  { %v4481_v56 = vpack.c.bf16 %v4465_v42, %v4465_v42  ;;  %v4513_v7 = vpack.c.bf16 %v4497_v30, %v4497_v30  ;;  %v4494_v42 = vadd.f32 %v4428_v36, %v7610_v2 }
0x2733   :  { %v4550_v43 = vunpack.c.l.b16 %v4481_v56  ;;  %v4641_v16 = vunpack.c.l.b16 %v4513_v7  ;;  %v4511_v7 = vpack.c.bf16 %v4495_v27, %v4495_v27 }
0x2735   :  { %v7995_v50 = vpack.c.b16 %v4550_v43, %v4549_v3  ;;  %v7997_v14 = vpack.c.b16 %v4641_v16, %v4640_v21  ;;  %v4510_v43 = vpack.c.bf16 %v4494_v42, %v4494_v42  ;;  %v4639_v16 = vunpack.c.l.b16 %v4511_v7 }
0x2736   :  { %v4438_v54 = vpop.f32.mrf.mxu3 }
0x2737   :  { %v4466_v24 = vadd.f32 %v4438_v54, %v7608_v13  ;;  %v4498_v32 = vadd.f32 %v4438_v54, %v7610_v2  ;;  %v4638_v54 = vunpack.c.l.b16 %v4510_v43 }
0x2739   :  { %v4482_v34 = vpack.c.bf16 %v4466_v24, %v4466_v24  ;;  %v4514_v31 = vpack.c.bf16 %v4498_v32, %v4498_v32  ;;  %v8015_v24 = vpack.c.b16 %v4639_v16, %v4638_v54 }
0x273b   :  { %v4551_v58 = vunpack.c.l.b16 %v4482_v34  ;;  %v4642_v10 = vunpack.c.l.b16 %v4514_v31 }
0x273e   :  { %v4440_v28 = vpop.f32.mrf.mxu3 }
0x273f   :  { %v4467_v44 = vadd.f32 %v4440_v28, %v7608_v13  ;;  %v4499_v11 = vadd.f32 %v4440_v28, %v7610_v2 }
0x2741   :  { %v4483_v61 = vpack.c.bf16 %v4467_v44, %v4467_v44  ;;  %v4515_v49 = vpack.c.bf16 %v4499_v11, %v4499_v11 }
0x2743   :  { %v4552_v41 = vunpack.c.l.b16 %v4483_v61  ;;  %v4643_v15 = vunpack.c.l.b16 %v4515_v49 }
0x2745   :  { %v8003_v51 = vpack.c.b16 %v4552_v41, %v4551_v58  ;;  %v8005_v52 = vpack.c.b16 %v4643_v15, %v4642_v10 }
0x2746   :  { %v4443_v8 = vpop.f32.mrf.mxu3 }
0x2747   :  { %v4500_v38 = vadd.f32 %v4443_v8, %v7610_v2 }
0x2749   :  { %v4516_v18 = vpack.c.bf16 %v4500_v38, %v4500_v38 }
0x274b   :  { %v4644_v30 = vunpack.c.l.b16 %v4516_v18  ;;  %v4468_v18 = vadd.f32 %v4443_v8, %v7608_v13 }
0x274e   :  { %v4445_v55 = vpop.f32.mrf.mxu3 }
0x274f   :  { %v4501_v29 = vadd.f32 %v4445_v55, %v7610_v2  ;;  %v4469_v58 = vadd.f32 %v4445_v55, %v7608_v13 }
0x2751   :  { %v4517_v9 = vpack.c.bf16 %v4501_v29, %v4501_v29  ;;  %v4485_v7 = vpack.c.bf16 %v4469_v58, %v4469_v58  ;;  %v4583_v58 = vsel %vm431_vm1, %v8003_v51, 0 }
0x2753   :  { %v4645_v56 = vunpack.c.l.b16 %v4517_v9 }
0x2755   :  { %v8011_v3 = vpack.c.b16 %v4645_v56, %v4644_v30 }
0x2756   :  { %v4448_v21 = vpop.f32.mrf.mxu3 }
0x2757   :  { %4668 = vrot.lane.b32.xlu2 %v8011_v3, %s5929_s0  ;;  %v4470_v10 = vadd.f32 %v4448_v21, %v7608_v13  ;;  %v4502_v29 = vadd.f32 %v4448_v21, %v7610_v2 }
0x2759   :  { %v4486_v43 = vpack.c.bf16 %v4470_v10, %v4470_v10  ;;  %v4580_v10 = vsel %vm431_vm1, %v7995_v50, 0 }
0x275b   :  { %v4555_v8 = vunpack.c.l.b16 %v4486_v43 }
0x275e   :  { %v4450_v32 = vpop.f32.mrf.mxu3 }
0x275f   :  { %4662 = vrot.lane.b32.xlu2 %v8015_v24, %s5929_s0  ;;  %v4471_v34 = vadd.f32 %v4450_v32, %v7608_v13  ;;  %v4503_v41 = vadd.f32 %v4450_v32, %v7610_v2  ;;  %v4518_v32 = vpack.c.bf16 %v4502_v29, %v4502_v29  ;;  %v4526_v29 = vpop.permute.xlu1 %4525 }
0x2761   :  { %v4487_v27 = vpack.c.bf16 %v4471_v34, %v4471_v34  ;;  %v4519_v16 = vpack.c.bf16 %v4503_v41, %v4503_v41  ;;  %v4646_v34 = vunpack.c.l.b16 %v4518_v32  ;;  %v4577_v41 = vsel %vm431_vm1, %v7989_v45, 0 }
0x2763   :  { %v4647_v21 = vunpack.c.l.b16 %v4519_v16 }
0x2766   :  { %v4453_v46 = vpop.f32.mrf.mxu3 }
0x2767   :  { %4658 = vrot.lane.b32.xlu2 %v7977_v57, %s5929_s0  ;;  %v4472_v36 = vadd.f32 %v4453_v46, %v7608_v13  ;;  %v4504_v28 = vadd.f32 %v4453_v46, %v7610_v2  ;;  %v4484_v46 = vpack.c.bf16 %v4468_v18, %v4468_v18 }
0x2769   :  { %v4488_v44 = vpack.c.bf16 %v4472_v36, %v4472_v36  ;;  %v4520_v11 = vpack.c.bf16 %v4504_v28, %v4504_v28  ;;  %v4556_v36 = vunpack.c.l.b16 %v4487_v27  ;;  %v4553_v28 = vunpack.c.l.b16 %v4484_v46 }
0x276b   :  { %v4557_v9 = vunpack.c.l.b16 %v4488_v44  ;;  %v4648_v42 = vunpack.c.l.b16 %v4520_v11  ;;  %v8045_v11 = vpack.c.b16 %v4647_v21, %v4646_v34 }
0x276e   :  { %v4455_v31 = vpop.f32.mrf.mxu3 }
0x276f   :  { %v4473_v61 = vadd.f32 %v4455_v31, %v7608_v13  ;;  %v4505_v49 = vadd.f32 %v4455_v31, %v7610_v2  ;;  %v4554_v2 = vunpack.c.l.b16 %v4485_v7  ;;  %v8041_v31 = vpack.c.b16 %v4556_v36, %v4555_v8 }
0x2771   :  { %v4489_v15 = vpack.c.bf16 %v4473_v61, %v4473_v61  ;;  %v4521_v38 = vpack.c.bf16 %v4505_v49, %v4505_v49  ;;  %v8043_v44 = vpack.c.b16 %v4554_v2, %v4553_v28  ;;  %v4589_v61 = vsel %vm431_vm1, %v8041_v31, 0 }
0x2773   :  { %v4558_v30 = vunpack.c.l.b16 %v4489_v15  ;;  %v4649_v56 = vunpack.c.l.b16 %v4521_v38  ;;  %v4586_v49 = vsel %vm431_vm1, %v8043_v44, 0  ;;  %v4574_v15 = vsel %vm431_vm1, %v7983_v37, 0 }
0x2774   :  { %v4571_v38 = vsel %vm431_vm1, %v7975_v19, 0 }
0x2775   :  { %v8031_v54 = vpack.c.b16 %v4558_v30, %v4557_v9  ;;  %v8033_v55 = vpack.c.b16 %v4649_v56, %v4648_v42 }
0x2777   :  { %4672 = vrot.lane.b32.xlu1 %v8033_v55, %s5929_s0  ;;  %4733 = vrot.lane.b32.xlu2 %v8031_v54, %s5930_s17  ;;  %v4592_v13 = vsel %vm431_vm1, %v8031_v54, 0 }
0x2778   :  { %4594 = vmatpush.bf16.xpose.msrb.mxu0 %v4592_v13 }
0x277f   :  { %4670 = vrot.lane.b32.xlu1 %v8045_v11, %s5929_s0  ;;  %4729 = vrot.lane.b32.xlu2 %v8043_v44, %s5930_s17 }
0x2780   :  { %4595 = vmatpush.bf16.xpose.msrb.mxu0 %v4589_v61 }
0x2787   :  { %4666 = vrot.lane.b32.xlu1 %v8005_v52, %s5929_s0  ;;  %4725 = vrot.lane.b32.xlu2 %v7995_v50, %s5930_s17 }
0x2788   :  { %4596 = vmatpush.bf16.xpose.msrb.mxu0 %v4586_v49 }
0x278f   :  { %4664 = vrot.lane.b32.xlu1 %v7997_v14, %s5929_s0  ;;  %4719 = vrot.lane.b32.xlu2 %v7975_v19, %s5930_s17 }
0x2790   :  { %4597 = vmatpush.bf16.xpose.msrb.mxu0 %v4583_v58 }
0x2798   :  { %4598 = vmatpush.bf16.xpose.msrb.mxu0 %v4580_v10 }
0x27a0   :  { %4599 = vmatpush.bf16.xpose.msrb.mxu0 %v4577_v41 }
0x27a8   :  { %4600 = vmatpush.bf16.xpose.msrb.mxu0 %v4574_v15 }
0x27b0   :  { %4601 = vmatpush.bf16.xpose.msrb.mxu0 %v4571_v38 }
0x27b1   :  { %v4669_v18 = vpop.permute.xlu2 %4668 }
0x27b7   :  { %5657 = vmatmul.msk.bf16.vlgmr.msrb.gmra.mxu0 %vm431_vm1, %v4526_v29 }
0x27b8   :  { %4834 = vmatpush.bf16.msra.mxu0 %v7837_v25 }
0x27b9   :  { %v4663_v27 = vpop.permute.xlu2 %4662 }
0x27c1   :  { %v4659_v9 = vpop.permute.xlu2 %4658 }
0x27d1   :  { %v4734_v42 = vpop.permute.xlu2 %4733 }
0x27d2   :  { %v4760_v30 = vsel %vm431_vm1, %v4734_v42, 0 }
0x27d3   :  { %4762 = vmatpush.bf16.xpose.msra.mxu2 %v4760_v30 }
0x27d9   :  { %v4730_v61 = vpop.permute.xlu2 %4729 }
0x27da   :  { %v4754_v49 = vsel %vm431_vm1, %v4730_v61, 0 }
0x27e1   :  { %v4726_v41 = vpop.permute.xlu2 %4725 }
0x27e9   :  { %v4673_v56 = vpop.permute.xlu1 %4672 }
0x27ea   :  { %4682 = vmatpush.bf16.msra.mxu1 %v4673_v56 }
0x27f1   :  { %v4671_v7 = vpop.permute.xlu1 %4670 }
0x27f2   :  { %4683 = vmatpush.bf16.msra.mxu1 %v4671_v7  ;;  %v4720_v7 = vpop.permute.xlu2 %4719 }
0x27f6   :  { %4684 = vmatpush.bf16.msra.mxu1 %v4669_v18 }
0x27f9   :  { %v4667_v43 = vpop.permute.xlu1 %4666 }
0x27fa   :  { %4685 = vmatpush.bf16.msra.mxu1 %v4667_v43 }
0x2801   :  { %v4665_v16 = vpop.permute.xlu1 %4664 }
0x2802   :  { %4686 = vmatpush.bf16.msra.mxu1 %v4665_v16 }
0x2806   :  { %4687 = vmatpush.bf16.msra.mxu1 %v4663_v27 }
0x2834   :  { %v4603_v25 = vpop.f32.mrf.mxu0 }
0x2835   :  { %v4607_v46 = vmul.f32 0.35355338, %v4603_v25  ;;  %v4739_v25 = vsel %vm431_vm1, %v4720_v7, 0 }
0x2837   :  { %4608 = vmax.xlane.f32.xlu0 %v4607_v46 }
0x283c   :  { %v4605_v32 = vpop.f32.mrf.mxu0 }
0x284b   :  { %4660 = vrot.lane.b32.xlu0 %v7985_v1, %s5929_s0 }
0x2853   :  { %4731 = vrot.lane.b32.xlu0 %v8041_v31, %s5930_s17 }
0x285b   :  { %4727 = vrot.lane.b32.xlu0 %v8003_v51, %s5930_s17 }
0x2863   :  { %4721 = vrot.lane.b32.xlu0 %v7983_v37, %s5930_s17 }
0x286b   :  { %4717 = vrot.lane.b32.xlu0 %v7911_v63, %s5937_s25 }
0x2873   :  { %4861 = vrot.lane.b32.xlu0 %v8031_v54, %s5931_s18 }
0x287b   :  { %4857 = vrot.lane.b32.xlu0 %v8043_v44, %s5931_s18 }
0x2883   :  { %4798 = vrot.lane.b32.xlu0 %v8045_v11, %s5932_s19 }
0x288b   :  { %4796 = vrot.lane.b32.xlu0 %v8011_v3, %s5932_s19 }
0x2893   :  { %4853 = vrot.lane.b32.xlu0 %v7995_v50, %s5931_s18 }
0x289b   :  { %4790 = vrot.lane.b32.xlu0 %v8015_v24, %s5932_s19 }
0x28a3   :  { %4851 = vrot.lane.b32.xlu0 %v7989_v45, %s5931_s18 }
0x28aa   :  { %v4609_v36 = vpop.xlane.xlu0 %4608 }
0x28ab   :  { %v4610_v13 = vsub.f32 %v4607_v46, %v4609_v36  ;;  %4788 = vrot.lane.b32.xlu0 %v7985_v1, %s5932_s19 }
0x28ad   :  { %v4611_v2 = vmul.f32 1.442695, %v4610_v13 }
0x28af   :  { %5837 = vpow2.f32 %v4611_v2 }
0x28b3   :  { %4849 = vrot.lane.b32.xlu0 %v7983_v37, %s5931_s18 }
0x28b5   :  { %v5838_v8 = vpop.eup %5837 }
0x28b6   :  { %4613 = vadd.xlane.f32.xlu1 %v5838_v8 }
0x28bb   :  { %4845 = vrot.lane.b32.xlu0 %v7911_v63, %s5938_s27 }
0x28bd   :  { %v4661_v21 = vpop.permute.xlu0 %4660 }
0x28be   :  { %4688 = vmatpush.bf16.msra.mxu1 %v4661_v21 }
0x28c2   :  { %4689 = vmatpush.bf16.msra.mxu1 %v4659_v9 }
0x28c3   :  { %4987 = vrot.lane.b32.xlu0 %v8041_v31, %s5933_s2 }
0x28c5   :  { %v4732_v28 = vpop.permute.xlu0 %4731 }
0x28c6   :  { %v4757_v34 = vsel %vm431_vm1, %v4732_v28, 0 }
0x28c7   :  { %4763 = vmatpush.bf16.xpose.msra.mxu2 %v4757_v34 }
0x28cb   :  { %4981 = vrot.lane.b32.xlu0 %v7995_v50, %s5933_s2  ;;  %v4748_v50 = vsel %vm431_vm1, %v4726_v41, 0 }
0x28cd   :  { %v4728_v58 = vpop.permute.xlu0 %4727 }
0x28ce   :  { %v4751_v10 = vsel %vm431_vm1, %v4728_v58, 0 }
0x28cf   :  { %4723 = vrot.lane.b32.xlu1 %v7989_v45, %s5930_s17  ;;  %4764 = vmatpush.bf16.xpose.msra.mxu2 %v4754_v49 }
0x28d3   :  { %4977 = vrot.lane.b32.xlu0 %v7983_v37, %s5933_s2 }
0x28d5   :  { %v4722_v37 = vpop.permute.xlu0 %4721 }
0x28d6   :  { %v4742_v56 = vsel %vm431_vm1, %v4722_v37, 0 }
0x28d7   :  { %4859 = vrot.lane.b32.xlu1 %v8041_v31, %s5931_s18  ;;  %4765 = vmatpush.bf16.xpose.msra.mxu2 %v4751_v10 }
0x28db   :  { %4973 = vrot.lane.b32.xlu0 %v7911_v63, %s5939_s9 }
0x28dd   :  { %v4718_v15 = vpop.permute.xlu0 %4717 }
0x28df   :  { %4800 = vrot.lane.b32.xlu1 %v8033_v55, %s5932_s19  ;;  %4766 = vmatpush.bf16.xpose.msra.mxu2 %v4748_v50 }
0x28e3   :  { %4926 = vrot.lane.b32.xlu0 %v8045_v11, %s5934_s30 }
0x28e5   :  { %v8132_v29 = vpop.permute.xlu0 %4861 }
0x28e7   :  { %4855 = vrot.lane.b32.xlu1 %v8003_v51, %s5931_s18 }
0x28eb   :  { %4922 = vrot.lane.b32.xlu0 %v8005_v52, %s5934_s30 }
0x28ed   :  { %v8135_v42 = vpop.permute.xlu0 %4857 }
0x28ef   :  { %4794 = vrot.lane.b32.xlu1 %v8005_v52, %s5932_s19 }
0x28f5   :  { %v4799_v43 = vpop.permute.xlu0 %4798 }
0x28fd   :  { %v4797_v46 = vpop.permute.xlu0 %4796 }
0x2929   :  { %v4614_v63 = vpop.xlane.xlu1 %4613 }
0x292a   :  { %5839 = vrcp.f32 %v4614_v63 }
0x2930   :  { %v5840_v31 = vpop.eup %5839 }
0x2931   :  { %v4616_v38 = vmul.f32 %v5840_v31, %v5838_v8 }
0x2933   :  { %v4617_v18 = vpack.c.bf16 %v4616_v38, %v4616_v38 }
0x2935   :  { %4690 = vmatmul.bf16.vlgmr.msra.gmra.mxu1 %v4617_v18 }
0x2941   :  { %v4724_v27 = vpop.permute.xlu1 %4723 }
0x2942   :  { %v4745_v9 = vsel %vm431_vm1, %v4724_v27, 0 }
0x2943   :  { %4767 = vmatpush.bf16.xpose.msra.mxu2 %v4745_v9 }
0x2949   :  { %v8137_v30 = vpop.permute.xlu1 %4859 }
0x294a   :  { %v4885_v27 = vsel %vm431_vm1, %v8137_v30, 0 }
0x294b   :  { %4768 = vmatpush.bf16.xpose.msra.mxu2 %v4742_v56 }
0x2951   :  { %v4801_v16 = vpop.permute.xlu1 %4800 }
0x2952   :  { %4810 = vmatpush.bf16.msrb.mxu1 %v4801_v16 }
0x2953   :  { %4769 = vmatpush.bf16.xpose.msra.mxu2 %v4739_v25 }
0x2956   :  { %4811 = vmatpush.bf16.msrb.mxu1 %v4799_v43 }
0x2959   :  { %v8141_v32 = vpop.permute.xlu1 %4855 }
0x295a   :  { %4812 = vmatpush.bf16.msrb.mxu1 %v4797_v46 }
0x2961   :  { %v4795_v36 = vpop.permute.xlu1 %4794 }
0x2962   :  { %4813 = vmatpush.bf16.msrb.mxu1 %v4795_v36 }
0x29b2   :  { %v4691_v13 = vpop.f32.mrf.mxu1 }
0x29b3   :  { %v4695_v2 = vpack.c.bf16 %v4691_v13, %v4691_v13 }
0x29b5   :  { %5658 = vmatmul.msk.bf16.vlgmr.msrb.gmra.mxu2 %vm431_vm1, %v4695_v2 }
0x29b6   :  { %4962 = vmatpush.bf16.msrb.mxu2 %v7921_v0  ;;  %v4854_v0 = vpop.permute.xlu0 %4853 }
0x29b7   :  { %v4876_v16 = vsel %vm431_vm1, %v4854_v0, 0 }
0x29ba   :  { %v4693_v8 = vpop.f32.mrf.mxu1 }
0x29be   :  { %v4791_v58 = vpop.permute.xlu0 %4790 }
0x29c5   :  { %5659 = vmatmul.msk.bf16.vlgmr.msra.gmra.mxu2 %vm431_vm1, %v4718_v15  ;;  %v4888_v15 = vsel %vm431_vm1, %v8132_v29, 0  ;;  %v4882_v29 = vsel %vm431_vm1, %v8135_v42, 0 }
0x2a38   :  { %v8146_v21 = vpop.f32.mrf.mxu2 }
0x2a40   :  { %v4710_v28 = vpop.f32.mrf.mxu2 }
0x2a48   :  { %v4771_v34 = vpop.f32.mrf.mxu2 }
0x2a49   :  { %v4775_v61 = vmul.f32 0.35355338, %v4771_v34 }
0x2a4b   :  { %4776 = vmax.xlane.f32.xlu2 %v4775_v61 }
0x2a50   :  { %v4773_v49 = vpop.f32.mrf.mxu2 }
0x2a63   :  { %4792 = vrot.lane.b32.xlu2 %v7997_v14, %s5932_s19 }
0x2a6b   :  { %4786 = vrot.lane.b32.xlu2 %v7977_v57, %s5932_s19 }
0x2a73   :  { %4847 = vrot.lane.b32.xlu2 %v7975_v19, %s5931_s18 }
0x2a7b   :  { %4989 = vrot.lane.b32.xlu2 %v8031_v54, %s5933_s2  ;;  %v4852_v54 = vpop.permute.xlu0 %4851 }
0x2a7c   :  { %v4873_v42 = vsel %vm431_vm1, %v4852_v54, 0 }
0x2a83   :  { %4983 = vrot.lane.b32.xlu2 %v8003_v51, %s5933_s2  ;;  %v4789_v51 = vpop.permute.xlu0 %4788 }
0x2a8b   :  { %4979 = vrot.lane.b32.xlu2 %v7989_v45, %s5933_s2  ;;  %v4850_v41 = vpop.permute.xlu0 %4849 }
0x2a8c   :  { %v4870_v13 = vsel %vm431_vm1, %v4850_v41, 0 }
0x2a93   :  { %4975 = vrot.lane.b32.xlu2 %v7975_v19, %s5933_s2  ;;  %v8176_v63 = vpop.permute.xlu0 %4845 }
0x2a9b   :  { %4928 = vrot.lane.b32.xlu2 %v8033_v55, %s5934_s30  ;;  %v4988_v18 = vpop.permute.xlu0 %4987 }
0x2a9c   :  { %v5013_v7 = vsel %vm431_vm1, %v4988_v18, 0 }
0x2aa3   :  { %4924 = vrot.lane.b32.xlu2 %v8011_v3, %s5934_s30  ;;  %v4982_v56 = vpop.permute.xlu0 %4981 }
0x2aab   :  { %4920 = vrot.lane.b32.xlu2 %v7997_v14, %s5934_s30  ;;  %v4978_v30 = vpop.permute.xlu0 %4977 }
0x2ab3   :  { %4918 = vrot.lane.b32.xlu2 %v8015_v24, %s5934_s30  ;;  %v4974_v25 = vpop.permute.xlu0 %4973 }
0x2abb   :  { %4916 = vrot.lane.b32.xlu2 %v7985_v1, %s5934_s30  ;;  %v4927_v36 = vpop.permute.xlu0 %4926 }
0x2abe   :  { %v4777_v19 = vpop.xlane.xlu2 %4776 }
0x2abf   :  { %v4778_v45 = vsub.f32 %v4775_v61, %v4777_v19 }
0x2ac1   :  { %v4779_v10 = vmul.f32 1.442695, %v4778_v45 }
0x2ac3   :  { %5841 = vpow2.f32 %v4779_v10  ;;  %4914 = vrot.lane.b32.xlu2 %v7977_v57, %s5934_s30  ;;  %s5942_s30 = smov 62  }
0x2ac6   :  { %v4793_v50 = vpop.permute.xlu2 %4792 }
0x2ac7   :  { %4814 = vmatpush.bf16.msrb.mxu1 %v4793_v50  ;;  %v5004_v50 = vsel %vm431_vm1, %v4982_v56, 0 }
0x2ac9   :  { %v5842_v37 = vpop.eup %5841 }
0x2aca   :  { %4781 = vadd.xlane.f32.xlu1 %v5842_v37 }
0x2acb   :  { %5056 = vrot.lane.b32.xlu2 %v8033_v55, %s5935_s12  ;;  %4815 = vmatpush.bf16.msrb.mxu1 %v4791_v58 }
0x2ace   :  { %v4787_v31 = vpop.permute.xlu2 %4786 }
0x2acf   :  { %4816 = vmatpush.bf16.msrb.mxu1 %v4789_v51 }
0x2ad3   :  { %5052 = vrot.lane.b32.xlu2 %v8011_v3, %s5935_s12  ;;  %4817 = vmatpush.bf16.msrb.mxu1 %v4787_v31 }
0x2ad6   :  { %v4848_v38 = vpop.permute.xlu2 %4847 }
0x2ad7   :  { %4890 = vmatpush.bf16.xpose.msra.mxu1 %v4888_v15  ;;  %v4867_v8 = vsel %vm431_vm1, %v4848_v38, 0 }
0x2adb   :  { %5048 = vrot.lane.b32.xlu2 %v7997_v14, %s5935_s12  ;;  %v4879_v14 = vsel %vm431_vm1, %v8141_v32, 0  ;;  %v4923_v32 = vpop.permute.xlu0 %4922 }
0x2ade   :  { %v4990_v55 = vpop.permute.xlu2 %4989 }
0x2adf   :  { %4891 = vmatpush.bf16.xpose.msra.mxu1 %v4885_v27  ;;  %v5016_v9 = vsel %vm431_vm1, %v4990_v55, 0 }
0x2ae0   :  { %5018 = vmatpush.bf16.xpose.msra.mxu3 %v5016_v9 }
0x2ae3   :  { %4985 = vrot.lane.b32.xlu1 %v8043_v44, %s5933_s2 }
0x2ae6   :  { %v4984_v3 = vpop.permute.xlu2 %4983 }
0x2ae7   :  { %4892 = vmatpush.bf16.xpose.msra.mxu1 %v4882_v29  ;;  %v5007_v41 = vsel %vm431_vm1, %v4984_v3, 0 }
0x2ae8   :  { %5019 = vmatpush.bf16.xpose.msra.mxu3 %v5013_v7  ;;  %v8222_v7 = vld [vmem:[%s8406_s5 + $0x10] sm:$0x3f] }
0x2aee   :  { %v4980_v43 = vpop.permute.xlu2 %4979 }
0x2aef   :  { %4893 = vmatpush.bf16.xpose.msra.mxu1 %v4879_v14  ;;  %v5001_v31 = vsel %vm431_vm1, %v4980_v43, 0  ;;  %v3474_v14 = vperm.slane %v8222_v7, 3 }
0x2af6   :  { %v4976_v46 = vpop.permute.xlu2 %4975 }
0x2af7   :  { %4894 = vmatpush.bf16.xpose.msra.mxu1 %v4876_v16  ;;  %v4995_v15 = vsel %vm431_vm1, %v4976_v46, 0 }
0x2afe   :  { %v4929_v44 = vpop.permute.xlu2 %4928 }
0x2aff   :  { %4895 = vmatpush.bf16.xpose.msra.mxu1 %v4873_v42  ;;  %4938 = vmatpush.bf16.msrb.mxu0 %v4929_v44  ;;  %v95_v44 = vsel %vm94_vm3, %v6358_v23, 0.0 }
0x2b03   :  { %4939 = vmatpush.bf16.msrb.mxu0 %v4927_v36  ;;  %v96_v36 = vrot.slane %v95_v44, 4 }
0x2b06   :  { %v4925_v2 = vpop.permute.xlu2 %4924 }
0x2b07   :  { %4896 = vmatpush.bf16.xpose.msra.mxu1 %v4870_v13  ;;  %4940 = vmatpush.bf16.msrb.mxu0 %v4925_v2  ;;  %v97_v2 = vadd.f32 %v96_v36, %v95_v44 }
0x2b0b   :  { %4941 = vmatpush.bf16.msrb.mxu0 %v4923_v32 }
0x2b0e   :  { %v4921_v28 = vpop.permute.xlu2 %4920 }
0x2b0f   :  { %4897 = vmatpush.bf16.xpose.msra.mxu1 %v4867_v8  ;;  %4942 = vmatpush.bf16.msrb.mxu0 %v4921_v28  ;;  %v98_v28 = vrot.slane %v97_v2, 2 }
0x2b16   :  { %v4919_v34 = vpop.permute.xlu2 %4918 }
0x2b17   :  { %4943 = vmatpush.bf16.msrb.mxu0 %v4919_v34 }
0x2b1e   :  { %v4917_v61 = vpop.permute.xlu2 %4916 }
0x2b1f   :  { %4944 = vmatpush.bf16.msrb.mxu0 %v4917_v61 }
0x2b26   :  { %v4915_v49 = vpop.permute.xlu2 %4914 }
0x2b27   :  { %4945 = vmatpush.bf16.msrb.mxu0 %v4915_v49 }
0x2b2e   :  { %v5057_v0 = vpop.permute.xlu2 %5056 }
0x2b2f   :  { %5066 = vmatpush.bf16.msra.mxu2 %v5057_v0  ;;  %v99_v0 = vadd.f32 %v98_v28, %v97_v2 }
0x2b36   :  { %v5053_v61 = vpop.permute.xlu2 %5052 }
0x2b3d   :  { %v4782_v58 = vpop.xlane.xlu1 %4781 }
0x2b3e   :  { %5843 = vrcp.f32 %v4782_v58 }
0x2b44   :  { %v5844_v54 = vpop.eup %5843 }
0x2b45   :  { %v4784_v51 = vmul.f32 %v5844_v54, %v5842_v37  ;;  %v4998_v37 = vsel %vm431_vm1, %v4978_v30, 0 }
0x2b47   :  { %v4785_v19 = vpack.c.bf16 %v4784_v51, %v4784_v51 }
0x2b49   :  { %4818 = vmatmul.bf16.vlgmr.msrb.gmra.mxu1 %v4785_v19  ;;  %v100_v19 = vrot.slane %v99_v0, 1 }
0x2b55   :  { %v4986_v45 = vpop.permute.xlu1 %4985 }
0x2b56   :  { %v5010_v10 = vsel %vm431_vm1, %v4986_v45, 0 }
0x2b57   :  { %5020 = vmatpush.bf16.xpose.msra.mxu3 %v5010_v10 }
0x2b59   :  { %5661 = vmatmul.msk.bf16.vlgmr.msra.gmra.mxu1 %vm431_vm1, %v8176_v63 }
0x2b5f   :  { %5021 = vmatpush.bf16.xpose.msra.mxu3 %v5007_v41 }
0x2b67   :  { %5022 = vmatpush.bf16.xpose.msra.mxu3 %v5004_v50  ;;  %v101_v50 = vadd.f32 %v100_v19, %v99_v0 }
0x2b6f   :  { %5023 = vmatpush.bf16.xpose.msra.mxu3 %v5001_v31 }
0x2b77   :  { %5024 = vmatpush.bf16.xpose.msra.mxu3 %v4998_v37 }
0x2b7f   :  { %5025 = vmatpush.bf16.xpose.msra.mxu3 %v4995_v15 }
0x2b86   :  { %5663 = vmatmul.msk.bf16.vlgmr.msra.gmra.mxu3 %vm431_vm1, %v4974_v25 }
0x2bc6   :  { %v4819_v38 = vpop.f32.mrf.mxu1 }
0x2bc7   :  { %v4823_v18 = vpack.c.bf16 %v4819_v38, %v4819_v38 }
0x2bc9   :  { %5660 = vmatmul.msk.bf16.vlgmr.msra.gmra.mxu0 %vm431_vm1, %v4823_v18 }
0x2bca   :  { %5090 = vmatpush.bf16.msra.mxu0 %v7929_v59  ;;  %v5756_v59 = vld [vmem:[%s8407_s6] ss:$0 sm:$0xff] }
0x2bce   :  { %v4821_v63 = vpop.f32.mrf.mxu1 }
0x2bd6   :  { %v4899_v27 = vpop.f32.mrf.mxu1 }
0x2bd7   :  { %v4903_v55 = vmul.f32 0.35355338, %v4899_v27  ;;  %v8249_v27 = vld [vmem:[%s8406_s5] sm:$0x3f] }
0x2bd9   :  { %4904 = vmax.xlane.f32.xlu1 %v4903_v55 }
0x2bde   :  { %v4901_v9 = vpop.f32.mrf.mxu1 }
0x2c09   :  { %v5027_v56 = vpop.f32.mrf.mxu3 }
0x2c0a   :  { %v5031_v29 = vmul.f32 0.35355338, %v5027_v56 }
0x2c0c   :  { %5032 = vmax.xlane.f32.xlu1 %v5031_v29 }
0x2c11   :  { %v5029_v3 = vpop.f32.mrf.mxu3 }
0x2c25   :  { %5054 = vrot.lane.b32.xlu1 %v8045_v11, %s5935_s12 }
0x2c2d   :  { %5046 = vrot.lane.b32.xlu1 %v8015_v24, %s5935_s12 }
0x2c35   :  { %5044 = vrot.lane.b32.xlu1 %v7985_v1, %s5935_s12 }
0x2c3d   :  { %123 = vrot.lane.b32.xlu1 %v5756_v59, %s5936_s20 }
0x2c45   :  { %3476 = vrot.lane.b32.xlu1 %v3474_v14, %s5928_s11  ;;  %v5049_v14 = vpop.permute.xlu2 %5048 }
0x2c46   :  { %v4836_v11 = vpop.f32.mrf.mxu0 }
0x2c4c   :  { %v4905_v24 = vpop.xlane.xlu1 %4904 }
0x2c4d   :  { %v4906_v30 = vsub.f32 %v4903_v55, %v4905_v24  ;;  %3886 = vrot.lane.b32.xlu1 %v7848_v47, %s5928_s11 }
0x2c4e   :  { %v4838_v1 = vpop.f32.mrf.mxu0 }
0x2c4f   :  { %v4907_v43 = vmul.f32 1.442695, %v4906_v30 }
0x2c51   :  { %5845 = vpow2.f32 %v4907_v43 }
0x2c55   :  { %4017 = vrot.lane.b32.xlu1 %v7909_v39, %s5928_s11  ;;  %v5940_v39 = vmov 8.0  }
0x2c57   :  { %v5846_v16 = vpop.eup %5845 }
0x2c58   :  { %4909 = vadd.xlane.f32.xlu0 %v5846_v16 }
0x2c5d   :  { %4841 = vrot.lane.b32.xlu1 %v4836_v11, %s5928_s11 }
0x2c65   :  { %4148 = vrot.lane.b32.xlu1 %v7934_v33, %s5928_s11  ;;  %v110_v33 = vsel %vm94_vm3, %v6360_v62, 0.0 }
0x2c6c   :  { %5050 = vrot.lane.b32.xlu0 %v8005_v52, %s5935_s12  ;;  %v111_v52 = vrot.slane %v110_v33, 4 }
0x2c74   :  { %5042 = vrot.lane.b32.xlu0 %v7977_v57, %s5935_s12  ;;  %v112_v57 = vadd.f32 %v111_v52, %v110_v33  ;;  %s5943_s12 = smov 63  }
0x2c76   :  { %v113_v34 = vrot.slane %v112_v57, 2 }
0x2c78   :  { %v114_v58 = vadd.f32 %v113_v34, %v112_v57 }
0x2c7a   :  { %v115_v45 = vrot.slane %v114_v58, 1 }
0x2c7c   :  { %v116_v31 = vadd.f32 %v115_v45, %v114_v58 }
0x2c7f   :  { %v5033_v47 = vpop.xlane.xlu1 %5032 }
0x2c80   :  { %v5034_v25 = vsub.f32 %v5031_v29, %v5033_v47 }
0x2c82   :  { %v5035_v46 = vmul.f32 1.442695, %v5034_v25 }
0x2c84   :  { %5847 = vpow2.f32 %v5035_v46 }
0x2c85   :  { %5849 = vrcp.f32 %v5940_v39 }
0x2c8a   :  { %v8237_v42 = vpop.eup %5847 }
0x2c8b   :  { %5037 = vadd.xlane.f32.xlu2 %v8237_v42  ;;  %v5850_v13 = vpop.eup %5849 }
0x2c8c   :  { %v103_v8 = vmul.f32 8.0, %v5850_v13  ;;  %vm107_vm4 = vweird.f32 %v5850_v13 }
0x2c8e   :  { %v104_v49 = vsub.f32 1.0, %v103_v8 }
0x2c90   :  { %v105_v51 = vmul.f32 %v5850_v13, %v104_v49 }
0x2c92   :  { %v106_v10 = vadd.f32 %v5850_v13, %v105_v51 }
0x2c94   :  { %v108_v37 = vsel %vm107_vm4, %v5850_v13, %v106_v10 }
0x2c95   :  { %v109_v15 = vmul.f32 %v108_v37, %v101_v50  ;;  %v117_v38 = vmul.f32 %v116_v31, %v108_v37 }
0x2c97   :  { %v5055_v32 = vpop.permute.xlu1 %5054  ;;  %v119_v18 = vsel %vm118_vm5, %v109_v15, %v117_v38 }
0x2c98   :  { %5067 = vmatpush.bf16.msra.mxu2 %v5055_v32 }
0x2c9c   :  { %5068 = vmatpush.bf16.msra.mxu2 %v5053_v61 }
0x2c9f   :  { %v5047_v54 = vpop.permute.xlu1 %5046 }
0x2ca3   :  { %4713 = vrot.lane.b32.xlu2 %v8146_v21, %s5928_s11  ;;  %v174_v21 = vperm.slane %v8249_v27, 3 }
0x2ca7   :  { %v5045_v41 = vpop.permute.xlu1 %5044 }
0x2cab   :  { %4279 = vrot.lane.b32.xlu2 %v7969_v60, %s5928_s11 }
0x2caf   :  { %v124_v63 = vpop.permute.xlu1 %123 }
0x2cb0   :  { %v126_v55 = vadd.f32 %v124_v63, %v119_v18 }
0x2cb2   :  { %v128_v9 = vsel %vm127_vm6, %v126_v55, -inf }
0x2cb3   :  { %176 = vrot.lane.b32.xlu2 %v174_v21, %s5929_s0  ;;  %129 = vmax.xlane.f32.xlu0 %v128_v9 }
0x2cb7   :  { %v3477_v11 = vpop.permute.xlu1 %3476 }
0x2cbb   :  { %716 = vrot.lane.b32.xlu2 %v6421_v53, %s5929_s0 }
0x2cbf   :  { %v3887_v24 = vpop.permute.xlu1 %3886 }
0x2cc3   :  { %1673 = vrot.lane.b32.xlu2 %v6834_v40, %s5929_s0  ;;  %v4327_v40 = vadd.f32 %v3477_v11, %v6360_v62 }
0x2cc7   :  { %v4018_v53 = vpop.permute.xlu1 %4017 }
0x2ccb   :  { %v4910_v60 = vpop.xlane.xlu0 %4909 }
0x2ccc   :  { %5851 = vrcp.f32 %v4910_v60 }
0x2ccf   :  { %v4842_v43 = vpop.permute.xlu1 %4841 }
0x2cd2   :  { %v5852_v56 = vpop.eup %5851 }
0x2cd3   :  { %v4912_v29 = vmul.f32 %v5852_v56, %v5846_v16  ;;  %v3479_v16 = vadd.f32 %v3477_v11, %v6358_v23 }
0x2cd5   :  { %v4913_v3 = vpack.c.bf16 %v4912_v29, %v4912_v29  ;;  %v3889_v46 = vadd.f32 %v3887_v24, %v3479_v16  ;;  %v2645_v24 = vsel %vm62_vm0, %v7267_v5, 0.0 }
0x2cd7   :  { %4946 = vmatmul.bf16.vlgmr.msrb.gmra.mxu0 %v4913_v3  ;;  %v4149_v44 = vpop.permute.xlu1 %4148  ;;  %v4020_v33 = vadd.f32 %v4018_v53, %v3889_v46 }
0x2cd9   :  { %v4151_v36 = vadd.f32 %v4149_v44, %v4020_v33 }
0x2cde   :  { %v5051_v59 = vpop.permute.xlu0 %5050 }
0x2cdf   :  { %5069 = vmatpush.bf16.msra.mxu2 %v5051_v59 }
0x2ce3   :  { %5070 = vmatpush.bf16.msra.mxu2 %v5049_v14 }
0x2ce6   :  { %v5043_v30 = vpop.permute.xlu0 %5042 }
0x2ce7   :  { %5071 = vmatpush.bf16.msra.mxu2 %v5047_v54 }
0x2ceb   :  { %5072 = vmatpush.bf16.msra.mxu2 %v5045_v41 }
0x2cef   :  { %5073 = vmatpush.bf16.msra.mxu2 %v5043_v30 }
0x2cfe   :  { %v5038_v1 = vpop.xlane.xlu2 %5037 }
0x2cff   :  { %5853 = vrcp.f32 %v5038_v1  ;;  %v5941_v1 = vmov 32.0  }
0x2d05   :  { %v5854_v32 = vpop.eup %5853 }
0x2d06   :  { %v4714_v47 = vpop.permute.xlu2 %4713  ;;  %v5040_v23 = vmul.f32 %v5854_v32, %v8237_v42 }
0x2d07   :  { %v4716_v25 = vadd.f32 %v4714_v47, %v4327_v40 }
0x2d08   :  { %v5041_v8 = vpack.c.bf16 %v5040_v23, %v5040_v23 }
0x2d09   :  { %v4844_v39 = vadd.f32 %v4842_v43, %v4716_v25  ;;  %v3431_v43 = vsel %vm62_vm0, %v7601_v35, 0.0 }
0x2d0e   :  { %v4280_v52 = vpop.permute.xlu2 %4279 }
0x2d0f   :  { %v8259_v13 = vadd.f32 %v4280_v52, %v4151_v36 }
0x2d11   :  { %4284 = vrot.lane.b32.xlu2 %v8259_v13, %s5929_s0 }
0x2d26   :  { %v130_v61 = vpop.xlane.xlu0 %129 }
0x2d27   :  { %v131_v58 = vsub.f32 %v126_v55, %v130_v61 }
0x2d29   :  { %v132_v54 = vmul.f32 1.442695, %v131_v58 }
0x2d2b   :  { %5855 = vpow2.f32 %v132_v54 }
0x2d2c   :  { %5857 = vrcp.f32 %v5941_v1 }
0x2d31   :  { %v8273_v51 = vpop.eup %5855 }
0x2d32   :  { %v5858_v40 = vpop.eup %5857 }
0x2d33   :  { %v990_v16 = vmul.f32 32.0, %v5858_v40  ;;  %vm994_vm8 = vweird.f32 %v5858_v40 }
0x2d35   :  { %v991_v25 = vsub.f32 1.0, %v990_v16 }
0x2d54   :  { %v4947_v2 = vpop.f32.mrf.mxu0 }
0x2d55   :  { %v4951_v57 = vpack.c.bf16 %v4947_v2, %v4947_v2 }
0x2d57   :  { %5662 = vmatmul.msk.bf16.vlgmr.msrb.gmra.mxu2 %vm431_vm1, %v4951_v57 }
0x2d5c   :  { %v4949_v62 = vpop.f32.mrf.mxu0 }
0x2d67   :  { %5074 = vmatmul.bf16.vlgmr.msra.gmra.mxu2 %v5041_v8 }
0x2dda   :  { %v4964_v28 = vpop.f32.mrf.mxu2 }
0x2ddb   :  { %4969 = vrot.lane.b32.xlu0 %v4964_v28, %s5928_s11 }
0x2de2   :  { %v4966_v34 = vpop.f32.mrf.mxu2 }
0x2de3   :  { %1414 = vrot.lane.b32.xlu0 %v6744_v6, %s5929_s0  ;;  %v177_v6 = vpop.permute.xlu2 %176 }
0x2de4   :  { %v179_v21 = vadd.f32 %v177_v6, %v6205_v12 }
0x2dea   :  { %v5075_v49 = vpop.f32.mrf.mxu2 }
0x2deb   :  { %v5079_v0 = vpack.c.bf16 %v5075_v49, %v5075_v49  ;;  %847 = vrot.lane.b32.xlu0 %v6442_v22, %s5929_s0  ;;  %v717_v19 = vpop.permute.xlu2 %716 }
0x2ded   :  { %5664 = vmatmul.msk.bf16.vlgmr.msra.gmra.mxu0 %vm431_vm1, %v5079_v0 }
0x2df2   :  { %v5077_v42 = vpop.f32.mrf.mxu2 }
0x2df3   :  { %1801 = vrot.lane.b32.xlu0 %v6870_v4, %s5929_s0  ;;  %v1674_v45 = vpop.permute.xlu2 %1673 }
0x2dfb   :  { %135 = vrot.lane.b32.xlu0 %v8273_v51, %s5936_s20  ;;  %v4285_v10 = vpop.permute.xlu2 %4284 }
0x2dfc   :  { %v4287_v22 = vsel %vm62_vm0, %v4285_v10, 0.0 }
0x2e25   :  { %4288 = vadd.xlane.f32.xlu0 %v4287_v22 }
0x2e4d   :  { %v4970_v4 = vpop.permute.xlu0 %4969 }
0x2e4e   :  { %v4972_v31 = vadd.f32 %v4970_v4, %v4844_v39  ;;  %v992_v39 = vmul.f32 %v5858_v40, %v991_v25 }
0x2e50   :  { %v993_v33 = vadd.f32 %v5858_v40, %v992_v39 }
0x2e52   :  { %v8303_v36 = vsel %vm994_vm8, %v5858_v40, %v993_v33 }
0x2e55   :  { %v1415_v37 = vpop.permute.xlu0 %1414 }
0x2e5d   :  { %v848_v63 = vpop.permute.xlu0 %847 }
0x2e65   :  { %v1802_v29 = vpop.permute.xlu0 %1801 }
0x2e6a   :  { %v5092_v41 = vpop.f32.mrf.mxu0 }
0x2e6b   :  { %5097 = vrot.lane.b32.xlu1 %v5092_v41, %s5928_s11 }
0x2e6d   :  { %v136_v12 = vpop.permute.xlu0 %135 }
0x2e72   :  { %v5094_v50 = vpop.f32.mrf.mxu0 }
0x2e73   :  { %582 = vrot.lane.b32.xlu1 %v6362_v26, %s5929_s0  ;;  %v1033_v26 = vadd.f32 %v177_v6, %v6353_v17  ;;  %v139_v17 = vsel %vm138_vm7, %v136_v12, 0.0 }
0x2e75   :  { %v1417_v55 = vadd.f32 %v1415_v37, %v1033_v26 }
0x2e7b   :  { %1545 = vrot.lane.b32.xlu1 %v6802_v48, %s5929_s0 }
0x2e83   :  { %978 = vrot.lane.b32.xlu1 %v6477_v20, %s5929_s0 }
0x2e98   :  { %v4289_v52 = vpop.xlane.xlu0 %4288 }
0x2e99   :  { %v4290_v2 = vmul.f32 %v4289_v52, %v8303_v36 }
0x2e9b   :  { %v8307_v57 = vsub.f32 %v8259_v13, %v4290_v2 }
0x2e9d   :  { %v4292_v62 = vmul.f32 %v8307_v57, %v8307_v57 }
0x2edd   :  { %v5098_v15 = vpop.permute.xlu1 %5097 }
0x2ede   :  { %v8285_v38 = vadd.f32 %v5098_v15, %v4972_v31 }
0x2ee0   :  { %5102 = vrot.lane.b32.xlu1 %v8285_v38, %s5929_s0 }
0x2ee5   :  { %v583_v18 = vpop.permute.xlu1 %582 }
0x2ee6   :  { %v585_v48 = vadd.f32 %v583_v18, %v179_v21 }
0x2ee8   :  { %v719_v20 = vadd.f32 %v717_v19, %v585_v48 }
0x2eea   :  { %v850_v59 = vadd.f32 %v848_v63, %v719_v20 }
0x2eed   :  { %v1546_v9 = vpop.permute.xlu1 %1545 }
0x2eee   :  { %v1548_v60 = vadd.f32 %v1546_v9, %v1417_v55  ;;  %v4313_v55 = vperm.slane %v8222_v7, 4 }
0x2ef0   :  { %v1676_v56 = vadd.f32 %v1674_v45, %v1548_v60 }
0x2ef2   :  { %v8291_v3 = vadd.f32 %v1802_v29, %v1676_v56  ;;  %v4319_v29 = vperm.slane %v8222_v7, 5 }
0x2ef4   :  { %1806 = vrot.lane.b32.xlu1 %v8291_v3, %s5928_s11 }
0x2ef5   :  { %v979_v14 = vpop.permute.xlu1 %978 }
0x2ef6   :  { %v981_v11 = vadd.f32 %v979_v14, %v850_v59 }
0x2ef8   :  { %983 = vrot.lane.b32.xlu2 %v981_v11, %s5928_s11 }
0x2f1e   :  { %140 = vadd.xlane.f32.xlu1 %v139_v17  ;;  %v1019_v17 = vperm.slane %v8249_v27, 4 }
0x2f26   :  { %2646 = vadd.xlane.f32.xlu1 %v2645_v24 }
0x2f52   :  { %v984_v30 = vpop.permute.xlu2 %983  ;;  %v5103_v47 = vpop.permute.xlu1 %5102 }
0x2f53   :  { %v986_v53 = vsel %vm62_vm0, %v984_v30, 0.0 }
0x2f54   :  { %987 = vadd.xlane.f32.xlu2 %v986_v53 }
0x2f5c   :  { %3432 = vadd.xlane.f32.xlu2 %v3431_v43 }
0x2f66   :  { %v1807_v46 = vpop.permute.xlu1 %1806 }
0x2f67   :  { %v1809_v44 = vsel %vm62_vm0, %v1807_v46, 0.0 }
0x2f68   :  { %1810 = vadd.xlane.f32.xlu0 %v1809_v44 }
0x2f7c   :  { %4294 = vrot.lane.b32.xlu0 %v4292_v62, %s5929_s0 }
0x2f91   :  { %v141_v32 = vpop.xlane.xlu1 %140 }
0x2f92   :  { %5859 = vrcp.f32 %v141_v32  ;;  %v153_v34 = vand.u32 2147483648, %v141_v32  ;;  %v151_v49 = vand.u32 2147483647, %v141_v32  ;;  %vm147_vm10 = vweird.f32 %v141_v32 }
0x2f94   :  { %v154_v58 = vor.u32 1.1754944e-38, %v153_v34  ;;  %vm152_vm12 = vcmp.eq.f32.partialorder %v151_v49, 8.507059e+37 }
0x2f98   :  { %v5860_v23 = vpop.eup %5859 }
0x2f99   :  { %v143_v8 = vmul.f32 %v5860_v23, %v141_v32  ;;  %vm148_vm9 = vweird.f32 %v5860_v23  ;;  %v2647_v48 = vpop.xlane.xlu1 %2646 }
0x2f9a   :  { %vm149_vm11 = vmor %vm147_vm10, %vm148_vm9 }
0x2f9b   :  { %v144_v28 = vsub.f32 1.0, %v143_v8 }
0x2f9d   :  { %v145_v61 = vmul.f32 %v5860_v23, %v144_v28 }
0x2f9f   :  { %v146_v0 = vadd.f32 %v5860_v23, %v145_v61 }
0x2fa1   :  { %v150_v13 = vsel %vm149_vm11, %v5860_v23, %v146_v0 }
0x2fa2   :  { %v155_v54 = vsel %vm152_vm12, %v154_v58, %v150_v13 }
0x2fa3   :  { %v156_v42 = vmul.f32 %v8273_v51, %v155_v54  ;;  %v5105_v51 = vsel %vm62_vm0, %v5103_v47, 0.0 }
0x2fa5   :  { %5148 = vrot.lane.b32.xlu1 %v156_v42, %s5942_s30  ;;  %5137 = vrot.lane.b32.xlu0 %v156_v42, %s5943_s12  ;;  %v5164_v6 = vrot.slane %v156_v42, 1 }
0x2fa6   :  { %158 = vrot.lane.b32.xlu2 %v156_v42, %s5936_s20 }
0x2fad   :  { %5165 = vrot.lane.b32.xlu0 %v5164_v6, %s5936_s20 }
0x2fc7   :  { %v988_v19 = vpop.xlane.xlu2 %987 }
0x2fc8   :  { %v996_v45 = vmul.f32 %v8303_v36, %v988_v19 }
0x2fca   :  { %v8317_v10 = vsub.f32 %v981_v11, %v996_v45 }
0x2fcc   :  { %v998_v22 = vmul.f32 %v8317_v10, %v8317_v10 }
0x2fce   :  { %1000 = vrot.lane.b32.xlu0 %v998_v22, %s5928_s11 }
0x2fcf   :  { %5106 = vadd.xlane.f32.xlu2 %v5105_v51  ;;  %v3433_v4 = vpop.xlane.xlu2 %3432 }
0x2fd0   :  { %v3434_v37 = vmul.f32 %v3433_v4, %v8303_v36 }
0x2fd2   :  { %v3435_v18 = vsub.f32 %v7601_v35, %v3434_v37 }
0x2fd4   :  { %v3436_v63 = vmul.f32 %v3435_v18, %v3435_v18 }
0x2fd6   :  { %v3437_v21 = vsel %vm62_vm0, %v3436_v63, 0.0 }
0x2fdb   :  { %v1811_v41 = vpop.xlane.xlu0 %1810 }
0x2fdc   :  { %v1812_v50 = vmul.f32 %v1811_v41, %v8303_v36 }
0x2fde   :  { %v8325_v31 = vsub.f32 %v8291_v3, %v1812_v50 }
0x2fe0   :  { %v1814_v15 = vmul.f32 %v8325_v31, %v8325_v31 }
0x2fe7   :  { %5171 = vrot.lane.b32.xlu2 %v5164_v6, %s5943_s12 }
0x2fee   :  { %v4295_v9 = vpop.permute.xlu0 %4294 }
0x2fef   :  { %1816 = vrot.lane.b32.xlu2 %v1814_v15, %s5928_s11  ;;  %v4297_v60 = vsel %vm62_vm0, %v4295_v9, 0.0 }
0x2ff8   :  { %3438 = vadd.xlane.f32.xlu0 %v3437_v21 }
0x3000   :  { %v159_v26 = vpop.permute.xlu2 %158 }
0x3001   :  { %161 = vst.msk [vmem:[#allocation4] sm:$0x3] %vm138_vm7, %v159_v26 }
0x3002   :  { %5724 = vpush %v159_v26 }
0x300c   :  { %4315 = vrot.lane.b32.xlu0 %v4313_v55, %s5928_s11 }
0x3014   :  { %1021 = vrot.lane.b32.xlu0 %v1019_v17, %s5929_s0 }
0x3017   :  { %v5138_v20 = vpop.permute.xlu0 %5137  ;;  %v5149_v35 = vpop.permute.xlu1 %5148 }
0x3018   :  { %4298 = vadd.xlane.f32.xlu2 %v4297_v60  ;;  %5726 = vpush %v5138_v20 }
0x3019   :  { %5728 = vpush %v5149_v35 }
0x301f   :  { %v5166_v56 = vpop.permute.xlu0 %5165 }
0x3020   :  { %5730 = vpush %v5166_v56 }
0x3030   :  { %4321 = vrot.lane.b32.xlu2 %v4319_v29, %s5928_s11 }
0x3033   :  { %s8357_s25 = spop %5724 }
0x3040   :  { %v1001_v7 = vpop.permute.xlu0 %1000 }
0x3041   :  { %v1003_v0 = vsel %vm62_vm0, %v1001_v7, 0.0 }
0x3042   :  { %v5107_v3 = vpop.xlane.xlu2 %5106 }
0x3043   :  { %v5108_v59 = vmul.f32 %v5107_v3, %v8303_v36 }
0x3045   :  { %v8341_v14 = vsub.f32 %v8285_v38, %v5108_v59  ;;  %v2648_v38 = vmul.f32 %v2647_v48, %v8303_v36 }
0x3047   :  { %v5110_v11 = vmul.f32 %v8341_v14, %v8341_v14  ;;  %v8352_v1 = vsub.f32 %v7267_v5, %v2648_v38  ;;  %v5875_v5 = vld [vmem:[%s8406_s5 + $0x8] sm:$0x3f] }
0x3048   :  { %v2667_v33 = vperm.slane %v5875_v5, 4  ;;  %v2669_v2 = vperm.slane %v5875_v5, 5 }
0x3049   :  { %5112 = vrot.lane.b32.xlu1 %v5110_v11, %s5929_s0  ;;  %v2650_v40 = vmul.f32 %v8352_v1, %v8352_v1  ;;  %s8359_s27 = spop %5726 }
0x304a   :  { %v5172_v12 = vpop.permute.xlu2 %5171  ;;  %s8364_s22 = spop %5728  ;;  %v5140_v59 = vstv %s8359_s27 }
0x304b   :  { %5732 = vpush %v5172_v12  ;;  %v2651_v25 = vsel %vm62_vm0, %v2650_v40, 0.0 }
0x3051   :  { %5182 = vrot.lane.b32.xlu1 %v5164_v6, %s5942_s30  ;;  %s8366_s23 = spop %5730  ;;  %v1025_v6 = vperm.slane %v8249_v27, 5 }
0x3052   :  { %v1817_v58 = vpop.permute.xlu2 %1816 }
0x3053   :  { %v1819_v13 = vsel %vm62_vm0, %v1817_v58, 0.0 }
0x306b   :  { %v3439_v24 = vpop.xlane.xlu0 %3438 }
0x306c   :  { %v3440_v30 = vmul.f32 %v3439_v24, %v8303_v36  ;;  %v5151_v24 = vstv %s8364_s22 }
0x306e   :  { %v3441_v53 = vadd.f32 1e-05, %v3440_v30 }
0x3070   :  { %5861 = vrsqrt.f32 %v3441_v53  ;;  %vm3448_vm14 = vweird.f32 %v3441_v53 }
0x3076   :  { %v5862_v43 = vpop.eup %5861 }
0x3077   :  { %v3443_v47 = vmul.f32 %v5862_v43, %v3441_v53  ;;  %vm3449_vm13 = vweird.f32 %v5862_v43 }
0x3078   :  { %vm3450_vm15 = vmor %vm3448_vm14, %vm3449_vm13 }
0x3079   :  { %v3444_v16 = vmul.f32 %v5862_v43, %v3443_v47 }
0x307b   :  { %v3445_v46 = vmul.f32 0.5, %v3444_v16  ;;  %2652 = vadd.xlane.f32.xlu1 %v2651_v25 }
0x307c   :  { %s5733_s24 = spop %5732 }
0x307d   :  { %v3446_v39 = vsub.f32 1.5, %v3445_v46  ;;  %v5174_v8 = vstv %s5733_s24 }
0x307e   :  { %v4316_v29 = vpop.permute.xlu0 %4315 }
0x307f   :  { %v3447_v44 = vmul.f32 %v5862_v43, %v3446_v39 }
0x3081   :  { %v3451_v52 = vsel %vm3450_vm15, %v5862_v43, %v3447_v44 }
0x3082   :  { %v3452_v62 = vmul.f32 %v3451_v52, %v3435_v18 }
0x3084   :  { %v3453_v32 = vmul.f32 %v3452_v62, %v2667_v33 }
0x3086   :  { %v3454_v23 = vadd.f32 %v3453_v32, %v2669_v2 }
0x3088   :  { %v5176_v28 = vmul.f32 %v5174_v8, %v3454_v23 }
0x308a   :  { %5178 = vrot.lane.b32.xlu0 %v5176_v28, %s5929_s0 }
0x308b   :  { %v4299_v54 = vpop.xlane.xlu2 %4298 }
0x308c   :  { %v4300_v42 = vmul.f32 %v4299_v54, %v8303_v36 }
0x308e   :  { %v4301_v19 = vadd.f32 1e-05, %v4300_v42 }
0x3090   :  { %5863 = vrsqrt.f32 %v4301_v19  ;;  %vm4308_vm3 = vweird.f32 %v4301_v19 }
0x3093   :  { %v4322_v17 = vpop.permute.xlu2 %4321 }
0x3096   :  { %v5864_v45 = vpop.eup %5863 }
0x3097   :  { %v4303_v41 = vmul.f32 %v5864_v45, %v4301_v19  ;;  %vm4309_vm1 = vweird.f32 %v5864_v45 }
0x3098   :  { %vm4310_vm4 = vmor %vm4308_vm3, %vm4309_vm1 }
0x3099   :  { %v4304_v4 = vmul.f32 %v5864_v45, %v4303_v41 }
0x309b   :  { %v4305_v37 = vmul.f32 0.5, %v4304_v4 }
0x309d   :  { %v4306_v63 = vsub.f32 1.5, %v4305_v37  ;;  %v5168_v37 = vstv %s8366_s23 }
0x309f   :  { %v4307_v27 = vmul.f32 %v5864_v45, %v4306_v63 }
0x30a1   :  { %v4311_v9 = vsel %vm4310_vm4, %v5864_v45, %v4307_v27 }
0x30a2   :  { %v4312_v35 = vmul.f32 %v4311_v9, %v8307_v57 }
0x30a4   :  { %v4318_v11 = vmul.f32 %v4316_v29, %v4312_v35 }
0x30a6   :  { %v4324_v7 = vadd.f32 %v4322_v17, %v4318_v11 }
0x30a8   :  { %v5153_v30 = vmul.f32 %v5151_v24, %v4324_v7 }
0x30bb   :  { %v5113_v34 = vpop.permute.xlu1 %5112 }
0x30bc   :  { %v5115_v61 = vsel %vm62_vm0, %v5113_v34, 0.0 }
0x30bd   :  { %5116 = vadd.xlane.f32.xlu1 %v5115_v61 }
0x30c3   :  { %v5183_v49 = vpop.permute.xlu1 %5182 }
0x30c4   :  { %5734 = vpush %v5183_v49 }
0x30c5   :  { %1004 = vadd.xlane.f32.xlu1 %v1003_v0 }
0x30cd   :  { %1820 = vadd.xlane.f32.xlu1 %v1819_v13 }
0x30e6   :  { %1027 = vrot.lane.b32.xlu1 %v1025_v6, %s5929_s0 }
0x30ee   :  { %v2653_v22 = vpop.xlane.xlu1 %2652 }
0x30ef   :  { %v2654_v51 = vmul.f32 %v2653_v22, %v8303_v36  ;;  %v1022_v22 = vpop.permute.xlu0 %1021 }
0x30f1   :  { %v2655_v50 = vadd.f32 1e-05, %v2654_v51 }
0x30f3   :  { %5865 = vrsqrt.f32 %v2655_v50  ;;  %vm2662_vm5 = vweird.f32 %v2655_v50 }
0x30f5   :  { %s5735_s5 = spop %5734 }
0x30f6   :  { %v5185_v61 = vstv %s5735_s5 }
0x30f9   :  { %v5866_v15 = vpop.eup %5865 }
0x30fa   :  { %v2657_v18 = vmul.f32 %v5866_v15, %v2655_v50  ;;  %vm2663_vm2 = vweird.f32 %v5866_v15 }
0x30fb   :  { %vm2664_vm6 = vmor %vm2662_vm5, %vm2663_vm2 }
0x30fc   :  { %v2658_v21 = vmul.f32 %v5866_v15, %v2657_v18 }
0x30fe   :  { %v2659_v26 = vmul.f32 0.5, %v2658_v21 }
0x3100   :  { %v2660_v55 = vsub.f32 1.5, %v2659_v26 }
0x3102   :  { %v2661_v48 = vmul.f32 %v5866_v15, %v2660_v55  ;;  %v5134_v55 = vstv %s8357_s25 }
0x3104   :  { %v2665_v60 = vsel %vm2664_vm6, %v5866_v15, %v2661_v48 }
0x3105   :  { %v2666_v20 = vmul.f32 %v2665_v60, %v8352_v1 }
0x3107   :  { %v2668_v56 = vmul.f32 %v2667_v33, %v2666_v20  ;;  %v5179_v20 = vpop.permute.xlu0 %5178 }
0x3109   :  { %v2670_v3 = vadd.f32 %v2669_v2, %v2668_v56 }
0x310b   :  { %v5142_v12 = vmul.f32 %v5140_v59, %v2670_v3 }
0x310d   :  { %5144 = vrot.lane.b32.xlu2 %v5142_v12, %s5929_s0  ;;  %s5944_s0 = smov [#allocation4]  }
0x3115   :  { %5155 = vrot.lane.b32.xlu2 %v5153_v30, %s5936_s20 }
0x3130   :  { %v5117_v38 = vpop.xlane.xlu1 %5116 }
0x3131   :  { %v5118_v53 = vmul.f32 %v5117_v38, %v8303_v36 }
0x3133   :  { %v5119_v1 = vadd.f32 1e-05, %v5118_v53 }
0x3135   :  { %5867 = vrsqrt.f32 %v5119_v1  ;;  %vm5126_vm8 = vweird.f32 %v5119_v1 }
0x3138   :  { %v1005_v57 = vpop.xlane.xlu1 %1004 }
0x3139   :  { %v1006_v43 = vmul.f32 %v1005_v57, %v8303_v36 }
0x313b   :  { %v5868_v40 = vpop.eup %5867  ;;  %v1007_v25 = vadd.f32 1e-05, %v1006_v43 }
0x313c   :  { %v5121_v47 = vmul.f32 %v5868_v40, %v5119_v1  ;;  %vm5127_vm7 = vweird.f32 %v5868_v40 }
0x313d   :  { %5869 = vrsqrt.f32 %v1007_v25  ;;  %vm5128_vm9 = vmor %vm5126_vm8, %vm5127_vm7  ;;  %vm1014_vm14 = vweird.f32 %v1007_v25 }
0x313e   :  { %v5122_v16 = vmul.f32 %v5868_v40, %v5121_v47 }
0x3140   :  { %v5123_v46 = vmul.f32 0.5, %v5122_v16  ;;  %v1821_v39 = vpop.xlane.xlu1 %1820 }
0x3141   :  { %v1822_v44 = vmul.f32 %v1821_v39, %v8303_v36 }
0x3142   :  { %v5124_v5 = vsub.f32 1.5, %v5123_v46 }
0x3143   :  { %v1823_v33 = vadd.f32 1e-05, %v1822_v44  ;;  %v5870_v32 = vpop.eup %5869 }
0x3144   :  { %v5125_v52 = vmul.f32 %v5868_v40, %v5124_v5  ;;  %v1009_v28 = vmul.f32 %v5870_v32, %v1007_v25  ;;  %vm1015_vm13 = vweird.f32 %v5870_v32 }
0x3145   :  { %5871 = vrsqrt.f32 %v1823_v33  ;;  %vm1830_vm11 = vweird.f32 %v1823_v33  ;;  %vm1016_vm15 = vmor %vm1014_vm14, %vm1015_vm13 }
0x3146   :  { %v5129_v2 = vsel %vm5128_vm9, %v5868_v40, %v5125_v52  ;;  %v1010_v58 = vmul.f32 %v5870_v32, %v1009_v28 }
0x3147   :  { %v5130_v62 = vmul.f32 %v5129_v2, %v8341_v14 }
0x3148   :  { %v1011_v42 = vmul.f32 0.5, %v1010_v58 }
0x3149   :  { %v5131_v23 = vmul.f32 %v5130_v62, %v4316_v29 }
0x314a   :  { %v1012_v19 = vsub.f32 1.5, %v1011_v42 }
0x314b   :  { %v5872_v8 = vpop.eup %5871  ;;  %v5132_v34 = vadd.f32 %v5131_v23, %v4322_v17 }
0x314c   :  { %v1825_v49 = vmul.f32 %v5872_v8, %v1823_v33  ;;  %vm1831_vm10 = vweird.f32 %v5872_v8  ;;  %v1013_v50 = vmul.f32 %v5870_v32, %v1012_v19 }
0x314d   :  { %v5187_v36 = vmul.f32 %v5185_v61, %v5132_v34  ;;  %vm1832_vm12 = vmor %vm1830_vm11, %vm1831_vm10 }
0x314e   :  { %v1826_v0 = vmul.f32 %v5872_v8, %v1825_v49  ;;  %v1017_v18 = vsel %vm1016_vm15, %v5870_v32, %v1013_v50 }
0x314f   :  { %5189 = vrot.lane.b32.xlu0 %v5187_v36, %s5936_s20  ;;  %v1018_v63 = vmul.f32 %v1017_v18, %v8317_v10  ;;  %s5217_s20 = sshll.u32 %s5944_s0, 4  ;;  %s5218_s20 = int_to_ptr.vmem [resolvable:$true] %s5217_s20 }
0x3150   :  { %v1827_v13 = vmul.f32 0.5, %v1826_v0  ;;  %5222 = dma.vmem_to_hbm [thread:$0]  %s5218_s20, 32, %s5220_s28, [#allocation5]  }
0x3151   :  { %v1024_v21 = vmul.f32 %v1022_v22, %v1018_v63 }
0x3152   :  { %v1828_v54 = vsub.f32 1.5, %v1827_v13 }
0x3154   :  { %v1829_v14 = vmul.f32 %v5872_v8, %v1828_v54 }
0x3156   :  { %v1833_v6 = vsel %vm1832_vm12, %v5872_v8, %v1829_v14 }
0x3157   :  { %v1834_v45 = vmul.f32 %v1833_v6, %v8325_v31 }
0x3158   :  { %v1028_v41 = vpop.permute.xlu1 %1027 }
0x3159   :  { %v1835_v51 = vmul.f32 %v1834_v45, %v1022_v22  ;;  %v1030_v27 = vadd.f32 %v1028_v41, %v1024_v21 }
0x315b   :  { %v1836_v4 = vadd.f32 %v1835_v51, %v1028_v41  ;;  %v5136_v48 = vmul.f32 %v5134_v55, %v1030_v27 }
0x315d   :  { %v5170_v15 = vmul.f32 %v5168_v37, %v1836_v4 }
0x315f   :  { %v5181_v10 = vadd.f32 %v5179_v20, %v5170_v15 }
0x3167   :  { %v5145_v26 = vpop.permute.xlu2 %5144 }
0x3168   :  { %v5147_v31 = vadd.f32 %v5145_v26, %v5136_v48 }
0x316f   :  { %v5156_v9 = vpop.permute.xlu2 %5155 }
0x3170   :  { %v5158_v60 = vadd.f32 %v5156_v9, %v5147_v31 }
0x3172   :  { %5160 = vrot.lane.b32.xlu2 %v5158_v60, %s5928_s11 }
0x31c1   :  { %v5190_v35 = vpop.permute.xlu0 %5189 }
0x31c2   :  { %v5192_v56 = vadd.f32 %v5190_v35, %v5181_v10 }
0x31c4   :  { %5194 = vrot.lane.b32.xlu0 %v5192_v56, %s5928_s11 }
0x31cc   :  { %v5161_v29 = vpop.permute.xlu2 %5160 }
0x31cd   :  { %5163 = vst.msk [vmem:[#allocation2] sm:$0xff] %vm62_vm0, %v5161_v29 }
0x3236   :  { %v5195_v3 = vpop.permute.xlu0 %5194 }
0x3237   :  { %5198 = vst.msk [vmem:[#allocation2 + $0x8] sm:$0xff] %vm62_vm0, %v5195_v3 }
0x3238   :  { %5211 = dma.vmem_to_hbm [thread:$0]  %s5204_s10, 256, %s5206_s15, [#allocation3], %s5946_s8, %s5946_s8, %s5947_s16  }
0x3239   :  { %5924 = dma.done.wait [#allocation3], 256  }
0x323a   :  { %5925 = vsyncadd [#allocation3], 4294967040 }
0x323b   :  { %5926 = dma.done.wait [#allocation5], 32  }
0x323c   :  { %5927 = vsyncadd [#allocation5], 4294967264 }
0x323d   :  { %5231 = vsyncpa [#allocation3], 1 }
0x323e   :  { %5232 = vsyncpa [#allocation5], 1 }

</bundles_post_ra>
